<compile_context>
chip_gen: v7x
topology: tpu7x:2x2x1
jax: 0.10.0
libtpu: 0.0.40
codegen_flags: <defaults>
</compile_context>

<pallas_src>
import math

import jax
import jax.numpy as jnp
from jax import lax
from jax.experimental import pallas as pl
from jax.experimental.pallas import tpu as pltpu

# Hyper-parameters (VeloLSTM defaults).
NUM_FRAMES = 5
FEATURE_DIM = 64
HIDDEN = 128
NUM_LAYERS = 2
LOC_DIM = 7
MAX_TILE_B = 256            # per-grid-step tracklet tile (fills v6e/v7x MXU M)

_TWO_PI = 2.0 * math.pi
_HALF_PI = math.pi / 2.0


# --------------------------------- kernel ------------------------------------
def velo_lstm_kernel(traj_ref,
                     w_r0_ref, b_r0_ref, w_r1_ref, b_r1_ref, wca_ref,
                     w_pred_in_ref, b_p0_ref, p_whh0_ref,
                     p_wih1_ref, p_whh1_ref, b_p1_ref, wpa_ref,
                     preds_ref, refines_ref):
    T, B, _ = traj_ref.shape          # B = per-tile (padded) batch, multiple of 8

    # Weights, stored transposed (in, out).  Refine layers are K=2*HIDDEN
    # stacked and all i/f/o gate columns are pre-scaled by 0.5 (see fuse_params).
    w_r0 = w_r0_ref[...]              # (2H, 4H) = [[w_ref_in; 0-pad]; r_whh0]
    w_r1 = w_r1_ref[...]              # (2H, 4H) = [r_wih1; r_whh1]
    wca = wca_ref[...]                # (H, 7)   conf2atten, pre-scaled by 0.5
    w_pred_in = w_pred_in_ref[...]    # (7, 4H)  vel2feat folded into pred wih_l0
    p_whh0 = p_whh0_ref[...]          # (H, 4H)
    p_wih1 = p_wih1_ref[...]          # (H, 4H)
    p_whh1 = p_whh1_ref[...]          # (H, 4H)
    wpa = wpa_ref[...]                # (H, 7)   pred2atten

    # Hoisted bias broadcasts (JAX does not CSE broadcast_in_dim).
    b_r0 = jnp.broadcast_to(b_r0_ref[...], (B, 4 * HIDDEN))
    b_r1 = jnp.broadcast_to(b_r1_ref[...], (B, 4 * HIDDEN))
    b_p0 = jnp.broadcast_to(b_p0_ref[...], (NUM_FRAMES * B, 4 * HIDDEN))
    b_p1 = jnp.broadcast_to(b_p1_ref[...], (NUM_FRAMES * B, 4 * HIDDEN))

    # Hoisted column-6 mask and the 128-lane zero pad for the stacked layer 0.
    col6 = lax.broadcasted_iota(jnp.int32, (B, LOC_DIM), 1) == 6
    zero_pad = jnp.zeros((B, HIDDEN - (2 * LOC_DIM + 1)), jnp.float32)

    def norm_angle(a):
        # (a + pi) mod 2*pi - pi, via floor (TPU friendly).
        return a - _TWO_PI * jnp.floor((a + math.pi) / _TWO_PI)

    def set_col6(x, v):
        return jnp.where(col6, v, x)

    def cell(gates, c):
        # PyTorch LSTM cell; i/f/o pre-activations were scaled by 0.5 in
        # fuse_params so sigmoid(x) == 0.5*(tanh(scaled)+1): ONE wide tanh.
        t = jnp.tanh(gates)
        i = 0.5 * (t[:, 0 * HIDDEN:1 * HIDDEN] + 1.0)
        f = 0.5 * (t[:, 1 * HIDDEN:2 * HIDDEN] + 1.0)
        g = t[:, 2 * HIDDEN:3 * HIDDEN]
        o = 0.5 * (t[:, 3 * HIDDEN:4 * HIDDEN] + 1.0)
        c_new = f * c + i * g
        return o * jnp.tanh(c_new), c_new

    def read_row(row):
        obs = row[:, :LOC_DIM]
        obs = set_col6(obs, norm_angle(obs[:, 6:7]))  # pred_traj[:, :, 6] normalized
        conf = row[:, LOC_DIM:LOC_DIM + 1]
        return obs, conf

    def store_step(ref, idx, val):
        # One contiguous (B, LOC_DIM) store per step (seq-major output).
        ref[pl.ds(idx, 1)] = val[None]

    def step(row, carry, first):
        (h_r0, c_r0, h_r1, c_r1, h_p0, c_p0, h_p1, c_p1,
         prev_refine, loc_pred, vel_hist) = carry
        obs, conf = read_row(row)
        obs_ang = obs[:, 6:7]

        # loc_pred[:, 6] = normalize_angle(...); per-row acute-angle correction.
        ang = norm_angle(loc_pred[:, 6:7])
        diff = ang - obs_ang
        ang = jnp.where(diff > _HALF_PI, ang - math.pi,
                        jnp.where(diff < -_HALF_PI, ang + math.pi, ang))
        loc_pred = set_col6(loc_pred, ang)

        # ------------------------------ refine -------------------------------
        pred_vel = loc_pred - prev_refine
        obsv_vel = obs - prev_refine
        # K=256 stacked layer 0: [pred_vel|obsv_vel|conf|0-pad|h] @ [[Wih;pad];Whh].
        x0 = jnp.concatenate([pred_vel, obsv_vel, conf, zero_pad, h_r0], axis=1)
        g0 = jnp.dot(x0, w_r0, preferred_element_type=jnp.float32) + b_r0
        h_r0, c_r0 = cell(g0, c_r0)
        # TODO(synk): nn.LSTM inter-layer dropout (p=0.1) omitted — eval mode.
        x1 = jnp.concatenate([h_r0, h_r1], axis=1)            # (B, 2H), lane-aligned
        g1 = jnp.dot(x1, w_r1, preferred_element_type=jnp.float32) + b_r1
        h_r1, c_r1 = cell(g1, c_r1)
        atten = 0.5 * (jnp.tanh(
            jnp.dot(h_r1, wca, preferred_element_type=jnp.float32)) + 1.0)
        loc_refine = atten * obsv_vel + (1.0 - atten) * pred_vel + prev_refine
        loc_refine = set_col6(loc_refine, norm_angle(loc_refine[:, 6:7]))

        dv = loc_refine - prev_refine
        if first:
            vel_hist = jnp.concatenate([dv] * NUM_FRAMES, axis=0)       # (5B, 7)
        else:
            vel_hist = jnp.concatenate([vel_hist[B:], dv], axis=0)      # shift by B
        prev_refine = loc_refine

        # ------------------------------ predict ------------------------------
        # Batched input projection over the 5-frame history (one matmul); all
        # f*B slice offsets are static multiples of the sublane-aligned B.
        gx0 = jnp.dot(vel_hist, w_pred_in,
                      preferred_element_type=jnp.float32) + b_p0        # (5B, 4H)
        h, c = h_p0, c_p0
        h0_list = []
        for f in range(NUM_FRAMES):
            g = gx0[f * B:(f + 1) * B] + jnp.dot(
                h, p_whh0, preferred_element_type=jnp.float32)
            h, c = cell(g, c)
            h0_list.append(h)
        h_p0, c_p0 = h, c

        # TODO(synk): K=256 stacking of p_wih1/p_whh1 would serialize the batched
        # input projection over the 5 frames; kept batched-proj + recurrent dot.
        h0_flat = jnp.concatenate(h0_list, axis=0)                      # (5B, H)
        gx1 = jnp.dot(h0_flat, p_wih1,
                      preferred_element_type=jnp.float32) + b_p1        # (5B, 4H)
        h, c = h_p1, c_p1
        h1_list = []
        for f in range(NUM_FRAMES):
            g = gx1[f * B:(f + 1) * B] + jnp.dot(
                h, p_whh1, preferred_element_type=jnp.float32)
            h, c = cell(g, c)
            h1_list.append(h)
        h_p1, c_p1 = h, c

        # Batched attention logits + softmax over the frame axis.
        out_flat = jnp.concatenate(h1_list, axis=0)                     # (5B, H)
        logits = jnp.dot(out_flat, wpa,
                         preferred_element_type=jnp.float32)            # (5B, 7)
        lgs = [logits[f * B:(f + 1) * B] for f in range(NUM_FRAMES)]
        vhs = [vel_hist[f * B:(f + 1) * B] for f in range(NUM_FRAMES)]
        m = lgs[0]
        for lg in lgs[1:]:
            m = jnp.maximum(m, lg)
        es = [jnp.exp(lg - m) for lg in lgs]
        denom = es[0]
        weighted = es[0] * vhs[0]
        for f in range(1, NUM_FRAMES):
            denom = denom + es[f]
            weighted = weighted + es[f] * vhs[f]
        loc_pred = weighted * pl.reciprocal(denom, approx=True) + loc_refine
        loc_pred = set_col6(loc_pred, norm_angle(loc_pred[:, 6:7]))

        carry = (h_r0, c_r0, h_r1, c_r1, h_p0, c_p0, h_p1, c_p1,
                 prev_refine, loc_pred, vel_hist)
        return carry, loc_pred, loc_refine

    # --------------------------- initial state --------------------------------
    zeros_h = jnp.zeros((B, HIDDEN), jnp.float32)
    row0 = traj_ref[0]
    prev0 = row0[:, :LOC_DIM]
    prev0 = set_col6(prev0, norm_angle(prev0[:, 6:7]))
    row1 = traj_ref[1]
    lp0 = row1[:, :LOC_DIM]
    lp0 = set_col6(lp0, norm_angle(lp0[:, 6:7]))
    carry = (zeros_h, zeros_h, zeros_h, zeros_h,
             zeros_h, zeros_h, zeros_h, zeros_h,
             prev0, lp0, jnp.zeros((NUM_FRAMES * B, LOC_DIM), jnp.float32))

    # Peel step i=1 (fills all NUM_FRAMES history slots), then a fori_loop for
    # the rest so live ranges stay bounded at large per-tile batch.
    carry, lp, lr = step(row1, carry, first=True)
    store_step(preds_ref, 0, lp)
    store_step(refines_ref, 0, lr)

    def body(i, carry):
        carry, lp, lr = step(traj_ref[i], carry, first=False)
        store_step(preds_ref, i - 1, lp)
        store_step(refines_ref, i - 1, lr)
        return carry

    lax.fori_loop(2, T, body, carry)


# ------------------------------- JAX wrapper ----------------------------------
def _const_spec(a):
    nd = a.ndim
    return pl.BlockSpec(a.shape, lambda t, _nd=nd: (0,) * _nd)


@jax.jit
def velo_lstm_forward(pred_traj, fused_params):
    """Returns (loc_preds, loc_refines), each (B, T-1, LOC_DIM) float32."""
    B, T, _ = pred_traj.shape
    # Tracklet tile: sublane multiple, capped at MAX_TILE_B; extra tiles go on
    # a "parallel" grid axis (sharded across TensorCores on v7x megacore).
    tile_b = min(MAX_TILE_B, max(8, ((B + 7) // 8) * 8))
    num_tiles = (B + tile_b - 1) // tile_b
    bp = num_tiles * tile_b

    traj_tm = jnp.transpose(pred_traj, (1, 0, 2))                  # (T, B, 8)
    if bp != B:
        traj_tm = jnp.pad(traj_tm, ((0, 0), (0, bp - B), (0, 0)))

    args = (traj_tm,) + tuple(fused_params)
    in_specs = ([pl.BlockSpec((T, tile_b, LOC_DIM + 1), lambda t: (0, t, 0))]
                + [_const_spec(p) for p in fused_params])
    out_specs = (pl.BlockSpec((T - 1, tile_b, LOC_DIM), lambda t: (0, t, 0)),
                 pl.BlockSpec((T - 1, tile_b, LOC_DIM), lambda t: (0, t, 0)))
    out_shape = (jax.ShapeDtypeStruct((T - 1, bp, LOC_DIM), jnp.float32),
                 jax.ShapeDtypeStruct((T - 1, bp, LOC_DIM), jnp.float32))

    preds, refines = pl.pallas_call(
        velo_lstm_kernel,
        grid=(num_tiles,),
        in_specs=in_specs,
        out_specs=out_specs,
        out_shape=out_shape,
        compiler_params=pltpu.CompilerParams(
            dimension_semantics=("parallel",),
            vmem_limit_bytes=32 * 1024 * 1024),
    )(*args)

    # Back to batch-first; drop the batch padding.
    loc_preds = jnp.transpose(preds, (1, 0, 2))[:B]
    loc_refines = jnp.transpose(refines, (1, 0, 2))[:B]
    return loc_preds, loc_refines


# ------------------------------ parameter setup -------------------------------
def make_params(key):
    """Deterministic synthetic parameter init (shapes match VeloLSTM.__init__).

    Weights are stored transposed, i.e. (in_features, out_features), so the
    kernel computes x @ W^T directly.
    """
    keys = list(jax.random.split(key, 16))
    kit = iter(keys)

    def xavier_t(shape):  # shape = (fan_in, fan_out) for the transposed weight
        fan_in, fan_out = shape
        a = math.sqrt(6.0 / (fan_in + fan_out))
        return jax.random.uniform(next(kit), shape, jnp.float32, -a, a)

    def lstm_layer(in_dim):
        w_ih_t = xavier_t((in_dim, 4 * HIDDEN))
        # TODO(synk): torch uses orthogonal init for weight_hh; a deterministic
        # scaled-uniform of the same shape is used here (synthetic weights).
        w_hh_t = xavier_t((HIDDEN, 4 * HIDDEN))
        b = jnp.zeros((1, 4 * HIDDEN), jnp.float32)  # bias_ih + bias_hh == 0
        return (w_ih_t, w_hh_t, b)

    w_vel_t = xavier_t((LOC_DIM, FEATURE_DIM))       # vel2feat
    b_vel = jnp.zeros((1, FEATURE_DIM), jnp.float32)
    w_conf_t = xavier_t((1, FEATURE_DIM))            # conf2feat (no bias)
    w_p2a_t = xavier_t((HIDDEN, LOC_DIM))            # pred2atten (no bias)
    w_c2a_t = xavier_t((HIDDEN, LOC_DIM))            # conf2atten (no bias)

    p0 = lstm_layer(FEATURE_DIM)        # pred_lstm layer 0
    p1 = lstm_layer(HIDDEN)             # pred_lstm layer 1
    r0 = lstm_layer(3 * FEATURE_DIM)    # refine_lstm layer 0
    r1 = lstm_layer(HIDDEN)             # refine_lstm layer 1

    return (w_vel_t, b_vel, w_conf_t, w_p2a_t, w_c2a_t) + p0 + p1 + r0 + r1


def fuse_params(params):
    """One-time algebraic weight preparation.

    * Fold vel2feat / conf2feat into the layer-0 LSTM input weights (exact:
      the module feeds the Linear embeddings straight into the LSTMs).
    * Pre-scale the i/f/o gate columns (and conf2atten) by 0.5 so the kernel
      needs one wide tanh per cell (sigmoid(x) = 0.5*(tanh(x/2)+1)).
    * Stack the refine LSTM into K=2*HIDDEN matrices so each refine cell is a
      single MXU pass on the 256-deep v6e/v7x MXU.
    """
    (w_vel_t, b_vel, w_conf_t, w_p2a_t, w_c2a_t,
     p_wih0, p_whh0, p_b0, p_wih1, p_whh1, p_b1,
     r_wih0, r_whh0, r_b0, r_wih1, r_whh1, r_b1) = params

    # Predict LSTM layer 0: embed = vel @ Wv + bv;  gates_x = embed @ Wih0.
    w_pred_in = w_vel_t @ p_wih0                                  # (7, 4H)
    b_p0 = b_vel @ p_wih0 + p_b0                                  # (1, 4H)

    # Refine LSTM layer 0: rows follow torch.cat([loc_embed, obs_embed, conf_embed]).
    r_loc = r_wih0[0:FEATURE_DIM]
    r_obs = r_wih0[FEATURE_DIM:2 * FEATURE_DIM]
    r_cnf = r_wih0[2 * FEATURE_DIM:3 * FEATURE_DIM]
    w_ref_in = jnp.concatenate(
        [w_vel_t @ r_loc, w_vel_t @ r_obs, w_conf_t @ r_cnf], axis=0)  # (15, 4H)
    b_r0 = b_vel @ r_loc + b_vel @ r_obs + r_b0                   # (1, 4H)

    # 0.5 pre-scale of the i/f/o gate columns (PyTorch gate order i, f, g, o).
    gate_scale = jnp.concatenate(
        [jnp.full((1, HIDDEN), 0.5, jnp.float32),
         jnp.full((1, HIDDEN), 0.5, jnp.float32),
         jnp.ones((1, HIDDEN), jnp.float32),
         jnp.full((1, HIDDEN), 0.5, jnp.float32)], axis=1)        # (1, 4H)

    def s(w):
        return (w * gate_scale).astype(jnp.float32)

    # K=256 stacking for both refine layers.
    pad = jnp.zeros((HIDDEN - w_ref_in.shape[0], 4 * HIDDEN), jnp.float32)
    w_r0_stacked = jnp.concatenate([s(w_ref_in), pad, s(r_whh0)], axis=0)   # (2H, 4H)
    w_r1_stacked = jnp.concatenate([s(r_wih1), s(r_whh1)], axis=0)          # (2H, 4H)

    # TODO(synk): on v6e/v7x cast these to bfloat16 for the MXU (keep f32
    # accumulation/state); left in f32 so results are chip-independent.
    return (w_r0_stacked, s(b_r0), w_r1_stacked, s(r_b1), 0.5 * w_c2a_t,
            s(w_pred_in), s(b_p0), s(p_whh0), s(p_wih1), s(p_whh1), s(p_b1),
            w_p2a_t)


if __name__ == "__main__":
    B, T = 2, 8
    key = jax.random.PRNGKey(0)
    k_traj, k_params = jax.random.split(key)
    # pred_traj: 7-D location + 1 confidence column (column -1).
    pred_traj = jax.random.normal(k_traj, (B, T, LOC_DIM + 1), jnp.float32)

    params = make_params(k_params)
    fused = fuse_params(params)          # one-time algebraic weight fusion
    loc_preds, loc_refines = velo_lstm_forward(pred_traj, fused)
    jax.block_until_ready((loc_preds, loc_refines))

    assert loc_preds.shape == (B, T - 1, LOC_DIM)
    assert loc_refines.shape == (B, T - 1, LOC_DIM)
    assert bool(jnp.all(jnp.isfinite(loc_preds)))
    assert bool(jnp.all(jnp.isfinite(loc_refines)))
    print("KERNEL_OK")
</pallas_src>

<mosaic_0001>
module attributes {stable_mosaic.version = 11 : i64} {
  func.func @velo_lstm_kernel(%arg0: i32, %arg1: memref<8x8x8xf32, #tpu.memory_space<vmem>>, %arg2: memref<256x512xf32, #tpu.memory_space<vmem>>, %arg3: memref<1x512xf32, #tpu.memory_space<vmem>>, %arg4: memref<256x512xf32, #tpu.memory_space<vmem>>, %arg5: memref<1x512xf32, #tpu.memory_space<vmem>>, %arg6: memref<128x7xf32, #tpu.memory_space<vmem>>, %arg7: memref<7x512xf32, #tpu.memory_space<vmem>>, %arg8: memref<1x512xf32, #tpu.memory_space<vmem>>, %arg9: memref<128x512xf32, #tpu.memory_space<vmem>>, %arg10: memref<128x512xf32, #tpu.memory_space<vmem>>, %arg11: memref<128x512xf32, #tpu.memory_space<vmem>>, %arg12: memref<1x512xf32, #tpu.memory_space<vmem>>, %arg13: memref<128x7xf32, #tpu.memory_space<vmem>>, %arg14: memref<7x8x7xf32, #tpu.memory_space<vmem>>, %arg15: memref<7x8x7xf32, #tpu.memory_space<vmem>>) attributes {dimension_semantics = [#tpu.dimension_semantics<parallel>], iteration_bounds = array<i64: 1>, scalar_prefetch = 0 : i64, scratch_operands = 0 : i64, tpu.core_type = #tpu.core_type<tc>, window_params = [{transform_indices = @transform_0, window_bounds = array<i64: 8, 8, 8>}, {pipeline_mode = #tpu.pipeline_mode<synchronous>, transform_indices = @transform_1, window_bounds = array<i64: 256, 512>}, {pipeline_mode = #tpu.pipeline_mode<synchronous>, transform_indices = @transform_2, window_bounds = array<i64: 1, 512>}, {pipeline_mode = #tpu.pipeline_mode<synchronous>, transform_indices = @transform_3, window_bounds = array<i64: 256, 512>}, {pipeline_mode = #tpu.pipeline_mode<synchronous>, transform_indices = @transform_4, window_bounds = array<i64: 1, 512>}, {pipeline_mode = #tpu.pipeline_mode<synchronous>, transform_indices = @transform_5, window_bounds = array<i64: 128, 7>}, {pipeline_mode = #tpu.pipeline_mode<synchronous>, transform_indices = @transform_6, window_bounds = array<i64: 7, 512>}, {pipeline_mode = #tpu.pipeline_mode<synchronous>, transform_indices = @transform_7, window_bounds = array<i64: 1, 512>}, {pipeline_mode = #tpu.pipeline_mode<synchronous>, transform_indices = @transform_8, window_bounds = array<i64: 128, 512>}, {pipeline_mode = #tpu.pipeline_mode<synchronous>, transform_indices = @transform_9, window_bounds = array<i64: 128, 512>}, {pipeline_mode = #tpu.pipeline_mode<synchronous>, transform_indices = @transform_10, window_bounds = array<i64: 128, 512>}, {pipeline_mode = #tpu.pipeline_mode<synchronous>, transform_indices = @transform_11, window_bounds = array<i64: 1, 512>}, {pipeline_mode = #tpu.pipeline_mode<synchronous>, transform_indices = @transform_12, window_bounds = array<i64: 128, 7>}, {transform_indices = @transform_13, window_bounds = array<i64: 7, 8, 7>}, {transform_indices = @transform_14, window_bounds = array<i64: 7, 8, 7>}]} {
    %c0 = arith.constant 0 : index
    %c0_0 = arith.constant 0 : index
    %0 = vector.load %arg2[%c0, %c0_0] : memref<256x512xf32, #tpu.memory_space<vmem>>, vector<256x512xf32>
    %c0_1 = arith.constant 0 : index
    %c0_2 = arith.constant 0 : index
    %1 = vector.load %arg4[%c0_1, %c0_2] : memref<256x512xf32, #tpu.memory_space<vmem>>, vector<256x512xf32>
    %c0_3 = arith.constant 0 : index
    %c0_4 = arith.constant 0 : index
    %2 = vector.load %arg6[%c0_3, %c0_4] : memref<128x7xf32, #tpu.memory_space<vmem>>, vector<128x7xf32>
    %c0_5 = arith.constant 0 : index
    %c0_6 = arith.constant 0 : index
    %3 = vector.load %arg7[%c0_5, %c0_6] : memref<7x512xf32, #tpu.memory_space<vmem>>, vector<7x512xf32>
    %c0_7 = arith.constant 0 : index
    %c0_8 = arith.constant 0 : index
    %4 = vector.load %arg9[%c0_7, %c0_8] : memref<128x512xf32, #tpu.memory_space<vmem>>, vector<128x512xf32>
    %c0_9 = arith.constant 0 : index
    %c0_10 = arith.constant 0 : index
    %5 = vector.load %arg10[%c0_9, %c0_10] : memref<128x512xf32, #tpu.memory_space<vmem>>, vector<128x512xf32>
    %c0_11 = arith.constant 0 : index
    %c0_12 = arith.constant 0 : index
    %6 = vector.load %arg11[%c0_11, %c0_12] : memref<128x512xf32, #tpu.memory_space<vmem>>, vector<128x512xf32>
    %c0_13 = arith.constant 0 : index
    %c0_14 = arith.constant 0 : index
    %7 = vector.load %arg13[%c0_13, %c0_14] : memref<128x7xf32, #tpu.memory_space<vmem>>, vector<128x7xf32>
    %c0_15 = arith.constant 0 : index
    %c0_16 = arith.constant 0 : index
    %8 = vector.load %arg3[%c0_15, %c0_16] : memref<1x512xf32, #tpu.memory_space<vmem>>, vector<1x512xf32>
    %9 = vector.shape_cast %8 : vector<1x512xf32> to vector<1x512xf32>
    %10 = vector.broadcast %9 : vector<1x512xf32> to vector<8x512xf32>
    %c0_17 = arith.constant 0 : index
    %c0_18 = arith.constant 0 : index
    %11 = vector.load %arg5[%c0_17, %c0_18] : memref<1x512xf32, #tpu.memory_space<vmem>>, vector<1x512xf32>
    %12 = vector.shape_cast %11 : vector<1x512xf32> to vector<1x512xf32>
    %13 = vector.broadcast %12 : vector<1x512xf32> to vector<8x512xf32>
    %c0_19 = arith.constant 0 : index
    %c0_20 = arith.constant 0 : index
    %14 = vector.load %arg8[%c0_19, %c0_20] : memref<1x512xf32, #tpu.memory_space<vmem>>, vector<1x512xf32>
    %15 = vector.shape_cast %14 : vector<1x512xf32> to vector<1x512xf32>
    %16 = vector.broadcast %15 : vector<1x512xf32> to vector<40x512xf32>
    %c0_21 = arith.constant 0 : index
    %c0_22 = arith.constant 0 : index
    %17 = vector.load %arg12[%c0_21, %c0_22] : memref<1x512xf32, #tpu.memory_space<vmem>>, vector<1x512xf32>
    %18 = vector.shape_cast %17 : vector<1x512xf32> to vector<1x512xf32>
    %19 = vector.broadcast %18 : vector<1x512xf32> to vector<40x512xf32>
    %20 = tpu.iota {dimensions = array<i32: 1>} : vector<8x7xi32>
    %c6_i32 = arith.constant 6 : i32
    %21 = vector.broadcast %c6_i32 : i32 to vector<8x7xi32>
    %22 = arith.cmpi eq, %20, %21 : vector<8x7xi32>
    %cst = arith.constant 0.000000e+00 : f32
    %23 = vector.broadcast %cst : f32 to vector<8x113xf32>
    %cst_23 = arith.constant 0.000000e+00 : f32
    %24 = vector.broadcast %cst_23 : f32 to vector<8x128xf32>
    %c0_24 = arith.constant 0 : index
    %c0_25 = arith.constant 0 : index
    %c0_26 = arith.constant 0 : index
    %25 = vector.load %arg1[%c0_24, %c0_25, %c0_26] : memref<8x8x8xf32, #tpu.memory_space<vmem>>, vector<1x8x8xf32>
    %26 = vector.shape_cast %25 : vector<1x8x8xf32> to vector<8x8xf32>
    %27 = vector.extract_strided_slice %26 {offsets = [0, 0], sizes = [8, 7], strides = [1, 1]} : vector<8x8xf32> to vector<8x7xf32>
    %28 = vector.extract_strided_slice %27 {offsets = [0, 6], sizes = [8, 1], strides = [1, 1]} : vector<8x7xf32> to vector<8x1xf32>
    %cst_27 = arith.constant 3.14159274 : f32
    %29 = vector.broadcast %cst_27 : f32 to vector<8x1xf32>
    %30 = arith.addf %28, %29 : vector<8x1xf32>
    %cst_28 = arith.constant 6.28318548 : f32
    %31 = vector.broadcast %cst_28 : f32 to vector<8x1xf32>
    %32 = arith.divf %30, %31 : vector<8x1xf32>
    %33 = math.floor %32 : vector<8x1xf32>
    %cst_29 = arith.constant 6.28318548 : f32
    %34 = vector.broadcast %cst_29 : f32 to vector<8x1xf32>
    %35 = arith.mulf %34, %33 : vector<8x1xf32>
    %36 = arith.subf %28, %35 : vector<8x1xf32>
    %37 = vector.shape_cast %36 : vector<8x1xf32> to vector<8x1xf32>
    %38 = vector.broadcast %37 : vector<8x1xf32> to vector<8x7xf32>
    %39 = arith.select %22, %38, %27 : vector<8x7xi1>, vector<8x7xf32>
    %c1 = arith.constant 1 : index
    %c0_30 = arith.constant 0 : index
    %c0_31 = arith.constant 0 : index
    %40 = vector.load %arg1[%c1, %c0_30, %c0_31] : memref<8x8x8xf32, #tpu.memory_space<vmem>>, vector<1x8x8xf32>
    %41 = vector.shape_cast %40 : vector<1x8x8xf32> to vector<8x8xf32>
    %42 = vector.extract_strided_slice %41 {offsets = [0, 0], sizes = [8, 7], strides = [1, 1]} : vector<8x8xf32> to vector<8x7xf32>
    %43 = vector.extract_strided_slice %42 {offsets = [0, 6], sizes = [8, 1], strides = [1, 1]} : vector<8x7xf32> to vector<8x1xf32>
    %cst_32 = arith.constant 3.14159274 : f32
    %44 = vector.broadcast %cst_32 : f32 to vector<8x1xf32>
    %45 = arith.addf %43, %44 : vector<8x1xf32>
    %cst_33 = arith.constant 6.28318548 : f32
    %46 = vector.broadcast %cst_33 : f32 to vector<8x1xf32>
    %47 = arith.divf %45, %46 : vector<8x1xf32>
    %48 = math.floor %47 : vector<8x1xf32>
    %cst_34 = arith.constant 6.28318548 : f32
    %49 = vector.broadcast %cst_34 : f32 to vector<8x1xf32>
    %50 = arith.mulf %49, %48 : vector<8x1xf32>
    %51 = arith.subf %43, %50 : vector<8x1xf32>
    %52 = vector.shape_cast %51 : vector<8x1xf32> to vector<8x1xf32>
    %53 = vector.broadcast %52 : vector<8x1xf32> to vector<8x7xf32>
    %54 = arith.select %22, %53, %42 : vector<8x7xi1>, vector<8x7xf32>
    %55 = vector.extract_strided_slice %41 {offsets = [0, 0], sizes = [8, 7], strides = [1, 1]} : vector<8x8xf32> to vector<8x7xf32>
    %56 = vector.extract_strided_slice %55 {offsets = [0, 6], sizes = [8, 1], strides = [1, 1]} : vector<8x7xf32> to vector<8x1xf32>
    %cst_35 = arith.constant 3.14159274 : f32
    %57 = vector.broadcast %cst_35 : f32 to vector<8x1xf32>
    %58 = arith.addf %56, %57 : vector<8x1xf32>
    %cst_36 = arith.constant 6.28318548 : f32
    %59 = vector.broadcast %cst_36 : f32 to vector<8x1xf32>
    %60 = arith.divf %58, %59 : vector<8x1xf32>
    %61 = math.floor %60 : vector<8x1xf32>
    %cst_37 = arith.constant 6.28318548 : f32
    %62 = vector.broadcast %cst_37 : f32 to vector<8x1xf32>
    %63 = arith.mulf %62, %61 : vector<8x1xf32>
    %64 = arith.subf %56, %63 : vector<8x1xf32>
    %65 = vector.shape_cast %64 : vector<8x1xf32> to vector<8x1xf32>
    %66 = vector.broadcast %65 : vector<8x1xf32> to vector<8x7xf32>
    %67 = arith.select %22, %66, %55 : vector<8x7xi1>, vector<8x7xf32>
    %68 = vector.extract_strided_slice %41 {offsets = [0, 7], sizes = [8, 1], strides = [1, 1]} : vector<8x8xf32> to vector<8x1xf32>
    %69 = vector.extract_strided_slice %67 {offsets = [0, 6], sizes = [8, 1], strides = [1, 1]} : vector<8x7xf32> to vector<8x1xf32>
    %70 = vector.extract_strided_slice %54 {offsets = [0, 6], sizes = [8, 1], strides = [1, 1]} : vector<8x7xf32> to vector<8x1xf32>
    %cst_38 = arith.constant 3.14159274 : f32
    %71 = vector.broadcast %cst_38 : f32 to vector<8x1xf32>
    %72 = arith.addf %70, %71 : vector<8x1xf32>
    %cst_39 = arith.constant 6.28318548 : f32
    %73 = vector.broadcast %cst_39 : f32 to vector<8x1xf32>
    %74 = arith.divf %72, %73 : vector<8x1xf32>
    %75 = math.floor %74 : vector<8x1xf32>
    %cst_40 = arith.constant 6.28318548 : f32
    %76 = vector.broadcast %cst_40 : f32 to vector<8x1xf32>
    %77 = arith.mulf %76, %75 : vector<8x1xf32>
    %78 = arith.subf %70, %77 : vector<8x1xf32>
    %79 = arith.subf %78, %69 : vector<8x1xf32>
    %cst_41 = arith.constant 1.57079637 : f32
    %80 = vector.broadcast %cst_41 : f32 to vector<8x1xf32>
    %81 = arith.cmpf ogt, %79, %80 : vector<8x1xf32>
    %cst_42 = arith.constant 3.14159274 : f32
    %82 = vector.broadcast %cst_42 : f32 to vector<8x1xf32>
    %83 = arith.subf %78, %82 : vector<8x1xf32>
    %cst_43 = arith.constant -1.57079637 : f32
    %84 = vector.broadcast %cst_43 : f32 to vector<8x1xf32>
    %85 = arith.cmpf olt, %79, %84 : vector<8x1xf32>
    %cst_44 = arith.constant 3.14159274 : f32
    %86 = vector.broadcast %cst_44 : f32 to vector<8x1xf32>
    %87 = arith.addf %78, %86 : vector<8x1xf32>
    %88 = arith.select %85, %87, %78 : vector<8x1xi1>, vector<8x1xf32>
    %89 = arith.select %81, %83, %88 : vector<8x1xi1>, vector<8x1xf32>
    %90 = vector.shape_cast %89 : vector<8x1xf32> to vector<8x1xf32>
    %91 = vector.broadcast %90 : vector<8x1xf32> to vector<8x7xf32>
    %92 = arith.select %22, %91, %54 : vector<8x7xi1>, vector<8x7xf32>
    %93 = arith.subf %92, %39 : vector<8x7xf32>
    %94 = arith.subf %67, %39 : vector<8x7xf32>
    %95 = tpu.concatenate %93, %94, %68, %23, %24 in 1 : vector<8x7xf32>, vector<8x7xf32>, vector<8x1xf32>, vector<8x113xf32>, vector<8x128xf32> -> vector<8x256xf32>
    %cst_45 = arith.constant dense<0.000000e+00> : vector<8x512xf32>
    %96 = tpu.matmul %95, %0, %cst_45 {dimension_numbers = #tpu.dot_dimension_numbers<[1], [0], [0], [1], [0, 0, 1, 1], [], []>} : vector<8x256xf32>, vector<256x512xf32>, vector<8x512xf32> -> vector<8x512xf32>
    %97 = arith.addf %96, %10 : vector<8x512xf32>
    %98 = math.tanh %97 : vector<8x512xf32>
    %99 = vector.extract_strided_slice %98 {offsets = [0, 0], sizes = [8, 128], strides = [1, 1]} : vector<8x512xf32> to vector<8x128xf32>
    %cst_46 = arith.constant 1.000000e+00 : f32
    %100 = vector.broadcast %cst_46 : f32 to vector<8x128xf32>
    %101 = arith.addf %99, %100 : vector<8x128xf32>
    %cst_47 = arith.constant 5.000000e-01 : f32
    %102 = vector.broadcast %cst_47 : f32 to vector<8x128xf32>
    %103 = arith.mulf %102, %101 : vector<8x128xf32>
    %104 = vector.extract_strided_slice %98 {offsets = [0, 128], sizes = [8, 128], strides = [1, 1]} : vector<8x512xf32> to vector<8x128xf32>
    %cst_48 = arith.constant 1.000000e+00 : f32
    %105 = vector.broadcast %cst_48 : f32 to vector<8x128xf32>
    %106 = arith.addf %104, %105 : vector<8x128xf32>
    %cst_49 = arith.constant 5.000000e-01 : f32
    %107 = vector.broadcast %cst_49 : f32 to vector<8x128xf32>
    %108 = arith.mulf %107, %106 : vector<8x128xf32>
    %109 = vector.extract_strided_slice %98 {offsets = [0, 256], sizes = [8, 128], strides = [1, 1]} : vector<8x512xf32> to vector<8x128xf32>
    %110 = vector.extract_strided_slice %98 {offsets = [0, 384], sizes = [8, 128], strides = [1, 1]} : vector<8x512xf32> to vector<8x128xf32>
    %cst_50 = arith.constant 1.000000e+00 : f32
    %111 = vector.broadcast %cst_50 : f32 to vector<8x128xf32>
    %112 = arith.addf %110, %111 : vector<8x128xf32>
    %cst_51 = arith.constant 5.000000e-01 : f32
    %113 = vector.broadcast %cst_51 : f32 to vector<8x128xf32>
    %114 = arith.mulf %113, %112 : vector<8x128xf32>
    %115 = arith.mulf %108, %24 : vector<8x128xf32>
    %116 = arith.mulf %103, %109 : vector<8x128xf32>
    %117 = arith.addf %115, %116 : vector<8x128xf32>
    %118 = math.tanh %117 : vector<8x128xf32>
    %119 = arith.mulf %114, %118 : vector<8x128xf32>
    %120 = tpu.concatenate %119, %24 in 1 : vector<8x128xf32>, vector<8x128xf32> -> vector<8x256xf32>
    %cst_52 = arith.constant dense<0.000000e+00> : vector<8x512xf32>
    %121 = tpu.matmul %120, %1, %cst_52 {dimension_numbers = #tpu.dot_dimension_numbers<[1], [0], [0], [1], [0, 0, 1, 1], [], []>} : vector<8x256xf32>, vector<256x512xf32>, vector<8x512xf32> -> vector<8x512xf32>
    %122 = arith.addf %121, %13 : vector<8x512xf32>
    %123 = math.tanh %122 : vector<8x512xf32>
    %124 = vector.extract_strided_slice %123 {offsets = [0, 0], sizes = [8, 128], strides = [1, 1]} : vector<8x512xf32> to vector<8x128xf32>
    %cst_53 = arith.constant 1.000000e+00 : f32
    %125 = vector.broadcast %cst_53 : f32 to vector<8x128xf32>
    %126 = arith.addf %124, %125 : vector<8x128xf32>
    %cst_54 = arith.constant 5.000000e-01 : f32
    %127 = vector.broadcast %cst_54 : f32 to vector<8x128xf32>
    %128 = arith.mulf %127, %126 : vector<8x128xf32>
    %129 = vector.extract_strided_slice %123 {offsets = [0, 128], sizes = [8, 128], strides = [1, 1]} : vector<8x512xf32> to vector<8x128xf32>
    %cst_55 = arith.constant 1.000000e+00 : f32
    %130 = vector.broadcast %cst_55 : f32 to vector<8x128xf32>
    %131 = arith.addf %129, %130 : vector<8x128xf32>
    %cst_56 = arith.constant 5.000000e-01 : f32
    %132 = vector.broadcast %cst_56 : f32 to vector<8x128xf32>
    %133 = arith.mulf %132, %131 : vector<8x128xf32>
    %134 = vector.extract_strided_slice %123 {offsets = [0, 256], sizes = [8, 128], strides = [1, 1]} : vector<8x512xf32> to vector<8x128xf32>
    %135 = vector.extract_strided_slice %123 {offsets = [0, 384], sizes = [8, 128], strides = [1, 1]} : vector<8x512xf32> to vector<8x128xf32>
    %cst_57 = arith.constant 1.000000e+00 : f32
    %136 = vector.broadcast %cst_57 : f32 to vector<8x128xf32>
    %137 = arith.addf %135, %136 : vector<8x128xf32>
    %cst_58 = arith.constant 5.000000e-01 : f32
    %138 = vector.broadcast %cst_58 : f32 to vector<8x128xf32>
    %139 = arith.mulf %138, %137 : vector<8x128xf32>
    %140 = arith.mulf %133, %24 : vector<8x128xf32>
    %141 = arith.mulf %128, %134 : vector<8x128xf32>
    %142 = arith.addf %140, %141 : vector<8x128xf32>
    %143 = math.tanh %142 : vector<8x128xf32>
    %144 = arith.mulf %139, %143 : vector<8x128xf32>
    %cst_59 = arith.constant dense<0.000000e+00> : vector<8x7xf32>
    %145 = tpu.matmul %144, %2, %cst_59 {dimension_numbers = #tpu.dot_dimension_numbers<[1], [0], [0], [1], [0, 0, 1, 1], [], []>} : vector<8x128xf32>, vector<128x7xf32>, vector<8x7xf32> -> vector<8x7xf32>
    %146 = math.tanh %145 : vector<8x7xf32>
    %cst_60 = arith.constant 1.000000e+00 : f32
    %147 = vector.broadcast %cst_60 : f32 to vector<8x7xf32>
    %148 = arith.addf %146, %147 : vector<8x7xf32>
    %cst_61 = arith.constant 5.000000e-01 : f32
    %149 = vector.broadcast %cst_61 : f32 to vector<8x7xf32>
    %150 = arith.mulf %149, %148 : vector<8x7xf32>
    %151 = arith.mulf %150, %94 : vector<8x7xf32>
    %cst_62 = arith.constant 1.000000e+00 : f32
    %152 = vector.broadcast %cst_62 : f32 to vector<8x7xf32>
    %153 = arith.subf %152, %150 : vector<8x7xf32>
    %154 = arith.mulf %153, %93 : vector<8x7xf32>
    %155 = arith.addf %151, %154 : vector<8x7xf32>
    %156 = arith.addf %155, %39 : vector<8x7xf32>
    %157 = vector.extract_strided_slice %156 {offsets = [0, 6], sizes = [8, 1], strides = [1, 1]} : vector<8x7xf32> to vector<8x1xf32>
    %cst_63 = arith.constant 3.14159274 : f32
    %158 = vector.broadcast %cst_63 : f32 to vector<8x1xf32>
    %159 = arith.addf %157, %158 : vector<8x1xf32>
    %cst_64 = arith.constant 6.28318548 : f32
    %160 = vector.broadcast %cst_64 : f32 to vector<8x1xf32>
    %161 = arith.divf %159, %160 : vector<8x1xf32>
    %162 = math.floor %161 : vector<8x1xf32>
    %cst_65 = arith.constant 6.28318548 : f32
    %163 = vector.broadcast %cst_65 : f32 to vector<8x1xf32>
    %164 = arith.mulf %163, %162 : vector<8x1xf32>
    %165 = arith.subf %157, %164 : vector<8x1xf32>
    %166 = vector.shape_cast %165 : vector<8x1xf32> to vector<8x1xf32>
    %167 = vector.broadcast %166 : vector<8x1xf32> to vector<8x7xf32>
    %168 = arith.select %22, %167, %156 : vector<8x7xi1>, vector<8x7xf32>
    %169 = arith.subf %168, %39 : vector<8x7xf32>
    %170 = tpu.concatenate %169, %169, %169, %169, %169 in 0 : vector<8x7xf32>, vector<8x7xf32>, vector<8x7xf32>, vector<8x7xf32>, vector<8x7xf32> -> vector<40x7xf32>
    %cst_66 = arith.constant dense<0.000000e+00> : vector<40x512xf32>
    %171 = tpu.matmul %170, %3, %cst_66 {dimension_numbers = #tpu.dot_dimension_numbers<[1], [0], [0], [1], [0, 0, 1, 1], [], []>} : vector<40x7xf32>, vector<7x512xf32>, vector<40x512xf32> -> vector<40x512xf32>
    %172 = arith.addf %171, %16 : vector<40x512xf32>
    %173 = vector.extract_strided_slice %172 {offsets = [0, 0], sizes = [8, 512], strides = [1, 1]} : vector<40x512xf32> to vector<8x512xf32>
    %cst_67 = arith.constant dense<0.000000e+00> : vector<8x512xf32>
    %174 = tpu.matmul %24, %4, %cst_67 {dimension_numbers = #tpu.dot_dimension_numbers<[1], [0], [0], [1], [0, 0, 1, 1], [], []>} : vector<8x128xf32>, vector<128x512xf32>, vector<8x512xf32> -> vector<8x512xf32>
    %175 = arith.addf %173, %174 : vector<8x512xf32>
    %176 = math.tanh %175 : vector<8x512xf32>
    %177 = vector.extract_strided_slice %176 {offsets = [0, 0], sizes = [8, 128], strides = [1, 1]} : vector<8x512xf32> to vector<8x128xf32>
    %cst_68 = arith.constant 1.000000e+00 : f32
    %178 = vector.broadcast %cst_68 : f32 to vector<8x128xf32>
    %179 = arith.addf %177, %178 : vector<8x128xf32>
    %cst_69 = arith.constant 5.000000e-01 : f32
    %180 = vector.broadcast %cst_69 : f32 to vector<8x128xf32>
    %181 = arith.mulf %180, %179 : vector<8x128xf32>
    %182 = vector.extract_strided_slice %176 {offsets = [0, 128], sizes = [8, 128], strides = [1, 1]} : vector<8x512xf32> to vector<8x128xf32>
    %cst_70 = arith.constant 1.000000e+00 : f32
    %183 = vector.broadcast %cst_70 : f32 to vector<8x128xf32>
    %184 = arith.addf %182, %183 : vector<8x128xf32>
    %cst_71 = arith.constant 5.000000e-01 : f32
    %185 = vector.broadcast %cst_71 : f32 to vector<8x128xf32>
    %186 = arith.mulf %185, %184 : vector<8x128xf32>
    %187 = vector.extract_strided_slice %176 {offsets = [0, 256], sizes = [8, 128], strides = [1, 1]} : vector<8x512xf32> to vector<8x128xf32>
    %188 = vector.extract_strided_slice %176 {offsets = [0, 384], sizes = [8, 128], strides = [1, 1]} : vector<8x512xf32> to vector<8x128xf32>
    %cst_72 = arith.constant 1.000000e+00 : f32
    %189 = vector.broadcast %cst_72 : f32 to vector<8x128xf32>
    %190 = arith.addf %188, %189 : vector<8x128xf32>
    %cst_73 = arith.constant 5.000000e-01 : f32
    %191 = vector.broadcast %cst_73 : f32 to vector<8x128xf32>
    %192 = arith.mulf %191, %190 : vector<8x128xf32>
    %193 = arith.mulf %186, %24 : vector<8x128xf32>
    %194 = arith.mulf %181, %187 : vector<8x128xf32>
    %195 = arith.addf %193, %194 : vector<8x128xf32>
    %196 = math.tanh %195 : vector<8x128xf32>
    %197 = arith.mulf %192, %196 : vector<8x128xf32>
    %198 = vector.extract_strided_slice %172 {offsets = [8, 0], sizes = [8, 512], strides = [1, 1]} : vector<40x512xf32> to vector<8x512xf32>
    %cst_74 = arith.constant dense<0.000000e+00> : vector<8x512xf32>
    %199 = tpu.matmul %197, %4, %cst_74 {dimension_numbers = #tpu.dot_dimension_numbers<[1], [0], [0], [1], [0, 0, 1, 1], [], []>} : vector<8x128xf32>, vector<128x512xf32>, vector<8x512xf32> -> vector<8x512xf32>
    %200 = arith.addf %198, %199 : vector<8x512xf32>
    %201 = math.tanh %200 : vector<8x512xf32>
    %202 = vector.extract_strided_slice %201 {offsets = [0, 0], sizes = [8, 128], strides = [1, 1]} : vector<8x512xf32> to vector<8x128xf32>
    %cst_75 = arith.constant 1.000000e+00 : f32
    %203 = vector.broadcast %cst_75 : f32 to vector<8x128xf32>
    %204 = arith.addf %202, %203 : vector<8x128xf32>
    %cst_76 = arith.constant 5.000000e-01 : f32
    %205 = vector.broadcast %cst_76 : f32 to vector<8x128xf32>
    %206 = arith.mulf %205, %204 : vector<8x128xf32>
    %207 = vector.extract_strided_slice %201 {offsets = [0, 128], sizes = [8, 128], strides = [1, 1]} : vector<8x512xf32> to vector<8x128xf32>
    %cst_77 = arith.constant 1.000000e+00 : f32
    %208 = vector.broadcast %cst_77 : f32 to vector<8x128xf32>
    %209 = arith.addf %207, %208 : vector<8x128xf32>
    %cst_78 = arith.constant 5.000000e-01 : f32
    %210 = vector.broadcast %cst_78 : f32 to vector<8x128xf32>
    %211 = arith.mulf %210, %209 : vector<8x128xf32>
    %212 = vector.extract_strided_slice %201 {offsets = [0, 256], sizes = [8, 128], strides = [1, 1]} : vector<8x512xf32> to vector<8x128xf32>
    %213 = vector.extract_strided_slice %201 {offsets = [0, 384], sizes = [8, 128], strides = [1, 1]} : vector<8x512xf32> to vector<8x128xf32>
    %cst_79 = arith.constant 1.000000e+00 : f32
    %214 = vector.broadcast %cst_79 : f32 to vector<8x128xf32>
    %215 = arith.addf %213, %214 : vector<8x128xf32>
    %cst_80 = arith.constant 5.000000e-01 : f32
    %216 = vector.broadcast %cst_80 : f32 to vector<8x128xf32>
    %217 = arith.mulf %216, %215 : vector<8x128xf32>
    %218 = arith.mulf %211, %195 : vector<8x128xf32>
    %219 = arith.mulf %206, %212 : vector<8x128xf32>
    %220 = arith.addf %218, %219 : vector<8x128xf32>
    %221 = math.tanh %220 : vector<8x128xf32>
    %222 = arith.mulf %217, %221 : vector<8x128xf32>
    %223 = vector.extract_strided_slice %172 {offsets = [16, 0], sizes = [8, 512], strides = [1, 1]} : vector<40x512xf32> to vector<8x512xf32>
    %cst_81 = arith.constant dense<0.000000e+00> : vector<8x512xf32>
    %224 = tpu.matmul %222, %4, %cst_81 {dimension_numbers = #tpu.dot_dimension_numbers<[1], [0], [0], [1], [0, 0, 1, 1], [], []>} : vector<8x128xf32>, vector<128x512xf32>, vector<8x512xf32> -> vector<8x512xf32>
    %225 = arith.addf %223, %224 : vector<8x512xf32>
    %226 = math.tanh %225 : vector<8x512xf32>
    %227 = vector.extract_strided_slice %226 {offsets = [0, 0], sizes = [8, 128], strides = [1, 1]} : vector<8x512xf32> to vector<8x128xf32>
    %cst_82 = arith.constant 1.000000e+00 : f32
    %228 = vector.broadcast %cst_82 : f32 to vector<8x128xf32>
    %229 = arith.addf %227, %228 : vector<8x128xf32>
    %cst_83 = arith.constant 5.000000e-01 : f32
    %230 = vector.broadcast %cst_83 : f32 to vector<8x128xf32>
    %231 = arith.mulf %230, %229 : vector<8x128xf32>
    %232 = vector.extract_strided_slice %226 {offsets = [0, 128], sizes = [8, 128], strides = [1, 1]} : vector<8x512xf32> to vector<8x128xf32>
    %cst_84 = arith.constant 1.000000e+00 : f32
    %233 = vector.broadcast %cst_84 : f32 to vector<8x128xf32>
    %234 = arith.addf %232, %233 : vector<8x128xf32>
    %cst_85 = arith.constant 5.000000e-01 : f32
    %235 = vector.broadcast %cst_85 : f32 to vector<8x128xf32>
    %236 = arith.mulf %235, %234 : vector<8x128xf32>
    %237 = vector.extract_strided_slice %226 {offsets = [0, 256], sizes = [8, 128], strides = [1, 1]} : vector<8x512xf32> to vector<8x128xf32>
    %238 = vector.extract_strided_slice %226 {offsets = [0, 384], sizes = [8, 128], strides = [1, 1]} : vector<8x512xf32> to vector<8x128xf32>
    %cst_86 = arith.constant 1.000000e+00 : f32
    %239 = vector.broadcast %cst_86 : f32 to vector<8x128xf32>
    %240 = arith.addf %238, %239 : vector<8x128xf32>
    %cst_87 = arith.constant 5.000000e-01 : f32
    %241 = vector.broadcast %cst_87 : f32 to vector<8x128xf32>
    %242 = arith.mulf %241, %240 : vector<8x128xf32>
    %243 = arith.mulf %236, %220 : vector<8x128xf32>
    %244 = arith.mulf %231, %237 : vector<8x128xf32>
    %245 = arith.addf %243, %244 : vector<8x128xf32>
    %246 = math.tanh %245 : vector<8x128xf32>
    %247 = arith.mulf %242, %246 : vector<8x128xf32>
    %248 = vector.extract_strided_slice %172 {offsets = [24, 0], sizes = [8, 512], strides = [1, 1]} : vector<40x512xf32> to vector<8x512xf32>
    %cst_88 = arith.constant dense<0.000000e+00> : vector<8x512xf32>
    %249 = tpu.matmul %247, %4, %cst_88 {dimension_numbers = #tpu.dot_dimension_numbers<[1], [0], [0], [1], [0, 0, 1, 1], [], []>} : vector<8x128xf32>, vector<128x512xf32>, vector<8x512xf32> -> vector<8x512xf32>
    %250 = arith.addf %248, %249 : vector<8x512xf32>
    %251 = math.tanh %250 : vector<8x512xf32>
    %252 = vector.extract_strided_slice %251 {offsets = [0, 0], sizes = [8, 128], strides = [1, 1]} : vector<8x512xf32> to vector<8x128xf32>
    %cst_89 = arith.constant 1.000000e+00 : f32
    %253 = vector.broadcast %cst_89 : f32 to vector<8x128xf32>
    %254 = arith.addf %252, %253 : vector<8x128xf32>
    %cst_90 = arith.constant 5.000000e-01 : f32
    %255 = vector.broadcast %cst_90 : f32 to vector<8x128xf32>
    %256 = arith.mulf %255, %254 : vector<8x128xf32>
    %257 = vector.extract_strided_slice %251 {offsets = [0, 128], sizes = [8, 128], strides = [1, 1]} : vector<8x512xf32> to vector<8x128xf32>
    %cst_91 = arith.constant 1.000000e+00 : f32
    %258 = vector.broadcast %cst_91 : f32 to vector<8x128xf32>
    %259 = arith.addf %257, %258 : vector<8x128xf32>
    %cst_92 = arith.constant 5.000000e-01 : f32
    %260 = vector.broadcast %cst_92 : f32 to vector<8x128xf32>
    %261 = arith.mulf %260, %259 : vector<8x128xf32>
    %262 = vector.extract_strided_slice %251 {offsets = [0, 256], sizes = [8, 128], strides = [1, 1]} : vector<8x512xf32> to vector<8x128xf32>
    %263 = vector.extract_strided_slice %251 {offsets = [0, 384], sizes = [8, 128], strides = [1, 1]} : vector<8x512xf32> to vector<8x128xf32>
    %cst_93 = arith.constant 1.000000e+00 : f32
    %264 = vector.broadcast %cst_93 : f32 to vector<8x128xf32>
    %265 = arith.addf %263, %264 : vector<8x128xf32>
    %cst_94 = arith.constant 5.000000e-01 : f32
    %266 = vector.broadcast %cst_94 : f32 to vector<8x128xf32>
    %267 = arith.mulf %266, %265 : vector<8x128xf32>
    %268 = arith.mulf %261, %245 : vector<8x128xf32>
    %269 = arith.mulf %256, %262 : vector<8x128xf32>
    %270 = arith.addf %268, %269 : vector<8x128xf32>
    %271 = math.tanh %270 : vector<8x128xf32>
    %272 = arith.mulf %267, %271 : vector<8x128xf32>
    %273 = vector.extract_strided_slice %172 {offsets = [32, 0], sizes = [8, 512], strides = [1, 1]} : vector<40x512xf32> to vector<8x512xf32>
    %cst_95 = arith.constant dense<0.000000e+00> : vector<8x512xf32>
    %274 = tpu.matmul %272, %4, %cst_95 {dimension_numbers = #tpu.dot_dimension_numbers<[1], [0], [0], [1], [0, 0, 1, 1], [], []>} : vector<8x128xf32>, vector<128x512xf32>, vector<8x512xf32> -> vector<8x512xf32>
    %275 = arith.addf %273, %274 : vector<8x512xf32>
    %276 = math.tanh %275 : vector<8x512xf32>
    %277 = vector.extract_strided_slice %276 {offsets = [0, 0], sizes = [8, 128], strides = [1, 1]} : vector<8x512xf32> to vector<8x128xf32>
    %cst_96 = arith.constant 1.000000e+00 : f32
    %278 = vector.broadcast %cst_96 : f32 to vector<8x128xf32>
    %279 = arith.addf %277, %278 : vector<8x128xf32>
    %cst_97 = arith.constant 5.000000e-01 : f32
    %280 = vector.broadcast %cst_97 : f32 to vector<8x128xf32>
    %281 = arith.mulf %280, %279 : vector<8x128xf32>
    %282 = vector.extract_strided_slice %276 {offsets = [0, 128], sizes = [8, 128], strides = [1, 1]} : vector<8x512xf32> to vector<8x128xf32>
    %cst_98 = arith.constant 1.000000e+00 : f32
    %283 = vector.broadcast %cst_98 : f32 to vector<8x128xf32>
    %284 = arith.addf %282, %283 : vector<8x128xf32>
    %cst_99 = arith.constant 5.000000e-01 : f32
    %285 = vector.broadcast %cst_99 : f32 to vector<8x128xf32>
    %286 = arith.mulf %285, %284 : vector<8x128xf32>
    %287 = vector.extract_strided_slice %276 {offsets = [0, 256], sizes = [8, 128], strides = [1, 1]} : vector<8x512xf32> to vector<8x128xf32>
    %288 = vector.extract_strided_slice %276 {offsets = [0, 384], sizes = [8, 128], strides = [1, 1]} : vector<8x512xf32> to vector<8x128xf32>
    %cst_100 = arith.constant 1.000000e+00 : f32
    %289 = vector.broadcast %cst_100 : f32 to vector<8x128xf32>
    %290 = arith.addf %288, %289 : vector<8x128xf32>
    %cst_101 = arith.constant 5.000000e-01 : f32
    %291 = vector.broadcast %cst_101 : f32 to vector<8x128xf32>
    %292 = arith.mulf %291, %290 : vector<8x128xf32>
    %293 = arith.mulf %286, %270 : vector<8x128xf32>
    %294 = arith.mulf %281, %287 : vector<8x128xf32>
    %295 = arith.addf %293, %294 : vector<8x128xf32>
    %296 = math.tanh %295 : vector<8x128xf32>
    %297 = arith.mulf %292, %296 : vector<8x128xf32>
    %298 = tpu.concatenate %197, %222, %247, %272, %297 in 0 : vector<8x128xf32>, vector<8x128xf32>, vector<8x128xf32>, vector<8x128xf32>, vector<8x128xf32> -> vector<40x128xf32>
    %cst_102 = arith.constant dense<0.000000e+00> : vector<40x512xf32>
    %299 = tpu.matmul %298, %5, %cst_102 {dimension_numbers = #tpu.dot_dimension_numbers<[1], [0], [0], [1], [0, 0, 1, 1], [], []>} : vector<40x128xf32>, vector<128x512xf32>, vector<40x512xf32> -> vector<40x512xf32>
    %300 = arith.addf %299, %19 : vector<40x512xf32>
    %301 = vector.extract_strided_slice %300 {offsets = [0, 0], sizes = [8, 512], strides = [1, 1]} : vector<40x512xf32> to vector<8x512xf32>
    %cst_103 = arith.constant dense<0.000000e+00> : vector<8x512xf32>
    %302 = tpu.matmul %24, %6, %cst_103 {dimension_numbers = #tpu.dot_dimension_numbers<[1], [0], [0], [1], [0, 0, 1, 1], [], []>} : vector<8x128xf32>, vector<128x512xf32>, vector<8x512xf32> -> vector<8x512xf32>
    %303 = arith.addf %301, %302 : vector<8x512xf32>
    %304 = math.tanh %303 : vector<8x512xf32>
    %305 = vector.extract_strided_slice %304 {offsets = [0, 0], sizes = [8, 128], strides = [1, 1]} : vector<8x512xf32> to vector<8x128xf32>
    %cst_104 = arith.constant 1.000000e+00 : f32
    %306 = vector.broadcast %cst_104 : f32 to vector<8x128xf32>
    %307 = arith.addf %305, %306 : vector<8x128xf32>
    %cst_105 = arith.constant 5.000000e-01 : f32
    %308 = vector.broadcast %cst_105 : f32 to vector<8x128xf32>
    %309 = arith.mulf %308, %307 : vector<8x128xf32>
    %310 = vector.extract_strided_slice %304 {offsets = [0, 128], sizes = [8, 128], strides = [1, 1]} : vector<8x512xf32> to vector<8x128xf32>
    %cst_106 = arith.constant 1.000000e+00 : f32
    %311 = vector.broadcast %cst_106 : f32 to vector<8x128xf32>
    %312 = arith.addf %310, %311 : vector<8x128xf32>
    %cst_107 = arith.constant 5.000000e-01 : f32
    %313 = vector.broadcast %cst_107 : f32 to vector<8x128xf32>
    %314 = arith.mulf %313, %312 : vector<8x128xf32>
    %315 = vector.extract_strided_slice %304 {offsets = [0, 256], sizes = [8, 128], strides = [1, 1]} : vector<8x512xf32> to vector<8x128xf32>
    %316 = vector.extract_strided_slice %304 {offsets = [0, 384], sizes = [8, 128], strides = [1, 1]} : vector<8x512xf32> to vector<8x128xf32>
    %cst_108 = arith.constant 1.000000e+00 : f32
    %317 = vector.broadcast %cst_108 : f32 to vector<8x128xf32>
    %318 = arith.addf %316, %317 : vector<8x128xf32>
    %cst_109 = arith.constant 5.000000e-01 : f32
    %319 = vector.broadcast %cst_109 : f32 to vector<8x128xf32>
    %320 = arith.mulf %319, %318 : vector<8x128xf32>
    %321 = arith.mulf %314, %24 : vector<8x128xf32>
    %322 = arith.mulf %309, %315 : vector<8x128xf32>
    %323 = arith.addf %321, %322 : vector<8x128xf32>
    %324 = math.tanh %323 : vector<8x128xf32>
    %325 = arith.mulf %320, %324 : vector<8x128xf32>
    %326 = vector.extract_strided_slice %300 {offsets = [8, 0], sizes = [8, 512], strides = [1, 1]} : vector<40x512xf32> to vector<8x512xf32>
    %cst_110 = arith.constant dense<0.000000e+00> : vector<8x512xf32>
    %327 = tpu.matmul %325, %6, %cst_110 {dimension_numbers = #tpu.dot_dimension_numbers<[1], [0], [0], [1], [0, 0, 1, 1], [], []>} : vector<8x128xf32>, vector<128x512xf32>, vector<8x512xf32> -> vector<8x512xf32>
    %328 = arith.addf %326, %327 : vector<8x512xf32>
    %329 = math.tanh %328 : vector<8x512xf32>
    %330 = vector.extract_strided_slice %329 {offsets = [0, 0], sizes = [8, 128], strides = [1, 1]} : vector<8x512xf32> to vector<8x128xf32>
    %cst_111 = arith.constant 1.000000e+00 : f32
    %331 = vector.broadcast %cst_111 : f32 to vector<8x128xf32>
    %332 = arith.addf %330, %331 : vector<8x128xf32>
    %cst_112 = arith.constant 5.000000e-01 : f32
    %333 = vector.broadcast %cst_112 : f32 to vector<8x128xf32>
    %334 = arith.mulf %333, %332 : vector<8x128xf32>
    %335 = vector.extract_strided_slice %329 {offsets = [0, 128], sizes = [8, 128], strides = [1, 1]} : vector<8x512xf32> to vector<8x128xf32>
    %cst_113 = arith.constant 1.000000e+00 : f32
    %336 = vector.broadcast %cst_113 : f32 to vector<8x128xf32>
    %337 = arith.addf %335, %336 : vector<8x128xf32>
    %cst_114 = arith.constant 5.000000e-01 : f32
    %338 = vector.broadcast %cst_114 : f32 to vector<8x128xf32>
    %339 = arith.mulf %338, %337 : vector<8x128xf32>
    %340 = vector.extract_strided_slice %329 {offsets = [0, 256], sizes = [8, 128], strides = [1, 1]} : vector<8x512xf32> to vector<8x128xf32>
    %341 = vector.extract_strided_slice %329 {offsets = [0, 384], sizes = [8, 128], strides = [1, 1]} : vector<8x512xf32> to vector<8x128xf32>
    %cst_115 = arith.constant 1.000000e+00 : f32
    %342 = vector.broadcast %cst_115 : f32 to vector<8x128xf32>
    %343 = arith.addf %341, %342 : vector<8x128xf32>
    %cst_116 = arith.constant 5.000000e-01 : f32
    %344 = vector.broadcast %cst_116 : f32 to vector<8x128xf32>
    %345 = arith.mulf %344, %343 : vector<8x128xf32>
    %346 = arith.mulf %339, %323 : vector<8x128xf32>
    %347 = arith.mulf %334, %340 : vector<8x128xf32>
    %348 = arith.addf %346, %347 : vector<8x128xf32>
    %349 = math.tanh %348 : vector<8x128xf32>
    %350 = arith.mulf %345, %349 : vector<8x128xf32>
    %351 = vector.extract_strided_slice %300 {offsets = [16, 0], sizes = [8, 512], strides = [1, 1]} : vector<40x512xf32> to vector<8x512xf32>
    %cst_117 = arith.constant dense<0.000000e+00> : vector<8x512xf32>
    %352 = tpu.matmul %350, %6, %cst_117 {dimension_numbers = #tpu.dot_dimension_numbers<[1], [0], [0], [1], [0, 0, 1, 1], [], []>} : vector<8x128xf32>, vector<128x512xf32>, vector<8x512xf32> -> vector<8x512xf32>
    %353 = arith.addf %351, %352 : vector<8x512xf32>
    %354 = math.tanh %353 : vector<8x512xf32>
    %355 = vector.extract_strided_slice %354 {offsets = [0, 0], sizes = [8, 128], strides = [1, 1]} : vector<8x512xf32> to vector<8x128xf32>
    %cst_118 = arith.constant 1.000000e+00 : f32
    %356 = vector.broadcast %cst_118 : f32 to vector<8x128xf32>
    %357 = arith.addf %355, %356 : vector<8x128xf32>
    %cst_119 = arith.constant 5.000000e-01 : f32
    %358 = vector.broadcast %cst_119 : f32 to vector<8x128xf32>
    %359 = arith.mulf %358, %357 : vector<8x128xf32>
    %360 = vector.extract_strided_slice %354 {offsets = [0, 128], sizes = [8, 128], strides = [1, 1]} : vector<8x512xf32> to vector<8x128xf32>
    %cst_120 = arith.constant 1.000000e+00 : f32
    %361 = vector.broadcast %cst_120 : f32 to vector<8x128xf32>
    %362 = arith.addf %360, %361 : vector<8x128xf32>
    %cst_121 = arith.constant 5.000000e-01 : f32
    %363 = vector.broadcast %cst_121 : f32 to vector<8x128xf32>
    %364 = arith.mulf %363, %362 : vector<8x128xf32>
    %365 = vector.extract_strided_slice %354 {offsets = [0, 256], sizes = [8, 128], strides = [1, 1]} : vector<8x512xf32> to vector<8x128xf32>
    %366 = vector.extract_strided_slice %354 {offsets = [0, 384], sizes = [8, 128], strides = [1, 1]} : vector<8x512xf32> to vector<8x128xf32>
    %cst_122 = arith.constant 1.000000e+00 : f32
    %367 = vector.broadcast %cst_122 : f32 to vector<8x128xf32>
    %368 = arith.addf %366, %367 : vector<8x128xf32>
    %cst_123 = arith.constant 5.000000e-01 : f32
    %369 = vector.broadcast %cst_123 : f32 to vector<8x128xf32>
    %370 = arith.mulf %369, %368 : vector<8x128xf32>
    %371 = arith.mulf %364, %348 : vector<8x128xf32>
    %372 = arith.mulf %359, %365 : vector<8x128xf32>
    %373 = arith.addf %371, %372 : vector<8x128xf32>
    %374 = math.tanh %373 : vector<8x128xf32>
    %375 = arith.mulf %370, %374 : vector<8x128xf32>
    %376 = vector.extract_strided_slice %300 {offsets = [24, 0], sizes = [8, 512], strides = [1, 1]} : vector<40x512xf32> to vector<8x512xf32>
    %cst_124 = arith.constant dense<0.000000e+00> : vector<8x512xf32>
    %377 = tpu.matmul %375, %6, %cst_124 {dimension_numbers = #tpu.dot_dimension_numbers<[1], [0], [0], [1], [0, 0, 1, 1], [], []>} : vector<8x128xf32>, vector<128x512xf32>, vector<8x512xf32> -> vector<8x512xf32>
    %378 = arith.addf %376, %377 : vector<8x512xf32>
    %379 = math.tanh %378 : vector<8x512xf32>
    %380 = vector.extract_strided_slice %379 {offsets = [0, 0], sizes = [8, 128], strides = [1, 1]} : vector<8x512xf32> to vector<8x128xf32>
    %cst_125 = arith.constant 1.000000e+00 : f32
    %381 = vector.broadcast %cst_125 : f32 to vector<8x128xf32>
    %382 = arith.addf %380, %381 : vector<8x128xf32>
    %cst_126 = arith.constant 5.000000e-01 : f32
    %383 = vector.broadcast %cst_126 : f32 to vector<8x128xf32>
    %384 = arith.mulf %383, %382 : vector<8x128xf32>
    %385 = vector.extract_strided_slice %379 {offsets = [0, 128], sizes = [8, 128], strides = [1, 1]} : vector<8x512xf32> to vector<8x128xf32>
    %cst_127 = arith.constant 1.000000e+00 : f32
    %386 = vector.broadcast %cst_127 : f32 to vector<8x128xf32>
    %387 = arith.addf %385, %386 : vector<8x128xf32>
    %cst_128 = arith.constant 5.000000e-01 : f32
    %388 = vector.broadcast %cst_128 : f32 to vector<8x128xf32>
    %389 = arith.mulf %388, %387 : vector<8x128xf32>
    %390 = vector.extract_strided_slice %379 {offsets = [0, 256], sizes = [8, 128], strides = [1, 1]} : vector<8x512xf32> to vector<8x128xf32>
    %391 = vector.extract_strided_slice %379 {offsets = [0, 384], sizes = [8, 128], strides = [1, 1]} : vector<8x512xf32> to vector<8x128xf32>
    %cst_129 = arith.constant 1.000000e+00 : f32
    %392 = vector.broadcast %cst_129 : f32 to vector<8x128xf32>
    %393 = arith.addf %391, %392 : vector<8x128xf32>
    %cst_130 = arith.constant 5.000000e-01 : f32
    %394 = vector.broadcast %cst_130 : f32 to vector<8x128xf32>
    %395 = arith.mulf %394, %393 : vector<8x128xf32>
    %396 = arith.mulf %389, %373 : vector<8x128xf32>
    %397 = arith.mulf %384, %390 : vector<8x128xf32>
    %398 = arith.addf %396, %397 : vector<8x128xf32>
    %399 = math.tanh %398 : vector<8x128xf32>
    %400 = arith.mulf %395, %399 : vector<8x128xf32>
    %401 = vector.extract_strided_slice %300 {offsets = [32, 0], sizes = [8, 512], strides = [1, 1]} : vector<40x512xf32> to vector<8x512xf32>
    %cst_131 = arith.constant dense<0.000000e+00> : vector<8x512xf32>
    %402 = tpu.matmul %400, %6, %cst_131 {dimension_numbers = #tpu.dot_dimension_numbers<[1], [0], [0], [1], [0, 0, 1, 1], [], []>} : vector<8x128xf32>, vector<128x512xf32>, vector<8x512xf32> -> vector<8x512xf32>
    %403 = arith.addf %401, %402 : vector<8x512xf32>
    %404 = math.tanh %403 : vector<8x512xf32>
    %405 = vector.extract_strided_slice %404 {offsets = [0, 0], sizes = [8, 128], strides = [1, 1]} : vector<8x512xf32> to vector<8x128xf32>
    %cst_132 = arith.constant 1.000000e+00 : f32
    %406 = vector.broadcast %cst_132 : f32 to vector<8x128xf32>
    %407 = arith.addf %405, %406 : vector<8x128xf32>
    %cst_133 = arith.constant 5.000000e-01 : f32
    %408 = vector.broadcast %cst_133 : f32 to vector<8x128xf32>
    %409 = arith.mulf %408, %407 : vector<8x128xf32>
    %410 = vector.extract_strided_slice %404 {offsets = [0, 128], sizes = [8, 128], strides = [1, 1]} : vector<8x512xf32> to vector<8x128xf32>
    %cst_134 = arith.constant 1.000000e+00 : f32
    %411 = vector.broadcast %cst_134 : f32 to vector<8x128xf32>
    %412 = arith.addf %410, %411 : vector<8x128xf32>
    %cst_135 = arith.constant 5.000000e-01 : f32
    %413 = vector.broadcast %cst_135 : f32 to vector<8x128xf32>
    %414 = arith.mulf %413, %412 : vector<8x128xf32>
    %415 = vector.extract_strided_slice %404 {offsets = [0, 256], sizes = [8, 128], strides = [1, 1]} : vector<8x512xf32> to vector<8x128xf32>
    %416 = vector.extract_strided_slice %404 {offsets = [0, 384], sizes = [8, 128], strides = [1, 1]} : vector<8x512xf32> to vector<8x128xf32>
    %cst_136 = arith.constant 1.000000e+00 : f32
    %417 = vector.broadcast %cst_136 : f32 to vector<8x128xf32>
    %418 = arith.addf %416, %417 : vector<8x128xf32>
    %cst_137 = arith.constant 5.000000e-01 : f32
    %419 = vector.broadcast %cst_137 : f32 to vector<8x128xf32>
    %420 = arith.mulf %419, %418 : vector<8x128xf32>
    %421 = arith.mulf %414, %398 : vector<8x128xf32>
    %422 = arith.mulf %409, %415 : vector<8x128xf32>
    %423 = arith.addf %421, %422 : vector<8x128xf32>
    %424 = math.tanh %423 : vector<8x128xf32>
    %425 = arith.mulf %420, %424 : vector<8x128xf32>
    %426 = tpu.concatenate %325, %350, %375, %400, %425 in 0 : vector<8x128xf32>, vector<8x128xf32>, vector<8x128xf32>, vector<8x128xf32>, vector<8x128xf32> -> vector<40x128xf32>
    %cst_138 = arith.constant dense<0.000000e+00> : vector<40x7xf32>
    %427 = tpu.matmul %426, %7, %cst_138 {dimension_numbers = #tpu.dot_dimension_numbers<[1], [0], [0], [1], [0, 0, 1, 1], [], []>} : vector<40x128xf32>, vector<128x7xf32>, vector<40x7xf32> -> vector<40x7xf32>
    %428 = vector.extract_strided_slice %427 {offsets = [0, 0], sizes = [8, 7], strides = [1, 1]} : vector<40x7xf32> to vector<8x7xf32>
    %429 = vector.extract_strided_slice %427 {offsets = [8, 0], sizes = [8, 7], strides = [1, 1]} : vector<40x7xf32> to vector<8x7xf32>
    %430 = vector.extract_strided_slice %427 {offsets = [16, 0], sizes = [8, 7], strides = [1, 1]} : vector<40x7xf32> to vector<8x7xf32>
    %431 = vector.extract_strided_slice %427 {offsets = [24, 0], sizes = [8, 7], strides = [1, 1]} : vector<40x7xf32> to vector<8x7xf32>
    %432 = vector.extract_strided_slice %427 {offsets = [32, 0], sizes = [8, 7], strides = [1, 1]} : vector<40x7xf32> to vector<8x7xf32>
    %433 = vector.extract_strided_slice %170 {offsets = [0, 0], sizes = [8, 7], strides = [1, 1]} : vector<40x7xf32> to vector<8x7xf32>
    %434 = vector.extract_strided_slice %170 {offsets = [8, 0], sizes = [8, 7], strides = [1, 1]} : vector<40x7xf32> to vector<8x7xf32>
    %435 = vector.extract_strided_slice %170 {offsets = [16, 0], sizes = [8, 7], strides = [1, 1]} : vector<40x7xf32> to vector<8x7xf32>
    %436 = vector.extract_strided_slice %170 {offsets = [24, 0], sizes = [8, 7], strides = [1, 1]} : vector<40x7xf32> to vector<8x7xf32>
    %437 = vector.extract_strided_slice %170 {offsets = [32, 0], sizes = [8, 7], strides = [1, 1]} : vector<40x7xf32> to vector<8x7xf32>
    %438 = arith.maximumf %428, %429 : vector<8x7xf32>
    %439 = arith.maximumf %438, %430 : vector<8x7xf32>
    %440 = arith.maximumf %439, %431 : vector<8x7xf32>
    %441 = arith.maximumf %440, %432 : vector<8x7xf32>
    %442 = arith.subf %428, %441 : vector<8x7xf32>
    %443 = math.exp %442 : vector<8x7xf32>
    %444 = arith.subf %429, %441 : vector<8x7xf32>
    %445 = math.exp %444 : vector<8x7xf32>
    %446 = arith.subf %430, %441 : vector<8x7xf32>
    %447 = math.exp %446 : vector<8x7xf32>
    %448 = arith.subf %431, %441 : vector<8x7xf32>
    %449 = math.exp %448 : vector<8x7xf32>
    %450 = arith.subf %432, %441 : vector<8x7xf32>
    %451 = math.exp %450 : vector<8x7xf32>
    %452 = arith.mulf %443, %433 : vector<8x7xf32>
    %453 = arith.addf %443, %445 : vector<8x7xf32>
    %454 = arith.mulf %445, %434 : vector<8x7xf32>
    %455 = arith.addf %452, %454 : vector<8x7xf32>
    %456 = arith.addf %453, %447 : vector<8x7xf32>
    %457 = arith.mulf %447, %435 : vector<8x7xf32>
    %458 = arith.addf %455, %457 : vector<8x7xf32>
    %459 = arith.addf %456, %449 : vector<8x7xf32>
    %460 = arith.mulf %449, %436 : vector<8x7xf32>
    %461 = arith.addf %458, %460 : vector<8x7xf32>
    %462 = arith.addf %459, %451 : vector<8x7xf32>
    %463 = arith.mulf %451, %437 : vector<8x7xf32>
    %464 = arith.addf %461, %463 : vector<8x7xf32>
    %465 = tpu.reciprocal %462 {approx = true} : vector<8x7xf32> -> vector<8x7xf32>
    %466 = arith.mulf %464, %465 : vector<8x7xf32>
    %467 = arith.addf %466, %168 : vector<8x7xf32>
    %468 = vector.extract_strided_slice %467 {offsets = [0, 6], sizes = [8, 1], strides = [1, 1]} : vector<8x7xf32> to vector<8x1xf32>
    %cst_139 = arith.constant 3.14159274 : f32
    %469 = vector.broadcast %cst_139 : f32 to vector<8x1xf32>
    %470 = arith.addf %468, %469 : vector<8x1xf32>
    %cst_140 = arith.constant 6.28318548 : f32
    %471 = vector.broadcast %cst_140 : f32 to vector<8x1xf32>
    %472 = arith.divf %470, %471 : vector<8x1xf32>
    %473 = math.floor %472 : vector<8x1xf32>
    %cst_141 = arith.constant 6.28318548 : f32
    %474 = vector.broadcast %cst_141 : f32 to vector<8x1xf32>
    %475 = arith.mulf %474, %473 : vector<8x1xf32>
    %476 = arith.subf %468, %475 : vector<8x1xf32>
    %477 = vector.shape_cast %476 : vector<8x1xf32> to vector<8x1xf32>
    %478 = vector.broadcast %477 : vector<8x1xf32> to vector<8x7xf32>
    %479 = arith.select %22, %478, %467 : vector<8x7xi1>, vector<8x7xf32>
    %480 = vector.shape_cast %479 : vector<8x7xf32> to vector<1x8x7xf32>
    %c0_142 = arith.constant 0 : index
    %c0_143 = arith.constant 0 : index
    %c0_144 = arith.constant 0 : index
    %481 = vector.load %arg14[%c0_142, %c0_143, %c0_144] : memref<7x8x7xf32, #tpu.memory_space<vmem>>, vector<1x8x7xf32>
    tpu.vector_store %arg14[%c0_142, %c0_143, %c0_144], %480 {strides = array<i32>} : memref<7x8x7xf32, #tpu.memory_space<vmem>>, vector<1x8x7xf32>,
    %482 = vector.shape_cast %168 : vector<8x7xf32> to vector<1x8x7xf32>
    %c0_145 = arith.constant 0 : index
    %c0_146 = arith.constant 0 : index
    %c0_147 = arith.constant 0 : index
    %483 = vector.load %arg15[%c0_145, %c0_146, %c0_147] : memref<7x8x7xf32, #tpu.memory_space<vmem>>, vector<1x8x7xf32>
    tpu.vector_store %arg15[%c0_145, %c0_146, %c0_147], %482 {strides = array<i32>} : memref<7x8x7xf32, #tpu.memory_space<vmem>>, vector<1x8x7xf32>,
    %c2_i32 = arith.constant 2 : i32
    %c6_i32_148 = arith.constant 6 : i32
    %484 = arith.addi %c2_i32, %c6_i32_148 : i32
    %c1_i32 = arith.constant 1 : i32
    %485:11 = scf.for %arg16 = %c2_i32 to %484 step %c1_i32 iter_args(%arg17 = %119, %arg18 = %117, %arg19 = %144, %arg20 = %142, %arg21 = %297, %arg22 = %295, %arg23 = %425, %arg24 = %423, %arg25 = %168, %arg26 = %479, %arg27 = %170) -> (vector<8x128xf32>, vector<8x128xf32>, vector<8x128xf32>, vector<8x128xf32>, vector<8x128xf32>, vector<8x128xf32>, vector<8x128xf32>, vector<8x128xf32>, vector<8x7xf32>, vector<8x7xf32>, vector<40x7xf32>)  : i32 {
      %486 = arith.index_cast %arg16 : i32 to index
      %c0_150 = arith.constant 0 : index
      %c0_151 = arith.constant 0 : index
      %487 = vector.load %arg1[%486, %c0_150, %c0_151] : memref<8x8x8xf32, #tpu.memory_space<vmem>>, vector<1x8x8xf32>
      %488 = vector.shape_cast %487 : vector<1x8x8xf32> to vector<8x8xf32>
      %489 = vector.extract_strided_slice %488 {offsets = [0, 0], sizes = [8, 7], strides = [1, 1]} : vector<8x8xf32> to vector<8x7xf32>
      %490 = vector.extract_strided_slice %489 {offsets = [0, 6], sizes = [8, 1], strides = [1, 1]} : vector<8x7xf32> to vector<8x1xf32>
      %cst_152 = arith.constant 3.14159274 : f32
      %491 = vector.broadcast %cst_152 : f32 to vector<8x1xf32>
      %492 = arith.addf %490, %491 : vector<8x1xf32>
      %cst_153 = arith.constant 6.28318548 : f32
      %493 = vector.broadcast %cst_153 : f32 to vector<8x1xf32>
      %494 = arith.divf %492, %493 : vector<8x1xf32>
      %495 = math.floor %494 : vector<8x1xf32>
      %cst_154 = arith.constant 6.28318548 : f32
      %496 = vector.broadcast %cst_154 : f32 to vector<8x1xf32>
      %497 = arith.mulf %496, %495 : vector<8x1xf32>
      %498 = arith.subf %490, %497 : vector<8x1xf32>
      %499 = vector.shape_cast %498 : vector<8x1xf32> to vector<8x1xf32>
      %500 = vector.broadcast %499 : vector<8x1xf32> to vector<8x7xf32>
      %501 = arith.select %22, %500, %489 : vector<8x7xi1>, vector<8x7xf32>
      %502 = vector.extract_strided_slice %488 {offsets = [0, 7], sizes = [8, 1], strides = [1, 1]} : vector<8x8xf32> to vector<8x1xf32>
      %503 = vector.extract_strided_slice %501 {offsets = [0, 6], sizes = [8, 1], strides = [1, 1]} : vector<8x7xf32> to vector<8x1xf32>
      %504 = vector.extract_strided_slice %arg26 {offsets = [0, 6], sizes = [8, 1], strides = [1, 1]} : vector<8x7xf32> to vector<8x1xf32>
      %cst_155 = arith.constant 3.14159274 : f32
      %505 = vector.broadcast %cst_155 : f32 to vector<8x1xf32>
      %506 = arith.addf %504, %505 : vector<8x1xf32>
      %cst_156 = arith.constant 6.28318548 : f32
      %507 = vector.broadcast %cst_156 : f32 to vector<8x1xf32>
      %508 = arith.divf %506, %507 : vector<8x1xf32>
      %509 = math.floor %508 : vector<8x1xf32>
      %cst_157 = arith.constant 6.28318548 : f32
      %510 = vector.broadcast %cst_157 : f32 to vector<8x1xf32>
      %511 = arith.mulf %510, %509 : vector<8x1xf32>
      %512 = arith.subf %504, %511 : vector<8x1xf32>
      %513 = arith.subf %512, %503 : vector<8x1xf32>
      %cst_158 = arith.constant 1.57079637 : f32
      %514 = vector.broadcast %cst_158 : f32 to vector<8x1xf32>
      %515 = arith.cmpf ogt, %513, %514 : vector<8x1xf32>
      %cst_159 = arith.constant 3.14159274 : f32
      %516 = vector.broadcast %cst_159 : f32 to vector<8x1xf32>
      %517 = arith.subf %512, %516 : vector<8x1xf32>
      %cst_160 = arith.constant -1.57079637 : f32
      %518 = vector.broadcast %cst_160 : f32 to vector<8x1xf32>
      %519 = arith.cmpf olt, %513, %518 : vector<8x1xf32>
      %cst_161 = arith.constant 3.14159274 : f32
      %520 = vector.broadcast %cst_161 : f32 to vector<8x1xf32>
      %521 = arith.addf %512, %520 : vector<8x1xf32>
      %522 = arith.select %519, %521, %512 : vector<8x1xi1>, vector<8x1xf32>
      %523 = arith.select %515, %517, %522 : vector<8x1xi1>, vector<8x1xf32>
      %524 = vector.shape_cast %523 : vector<8x1xf32> to vector<8x1xf32>
      %525 = vector.broadcast %524 : vector<8x1xf32> to vector<8x7xf32>
      %526 = arith.select %22, %525, %arg26 : vector<8x7xi1>, vector<8x7xf32>
      %527 = arith.subf %526, %arg25 : vector<8x7xf32>
      %528 = arith.subf %501, %arg25 : vector<8x7xf32>
      %529 = tpu.concatenate %527, %528, %502, %23, %arg17 in 1 : vector<8x7xf32>, vector<8x7xf32>, vector<8x1xf32>, vector<8x113xf32>, vector<8x128xf32> -> vector<8x256xf32>
      %cst_162 = arith.constant dense<0.000000e+00> : vector<8x512xf32>
      %530 = tpu.matmul %529, %0, %cst_162 {dimension_numbers = #tpu.dot_dimension_numbers<[1], [0], [0], [1], [0, 0, 1, 1], [], []>} : vector<8x256xf32>, vector<256x512xf32>, vector<8x512xf32> -> vector<8x512xf32>
      %531 = arith.addf %530, %10 : vector<8x512xf32>
      %532 = math.tanh %531 : vector<8x512xf32>
      %533 = vector.extract_strided_slice %532 {offsets = [0, 0], sizes = [8, 128], strides = [1, 1]} : vector<8x512xf32> to vector<8x128xf32>
      %cst_163 = arith.constant 1.000000e+00 : f32
      %534 = vector.broadcast %cst_163 : f32 to vector<8x128xf32>
      %535 = arith.addf %533, %534 : vector<8x128xf32>
      %cst_164 = arith.constant 5.000000e-01 : f32
      %536 = vector.broadcast %cst_164 : f32 to vector<8x128xf32>
      %537 = arith.mulf %536, %535 : vector<8x128xf32>
      %538 = vector.extract_strided_slice %532 {offsets = [0, 128], sizes = [8, 128], strides = [1, 1]} : vector<8x512xf32> to vector<8x128xf32>
      %cst_165 = arith.constant 1.000000e+00 : f32
      %539 = vector.broadcast %cst_165 : f32 to vector<8x128xf32>
      %540 = arith.addf %538, %539 : vector<8x128xf32>
      %cst_166 = arith.constant 5.000000e-01 : f32
      %541 = vector.broadcast %cst_166 : f32 to vector<8x128xf32>
      %542 = arith.mulf %541, %540 : vector<8x128xf32>
      %543 = vector.extract_strided_slice %532 {offsets = [0, 256], sizes = [8, 128], strides = [1, 1]} : vector<8x512xf32> to vector<8x128xf32>
      %544 = vector.extract_strided_slice %532 {offsets = [0, 384], sizes = [8, 128], strides = [1, 1]} : vector<8x512xf32> to vector<8x128xf32>
      %cst_167 = arith.constant 1.000000e+00 : f32
      %545 = vector.broadcast %cst_167 : f32 to vector<8x128xf32>
      %546 = arith.addf %544, %545 : vector<8x128xf32>
      %cst_168 = arith.constant 5.000000e-01 : f32
      %547 = vector.broadcast %cst_168 : f32 to vector<8x128xf32>
      %548 = arith.mulf %547, %546 : vector<8x128xf32>
      %549 = arith.mulf %542, %arg18 : vector<8x128xf32>
      %550 = arith.mulf %537, %543 : vector<8x128xf32>
      %551 = arith.addf %549, %550 : vector<8x128xf32>
      %552 = math.tanh %551 : vector<8x128xf32>
      %553 = arith.mulf %548, %552 : vector<8x128xf32>
      %554 = tpu.concatenate %553, %arg19 in 1 : vector<8x128xf32>, vector<8x128xf32> -> vector<8x256xf32>
      %cst_169 = arith.constant dense<0.000000e+00> : vector<8x512xf32>
      %555 = tpu.matmul %554, %1, %cst_169 {dimension_numbers = #tpu.dot_dimension_numbers<[1], [0], [0], [1], [0, 0, 1, 1], [], []>} : vector<8x256xf32>, vector<256x512xf32>, vector<8x512xf32> -> vector<8x512xf32>
      %556 = arith.addf %555, %13 : vector<8x512xf32>
      %557 = math.tanh %556 : vector<8x512xf32>
      %558 = vector.extract_strided_slice %557 {offsets = [0, 0], sizes = [8, 128], strides = [1, 1]} : vector<8x512xf32> to vector<8x128xf32>
      %cst_170 = arith.constant 1.000000e+00 : f32
      %559 = vector.broadcast %cst_170 : f32 to vector<8x128xf32>
      %560 = arith.addf %558, %559 : vector<8x128xf32>
      %cst_171 = arith.constant 5.000000e-01 : f32
      %561 = vector.broadcast %cst_171 : f32 to vector<8x128xf32>
      %562 = arith.mulf %561, %560 : vector<8x128xf32>
      %563 = vector.extract_strided_slice %557 {offsets = [0, 128], sizes = [8, 128], strides = [1, 1]} : vector<8x512xf32> to vector<8x128xf32>
      %cst_172 = arith.constant 1.000000e+00 : f32
      %564 = vector.broadcast %cst_172 : f32 to vector<8x128xf32>
      %565 = arith.addf %563, %564 : vector<8x128xf32>
      %cst_173 = arith.constant 5.000000e-01 : f32
      %566 = vector.broadcast %cst_173 : f32 to vector<8x128xf32>
      %567 = arith.mulf %566, %565 : vector<8x128xf32>
      %568 = vector.extract_strided_slice %557 {offsets = [0, 256], sizes = [8, 128], strides = [1, 1]} : vector<8x512xf32> to vector<8x128xf32>
      %569 = vector.extract_strided_slice %557 {offsets = [0, 384], sizes = [8, 128], strides = [1, 1]} : vector<8x512xf32> to vector<8x128xf32>
      %cst_174 = arith.constant 1.000000e+00 : f32
      %570 = vector.broadcast %cst_174 : f32 to vector<8x128xf32>
      %571 = arith.addf %569, %570 : vector<8x128xf32>
      %cst_175 = arith.constant 5.000000e-01 : f32
      %572 = vector.broadcast %cst_175 : f32 to vector<8x128xf32>
      %573 = arith.mulf %572, %571 : vector<8x128xf32>
      %574 = arith.mulf %567, %arg20 : vector<8x128xf32>
      %575 = arith.mulf %562, %568 : vector<8x128xf32>
      %576 = arith.addf %574, %575 : vector<8x128xf32>
      %577 = math.tanh %576 : vector<8x128xf32>
      %578 = arith.mulf %573, %577 : vector<8x128xf32>
      %cst_176 = arith.constant dense<0.000000e+00> : vector<8x7xf32>
      %579 = tpu.matmul %578, %2, %cst_176 {dimension_numbers = #tpu.dot_dimension_numbers<[1], [0], [0], [1], [0, 0, 1, 1], [], []>} : vector<8x128xf32>, vector<128x7xf32>, vector<8x7xf32> -> vector<8x7xf32>
      %580 = math.tanh %579 : vector<8x7xf32>
      %cst_177 = arith.constant 1.000000e+00 : f32
      %581 = vector.broadcast %cst_177 : f32 to vector<8x7xf32>
      %582 = arith.addf %580, %581 : vector<8x7xf32>
      %cst_178 = arith.constant 5.000000e-01 : f32
      %583 = vector.broadcast %cst_178 : f32 to vector<8x7xf32>
      %584 = arith.mulf %583, %582 : vector<8x7xf32>
      %585 = arith.mulf %584, %528 : vector<8x7xf32>
      %cst_179 = arith.constant 1.000000e+00 : f32
      %586 = vector.broadcast %cst_179 : f32 to vector<8x7xf32>
      %587 = arith.subf %586, %584 : vector<8x7xf32>
      %588 = arith.mulf %587, %527 : vector<8x7xf32>
      %589 = arith.addf %585, %588 : vector<8x7xf32>
      %590 = arith.addf %589, %arg25 : vector<8x7xf32>
      %591 = vector.extract_strided_slice %590 {offsets = [0, 6], sizes = [8, 1], strides = [1, 1]} : vector<8x7xf32> to vector<8x1xf32>
      %cst_180 = arith.constant 3.14159274 : f32
      %592 = vector.broadcast %cst_180 : f32 to vector<8x1xf32>
      %593 = arith.addf %591, %592 : vector<8x1xf32>
      %cst_181 = arith.constant 6.28318548 : f32
      %594 = vector.broadcast %cst_181 : f32 to vector<8x1xf32>
      %595 = arith.divf %593, %594 : vector<8x1xf32>
      %596 = math.floor %595 : vector<8x1xf32>
      %cst_182 = arith.constant 6.28318548 : f32
      %597 = vector.broadcast %cst_182 : f32 to vector<8x1xf32>
      %598 = arith.mulf %597, %596 : vector<8x1xf32>
      %599 = arith.subf %591, %598 : vector<8x1xf32>
      %600 = vector.shape_cast %599 : vector<8x1xf32> to vector<8x1xf32>
      %601 = vector.broadcast %600 : vector<8x1xf32> to vector<8x7xf32>
      %602 = arith.select %22, %601, %590 : vector<8x7xi1>, vector<8x7xf32>
      %603 = arith.subf %602, %arg25 : vector<8x7xf32>
      %604 = vector.extract_strided_slice %arg27 {offsets = [8, 0], sizes = [32, 7], strides = [1, 1]} : vector<40x7xf32> to vector<32x7xf32>
      %605 = tpu.concatenate %604, %603 in 0 : vector<32x7xf32>, vector<8x7xf32> -> vector<40x7xf32>
      %cst_183 = arith.constant dense<0.000000e+00> : vector<40x512xf32>
      %606 = tpu.matmul %605, %3, %cst_183 {dimension_numbers = #tpu.dot_dimension_numbers<[1], [0], [0], [1], [0, 0, 1, 1], [], []>} : vector<40x7xf32>, vector<7x512xf32>, vector<40x512xf32> -> vector<40x512xf32>
      %607 = arith.addf %606, %16 : vector<40x512xf32>
      %608 = vector.extract_strided_slice %607 {offsets = [0, 0], sizes = [8, 512], strides = [1, 1]} : vector<40x512xf32> to vector<8x512xf32>
      %cst_184 = arith.constant dense<0.000000e+00> : vector<8x512xf32>
      %609 = tpu.matmul %arg21, %4, %cst_184 {dimension_numbers = #tpu.dot_dimension_numbers<[1], [0], [0], [1], [0, 0, 1, 1], [], []>} : vector<8x128xf32>, vector<128x512xf32>, vector<8x512xf32> -> vector<8x512xf32>
      %610 = arith.addf %608, %609 : vector<8x512xf32>
      %611 = math.tanh %610 : vector<8x512xf32>
      %612 = vector.extract_strided_slice %611 {offsets = [0, 0], sizes = [8, 128], strides = [1, 1]} : vector<8x512xf32> to vector<8x128xf32>
      %cst_185 = arith.constant 1.000000e+00 : f32
      %613 = vector.broadcast %cst_185 : f32 to vector<8x128xf32>
      %614 = arith.addf %612, %613 : vector<8x128xf32>
      %cst_186 = arith.constant 5.000000e-01 : f32
      %615 = vector.broadcast %cst_186 : f32 to vector<8x128xf32>
      %616 = arith.mulf %615, %614 : vector<8x128xf32>
      %617 = vector.extract_strided_slice %611 {offsets = [0, 128], sizes = [8, 128], strides = [1, 1]} : vector<8x512xf32> to vector<8x128xf32>
      %cst_187 = arith.constant 1.000000e+00 : f32
      %618 = vector.broadcast %cst_187 : f32 to vector<8x128xf32>
      %619 = arith.addf %617, %618 : vector<8x128xf32>
      %cst_188 = arith.constant 5.000000e-01 : f32
      %620 = vector.broadcast %cst_188 : f32 to vector<8x128xf32>
      %621 = arith.mulf %620, %619 : vector<8x128xf32>
      %622 = vector.extract_strided_slice %611 {offsets = [0, 256], sizes = [8, 128], strides = [1, 1]} : vector<8x512xf32> to vector<8x128xf32>
      %623 = vector.extract_strided_slice %611 {offsets = [0, 384], sizes = [8, 128], strides = [1, 1]} : vector<8x512xf32> to vector<8x128xf32>
      %cst_189 = arith.constant 1.000000e+00 : f32
      %624 = vector.broadcast %cst_189 : f32 to vector<8x128xf32>
      %625 = arith.addf %623, %624 : vector<8x128xf32>
      %cst_190 = arith.constant 5.000000e-01 : f32
      %626 = vector.broadcast %cst_190 : f32 to vector<8x128xf32>
      %627 = arith.mulf %626, %625 : vector<8x128xf32>
      %628 = arith.mulf %621, %arg22 : vector<8x128xf32>
      %629 = arith.mulf %616, %622 : vector<8x128xf32>
      %630 = arith.addf %628, %629 : vector<8x128xf32>
      %631 = math.tanh %630 : vector<8x128xf32>
      %632 = arith.mulf %627, %631 : vector<8x128xf32>
      %633 = vector.extract_strided_slice %607 {offsets = [8, 0], sizes = [8, 512], strides = [1, 1]} : vector<40x512xf32> to vector<8x512xf32>
      %cst_191 = arith.constant dense<0.000000e+00> : vector<8x512xf32>
      %634 = tpu.matmul %632, %4, %cst_191 {dimension_numbers = #tpu.dot_dimension_numbers<[1], [0], [0], [1], [0, 0, 1, 1], [], []>} : vector<8x128xf32>, vector<128x512xf32>, vector<8x512xf32> -> vector<8x512xf32>
      %635 = arith.addf %633, %634 : vector<8x512xf32>
      %636 = math.tanh %635 : vector<8x512xf32>
      %637 = vector.extract_strided_slice %636 {offsets = [0, 0], sizes = [8, 128], strides = [1, 1]} : vector<8x512xf32> to vector<8x128xf32>
      %cst_192 = arith.constant 1.000000e+00 : f32
      %638 = vector.broadcast %cst_192 : f32 to vector<8x128xf32>
      %639 = arith.addf %637, %638 : vector<8x128xf32>
      %cst_193 = arith.constant 5.000000e-01 : f32
      %640 = vector.broadcast %cst_193 : f32 to vector<8x128xf32>
      %641 = arith.mulf %640, %639 : vector<8x128xf32>
      %642 = vector.extract_strided_slice %636 {offsets = [0, 128], sizes = [8, 128], strides = [1, 1]} : vector<8x512xf32> to vector<8x128xf32>
      %cst_194 = arith.constant 1.000000e+00 : f32
      %643 = vector.broadcast %cst_194 : f32 to vector<8x128xf32>
      %644 = arith.addf %642, %643 : vector<8x128xf32>
      %cst_195 = arith.constant 5.000000e-01 : f32
      %645 = vector.broadcast %cst_195 : f32 to vector<8x128xf32>
      %646 = arith.mulf %645, %644 : vector<8x128xf32>
      %647 = vector.extract_strided_slice %636 {offsets = [0, 256], sizes = [8, 128], strides = [1, 1]} : vector<8x512xf32> to vector<8x128xf32>
      %648 = vector.extract_strided_slice %636 {offsets = [0, 384], sizes = [8, 128], strides = [1, 1]} : vector<8x512xf32> to vector<8x128xf32>
      %cst_196 = arith.constant 1.000000e+00 : f32
      %649 = vector.broadcast %cst_196 : f32 to vector<8x128xf32>
      %650 = arith.addf %648, %649 : vector<8x128xf32>
      %cst_197 = arith.constant 5.000000e-01 : f32
      %651 = vector.broadcast %cst_197 : f32 to vector<8x128xf32>
      %652 = arith.mulf %651, %650 : vector<8x128xf32>
      %653 = arith.mulf %646, %630 : vector<8x128xf32>
      %654 = arith.mulf %641, %647 : vector<8x128xf32>
      %655 = arith.addf %653, %654 : vector<8x128xf32>
      %656 = math.tanh %655 : vector<8x128xf32>
      %657 = arith.mulf %652, %656 : vector<8x128xf32>
      %658 = vector.extract_strided_slice %607 {offsets = [16, 0], sizes = [8, 512], strides = [1, 1]} : vector<40x512xf32> to vector<8x512xf32>
      %cst_198 = arith.constant dense<0.000000e+00> : vector<8x512xf32>
      %659 = tpu.matmul %657, %4, %cst_198 {dimension_numbers = #tpu.dot_dimension_numbers<[1], [0], [0], [1], [0, 0, 1, 1], [], []>} : vector<8x128xf32>, vector<128x512xf32>, vector<8x512xf32> -> vector<8x512xf32>
      %660 = arith.addf %658, %659 : vector<8x512xf32>
      %661 = math.tanh %660 : vector<8x512xf32>
      %662 = vector.extract_strided_slice %661 {offsets = [0, 0], sizes = [8, 128], strides = [1, 1]} : vector<8x512xf32> to vector<8x128xf32>
      %cst_199 = arith.constant 1.000000e+00 : f32
      %663 = vector.broadcast %cst_199 : f32 to vector<8x128xf32>
      %664 = arith.addf %662, %663 : vector<8x128xf32>
      %cst_200 = arith.constant 5.000000e-01 : f32
      %665 = vector.broadcast %cst_200 : f32 to vector<8x128xf32>
      %666 = arith.mulf %665, %664 : vector<8x128xf32>
      %667 = vector.extract_strided_slice %661 {offsets = [0, 128], sizes = [8, 128], strides = [1, 1]} : vector<8x512xf32> to vector<8x128xf32>
      %cst_201 = arith.constant 1.000000e+00 : f32
      %668 = vector.broadcast %cst_201 : f32 to vector<8x128xf32>
      %669 = arith.addf %667, %668 : vector<8x128xf32>
      %cst_202 = arith.constant 5.000000e-01 : f32
      %670 = vector.broadcast %cst_202 : f32 to vector<8x128xf32>
      %671 = arith.mulf %670, %669 : vector<8x128xf32>
      %672 = vector.extract_strided_slice %661 {offsets = [0, 256], sizes = [8, 128], strides = [1, 1]} : vector<8x512xf32> to vector<8x128xf32>
      %673 = vector.extract_strided_slice %661 {offsets = [0, 384], sizes = [8, 128], strides = [1, 1]} : vector<8x512xf32> to vector<8x128xf32>
      %cst_203 = arith.constant 1.000000e+00 : f32
      %674 = vector.broadcast %cst_203 : f32 to vector<8x128xf32>
      %675 = arith.addf %673, %674 : vector<8x128xf32>
      %cst_204 = arith.constant 5.000000e-01 : f32
      %676 = vector.broadcast %cst_204 : f32 to vector<8x128xf32>
      %677 = arith.mulf %676, %675 : vector<8x128xf32>
      %678 = arith.mulf %671, %655 : vector<8x128xf32>
      %679 = arith.mulf %666, %672 : vector<8x128xf32>
      %680 = arith.addf %678, %679 : vector<8x128xf32>
      %681 = math.tanh %680 : vector<8x128xf32>
      %682 = arith.mulf %677, %681 : vector<8x128xf32>
      %683 = vector.extract_strided_slice %607 {offsets = [24, 0], sizes = [8, 512], strides = [1, 1]} : vector<40x512xf32> to vector<8x512xf32>
      %cst_205 = arith.constant dense<0.000000e+00> : vector<8x512xf32>
      %684 = tpu.matmul %682, %4, %cst_205 {dimension_numbers = #tpu.dot_dimension_numbers<[1], [0], [0], [1], [0, 0, 1, 1], [], []>} : vector<8x128xf32>, vector<128x512xf32>, vector<8x512xf32> -> vector<8x512xf32>
      %685 = arith.addf %683, %684 : vector<8x512xf32>
      %686 = math.tanh %685 : vector<8x512xf32>
      %687 = vector.extract_strided_slice %686 {offsets = [0, 0], sizes = [8, 128], strides = [1, 1]} : vector<8x512xf32> to vector<8x128xf32>
      %cst_206 = arith.constant 1.000000e+00 : f32
      %688 = vector.broadcast %cst_206 : f32 to vector<8x128xf32>
      %689 = arith.addf %687, %688 : vector<8x128xf32>
      %cst_207 = arith.constant 5.000000e-01 : f32
      %690 = vector.broadcast %cst_207 : f32 to vector<8x128xf32>
      %691 = arith.mulf %690, %689 : vector<8x128xf32>
      %692 = vector.extract_strided_slice %686 {offsets = [0, 128], sizes = [8, 128], strides = [1, 1]} : vector<8x512xf32> to vector<8x128xf32>
      %cst_208 = arith.constant 1.000000e+00 : f32
      %693 = vector.broadcast %cst_208 : f32 to vector<8x128xf32>
      %694 = arith.addf %692, %693 : vector<8x128xf32>
      %cst_209 = arith.constant 5.000000e-01 : f32
      %695 = vector.broadcast %cst_209 : f32 to vector<8x128xf32>
      %696 = arith.mulf %695, %694 : vector<8x128xf32>
      %697 = vector.extract_strided_slice %686 {offsets = [0, 256], sizes = [8, 128], strides = [1, 1]} : vector<8x512xf32> to vector<8x128xf32>
      %698 = vector.extract_strided_slice %686 {offsets = [0, 384], sizes = [8, 128], strides = [1, 1]} : vector<8x512xf32> to vector<8x128xf32>
      %cst_210 = arith.constant 1.000000e+00 : f32
      %699 = vector.broadcast %cst_210 : f32 to vector<8x128xf32>
      %700 = arith.addf %698, %699 : vector<8x128xf32>
      %cst_211 = arith.constant 5.000000e-01 : f32
      %701 = vector.broadcast %cst_211 : f32 to vector<8x128xf32>
      %702 = arith.mulf %701, %700 : vector<8x128xf32>
      %703 = arith.mulf %696, %680 : vector<8x128xf32>
      %704 = arith.mulf %691, %697 : vector<8x128xf32>
      %705 = arith.addf %703, %704 : vector<8x128xf32>
      %706 = math.tanh %705 : vector<8x128xf32>
      %707 = arith.mulf %702, %706 : vector<8x128xf32>
      %708 = vector.extract_strided_slice %607 {offsets = [32, 0], sizes = [8, 512], strides = [1, 1]} : vector<40x512xf32> to vector<8x512xf32>
      %cst_212 = arith.constant dense<0.000000e+00> : vector<8x512xf32>
      %709 = tpu.matmul %707, %4, %cst_212 {dimension_numbers = #tpu.dot_dimension_numbers<[1], [0], [0], [1], [0, 0, 1, 1], [], []>} : vector<8x128xf32>, vector<128x512xf32>, vector<8x512xf32> -> vector<8x512xf32>
      %710 = arith.addf %708, %709 : vector<8x512xf32>
      %711 = math.tanh %710 : vector<8x512xf32>
      %712 = vector.extract_strided_slice %711 {offsets = [0, 0], sizes = [8, 128], strides = [1, 1]} : vector<8x512xf32> to vector<8x128xf32>
      %cst_213 = arith.constant 1.000000e+00 : f32
      %713 = vector.broadcast %cst_213 : f32 to vector<8x128xf32>
      %714 = arith.addf %712, %713 : vector<8x128xf32>
      %cst_214 = arith.constant 5.000000e-01 : f32
      %715 = vector.broadcast %cst_214 : f32 to vector<8x128xf32>
      %716 = arith.mulf %715, %714 : vector<8x128xf32>
      %717 = vector.extract_strided_slice %711 {offsets = [0, 128], sizes = [8, 128], strides = [1, 1]} : vector<8x512xf32> to vector<8x128xf32>
      %cst_215 = arith.constant 1.000000e+00 : f32
      %718 = vector.broadcast %cst_215 : f32 to vector<8x128xf32>
      %719 = arith.addf %717, %718 : vector<8x128xf32>
      %cst_216 = arith.constant 5.000000e-01 : f32
      %720 = vector.broadcast %cst_216 : f32 to vector<8x128xf32>
      %721 = arith.mulf %720, %719 : vector<8x128xf32>
      %722 = vector.extract_strided_slice %711 {offsets = [0, 256], sizes = [8, 128], strides = [1, 1]} : vector<8x512xf32> to vector<8x128xf32>
      %723 = vector.extract_strided_slice %711 {offsets = [0, 384], sizes = [8, 128], strides = [1, 1]} : vector<8x512xf32> to vector<8x128xf32>
      %cst_217 = arith.constant 1.000000e+00 : f32
      %724 = vector.broadcast %cst_217 : f32 to vector<8x128xf32>
      %725 = arith.addf %723, %724 : vector<8x128xf32>
      %cst_218 = arith.constant 5.000000e-01 : f32
      %726 = vector.broadcast %cst_218 : f32 to vector<8x128xf32>
      %727 = arith.mulf %726, %725 : vector<8x128xf32>
      %728 = arith.mulf %721, %705 : vector<8x128xf32>
      %729 = arith.mulf %716, %722 : vector<8x128xf32>
      %730 = arith.addf %728, %729 : vector<8x128xf32>
      %731 = math.tanh %730 : vector<8x128xf32>
      %732 = arith.mulf %727, %731 : vector<8x128xf32>
      %733 = tpu.concatenate %632, %657, %682, %707, %732 in 0 : vector<8x128xf32>, vector<8x128xf32>, vector<8x128xf32>, vector<8x128xf32>, vector<8x128xf32> -> vector<40x128xf32>
      %cst_219 = arith.constant dense<0.000000e+00> : vector<40x512xf32>
      %734 = tpu.matmul %733, %5, %cst_219 {dimension_numbers = #tpu.dot_dimension_numbers<[1], [0], [0], [1], [0, 0, 1, 1], [], []>} : vector<40x128xf32>, vector<128x512xf32>, vector<40x512xf32> -> vector<40x512xf32>
      %735 = arith.addf %734, %19 : vector<40x512xf32>
      %736 = vector.extract_strided_slice %735 {offsets = [0, 0], sizes = [8, 512], strides = [1, 1]} : vector<40x512xf32> to vector<8x512xf32>
      %cst_220 = arith.constant dense<0.000000e+00> : vector<8x512xf32>
      %737 = tpu.matmul %arg23, %6, %cst_220 {dimension_numbers = #tpu.dot_dimension_numbers<[1], [0], [0], [1], [0, 0, 1, 1], [], []>} : vector<8x128xf32>, vector<128x512xf32>, vector<8x512xf32> -> vector<8x512xf32>
      %738 = arith.addf %736, %737 : vector<8x512xf32>
      %739 = math.tanh %738 : vector<8x512xf32>
      %740 = vector.extract_strided_slice %739 {offsets = [0, 0], sizes = [8, 128], strides = [1, 1]} : vector<8x512xf32> to vector<8x128xf32>
      %cst_221 = arith.constant 1.000000e+00 : f32
      %741 = vector.broadcast %cst_221 : f32 to vector<8x128xf32>
      %742 = arith.addf %740, %741 : vector<8x128xf32>
      %cst_222 = arith.constant 5.000000e-01 : f32
      %743 = vector.broadcast %cst_222 : f32 to vector<8x128xf32>
      %744 = arith.mulf %743, %742 : vector<8x128xf32>
      %745 = vector.extract_strided_slice %739 {offsets = [0, 128], sizes = [8, 128], strides = [1, 1]} : vector<8x512xf32> to vector<8x128xf32>
      %cst_223 = arith.constant 1.000000e+00 : f32
      %746 = vector.broadcast %cst_223 : f32 to vector<8x128xf32>
      %747 = arith.addf %745, %746 : vector<8x128xf32>
      %cst_224 = arith.constant 5.000000e-01 : f32
      %748 = vector.broadcast %cst_224 : f32 to vector<8x128xf32>
      %749 = arith.mulf %748, %747 : vector<8x128xf32>
      %750 = vector.extract_strided_slice %739 {offsets = [0, 256], sizes = [8, 128], strides = [1, 1]} : vector<8x512xf32> to vector<8x128xf32>
      %751 = vector.extract_strided_slice %739 {offsets = [0, 384], sizes = [8, 128], strides = [1, 1]} : vector<8x512xf32> to vector<8x128xf32>
      %cst_225 = arith.constant 1.000000e+00 : f32
      %752 = vector.broadcast %cst_225 : f32 to vector<8x128xf32>
      %753 = arith.addf %751, %752 : vector<8x128xf32>
      %cst_226 = arith.constant 5.000000e-01 : f32
      %754 = vector.broadcast %cst_226 : f32 to vector<8x128xf32>
      %755 = arith.mulf %754, %753 : vector<8x128xf32>
      %756 = arith.mulf %749, %arg24 : vector<8x128xf32>
      %757 = arith.mulf %744, %750 : vector<8x128xf32>
      %758 = arith.addf %756, %757 : vector<8x128xf32>
      %759 = math.tanh %758 : vector<8x128xf32>
      %760 = arith.mulf %755, %759 : vector<8x128xf32>
      %761 = vector.extract_strided_slice %735 {offsets = [8, 0], sizes = [8, 512], strides = [1, 1]} : vector<40x512xf32> to vector<8x512xf32>
      %cst_227 = arith.constant dense<0.000000e+00> : vector<8x512xf32>
      %762 = tpu.matmul %760, %6, %cst_227 {dimension_numbers = #tpu.dot_dimension_numbers<[1], [0], [0], [1], [0, 0, 1, 1], [], []>} : vector<8x128xf32>, vector<128x512xf32>, vector<8x512xf32> -> vector<8x512xf32>
      %763 = arith.addf %761, %762 : vector<8x512xf32>
      %764 = math.tanh %763 : vector<8x512xf32>
      %765 = vector.extract_strided_slice %764 {offsets = [0, 0], sizes = [8, 128], strides = [1, 1]} : vector<8x512xf32> to vector<8x128xf32>
      %cst_228 = arith.constant 1.000000e+00 : f32
      %766 = vector.broadcast %cst_228 : f32 to vector<8x128xf32>
      %767 = arith.addf %765, %766 : vector<8x128xf32>
      %cst_229 = arith.constant 5.000000e-01 : f32
      %768 = vector.broadcast %cst_229 : f32 to vector<8x128xf32>
      %769 = arith.mulf %768, %767 : vector<8x128xf32>
      %770 = vector.extract_strided_slice %764 {offsets = [0, 128], sizes = [8, 128], strides = [1, 1]} : vector<8x512xf32> to vector<8x128xf32>
      %cst_230 = arith.constant 1.000000e+00 : f32
      %771 = vector.broadcast %cst_230 : f32 to vector<8x128xf32>
      %772 = arith.addf %770, %771 : vector<8x128xf32>
      %cst_231 = arith.constant 5.000000e-01 : f32
      %773 = vector.broadcast %cst_231 : f32 to vector<8x128xf32>
      %774 = arith.mulf %773, %772 : vector<8x128xf32>
      %775 = vector.extract_strided_slice %764 {offsets = [0, 256], sizes = [8, 128], strides = [1, 1]} : vector<8x512xf32> to vector<8x128xf32>
      %776 = vector.extract_strided_slice %764 {offsets = [0, 384], sizes = [8, 128], strides = [1, 1]} : vector<8x512xf32> to vector<8x128xf32>
      %cst_232 = arith.constant 1.000000e+00 : f32
      %777 = vector.broadcast %cst_232 : f32 to vector<8x128xf32>
      %778 = arith.addf %776, %777 : vector<8x128xf32>
      %cst_233 = arith.constant 5.000000e-01 : f32
      %779 = vector.broadcast %cst_233 : f32 to vector<8x128xf32>
      %780 = arith.mulf %779, %778 : vector<8x128xf32>
      %781 = arith.mulf %774, %758 : vector<8x128xf32>
      %782 = arith.mulf %769, %775 : vector<8x128xf32>
      %783 = arith.addf %781, %782 : vector<8x128xf32>
      %784 = math.tanh %783 : vector<8x128xf32>
      %785 = arith.mulf %780, %784 : vector<8x128xf32>
      %786 = vector.extract_strided_slice %735 {offsets = [16, 0], sizes = [8, 512], strides = [1, 1]} : vector<40x512xf32> to vector<8x512xf32>
      %cst_234 = arith.constant dense<0.000000e+00> : vector<8x512xf32>
      %787 = tpu.matmul %785, %6, %cst_234 {dimension_numbers = #tpu.dot_dimension_numbers<[1], [0], [0], [1], [0, 0, 1, 1], [], []>} : vector<8x128xf32>, vector<128x512xf32>, vector<8x512xf32> -> vector<8x512xf32>
      %788 = arith.addf %786, %787 : vector<8x512xf32>
      %789 = math.tanh %788 : vector<8x512xf32>
      %790 = vector.extract_strided_slice %789 {offsets = [0, 0], sizes = [8, 128], strides = [1, 1]} : vector<8x512xf32> to vector<8x128xf32>
      %cst_235 = arith.constant 1.000000e+00 : f32
      %791 = vector.broadcast %cst_235 : f32 to vector<8x128xf32>
      %792 = arith.addf %790, %791 : vector<8x128xf32>
      %cst_236 = arith.constant 5.000000e-01 : f32
      %793 = vector.broadcast %cst_236 : f32 to vector<8x128xf32>
      %794 = arith.mulf %793, %792 : vector<8x128xf32>
      %795 = vector.extract_strided_slice %789 {offsets = [0, 128], sizes = [8, 128], strides = [1, 1]} : vector<8x512xf32> to vector<8x128xf32>
      %cst_237 = arith.constant 1.000000e+00 : f32
      %796 = vector.broadcast %cst_237 : f32 to vector<8x128xf32>
      %797 = arith.addf %795, %796 : vector<8x128xf32>
      %cst_238 = arith.constant 5.000000e-01 : f32
      %798 = vector.broadcast %cst_238 : f32 to vector<8x128xf32>
      %799 = arith.mulf %798, %797 : vector<8x128xf32>
      %800 = vector.extract_strided_slice %789 {offsets = [0, 256], sizes = [8, 128], strides = [1, 1]} : vector<8x512xf32> to vector<8x128xf32>
      %801 = vector.extract_strided_slice %789 {offsets = [0, 384], sizes = [8, 128], strides = [1, 1]} : vector<8x512xf32> to vector<8x128xf32>
      %cst_239 = arith.constant 1.000000e+00 : f32
      %802 = vector.broadcast %cst_239 : f32 to vector<8x128xf32>
      %803 = arith.addf %801, %802 : vector<8x128xf32>
      %cst_240 = arith.constant 5.000000e-01 : f32
      %804 = vector.broadcast %cst_240 : f32 to vector<8x128xf32>
      %805 = arith.mulf %804, %803 : vector<8x128xf32>
      %806 = arith.mulf %799, %783 : vector<8x128xf32>
      %807 = arith.mulf %794, %800 : vector<8x128xf32>
      %808 = arith.addf %806, %807 : vector<8x128xf32>
      %809 = math.tanh %808 : vector<8x128xf32>
      %810 = arith.mulf %805, %809 : vector<8x128xf32>
      %811 = vector.extract_strided_slice %735 {offsets = [24, 0], sizes = [8, 512], strides = [1, 1]} : vector<40x512xf32> to vector<8x512xf32>
      %cst_241 = arith.constant dense<0.000000e+00> : vector<8x512xf32>
      %812 = tpu.matmul %810, %6, %cst_241 {dimension_numbers = #tpu.dot_dimension_numbers<[1], [0], [0], [1], [0, 0, 1, 1], [], []>} : vector<8x128xf32>, vector<128x512xf32>, vector<8x512xf32> -> vector<8x512xf32>
      %813 = arith.addf %811, %812 : vector<8x512xf32>
      %814 = math.tanh %813 : vector<8x512xf32>
      %815 = vector.extract_strided_slice %814 {offsets = [0, 0], sizes = [8, 128], strides = [1, 1]} : vector<8x512xf32> to vector<8x128xf32>
      %cst_242 = arith.constant 1.000000e+00 : f32
      %816 = vector.broadcast %cst_242 : f32 to vector<8x128xf32>
      %817 = arith.addf %815, %816 : vector<8x128xf32>
      %cst_243 = arith.constant 5.000000e-01 : f32
      %818 = vector.broadcast %cst_243 : f32 to vector<8x128xf32>
      %819 = arith.mulf %818, %817 : vector<8x128xf32>
      %820 = vector.extract_strided_slice %814 {offsets = [0, 128], sizes = [8, 128], strides = [1, 1]} : vector<8x512xf32> to vector<8x128xf32>
      %cst_244 = arith.constant 1.000000e+00 : f32
      %821 = vector.broadcast %cst_244 : f32 to vector<8x128xf32>
      %822 = arith.addf %820, %821 : vector<8x128xf32>
      %cst_245 = arith.constant 5.000000e-01 : f32
      %823 = vector.broadcast %cst_245 : f32 to vector<8x128xf32>
      %824 = arith.mulf %823, %822 : vector<8x128xf32>
      %825 = vector.extract_strided_slice %814 {offsets = [0, 256], sizes = [8, 128], strides = [1, 1]} : vector<8x512xf32> to vector<8x128xf32>
      %826 = vector.extract_strided_slice %814 {offsets = [0, 384], sizes = [8, 128], strides = [1, 1]} : vector<8x512xf32> to vector<8x128xf32>
      %cst_246 = arith.constant 1.000000e+00 : f32
      %827 = vector.broadcast %cst_246 : f32 to vector<8x128xf32>
      %828 = arith.addf %826, %827 : vector<8x128xf32>
      %cst_247 = arith.constant 5.000000e-01 : f32
      %829 = vector.broadcast %cst_247 : f32 to vector<8x128xf32>
      %830 = arith.mulf %829, %828 : vector<8x128xf32>
      %831 = arith.mulf %824, %808 : vector<8x128xf32>
      %832 = arith.mulf %819, %825 : vector<8x128xf32>
      %833 = arith.addf %831, %832 : vector<8x128xf32>
      %834 = math.tanh %833 : vector<8x128xf32>
      %835 = arith.mulf %830, %834 : vector<8x128xf32>
      %836 = vector.extract_strided_slice %735 {offsets = [32, 0], sizes = [8, 512], strides = [1, 1]} : vector<40x512xf32> to vector<8x512xf32>
      %cst_248 = arith.constant dense<0.000000e+00> : vector<8x512xf32>
      %837 = tpu.matmul %835, %6, %cst_248 {dimension_numbers = #tpu.dot_dimension_numbers<[1], [0], [0], [1], [0, 0, 1, 1], [], []>} : vector<8x128xf32>, vector<128x512xf32>, vector<8x512xf32> -> vector<8x512xf32>
      %838 = arith.addf %836, %837 : vector<8x512xf32>
      %839 = math.tanh %838 : vector<8x512xf32>
      %840 = vector.extract_strided_slice %839 {offsets = [0, 0], sizes = [8, 128], strides = [1, 1]} : vector<8x512xf32> to vector<8x128xf32>
      %cst_249 = arith.constant 1.000000e+00 : f32
      %841 = vector.broadcast %cst_249 : f32 to vector<8x128xf32>
      %842 = arith.addf %840, %841 : vector<8x128xf32>
      %cst_250 = arith.constant 5.000000e-01 : f32
      %843 = vector.broadcast %cst_250 : f32 to vector<8x128xf32>
      %844 = arith.mulf %843, %842 : vector<8x128xf32>
      %845 = vector.extract_strided_slice %839 {offsets = [0, 128], sizes = [8, 128], strides = [1, 1]} : vector<8x512xf32> to vector<8x128xf32>
      %cst_251 = arith.constant 1.000000e+00 : f32
      %846 = vector.broadcast %cst_251 : f32 to vector<8x128xf32>
      %847 = arith.addf %845, %846 : vector<8x128xf32>
      %cst_252 = arith.constant 5.000000e-01 : f32
      %848 = vector.broadcast %cst_252 : f32 to vector<8x128xf32>
      %849 = arith.mulf %848, %847 : vector<8x128xf32>
      %850 = vector.extract_strided_slice %839 {offsets = [0, 256], sizes = [8, 128], strides = [1, 1]} : vector<8x512xf32> to vector<8x128xf32>
      %851 = vector.extract_strided_slice %839 {offsets = [0, 384], sizes = [8, 128], strides = [1, 1]} : vector<8x512xf32> to vector<8x128xf32>
      %cst_253 = arith.constant 1.000000e+00 : f32
      %852 = vector.broadcast %cst_253 : f32 to vector<8x128xf32>
      %853 = arith.addf %851, %852 : vector<8x128xf32>
      %cst_254 = arith.constant 5.000000e-01 : f32
      %854 = vector.broadcast %cst_254 : f32 to vector<8x128xf32>
      %855 = arith.mulf %854, %853 : vector<8x128xf32>
      %856 = arith.mulf %849, %833 : vector<8x128xf32>
      %857 = arith.mulf %844, %850 : vector<8x128xf32>
      %858 = arith.addf %856, %857 : vector<8x128xf32>
      %859 = math.tanh %858 : vector<8x128xf32>
      %860 = arith.mulf %855, %859 : vector<8x128xf32>
      %861 = tpu.concatenate %760, %785, %810, %835, %860 in 0 : vector<8x128xf32>, vector<8x128xf32>, vector<8x128xf32>, vector<8x128xf32>, vector<8x128xf32> -> vector<40x128xf32>
      %cst_255 = arith.constant dense<0.000000e+00> : vector<40x7xf32>
      %862 = tpu.matmul %861, %7, %cst_255 {dimension_numbers = #tpu.dot_dimension_numbers<[1], [0], [0], [1], [0, 0, 1, 1], [], []>} : vector<40x128xf32>, vector<128x7xf32>, vector<40x7xf32> -> vector<40x7xf32>
      %863 = vector.extract_strided_slice %862 {offsets = [0, 0], sizes = [8, 7], strides = [1, 1]} : vector<40x7xf32> to vector<8x7xf32>
      %864 = vector.extract_strided_slice %862 {offsets = [8, 0], sizes = [8, 7], strides = [1, 1]} : vector<40x7xf32> to vector<8x7xf32>
      %865 = vector.extract_strided_slice %862 {offsets = [16, 0], sizes = [8, 7], strides = [1, 1]} : vector<40x7xf32> to vector<8x7xf32>
      %866 = vector.extract_strided_slice %862 {offsets = [24, 0], sizes = [8, 7], strides = [1, 1]} : vector<40x7xf32> to vector<8x7xf32>
      %867 = vector.extract_strided_slice %862 {offsets = [32, 0], sizes = [8, 7], strides = [1, 1]} : vector<40x7xf32> to vector<8x7xf32>
      %868 = vector.extract_strided_slice %605 {offsets = [0, 0], sizes = [8, 7], strides = [1, 1]} : vector<40x7xf32> to vector<8x7xf32>
      %869 = vector.extract_strided_slice %605 {offsets = [8, 0], sizes = [8, 7], strides = [1, 1]} : vector<40x7xf32> to vector<8x7xf32>
      %870 = vector.extract_strided_slice %605 {offsets = [16, 0], sizes = [8, 7], strides = [1, 1]} : vector<40x7xf32> to vector<8x7xf32>
      %871 = vector.extract_strided_slice %605 {offsets = [24, 0], sizes = [8, 7], strides = [1, 1]} : vector<40x7xf32> to vector<8x7xf32>
      %872 = vector.extract_strided_slice %605 {offsets = [32, 0], sizes = [8, 7], strides = [1, 1]} : vector<40x7xf32> to vector<8x7xf32>
      %873 = arith.maximumf %863, %864 : vector<8x7xf32>
      %874 = arith.maximumf %873, %865 : vector<8x7xf32>
      %875 = arith.maximumf %874, %866 : vector<8x7xf32>
      %876 = arith.maximumf %875, %867 : vector<8x7xf32>
      %877 = arith.subf %863, %876 : vector<8x7xf32>
      %878 = math.exp %877 : vector<8x7xf32>
      %879 = arith.subf %864, %876 : vector<8x7xf32>
      %880 = math.exp %879 : vector<8x7xf32>
      %881 = arith.subf %865, %876 : vector<8x7xf32>
      %882 = math.exp %881 : vector<8x7xf32>
      %883 = arith.subf %866, %876 : vector<8x7xf32>
      %884 = math.exp %883 : vector<8x7xf32>
      %885 = arith.subf %867, %876 : vector<8x7xf32>
      %886 = math.exp %885 : vector<8x7xf32>
      %887 = arith.mulf %878, %868 : vector<8x7xf32>
      %888 = arith.addf %878, %880 : vector<8x7xf32>
      %889 = arith.mulf %880, %869 : vector<8x7xf32>
      %890 = arith.addf %887, %889 : vector<8x7xf32>
      %891 = arith.addf %888, %882 : vector<8x7xf32>
      %892 = arith.mulf %882, %870 : vector<8x7xf32>
      %893 = arith.addf %890, %892 : vector<8x7xf32>
      %894 = arith.addf %891, %884 : vector<8x7xf32>
      %895 = arith.mulf %884, %871 : vector<8x7xf32>
      %896 = arith.addf %893, %895 : vector<8x7xf32>
      %897 = arith.addf %894, %886 : vector<8x7xf32>
      %898 = arith.mulf %886, %872 : vector<8x7xf32>
      %899 = arith.addf %896, %898 : vector<8x7xf32>
      %900 = tpu.reciprocal %897 {approx = true} : vector<8x7xf32> -> vector<8x7xf32>
      %901 = arith.mulf %899, %900 : vector<8x7xf32>
      %902 = arith.addf %901, %602 : vector<8x7xf32>
      %903 = vector.extract_strided_slice %902 {offsets = [0, 6], sizes = [8, 1], strides = [1, 1]} : vector<8x7xf32> to vector<8x1xf32>
      %cst_256 = arith.constant 3.14159274 : f32
      %904 = vector.broadcast %cst_256 : f32 to vector<8x1xf32>
      %905 = arith.addf %903, %904 : vector<8x1xf32>
      %cst_257 = arith.constant 6.28318548 : f32
      %906 = vector.broadcast %cst_257 : f32 to vector<8x1xf32>
      %907 = arith.divf %905, %906 : vector<8x1xf32>
      %908 = math.floor %907 : vector<8x1xf32>
      %cst_258 = arith.constant 6.28318548 : f32
      %909 = vector.broadcast %cst_258 : f32 to vector<8x1xf32>
      %910 = arith.mulf %909, %908 : vector<8x1xf32>
      %911 = arith.subf %903, %910 : vector<8x1xf32>
      %912 = vector.shape_cast %911 : vector<8x1xf32> to vector<8x1xf32>
      %913 = vector.broadcast %912 : vector<8x1xf32> to vector<8x7xf32>
      %914 = arith.select %22, %913, %902 : vector<8x7xi1>, vector<8x7xf32>
      %c1_i32_259 = arith.constant 1 : i32
      %915 = arith.subi %arg16, %c1_i32_259 : i32
      %916 = vector.shape_cast %914 : vector<8x7xf32> to vector<1x8x7xf32>
      %917 = arith.index_cast %915 : i32 to index
      %c0_260 = arith.constant 0 : index
      %c0_261 = arith.constant 0 : index
      %918 = vector.load %arg14[%917, %c0_260, %c0_261] : memref<7x8x7xf32, #tpu.memory_space<vmem>>, vector<1x8x7xf32>
      tpu.vector_store %arg14[%917, %c0_260, %c0_261], %916 {strides = array<i32>} : memref<7x8x7xf32, #tpu.memory_space<vmem>>, vector<1x8x7xf32>,
      %c1_i32_262 = arith.constant 1 : i32
      %919 = arith.subi %arg16, %c1_i32_262 : i32
      %920 = vector.shape_cast %602 : vector<8x7xf32> to vector<1x8x7xf32>
      %921 = arith.index_cast %919 : i32 to index
      %c0_263 = arith.constant 0 : index
      %c0_264 = arith.constant 0 : index
      %922 = vector.load %arg15[%921, %c0_263, %c0_264] : memref<7x8x7xf32, #tpu.memory_space<vmem>>, vector<1x8x7xf32>
      tpu.vector_store %arg15[%921, %c0_263, %c0_264], %920 {strides = array<i32>} : memref<7x8x7xf32, #tpu.memory_space<vmem>>, vector<1x8x7xf32>,
      scf.yield %553, %551, %578, %576, %732, %730, %860, %858, %602, %914, %605 : vector<8x128xf32>, vector<8x128xf32>, vector<8x128xf32>, vector<8x128xf32>, vector<8x128xf32>, vector<8x128xf32>, vector<8x128xf32>, vector<8x128xf32>, vector<8x7xf32>, vector<8x7xf32>, vector<40x7xf32>
    }
    %c6_i32_149 = arith.constant 6 : i32
    return
  }
  func.func @transform_0(%arg0: i32) -> (i32, i32, i32) {
    %c0_i32 = arith.constant 0 : i32
    %c0_i32_0 = arith.constant 0 : i32
    %c0_i32_1 = arith.constant 0 : i32
    return %c0_i32, %arg0, %c0_i32_0 : i32, i32, i32
  }
  func.func @transform_1(%arg0: i32) -> (i32, i32) {
    %c0_i32 = arith.constant 0 : i32
    %c0_i32_0 = arith.constant 0 : i32
    %c0_i32_1 = arith.constant 0 : i32
    return %c0_i32, %c0_i32_0 : i32, i32
  }
  func.func @transform_2(%arg0: i32) -> (i32, i32) {
    %c0_i32 = arith.constant 0 : i32
    %c0_i32_0 = arith.constant 0 : i32
    %c0_i32_1 = arith.constant 0 : i32
    return %c0_i32, %c0_i32_0 : i32, i32
  }
  func.func @transform_3(%arg0: i32) -> (i32, i32) {
    %c0_i32 = arith.constant 0 : i32
    %c0_i32_0 = arith.constant 0 : i32
    %c0_i32_1 = arith.constant 0 : i32
    return %c0_i32, %c0_i32_0 : i32, i32
  }
  func.func @transform_4(%arg0: i32) -> (i32, i32) {
    %c0_i32 = arith.constant 0 : i32
    %c0_i32_0 = arith.constant 0 : i32
    %c0_i32_1 = arith.constant 0 : i32
    return %c0_i32, %c0_i32_0 : i32, i32
  }
  func.func @transform_5(%arg0: i32) -> (i32, i32) {
    %c0_i32 = arith.constant 0 : i32
    %c0_i32_0 = arith.constant 0 : i32
    %c0_i32_1 = arith.constant 0 : i32
    return %c0_i32, %c0_i32_0 : i32, i32
  }
  func.func @transform_6(%arg0: i32) -> (i32, i32) {
    %c0_i32 = arith.constant 0 : i32
    %c0_i32_0 = arith.constant 0 : i32
    %c0_i32_1 = arith.constant 0 : i32
    return %c0_i32, %c0_i32_0 : i32, i32
  }
  func.func @transform_7(%arg0: i32) -> (i32, i32) {
    %c0_i32 = arith.constant 0 : i32
    %c0_i32_0 = arith.constant 0 : i32
    %c0_i32_1 = arith.constant 0 : i32
    return %c0_i32, %c0_i32_0 : i32, i32
  }
  func.func @transform_8(%arg0: i32) -> (i32, i32) {
    %c0_i32 = arith.constant 0 : i32
    %c0_i32_0 = arith.constant 0 : i32
    %c0_i32_1 = arith.constant 0 : i32
    return %c0_i32, %c0_i32_0 : i32, i32
  }
  func.func @transform_9(%arg0: i32) -> (i32, i32) {
    %c0_i32 = arith.constant 0 : i32
    %c0_i32_0 = arith.constant 0 : i32
    %c0_i32_1 = arith.constant 0 : i32
    return %c0_i32, %c0_i32_0 : i32, i32
  }
  func.func @transform_10(%arg0: i32) -> (i32, i32) {
    %c0_i32 = arith.constant 0 : i32
    %c0_i32_0 = arith.constant 0 : i32
    %c0_i32_1 = arith.constant 0 : i32
    return %c0_i32, %c0_i32_0 : i32, i32
  }
  func.func @transform_11(%arg0: i32) -> (i32, i32) {
    %c0_i32 = arith.constant 0 : i32
    %c0_i32_0 = arith.constant 0 : i32
    %c0_i32_1 = arith.constant 0 : i32
    return %c0_i32, %c0_i32_0 : i32, i32
  }
  func.func @transform_12(%arg0: i32) -> (i32, i32) {
    %c0_i32 = arith.constant 0 : i32
    %c0_i32_0 = arith.constant 0 : i32
    %c0_i32_1 = arith.constant 0 : i32
    return %c0_i32, %c0_i32_0 : i32, i32
  }
  func.func @transform_13(%arg0: i32) -> (i32, i32, i32) {
    %c0_i32 = arith.constant 0 : i32
    %c0_i32_0 = arith.constant 0 : i32
    %c0_i32_1 = arith.constant 0 : i32
    return %c0_i32, %arg0, %c0_i32_0 : i32, i32, i32
  }
  func.func @transform_14(%arg0: i32) -> (i32, i32, i32) {
    %c0_i32 = arith.constant 0 : i32
    %c0_i32_0 = arith.constant 0 : i32
    %c0_i32_1 = arith.constant 0 : i32
    return %c0_i32, %arg0, %c0_i32_0 : i32, i32, i32
  }
}

</mosaic_0001>

<bundles_post_ra>
// kernel: velo_lstm_forward.1
= control target key start
LH: loop header
LB: loop body
LE: loop exit
PB: predicated region body
PF: predicated region fallthrough
CT: control target
= control target key end

     0   :  { %20 = vsyncpa [#allocation3], 0  ;;  %s11674_s0 = inlined_call_operand.vmem [shape: f32[8,8,8], index: 0, kind: input, shape index: {}]   ;;  %s11675_s1 = inlined_call_operand.hbm [shape: f32[256,512], index: 1, kind: input, shape index: {}]   ;;  %s11676_s2 = inlined_call_operand.vmem [shape: f32[1,512], index: 2, kind: input, shape index: {}]   ;;  %s11677_s3 = inlined_call_operand.hbm [shape: f32[256,512], index: 3, kind: input, shape index: {}]   ;;  %s11678_s4 = inlined_call_operand.vmem [shape: f32[1,512], index: 4, kind: input, shape index: {}]   ;;  %s11679_s5 = inlined_call_operand.vmem [shape: f32[128,7], index: 5, kind: input, shape index: {}]   ;;  %s11680_s6 = inlined_call_operand.vmem [shape: f32[7,512], index: 6, kind: input, shape index: {}]   ;;  %s11681_s7 = inlined_call_operand.vmem [shape: f32[1,512], index: 7, kind: input, shape index: {}]   ;;  %s11682_s8 = inlined_call_operand.hbm [shape: f32[128,512], index: 8, kind: input, shape index: {}]   ;;  %s11683_s9 = inlined_call_operand.hbm [shape: f32[128,512], index: 9, kind: input, shape index: {}]   ;;  %s11684_s10 = inlined_call_operand.hbm [shape: f32[128,512], index: 10, kind: input, shape index: {}]   ;;  %s11685_s11 = inlined_call_operand.vmem [shape: f32[1,512], index: 11, kind: input, shape index: {}]   ;;  %s11686_s12 = inlined_call_operand.vmem [shape: f32[128,7], index: 12, kind: input, shape index: {}]   ;;  %s11687_s13 = inlined_call_operand.vmem [shape: f32[7,8,7], index: 13, kind: output, shape index: {0}]   ;;  %s11688_s14 = inlined_call_operand.vmem [shape: f32[7,8,7], index: 14, kind: output, shape index: {1}]  }
   0x1   :  { %21 = vsyncpa [#allocation5], 0 }
   0x2   :  { %22 = vsyncpa [#allocation8], 0  ;;  %s9076_s29 = smov [#allocation4]   ;;  %s9077_s15 = smov [#allocation7]  }
   0x3   :  { %s44_s30 = sshll.u32 %s9076_s29, 4  ;;  %s76_s16 = sshll.u32 %s9077_s15, 4  ;;  %s45_s30 = int_to_ptr.vmem [resolvable:$true] %s44_s30  ;;  %s9168_s16 = int_to_ptr.vmem [resolvable:$true] %s76_s16 }
   0x4   :  { %s8840_s19 = scalar_lea.hbm %s11677_s3, 16384 }
   0x5   :  { %p8841_p0 = scmp.ne.s32.totalorder %s11677_s3, %s8840_s19  ;;  %p8844_p1 = scmp.lt.u32.totalorder %s8840_s19, %s11677_s3 }
   0x7   :  { %p8846_p2 = pnand %p8844_p1, %p8841_p0 }
   0x9   :  { %8849 = shalt.err (!%p8846_p2)
}
   0xa   :  { %s8850_s24 = scalar_lea.vmem %s45_s30, 16384  ;;  %p8855_p4 = scmp.lt.s32.totalorder %s45_s30, %s45_s30 }
   0xb   :  { %p8851_p3 = scmp.ne.s32.totalorder %s45_s30, %s8850_s24  ;;  %p8856_p5 = scmp.lt.s32.totalorder %s8850_s24, %s8850_s24 }
   0xd   :  { %p8857_p6 = por %p8856_p5, %p8855_p4 }
   0xf   :  { %p8858_p7 = pnand %p8857_p6, %p8851_p3 }
  0x11   :  { %8861 = shalt.err (!%p8858_p7)
}
  0x12   :  { %s9078_s25 = smov 512   ;;  %s9079_s26 = smov 32  }
  0x13   :  { %50 = dma.hbm_to_vmem [thread:$0]  %s11677_s3, 16384, %s45_s30, [#allocation5], %s9078_s25, %s9078_s25, %s9079_s26  }
  0x14   :  { %s8862_s17 = scalar_lea.hbm %s11683_s9, 8192 }
  0x15   :  { %p8863_p8 = scmp.ne.s32.totalorder %s11683_s9, %s8862_s17  ;;  %p8866_p9 = scmp.lt.u32.totalorder %s8862_s17, %s11683_s9 }
  0x17   :  { %p8868_p10 = pnand %p8866_p9, %p8863_p8 }
  0x19   :  { %8871 = shalt.err (!%p8868_p10)
}
  0x1a   :  { %s8872_s22 = scalar_lea.vmem %s9168_s16, 8192  ;;  %p8877_p12 = scmp.lt.s32.totalorder %s9168_s16, %s9168_s16 }
  0x1b   :  { %p8873_p11 = scmp.ne.s32.totalorder %s9168_s16, %s8872_s22  ;;  %p8878_p13 = scmp.lt.s32.totalorder %s8872_s22, %s8872_s22 }
  0x1d   :  { %p8879_p0 = por %p8878_p13, %p8877_p12 }
  0x1f   :  { %p8880_p1 = pnand %p8879_p0, %p8873_p11 }
  0x21   :  { %8883 = shalt.err (!%p8880_p1)
}
  0x22   :  { %82 = dma.hbm_to_vmem [thread:$0]  %s11683_s9, 8192, %s9168_s16, [#allocation8], %s9078_s25, %s9078_s25, %s9079_s26  }
  0x23   :  { %s9080_s23 = smov [#allocation2]   ;;  %s9081_s27 = smov [#allocation6]  }
  0x24   :  { %s30_s24 = sshll.u32 %s9080_s23, 4  ;;  %s64_s28 = sshll.u32 %s9081_s27, 4  ;;  %s31_s24 = int_to_ptr.vmem [resolvable:$true] %s30_s24  ;;  %s9205_s28 = int_to_ptr.vmem [resolvable:$true] %s64_s28 }
  0x25   :  { %s8884_s17 = scalar_lea.hbm %s11675_s1, 16384 }
  0x26   :  { %p8885_p2 = scmp.ne.s32.totalorder %s11675_s1, %s8884_s17  ;;  %p8888_p3 = scmp.lt.u32.totalorder %s8884_s17, %s11675_s1 }
  0x28   :  { %p8890_p4 = pnand %p8888_p3, %p8885_p2 }
  0x2a   :  { %8893 = shalt.err (!%p8890_p4)
}
  0x2b   :  { %s8894_s9 = scalar_lea.vmem %s31_s24, 16384  ;;  %p8899_p6 = scmp.lt.s32.totalorder %s31_s24, %s31_s24 }
  0x2c   :  { %p8895_p5 = scmp.ne.s32.totalorder %s31_s24, %s8894_s9  ;;  %p8900_p7 = scmp.lt.s32.totalorder %s8894_s9, %s8894_s9 }
  0x2e   :  { %p8901_p8 = por %p8900_p7, %p8899_p6 }
  0x30   :  { %p8902_p9 = pnand %p8901_p8, %p8895_p5 }
  0x32   :  { %8905 = shalt.err (!%p8902_p9)
}
  0x33   :  { %36 = dma.hbm_to_vmem [thread:$0]  %s11675_s1, 16384, %s31_s24, [#allocation3], %s9078_s25, %s9078_s25, %s9079_s26  }
  0x34   :  { %s8906_s23 = scalar_lea.hbm %s11682_s8, 8192 }
  0x35   :  { %p8907_p10 = scmp.ne.s32.totalorder %s11682_s8, %s8906_s23  ;;  %p8910_p11 = scmp.lt.u32.totalorder %s8906_s23, %s11682_s8 }
  0x37   :  { %p8912_p12 = pnand %p8910_p11, %p8907_p10 }
  0x39   :  { %8915 = shalt.err (!%p8912_p12)
}
  0x3a   :  { %s8916_s18 = scalar_lea.vmem %s9205_s28, 8192  ;;  %p8921_p0 = scmp.lt.s32.totalorder %s9205_s28, %s9205_s28 }
  0x3b   :  { %p8917_p13 = scmp.ne.s32.totalorder %s9205_s28, %s8916_s18  ;;  %p8922_p1 = scmp.lt.s32.totalorder %s8916_s18, %s8916_s18 }
  0x3d   :  { %p8923_p2 = por %p8922_p1, %p8921_p0 }
  0x3f   :  { %p8924_p3 = pnand %p8923_p2, %p8917_p13 }
  0x41   :  { %8927 = shalt.err (!%p8924_p3)
}
  0x42   :  { %70 = dma.hbm_to_vmem [thread:$0]  %s11682_s8, 8192, %s9205_s28, [#allocation5], %s9078_s25, %s9078_s25, %s9079_s26  }
  0x43   :  { %s9082_s19 = smov [#allocation9]   ;;  %s8928_s16 = scalar_lea.hbm %s11684_s10, 8192 }
  0x44   :  { %s88_s20 = sshll.u32 %s9082_s19, 4  ;;  %p8929_p4 = scmp.ne.s32.totalorder %s11684_s10, %s8928_s16  ;;  %s89_s20 = int_to_ptr.vmem [resolvable:$true] %s88_s20 }
  0x45   :  { %p8932_p5 = scmp.lt.u32.totalorder %s8928_s16, %s11684_s10 }
  0x47   :  { %p8934_p6 = pnand %p8932_p5, %p8929_p4 }
  0x49   :  { %8937 = shalt.err (!%p8934_p6)
}
  0x4a   :  { %s8938_s27 = scalar_lea.vmem %s89_s20, 8192  ;;  %p8943_p8 = scmp.lt.s32.totalorder %s89_s20, %s89_s20 }
  0x4b   :  { %p8939_p7 = scmp.ne.s32.totalorder %s89_s20, %s8938_s27  ;;  %p8944_p9 = scmp.lt.s32.totalorder %s8938_s27, %s8938_s27 }
  0x4d   :  { %p8945_p10 = por %p8944_p9, %p8943_p8 }
  0x4f   :  { %p8946_p11 = pnand %p8945_p10, %p8939_p7 }
  0x51   :  { %8949 = shalt.err (!%p8946_p11)
}
  0x52   :  { %94 = dma.hbm_to_vmem [thread:$0]  %s11684_s10, 8192, %s89_s20, [#allocation8], %s9078_s25, %s9078_s25, %s9079_s26  }
  0x53   :  { %9010 = dma.done.wait [#allocation3], 16384  }
  0x54   :  { %9011 = vsyncadd [#allocation3], 4294950912 }
  0x55   :  { %9012 = dma.done.wait [#allocation5], 24576  }
  0x56   :  { %9013 = vsyncadd [#allocation5], 4294942720 }
  0x57   :  { %9014 = dma.done.wait [#allocation8], 16384  }
  0x58   :  { %9015 = vsyncadd [#allocation8], 4294950912  ;;  %v9083_v0 = vmov 6   ;;  %v9260_v1 = vld [vmem:[%s11674_s0 + $0x8] sm:$0xff]  ;;  %v9265_v2 = vld [vmem:[%s11674_s0] sm:$0xff]  ;;  %s9084_s10 = smov 7  }
  0x59   :  { %8568 = vset.pattern.permute.xlu0 %v9083_v0  ;;  %8569 = vset.pattern.permute.xlu1 %v9083_v0  ;;  %v704_v3 = vadd.f32 3.1415927, %v9260_v1  ;;  %v690_v4 = vadd.f32 3.1415927, %v9265_v2  ;;  %v115_v13 = vld [vmem:[#allocation2 + $0x8] sm:$0xff]  ;;  %v117_v15 = vld [vmem:[#allocation2 + $0x18] sm:$0xff] }
  0x5a   :  { %v119_v14 = vld [vmem:[#allocation2 + $0x28] sm:$0xff]  ;;  %v121_v17 = vld [vmem:[#allocation2 + $0x38] sm:$0xff]  ;;  %v114_v18 = vld [vmem:[#allocation2] sm:$0xff]  ;;  %vm743_vm3 = vcmask 56320   ;;  %vm745_vm4 = vcmask 113664   ;;  %vm747_vm5 = vcmask 121856  }
  0x5b   :  { %v705_v5 = vmul.f32 0.15915494, %v704_v3  ;;  %v692_v6 = vmul.f32 0.15915494, %v690_v4  ;;  %v9273_v16 = vpack.c.bf16 %v119_v14, %v115_v13  ;;  %v118_v19 = vld [vmem:[#allocation2 + $0x20] sm:$0xff]  ;;  %v9275_v20 = vpack.c.bf16 %v121_v17, %v117_v15  ;;  %v116_v22 = vld [vmem:[#allocation2 + $0x10] sm:$0xff] }
  0x5c   :  { %v9277_v21 = vpack.c.bf16 %v118_v19, %v114_v18  ;;  %v120_v23 = vld [vmem:[#allocation2 + $0x30] sm:$0xff]  ;;  %v123_v24 = vld [vmem:[#allocation2 + $0x48] sm:$0xff]  ;;  %v125_v27 = vld [vmem:[#allocation2 + $0x58] sm:$0xff]  ;;  %vm9087_vm6 = vmmov 0   ;;  %vm1156_vm7 = vcmask 1046528   ;;  %s10771_s9 = smov 2  }
  0x5d   :  { %v706_v7 = vfloor.f32 %v705_v5  ;;  %v693_v8 = vfloor.f32 %v692_v6  ;;  %12072 = vst [vmem:[#allocation13_spill] sm:$0xff] %v9273_v16  ;;  %12073 = vst [vmem:[#allocation14_spill] sm:$0xff] %v9275_v20  ;;  %6256 = vmatprep.subr.bf16.mxu0 %v9273_v16  ;;  %v9280_v25 = vpack.c.bf16 %v120_v23, %v116_v22  ;;  %v127_v26 = vld [vmem:[#allocation2 + $0x68] sm:$0xff]  ;;  %v129_v28 = vld [vmem:[#allocation2 + $0x78] sm:$0xff]  ;;  %6320 = vmatprep.subr.bf16.mxu1 %v9275_v20 }
  0x5e   :  { %12074 = vst [vmem:[#allocation15_spill] sm:$0xff] %v9277_v21  ;;  %6258 = vmatpush1.bf16.msra.mxu0 %v9277_v21  ;;  %v9284_v29 = vpack.c.bf16 %v127_v26, %v123_v24  ;;  %v9286_v30 = vpack.c.bf16 %v129_v28, %v125_v27  ;;  %v122_v31 = vld [vmem:[#allocation2 + $0x40] sm:$0xff]  ;;  %v124_v33 = vld [vmem:[#allocation2 + $0x50] sm:$0xff]  ;;  %v131_v36 = vld [vmem:[#allocation2 + $0x88] sm:$0xff] }
  0x5f   :  { %v707_v9 = vmul.f32 6.2831855, %v706_v7  ;;  %v694_v10 = vmul.f32 6.2831855, %v693_v8  ;;  %12075 = vst [vmem:[#allocation16_spill] sm:$0xff] %v9280_v25  ;;  %v126_v32 = vld [vmem:[#allocation2 + $0x60] sm:$0xff]  ;;  %6322 = vmatpush1.bf16.msra.mxu1 %v9280_v25 }
  0x60   :  { %12076 = vst [vmem:[#allocation17_spill] sm:$0xff] %v9284_v29  ;;  %12077 = vst [vmem:[#allocation18_spill] sm:$0xff] %v9286_v30  ;;  %v9289_v34 = vpack.c.bf16 %v126_v32, %v122_v31  ;;  %v128_v35 = vld [vmem:[#allocation2 + $0x70] sm:$0xff]  ;;  %v135_v37 = vld [vmem:[#allocation2 + $0xa8] sm:$0xff]  ;;  %6260 = vmatprep.subr.bf16.mxu0 %v9284_v29  ;;  %6324 = vmatprep.subr.bf16.mxu1 %v9286_v30 }
  0x61   :  { %v708_v11 = vsub.f32 %v9260_v1, %v707_v9  ;;  %v695_v12 = vsub.f32 %v9265_v2, %v694_v10  ;;  %v9293_v38 = vpack.c.bf16 %v128_v35, %v124_v33  ;;  %v9295_v39 = vpack.c.bf16 %v135_v37, %v131_v36  ;;  %v133_v40 = vld [vmem:[#allocation2 + $0x98] sm:$0xff]  ;;  %v130_v42 = vld [vmem:[#allocation2 + $0x80] sm:$0xff]  ;;  %v132_v45 = vld [vmem:[#allocation2 + $0x90] sm:$0xff] }
  0x62   :  { %12078 = vst [vmem:[#allocation19_spill] sm:$0xff] %v9289_v34  ;;  %v137_v41 = vld [vmem:[#allocation2 + $0xb8] sm:$0xff]  ;;  %v134_v44 = vld [vmem:[#allocation2 + $0xa0] sm:$0xff]  ;;  %v136_v46 = vld [vmem:[#allocation2 + $0xb0] sm:$0xff]  ;;  %6262 = vmatpush1.bf16.msra.mxu0 %v9289_v34 }
  0x63   :  { %711 = vperm.xlu0 %8568, %v708_v11   ;;  %12079 = vst [vmem:[#allocation20_spill] sm:$0xff] %v9293_v38  ;;  %12080 = vst [vmem:[#allocation21_spill] sm:$0xff] %v9295_v39  ;;  %v9297_v43 = vpack.c.bf16 %v137_v41, %v133_v40  ;;  %v9300_v47 = vpack.c.bf16 %v134_v44, %v130_v42  ;;  %v139_v48 = vld [vmem:[#allocation2 + $0xc8] sm:$0xff]  ;;  %v141_v50 = vld [vmem:[#allocation2 + $0xd8] sm:$0xff]  ;;  %6326 = vmatpush1.bf16.msra.mxu1 %v9293_v38 }
  0x64   :  { %v143_v49 = vld [vmem:[#allocation2 + $0xe8] sm:$0xff]  ;;  %6264 = vmatprep.subr.bf16.mxu0 %v9295_v39  ;;  %v9304_v51 = vpack.c.bf16 %v136_v46, %v132_v45  ;;  %v145_v53 = vld [vmem:[#allocation2 + $0xf8] sm:$0xff]  ;;  %v138_v54 = vld [vmem:[#allocation2 + $0xc0] sm:$0xff] }
  0x65   :  { %12081 = vst [vmem:[#allocation22_spill] sm:$0xff] %v9297_v43  ;;  %12082 = vst [vmem:[#allocation23_spill] sm:$0xff] %v9300_v47  ;;  %v9306_v52 = vpack.c.bf16 %v143_v49, %v139_v48  ;;  %v142_v55 = vld [vmem:[#allocation2 + $0xe0] sm:$0xff]  ;;  %6328 = vmatprep.subr.bf16.mxu1 %v9297_v43  ;;  %v9309_v56 = vpack.c.bf16 %v145_v53, %v141_v50  ;;  %v140_v57 = vld [vmem:[#allocation2 + $0xd0] sm:$0xff] }
  0x66   :  { %12083 = vst [vmem:[#allocation24_spill] sm:$0xff] %v9304_v51  ;;  %v144_v58 = vld [vmem:[#allocation2 + $0xf0] sm:$0xff]  ;;  %v147_v59 = vld [vmem:[#allocation2 + $0x108] sm:$0xff]  ;;  %v149_v61 = vld [vmem:[#allocation2 + $0x118] sm:$0xff]  ;;  %6266 = vmatpush1.bf16.msra.mxu0 %v9300_v47  ;;  %v9312_v63 = vpack.c.bf16 %v142_v55, %v138_v54 }
  0x67   :  { %698 = vperm.xlu0 %8568, %v695_v12   ;;  %12084 = vst [vmem:[#allocation25_spill] sm:$0xff] %v9306_v52  ;;  %12085 = vst [vmem:[#allocation26_spill] sm:$0xff] %v9309_v56  ;;  %v151_v60 = vld [vmem:[#allocation2 + $0x128] sm:$0xff]  ;;  %v153_v62 = vld [vmem:[#allocation2 + $0x138] sm:$0xff]  ;;  %6330 = vmatpush1.bf16.msra.mxu1 %v9304_v51  ;;  %v9316_v0 = vpack.c.bf16 %v144_v58, %v140_v57 }
  0x68   :  { %12086 = vst [vmem:[#allocation27_spill] sm:$0xff] %v9312_v63  ;;  %6268 = vmatprep.subr.bf16.mxu0 %v9306_v52  ;;  %v9318_v3 = vpack.c.bf16 %v151_v60, %v147_v59  ;;  %v146_v4 = vld [vmem:[#allocation2 + $0x100] sm:$0xff]  ;;  %v148_v6 = vld [vmem:[#allocation2 + $0x110] sm:$0xff]  ;;  %6332 = vmatprep.subr.bf16.mxu1 %v9309_v56  ;;  %v9321_v7 = vpack.c.bf16 %v153_v62, %v149_v61  ;;  %v155_v9 = vld [vmem:[#allocation2 + $0x148] sm:$0xff] }
  0x69   :  { %12087 = vst [vmem:[#allocation28_spill] sm:$0xff] %v9316_v0  ;;  %v150_v5 = vld [vmem:[#allocation2 + $0x120] sm:$0xff]  ;;  %v152_v8 = vld [vmem:[#allocation2 + $0x130] sm:$0xff]  ;;  %v159_v10 = vld [vmem:[#allocation2 + $0x168] sm:$0xff] }
  0x6a   :  { %12088 = vst [vmem:[#allocation29_spill] sm:$0xff] %v9318_v3  ;;  %12089 = vst [vmem:[#allocation30_spill] sm:$0xff] %v9321_v7  ;;  %v157_v11 = vld [vmem:[#allocation2 + $0x158] sm:$0xff]  ;;  %6270 = vmatpush1.bf16.msra.mxu0 %v9312_v63  ;;  %v9324_v13 = vpack.c.bf16 %v150_v5, %v146_v4  ;;  %v9328_v14 = vpack.c.bf16 %v152_v8, %v148_v6  ;;  %v9330_v15 = vpack.c.bf16 %v159_v10, %v155_v9  ;;  %v154_v17 = vld [vmem:[#allocation2 + $0x140] sm:$0xff] }
  0x6b   :  { %740 = vrot.lane.b32.xlu0 %v9260_v1, %s9084_s10  ;;  %v161_v12 = vld [vmem:[#allocation2 + $0x178] sm:$0xff]  ;;  %6334 = vmatpush1.bf16.msra.mxu1 %v9316_v0  ;;  %v158_v18 = vld [vmem:[#allocation2 + $0x160] sm:$0xff]  ;;  %v156_v19 = vld [vmem:[#allocation2 + $0x150] sm:$0xff] }
  0x6c   :  { %12090 = vst [vmem:[#allocation31_spill] sm:$0xff] %v9324_v13  ;;  %6272 = vmatprep.subr.bf16.mxu0 %v9318_v3  ;;  %12091 = vst [vmem:[#allocation32_spill] sm:$0xff] %v9328_v14  ;;  %6336 = vmatprep.subr.bf16.mxu1 %v9321_v7  ;;  %v9333_v22 = vpack.c.bf16 %v161_v12, %v157_v11  ;;  %v160_v23 = vld [vmem:[#allocation2 + $0x170] sm:$0xff]  ;;  %v163_v24 = vld [vmem:[#allocation2 + $0x188] sm:$0xff]  ;;  %v9336_v31 = vpack.c.bf16 %v158_v18, %v154_v17 }
  0x6d   :  { %12092 = vst [vmem:[#allocation33_spill] sm:$0xff] %v9330_v15  ;;  %v167_v26 = vld [vmem:[#allocation2 + $0x1a8] sm:$0xff]  ;;  %v165_v27 = vld [vmem:[#allocation2 + $0x198] sm:$0xff]  ;;  %v9340_v32 = vpack.c.bf16 %v160_v23, %v156_v19  ;;  %v162_v35 = vld [vmem:[#allocation2 + $0x180] sm:$0xff] }
  0x6e   :  { %12093 = vst [vmem:[#allocation34_spill] sm:$0xff] %v9333_v22  ;;  %v169_v28 = vld [vmem:[#allocation2 + $0x1b8] sm:$0xff]  ;;  %6274 = vmatpush1.bf16.msra.mxu0 %v9324_v13  ;;  %12094 = vst [vmem:[#allocation35_spill] sm:$0xff] %v9336_v31  ;;  %v9342_v33 = vpack.c.bf16 %v167_v26, %v163_v24  ;;  %v166_v36 = vld [vmem:[#allocation2 + $0x1a0] sm:$0xff] }
  0x6f   :  { %6338 = vmatpush1.bf16.msra.mxu1 %v9328_v14  ;;  %6276 = vmatprep.subr.bf16.mxu0 %v9330_v15  ;;  %12095 = vst [vmem:[#allocation36_spill] sm:$0xff] %v9340_v32  ;;  %v164_v37 = vld [vmem:[#allocation2 + $0x190] sm:$0xff]  ;;  %v9345_v40 = vpack.c.bf16 %v169_v28, %v165_v27  ;;  %v171_v42 = vld [vmem:[#allocation2 + $0x1c8] sm:$0xff]  ;;  %v173_v45 = vld [vmem:[#allocation2 + $0x1d8] sm:$0xff]  ;;  %v9348_v48 = vpack.c.bf16 %v166_v36, %v162_v35 }
  0x70   :  { %12096 = vst [vmem:[#allocation37_spill] sm:$0xff] %v9342_v33  ;;  %6340 = vmatprep.subr.bf16.mxu1 %v9333_v22  ;;  %v168_v41 = vld [vmem:[#allocation2 + $0x1b0] sm:$0xff]  ;;  %v175_v44 = vld [vmem:[#allocation2 + $0x1e8] sm:$0xff]  ;;  %v177_v46 = vld [vmem:[#allocation2 + $0x1f8] sm:$0xff] }
  0x71   :  { %12097 = vst [vmem:[#allocation38_spill] sm:$0xff] %v9345_v40  ;;  %12098 = vst [vmem:[#allocation39_spill] sm:$0xff] %v9348_v48  ;;  %v9352_v49 = vpack.c.bf16 %v168_v41, %v164_v37  ;;  %v9354_v50 = vpack.c.bf16 %v175_v44, %v171_v42  ;;  %v170_v53 = vld [vmem:[#allocation2 + $0x1c0] sm:$0xff]  ;;  %v172_v55 = vld [vmem:[#allocation2 + $0x1d0] sm:$0xff]  ;;  %v9357_v57 = vpack.c.bf16 %v177_v46, %v173_v45 }
  0x72   :  { %6278 = vmatpush1.bf16.msra.mxu0 %v9336_v31  ;;  %v174_v54 = vld [vmem:[#allocation2 + $0x1e0] sm:$0xff]  ;;  %v176_v58 = vld [vmem:[#allocation2 + $0x1f0] sm:$0xff]  ;;  %v179_v59 = vld [vmem:[#allocation2 + $0x208] sm:$0xff] }
  0x73   :  { %6342 = vmatpush1.bf16.msra.mxu1 %v9340_v32  ;;  %6280 = vmatprep.subr.bf16.mxu0 %v9342_v33  ;;  %12099 = vst [vmem:[#allocation40_spill] sm:$0xff] %v9352_v49  ;;  %12100 = vst [vmem:[#allocation41_spill] sm:$0xff] %v9354_v50  ;;  %v183_v60 = vld [vmem:[#allocation2 + $0x228] sm:$0xff]  ;;  %v181_v61 = vld [vmem:[#allocation2 + $0x218] sm:$0xff]  ;;  %v9360_v4 = vpack.c.bf16 %v174_v54, %v170_v53  ;;  %v9364_v5 = vpack.c.bf16 %v176_v58, %v172_v55 }
  0x74   :  { %6344 = vmatprep.subr.bf16.mxu1 %v9345_v40  ;;  %12101 = vst [vmem:[#allocation42_spill] sm:$0xff] %v9357_v57  ;;  %v185_v62 = vld [vmem:[#allocation2 + $0x238] sm:$0xff]  ;;  %v9366_v6 = vpack.c.bf16 %v183_v60, %v179_v59  ;;  %v178_v8 = vld [vmem:[#allocation2 + $0x200] sm:$0xff]  ;;  %v180_v10 = vld [vmem:[#allocation2 + $0x210] sm:$0xff] }
  0x75   :  { %12102 = vst [vmem:[#allocation43_spill] sm:$0xff] %v9360_v4  ;;  %12103 = vst [vmem:[#allocation44_spill] sm:$0xff] %v9364_v5  ;;  %v182_v9 = vld [vmem:[#allocation2 + $0x220] sm:$0xff]  ;;  %v9369_v11 = vpack.c.bf16 %v185_v62, %v181_v61  ;;  %v184_v12 = vld [vmem:[#allocation2 + $0x230] sm:$0xff] }
  0x76   :  { %6282 = vmatpush1.bf16.msra.mxu0 %v9348_v48  ;;  %12104 = vst [vmem:[#allocation45_spill] sm:$0xff] %v9366_v6  ;;  %v187_v17 = vld [vmem:[#allocation2 + $0x248] sm:$0xff]  ;;  %v189_v19 = vld [vmem:[#allocation2 + $0x258] sm:$0xff]  ;;  %v9372_v24 = vpack.c.bf16 %v182_v9, %v178_v8  ;;  %v9376_v26 = vpack.c.bf16 %v184_v12, %v180_v10  ;;  %v186_v28 = vld [vmem:[#allocation2 + $0x240] sm:$0xff] }
  0x77   :  { %6346 = vmatpush1.bf16.msra.mxu1 %v9352_v49  ;;  %6284 = vmatprep.subr.bf16.mxu0 %v9354_v50  ;;  %12105 = vst [vmem:[#allocation46_spill] sm:$0xff] %v9369_v11  ;;  %v191_v18 = vld [vmem:[#allocation2 + $0x268] sm:$0xff]  ;;  %v193_v23 = vld [vmem:[#allocation2 + $0x278] sm:$0xff]  ;;  %v190_v35 = vld [vmem:[#allocation2 + $0x260] sm:$0xff] }
  0x78   :  { %6348 = vmatprep.subr.bf16.mxu1 %v9357_v57  ;;  %12106 = vst [vmem:[#allocation47_spill] sm:$0xff] %v9372_v24  ;;  %12107 = vst [vmem:[#allocation48_spill] sm:$0xff] %v9376_v26  ;;  %v9378_v27 = vpack.c.bf16 %v191_v18, %v187_v17  ;;  %v188_v36 = vld [vmem:[#allocation2 + $0x250] sm:$0xff]  ;;  %v9381_v37 = vpack.c.bf16 %v193_v23, %v189_v19  ;;  %v195_v42 = vld [vmem:[#allocation2 + $0x288] sm:$0xff]  ;;  %v9384_v53 = vpack.c.bf16 %v190_v35, %v186_v28 }
  0x79   :  { %v192_v41 = vld [vmem:[#allocation2 + $0x270] sm:$0xff]  ;;  %v199_v44 = vld [vmem:[#allocation2 + $0x2a8] sm:$0xff]  ;;  %v197_v45 = vld [vmem:[#allocation2 + $0x298] sm:$0xff] }
  0x7a   :  { %6286 = vmatpush1.bf16.msra.mxu0 %v9360_v4  ;;  %12108 = vst [vmem:[#allocation49_spill] sm:$0xff] %v9378_v27  ;;  %12109 = vst [vmem:[#allocation50_spill] sm:$0xff] %v9381_v37  ;;  %v201_v46 = vld [vmem:[#allocation2 + $0x2b8] sm:$0xff]  ;;  %v9388_v54 = vpack.c.bf16 %v192_v41, %v188_v36  ;;  %v9390_v55 = vpack.c.bf16 %v199_v44, %v195_v42  ;;  %v194_v58 = vld [vmem:[#allocation2 + $0x280] sm:$0xff] }
  0x7b   :  { %6350 = vmatpush1.bf16.msra.mxu1 %v9364_v5  ;;  %6288 = vmatprep.subr.bf16.mxu0 %v9366_v6  ;;  %12110 = vst [vmem:[#allocation51_spill] sm:$0xff] %v9384_v53  ;;  %v198_v59 = vld [vmem:[#allocation2 + $0x2a0] sm:$0xff]  ;;  %v196_v60 = vld [vmem:[#allocation2 + $0x290] sm:$0xff]  ;;  %v9393_v61 = vpack.c.bf16 %v201_v46, %v197_v45  ;;  %v203_v8 = vld [vmem:[#allocation2 + $0x2c8] sm:$0xff] }
  0x7c   :  { %6352 = vmatprep.subr.bf16.mxu1 %v9369_v11  ;;  %12111 = vst [vmem:[#allocation52_spill] sm:$0xff] %v9388_v54  ;;  %12112 = vst [vmem:[#allocation53_spill] sm:$0xff] %v9390_v55  ;;  %v200_v62 = vld [vmem:[#allocation2 + $0x2b0] sm:$0xff]  ;;  %v207_v9 = vld [vmem:[#allocation2 + $0x2e8] sm:$0xff]  ;;  %v9396_v17 = vpack.c.bf16 %v198_v59, %v194_v58 }
  0x7d   :  { %12113 = vst [vmem:[#allocation54_spill] sm:$0xff] %v9393_v61  ;;  %v205_v10 = vld [vmem:[#allocation2 + $0x2d8] sm:$0xff]  ;;  %v9400_v18 = vpack.c.bf16 %v200_v62, %v196_v60  ;;  %v9402_v19 = vpack.c.bf16 %v207_v9, %v203_v8  ;;  %v202_v23 = vld [vmem:[#allocation2 + $0x2c0] sm:$0xff]  ;;  %v204_v35 = vld [vmem:[#allocation2 + $0x2d0] sm:$0xff] }
  0x7e   :  { %6290 = vmatpush1.bf16.msra.mxu0 %v9372_v24  ;;  %v209_v12 = vld [vmem:[#allocation2 + $0x2f8] sm:$0xff]  ;;  %12114 = vst [vmem:[#allocation55_spill] sm:$0xff] %v9396_v17  ;;  %v206_v28 = vld [vmem:[#allocation2 + $0x2e0] sm:$0xff]  ;;  %v208_v41 = vld [vmem:[#allocation2 + $0x2f0] sm:$0xff] }
  0x7f   :  { %6354 = vmatpush1.bf16.msra.mxu1 %v9376_v26  ;;  %6292 = vmatprep.subr.bf16.mxu0 %v9378_v27  ;;  %12115 = vst [vmem:[#allocation56_spill] sm:$0xff] %v9400_v18  ;;  %12116 = vst [vmem:[#allocation57_spill] sm:$0xff] %v9402_v19  ;;  %v9405_v36 = vpack.c.bf16 %v209_v12, %v205_v10  ;;  %v211_v42 = vld [vmem:[#allocation2 + $0x308] sm:$0xff]  ;;  %v213_v45 = vld [vmem:[#allocation2 + $0x318] sm:$0xff]  ;;  %v9408_v58 = vpack.c.bf16 %v206_v28, %v202_v23 }
  0x80   :  { %6356 = vmatprep.subr.bf16.mxu1 %v9381_v37  ;;  %v215_v44 = vld [vmem:[#allocation2 + $0x328] sm:$0xff]  ;;  %v217_v46 = vld [vmem:[#allocation2 + $0x338] sm:$0xff]  ;;  %v9412_v59 = vpack.c.bf16 %v208_v41, %v204_v35  ;;  %v210_v62 = vld [vmem:[#allocation2 + $0x300] sm:$0xff] }
  0x81   :  { %12117 = vst [vmem:[#allocation58_spill] sm:$0xff] %v9405_v36  ;;  %12118 = vst [vmem:[#allocation59_spill] sm:$0xff] %v9408_v58  ;;  %v9414_v60 = vpack.c.bf16 %v215_v44, %v211_v42  ;;  %v214_v8 = vld [vmem:[#allocation2 + $0x320] sm:$0xff]  ;;  %v212_v9 = vld [vmem:[#allocation2 + $0x310] sm:$0xff]  ;;  %v9417_v10 = vpack.c.bf16 %v217_v46, %v213_v45 }
  0x82   :  { %6294 = vmatpush1.bf16.msra.mxu0 %v9384_v53  ;;  %12119 = vst [vmem:[#allocation60_spill] sm:$0xff] %v9412_v59  ;;  %v216_v12 = vld [vmem:[#allocation2 + $0x330] sm:$0xff]  ;;  %v221_v23 = vld [vmem:[#allocation2 + $0x358] sm:$0xff]  ;;  %v218_v42 = vld [vmem:[#allocation2 + $0x340] sm:$0xff] }
  0x83   :  { %6358 = vmatpush1.bf16.msra.mxu1 %v9388_v54  ;;  %6296 = vmatprep.subr.bf16.mxu0 %v9390_v55  ;;  %12120 = vst [vmem:[#allocation61_spill] sm:$0xff] %v9414_v60  ;;  %12121 = vst [vmem:[#allocation62_spill] sm:$0xff] %v9417_v10  ;;  %v225_v28 = vld [vmem:[#allocation2 + $0x378] sm:$0xff]  ;;  %v9424_v35 = vpack.c.bf16 %v216_v12, %v212_v9  ;;  %v222_v44 = vld [vmem:[#allocation2 + $0x360] sm:$0xff]  ;;  %v11700_v12 = vlaneseq }
  0x84   :  { %6360 = vmatprep.subr.bf16.mxu1 %v9393_v61  ;;  %v219_v61 = vld [vmem:[#allocation2 + $0x348] sm:$0xff]  ;;  %v220_v45 = vld [vmem:[#allocation2 + $0x350] sm:$0xff]  ;;  %v9429_v46 = vpack.c.bf16 %v225_v28, %v221_v23  ;;  %v261_v37 = vld [vmem:[#allocation4 + $0x98] sm:$0xff] }
  0x85   :  { %12123 = vst [vmem:[#allocation64_spill] sm:$0xff] %v9424_v35  ;;  %v9448_v23 = vand.u32 127, %v11700_v12  ;;  %v228_v12 = vld [vmem:[#allocation2 + $0x390] sm:$0xff]  ;;  %v259_v55 = vld [vmem:[#allocation4 + $0x88] sm:$0xff]  ;;  %v393_v50 = vld [vmem:[#allocation6 + $0x18] sm:$0xff] }
  0x86   :  { %6298 = vmatpush1.bf16.msra.mxu0 %v9396_v17  ;;  %v223_v17 = vld [vmem:[#allocation2 + $0x368] sm:$0xff]  ;;  %12125 = vst [vmem:[#allocation66_spill] sm:$0xff] %v9429_v46  ;;  %v397_v49 = vld [vmem:[#allocation6 + $0x38] sm:$0xff]  ;;  %v392_v48 = vld [vmem:[#allocation6 + $0x10] sm:$0xff] }
  0x87   :  { %6362 = vmatpush1.bf16.msra.mxu1 %v9400_v18  ;;  %6300 = vmatprep.subr.bf16.mxu0 %v9402_v19  ;;  %v9420_v18 = vpack.c.bf16 %v214_v8, %v210_v62  ;;  %v9426_v41 = vpack.c.bf16 %v223_v17, %v219_v61  ;;  %v227_v19 = vld [vmem:[#allocation2 + $0x388] sm:$0xff]  ;;  %v229_v62 = vld [vmem:[#allocation2 + $0x398] sm:$0xff]  ;;  %12130 = vst [vmem:[#allocation71_spill] sm:$0xff] %v9448_v23  ;;  %vm688_vm0 = vcmp.eq.s32.totalorder %v9448_v23, 6  ;;  %v396_v40 = vld [vmem:[#allocation6 + $0x30] sm:$0xff] }
  0x88   :  { %6364 = vmatprep.subr.bf16.mxu1 %v9405_v36  ;;  %v224_v36 = vld [vmem:[#allocation2 + $0x370] sm:$0xff]  ;;  %v233_v8 = vld [vmem:[#allocation2 + $0x3b8] sm:$0xff]  ;;  %v263_v53 = vld [vmem:[#allocation4 + $0xa8] sm:$0xff] }
  0x89   :  { %12122 = vst [vmem:[#allocation63_spill] sm:$0xff] %v9420_v18  ;;  %12124 = vst [vmem:[#allocation65_spill] sm:$0xff] %v9426_v41  ;;  %v9436_v61 = vpack.c.bf16 %v224_v36, %v220_v45  ;;  %v9441_v9 = vpack.c.bf16 %v233_v8, %v229_v62  ;;  %v443_v11 = vld [vmem:[#allocation6 + $0x1a8] sm:$0xff]  ;;  %v400_v33 = vld [vmem:[#allocation6 + $0x50] sm:$0xff] }
  0x8a   :  { %6302 = vmatpush1.bf16.msra.mxu0 %v9408_v58  ;;  %v231_v58 = vld [vmem:[#allocation2 + $0x3a8] sm:$0xff]  ;;  %v404_v32 = vld [vmem:[#allocation6 + $0x70] sm:$0xff]  ;;  %v425_v15 = vld [vmem:[#allocation6 + $0x118] sm:$0xff] }
  0x8b   :  { %6366 = vmatpush1.bf16.msra.mxu1 %v9412_v59  ;;  %6304 = vmatprep.subr.bf16.mxu0 %v9414_v60  ;;  %v9432_v59 = vpack.c.bf16 %v222_v44, %v218_v42  ;;  %12127 = vst [vmem:[#allocation68_spill] sm:$0xff] %v9436_v61  ;;  %v9438_v17 = vpack.c.bf16 %v231_v58, %v227_v19  ;;  %12129 = vst [vmem:[#allocation70_spill] sm:$0xff] %v9441_v9  ;;  %v256_v60 = vld [vmem:[#allocation4 + $0x70] sm:$0xff]  ;;  %v451_v5 = vld [vmem:[#allocation6 + $0x1e8] sm:$0xff] }
  0x8c   :  { %6368 = vmatprep.subr.bf16.mxu1 %v9417_v10  ;;  %v252_v10 = vld [vmem:[#allocation4 + $0x50] sm:$0xff]  ;;  %v429_v14 = vld [vmem:[#allocation6 + $0x138] sm:$0xff]  ;;  %v462_v47 = vld [vmem:[#allocation7 + $0x40] sm:$0xff] }
  0x8d   :  { %12126 = vst [vmem:[#allocation67_spill] sm:$0xff] %v9432_v59  ;;  %12128 = vst [vmem:[#allocation69_spill] sm:$0xff] %v9438_v17  ;;  %v424_v13 = vld [vmem:[#allocation6 + $0x110] sm:$0xff]  ;;  %v466_v43 = vld [vmem:[#allocation7 + $0x60] sm:$0xff] }
  0x8e   :  { %6306 = vmatpush1.bf16.msra.mxu0 %v9420_v18  ;;  %v428_v7 = vld [vmem:[#allocation6 + $0x130] sm:$0xff]  ;;  %v10032_v39 = vpack.c.bf16 %v466_v43, %v462_v47  ;;  %v478_v47 = vld [vmem:[#allocation7 + $0xc0] sm:$0xff] }
  0x8f   :  { %6370 = vmatpush1.bf16.msra.mxu1 %v9424_v35  ;;  %6308 = vmatprep.subr.bf16.mxu0 %v9426_v41  ;;  %v232_v41 = vld [vmem:[#allocation2 + $0x3b0] sm:$0xff] }
  0x90   :  { %6372 = vmatprep.subr.bf16.mxu1 %v9429_v46  ;;  %v9456_v18 = vpack.c.bf16 %v232_v41, %v228_v12  ;;  %v238_v41 = vld [vmem:[#allocation2 + $0x3e0] sm:$0xff]  ;;  %v432_v3 = vld [vmem:[#allocation6 + $0x150] sm:$0xff]  ;;  %12262 = vst [vmem:[#allocation201_spill] sm:$0xff] %v10032_v39 }
  0x91   :  { %v436_v0 = vld [vmem:[#allocation6 + $0x170] sm:$0xff] }
  0x92   :  { %6310 = vmatpush1.bf16.msra.mxu0 %v9432_v59  ;;  %v230_v59 = vld [vmem:[#allocation2 + $0x3a0] sm:$0xff]  ;;  %12132 = vst [vmem:[#allocation73_spill] sm:$0xff] %v9456_v18  ;;  %v440_v63 = vld [vmem:[#allocation6 + $0x190] sm:$0xff] }
  0x93   :  { %6374 = vmatpush1.bf16.msra.mxu1 %v9436_v61  ;;  %6312 = vmatprep.subr.bf16.mxu0 %v9438_v17  ;;  %v226_v61 = vld [vmem:[#allocation2 + $0x380] sm:$0xff]  ;;  %v444_v56 = vld [vmem:[#allocation6 + $0x1b0] sm:$0xff] }
  0x94   :  { %6376 = vmatprep.subr.bf16.mxu1 %v9441_v9  ;;  %v9454_v46 = vpack.c.bf16 %v230_v59, %v226_v61  ;;  %v241_v61 = vld [vmem:[#allocation2 + $0x3f8] sm:$0xff]  ;;  %v448_v52 = vld [vmem:[#allocation6 + $0x1d0] sm:$0xff] }
  0x95   :  { %v452_v51 = vld [vmem:[#allocation6 + $0x1f0] sm:$0xff] }
  0x96   :  { %12131 = vst [vmem:[#allocation72_spill] sm:$0xff] %v9454_v46  ;;  %6314 = vmatpush1.bf16.msra.mxu0 %v9454_v46 }
  0x97   :  { %6378 = vmatpush1.bf16.msra.mxu1 %v9456_v18  ;;  %v250_v18 = vld [vmem:[#allocation4 + $0x40] sm:$0xff] }
  0xe2   :  { %v712_v19 = vpop.permute.xlu0 %711 }
  0xe3   :  { %v714_v36 = vsel %vm688_vm0, %v712_v19, %v9260_v1 }
  0xe4   :  { %v715_v58 = vadd.f32 3.1415927, %v714_v36 }
  0xe6   :  { %v716_v28 = vmul.f32 0.15915494, %v715_v58  ;;  %v699_v17 = vpop.permute.xlu0 %698 }
  0xe7   :  { %v9461_v19 = vsel %vm688_vm0, %v699_v17, %v9265_v2  ;;  %v236_v2 = vld [vmem:[#allocation2 + $0x3d0] sm:$0xff] }
  0xe8   :  { %v717_v42 = vfloor.f32 %v716_v28  ;;  %v235_v28 = vld [vmem:[#allocation2 + $0x3c8] sm:$0xff]  ;;  %v240_v17 = vld [vmem:[#allocation2 + $0x3f0] sm:$0xff] }
  0xea   :  { %v718_v44 = vmul.f32 6.2831855, %v717_v42  ;;  %v239_v42 = vld [vmem:[#allocation2 + $0x3e8] sm:$0xff] }
  0xeb   :  { %v9465_v59 = vpack.c.bf16 %v239_v42, %v235_v28  ;;  %v245_v28 = vld [vmem:[#allocation4 + $0x18] sm:$0xff] }
  0xec   :  { %v719_v45 = vsub.f32 %v714_v36, %v718_v44  ;;  %v237_v44 = vld [vmem:[#allocation2 + $0x3d8] sm:$0xff] }
  0xed   :  { %12133 = vst [vmem:[#allocation74_spill] sm:$0xff] %v9465_v59  ;;  %v9467_v12 = vpack.c.bf16 %v241_v61, %v237_v44  ;;  %6316 = vmatprep.subr.bf16.mxu0 %v9465_v59  ;;  %v249_v44 = vld [vmem:[#allocation4 + $0x38] sm:$0xff] }
  0xee   :  { %v720_v62 = vsub.f32 %v719_v45, %v714_v36  ;;  %v724_v8 = vadd.f32 3.1415927, %v719_v45  ;;  %v5978_v9 = vadd.f32 -3.1415927, %v719_v45  ;;  %v9486_v61 = vpack.c.bf16 %v249_v44, %v245_v28  ;;  %v253_v28 = vld [vmem:[#allocation4 + $0x58] sm:$0xff] }
  0xef   :  { %12134 = vst [vmem:[#allocation75_spill] sm:$0xff] %v9467_v12  ;;  %6380 = vmatprep.subr.bf16.mxu1 %v9467_v12  ;;  %v257_v44 = vld [vmem:[#allocation4 + $0x78] sm:$0xff] }
  0xf0   :  { %vm721_vm1 = vcmp.gt.f32.partialorder %v720_v62, 1.5707964  ;;  %vm723_vm2 = vcmp.lt.f32.partialorder %v720_v62, -1.5707964  ;;  %12138 = vst [vmem:[#allocation79_spill] sm:$0xff] %v9486_v61 }
  0xf1   :  { %v725_v35 = vsel %vm723_vm2, %v724_v8, %v719_v45  ;;  %v234_v45 = vld [vmem:[#allocation2 + $0x3c0] sm:$0xff]  ;;  %v11705_v8 = vmov 0.0  }
  0xf2   :  { %v726_v58 = vsel %vm721_vm1, %v5978_v9, %v725_v35  ;;  %v9469_v62 = vpack.c.bf16 %v238_v41, %v234_v45  ;;  %v9472_v35 = vsub.f32 %v714_v36, %v9461_v19  ;;  %v9475_v9 = vpack.c.bf16 %v240_v17, %v236_v2  ;;  %813 = vmatprep.mubr.f32.mxu0 %v11705_v8  ;;  %v243_v36 = vld [vmem:[#allocation4 + $0x8] sm:$0xff]  ;;  %v242_v41 = vld [vmem:[#allocation4] sm:$0xff] }
  0xf3   :  { %729 = vperm.xlu1 %8569, %v726_v58   ;;  %884 = vmatprep.mubr.f32.mxu1 %v11705_v8  ;;  %v247_v58 = vld [vmem:[#allocation4 + $0x28] sm:$0xff]  ;;  %v246_v2 = vld [vmem:[#allocation4 + $0x20] sm:$0xff]  ;;  %v244_v8 = vld [vmem:[#allocation4 + $0x10] sm:$0xff] }
  0xf4   :  { %12135 = vst [vmem:[#allocation76_spill] sm:$0xff] %v9469_v62  ;;  %12136 = vst [vmem:[#allocation77_spill] sm:$0xff] %v9475_v9  ;;  %6318 = vmatpush1.bf16.msra.mxu0 %v9469_v62  ;;  %6382 = vmatpush1.bf16.msra.mxu1 %v9475_v9  ;;  %v9484_v42 = vpack.c.bf16 %v247_v58, %v243_v36  ;;  %v248_v9 = vld [vmem:[#allocation4 + $0x30] sm:$0xff]  ;;  %v251_v62 = vld [vmem:[#allocation4 + $0x48] sm:$0xff]  ;;  %v9496_v12 = vpack.c.bf16 %v246_v2, %v242_v41 }
  0xf5   :  { %6448 = vmatprep.subr.bf16.mxu1 %v9486_v61  ;;  %v255_v58 = vld [vmem:[#allocation4 + $0x68] sm:$0xff]  ;;  %v9498_v59 = vpack.c.bf16 %v248_v9, %v244_v8  ;;  %v265_v41 = vld [vmem:[#allocation4 + $0xb8] sm:$0xff]  ;;  %v9513_v9 = vpack.c.bf16 %v256_v60, %v252_v10  ;;  %v258_v8 = vld [vmem:[#allocation4 + $0x80] sm:$0xff] }
  0xf6   :  { %12137 = vst [vmem:[#allocation78_spill] sm:$0xff] %v9484_v42  ;;  %6384 = vmatprep.subr.bf16.mxu0 %v9484_v42  ;;  %v741_v42 = vpop.permute.xlu0 %740  ;;  %12139 = vst [vmem:[#allocation80_spill] sm:$0xff] %v9496_v12  ;;  %v9502_v46 = vpack.c.bf16 %v255_v58, %v251_v62  ;;  %v9519_v2 = vpack.c.bf16 %v265_v41, %v261_v37  ;;  %v260_v58 = vld [vmem:[#allocation4 + $0x90] sm:$0xff]  ;;  %v266_v37 = vld [vmem:[#allocation4 + $0xc0] sm:$0xff] }
  0xf7   :  { %736 = vrot.lane.b32.xlu1 %v9472_v35, %s9084_s10  ;;  %12140 = vst [vmem:[#allocation81_spill] sm:$0xff] %v9498_v59  ;;  %12144 = vst [vmem:[#allocation85_spill] sm:$0xff] %v9513_v9  ;;  %v268_v41 = vld [vmem:[#allocation4 + $0xd0] sm:$0xff] }
  0xf8   :  { %12141 = vst [vmem:[#allocation82_spill] sm:$0xff] %v9502_v46  ;;  %12146 = vst [vmem:[#allocation87_spill] sm:$0xff] %v9519_v2 }
 0x172   :  { %v730_v45 = vpop.permute.xlu1 %729 }
 0x173   :  { %v732_v17 = vsel %vm688_vm0, %v730_v45, %v9260_v1  ;;  %v254_v1 = vld [vmem:[#allocation4 + $0x60] sm:$0xff] }
 0x174   :  { %v9494_v36 = vsub.f32 %v732_v17, %v9461_v19  ;;  %v9504_v17 = vpack.c.bf16 %v257_v44, %v253_v28  ;;  %v9511_v62 = vpack.c.bf16 %v254_v1, %v250_v18  ;;  %v267_v28 = vld [vmem:[#allocation4 + $0xc8] sm:$0xff]  ;;  %v12147_v18 = vmov 0.0  }
 0x175   :  { %v271_v44 = vld [vmem:[#allocation4 + $0xe8] sm:$0xff] }
 0x176   :  { %v737_v61 = vpop.permute.xlu1 %736  ;;  %12142 = vst [vmem:[#allocation83_spill] sm:$0xff] %v9504_v17  ;;  %12143 = vst [vmem:[#allocation84_spill] sm:$0xff] %v9511_v62  ;;  %v9531_v10 = vpack.c.bf16 %v271_v44, %v267_v28  ;;  %v276_v44 = vld [vmem:[#allocation4 + $0x110] sm:$0xff] }
 0x177   :  { %v744_v45 = vsel %vm743_vm3, %v9494_v36, %v737_v61  ;;  %v262_v61 = vld [vmem:[#allocation4 + $0xa0] sm:$0xff] }
 0x178   :  { %v746_v54 = vsel %vm745_vm4, %v744_v45, %v741_v42  ;;  %v9517_v42 = vpack.c.bf16 %v263_v53, %v259_v55  ;;  %v269_v45 = vld [vmem:[#allocation4 + $0xd8] sm:$0xff]  ;;  %v9525_v60 = vpack.c.bf16 %v262_v61, %v258_v8  ;;  %v270_v55 = vld [vmem:[#allocation4 + $0xe0] sm:$0xff]  ;;  %12150 = vst [vmem:[#allocation90_spill] sm:$0xff] %v9531_v10 }
 0x179   :  { %5979 = vmatmul.mubr.msk.f32.vlgmr.msra.gmra.mrb[0].mxu0 %vm747_vm5, %v746_v54  ;;  %5980 = vmatmul.mubr.msk.f32.vlgmr.msra.gmra.mrb[0].mxu1 %vm747_vm5, %v746_v54  ;;  %v264_v54 = vld [vmem:[#allocation4 + $0xb0] sm:$0xff]  ;;  %v9537_v8 = vpack.c.bf16 %v270_v55, %v266_v37  ;;  %v282_v55 = vld [vmem:[#allocation4 + $0x140] sm:$0xff] }
 0x17a   :  { %6386 = vmatpush1.bf16.msra.mxu0 %v9496_v12  ;;  %6450 = vmatpush1.bf16.msra.mxu1 %v9498_v59  ;;  %12145 = vst [vmem:[#allocation86_spill] sm:$0xff] %v9517_v42  ;;  %v273_v59 = vld [vmem:[#allocation4 + $0xf8] sm:$0xff]  ;;  %12148 = vst [vmem:[#allocation88_spill] sm:$0xff] %v9525_v60  ;;  %v9527_v53 = vpack.c.bf16 %v264_v54, %v260_v58  ;;  %v274_v58 = vld [vmem:[#allocation4 + $0x100] sm:$0xff] }
 0x17b   :  { %6388 = vmatprep.subr.bf16.mxu0 %v9502_v46  ;;  %6452 = vmatprep.subr.bf16.mxu1 %v9504_v17  ;;  %v9533_v1 = vpack.c.bf16 %v273_v59, %v269_v45  ;;  %v272_v17 = vld [vmem:[#allocation4 + $0xf0] sm:$0xff]  ;;  %v275_v46 = vld [vmem:[#allocation4 + $0x108] sm:$0xff]  ;;  %v277_v12 = vld [vmem:[#allocation4 + $0x118] sm:$0xff]  ;;  %12152 = vst [vmem:[#allocation92_spill] sm:$0xff] %v9537_v8 }
 0x17c   :  { %970 = vmatprep.mubr.f32.mxu0 %v12147_v18  ;;  %1041 = vmatprep.mubr.f32.mxu1 %v12147_v18  ;;  %12149 = vst [vmem:[#allocation89_spill] sm:$0xff] %v9527_v53  ;;  %v9539_v61 = vpack.c.bf16 %v272_v17, %v268_v41  ;;  %v278_v54 = vld [vmem:[#allocation4 + $0x120] sm:$0xff]  ;;  %v280_v45 = vld [vmem:[#allocation4 + $0x130] sm:$0xff] }
 0x17d   :  { %12151 = vst [vmem:[#allocation91_spill] sm:$0xff] %v9533_v1  ;;  %v9549_v17 = vpack.c.bf16 %v278_v54, %v274_v58  ;;  %v9551_v37 = vpack.c.bf16 %v280_v45, %v276_v44  ;;  %v286_v41 = vld [vmem:[#allocation4 + $0x160] sm:$0xff]  ;;  %v296_v45 = vld [vmem:[#allocation4 + $0x1b0] sm:$0xff] }
 0x17e   :  { %6390 = vmatpush1.bf16.msra.mxu0 %v9511_v62  ;;  %6454 = vmatpush1.bf16.msra.mxu1 %v9513_v9  ;;  %v279_v62 = vld [vmem:[#allocation4 + $0x128] sm:$0xff]  ;;  %v281_v9 = vld [vmem:[#allocation4 + $0x138] sm:$0xff]  ;;  %12153 = vst [vmem:[#allocation93_spill] sm:$0xff] %v9539_v61  ;;  %v9561_v58 = vpack.c.bf16 %v286_v41, %v282_v55  ;;  %v290_v44 = vld [vmem:[#allocation4 + $0x180] sm:$0xff] }
 0x17f   :  { %6392 = vmatprep.subr.bf16.mxu0 %v9517_v42  ;;  %6456 = vmatprep.subr.bf16.mxu1 %v9519_v2  ;;  %v9543_v59 = vpack.c.bf16 %v279_v62, %v275_v46  ;;  %v9545_v28 = vpack.c.bf16 %v281_v9, %v277_v12  ;;  %v283_v2 = vld [vmem:[#allocation4 + $0x148] sm:$0xff]  ;;  %v285_v42 = vld [vmem:[#allocation4 + $0x158] sm:$0xff]  ;;  %12156 = vst [vmem:[#allocation96_spill] sm:$0xff] %v9549_v17  ;;  %12157 = vst [vmem:[#allocation97_spill] sm:$0xff] %v9551_v37 }
 0x180   :  { %v284_v62 = vld [vmem:[#allocation4 + $0x150] sm:$0xff]  ;;  %12160 = vst [vmem:[#allocation100_spill] sm:$0xff] %v9561_v58 }
 0x181   :  { %12154 = vst [vmem:[#allocation94_spill] sm:$0xff] %v9543_v59  ;;  %12155 = vst [vmem:[#allocation95_spill] sm:$0xff] %v9545_v28  ;;  %v288_v9 = vld [vmem:[#allocation4 + $0x170] sm:$0xff] }
 0x182   :  { %6394 = vmatpush1.bf16.msra.mxu0 %v9525_v60  ;;  %6458 = vmatpush1.bf16.msra.mxu1 %v9527_v53  ;;  %v287_v60 = vld [vmem:[#allocation4 + $0x168] sm:$0xff]  ;;  %v289_v53 = vld [vmem:[#allocation4 + $0x178] sm:$0xff]  ;;  %v9563_v54 = vpack.c.bf16 %v288_v9, %v284_v62 }
 0x183   :  { %6396 = vmatprep.subr.bf16.mxu0 %v9531_v10  ;;  %6460 = vmatprep.subr.bf16.mxu1 %v9533_v1  ;;  %v9555_v46 = vpack.c.bf16 %v287_v60, %v283_v2  ;;  %v9557_v12 = vpack.c.bf16 %v289_v53, %v285_v42  ;;  %v291_v1 = vld [vmem:[#allocation4 + $0x188] sm:$0xff]  ;;  %v293_v10 = vld [vmem:[#allocation4 + $0x198] sm:$0xff]  ;;  %v294_v60 = vld [vmem:[#allocation4 + $0x1a0] sm:$0xff] }
 0x184   :  { %12161 = vst [vmem:[#allocation101_spill] sm:$0xff] %v9563_v54  ;;  %v292_v53 = vld [vmem:[#allocation4 + $0x190] sm:$0xff]  ;;  %v9573_v55 = vpack.c.bf16 %v294_v60, %v290_v44  ;;  %v305_v62 = vld [vmem:[#allocation4 + $0x1f8] sm:$0xff]  ;;  %v298_v44 = vld [vmem:[#allocation4 + $0x1c0] sm:$0xff] }
 0x185   :  { %12158 = vst [vmem:[#allocation98_spill] sm:$0xff] %v9555_v46  ;;  %12159 = vst [vmem:[#allocation99_spill] sm:$0xff] %v9557_v12  ;;  %v9575_v41 = vpack.c.bf16 %v296_v45, %v292_v53  ;;  %v302_v60 = vld [vmem:[#allocation4 + $0x1e0] sm:$0xff]  ;;  %v300_v53 = vld [vmem:[#allocation4 + $0x1d0] sm:$0xff] }
 0x186   :  { %6398 = vmatpush1.bf16.msra.mxu0 %v9537_v8  ;;  %6462 = vmatpush1.bf16.msra.mxu1 %v9539_v61  ;;  %v295_v8 = vld [vmem:[#allocation4 + $0x1a8] sm:$0xff]  ;;  %v297_v61 = vld [vmem:[#allocation4 + $0x1b8] sm:$0xff]  ;;  %12164 = vst [vmem:[#allocation104_spill] sm:$0xff] %v9573_v55  ;;  %v9586_v45 = vpack.c.bf16 %v302_v60, %v298_v44  ;;  %v308_v60 = vld [vmem:[#allocation4 + $0x210] sm:$0xff] }
 0x187   :  { %6400 = vmatprep.subr.bf16.mxu0 %v9543_v59  ;;  %6464 = vmatprep.subr.bf16.mxu1 %v9545_v28  ;;  %v9567_v42 = vpack.c.bf16 %v295_v8, %v291_v1  ;;  %v9569_v2 = vpack.c.bf16 %v297_v61, %v293_v10  ;;  %12165 = vst [vmem:[#allocation105_spill] sm:$0xff] %v9575_v41  ;;  %v299_v10 = vld [vmem:[#allocation4 + $0x1c8] sm:$0xff]  ;;  %v301_v8 = vld [vmem:[#allocation4 + $0x1d8] sm:$0xff] }
 0x188   :  { %v303_v1 = vld [vmem:[#allocation4 + $0x1e8] sm:$0xff]  ;;  %v9583_v9 = vpack.c.bf16 %v305_v62, %v301_v8  ;;  %12168 = vst [vmem:[#allocation108_spill] sm:$0xff] %v9586_v45  ;;  %v313_v62 = vld [vmem:[#allocation4 + $0x238] sm:$0xff] }
 0x189   :  { %12162 = vst [vmem:[#allocation102_spill] sm:$0xff] %v9567_v42  ;;  %12163 = vst [vmem:[#allocation103_spill] sm:$0xff] %v9569_v2  ;;  %v9581_v61 = vpack.c.bf16 %v303_v1, %v299_v10  ;;  %v311_v10 = vld [vmem:[#allocation4 + $0x228] sm:$0xff]  ;;  %v309_v1 = vld [vmem:[#allocation4 + $0x218] sm:$0xff] }
 0x18a   :  { %6402 = vmatpush1.bf16.msra.mxu0 %v9549_v17  ;;  %6466 = vmatpush1.bf16.msra.mxu1 %v9551_v37  ;;  %12167 = vst [vmem:[#allocation107_spill] sm:$0xff] %v9583_v9 }
 0x18b   :  { %6404 = vmatprep.subr.bf16.mxu0 %v9555_v46  ;;  %6468 = vmatprep.subr.bf16.mxu1 %v9557_v12  ;;  %12166 = vst [vmem:[#allocation106_spill] sm:$0xff] %v9581_v61 }
 0x18e   :  { %6406 = vmatpush1.bf16.msra.mxu0 %v9561_v58  ;;  %6470 = vmatpush1.bf16.msra.mxu1 %v9563_v54  ;;  %v310_v54 = vld [vmem:[#allocation4 + $0x220] sm:$0xff] }
 0x18f   :  { %6408 = vmatprep.subr.bf16.mxu0 %v9567_v42  ;;  %6472 = vmatprep.subr.bf16.mxu1 %v9569_v2  ;;  %v304_v2 = vld [vmem:[#allocation4 + $0x1f0] sm:$0xff]  ;;  %v306_v42 = vld [vmem:[#allocation4 + $0x200] sm:$0xff] }
 0x190   :  { %v9597_v44 = vpack.c.bf16 %v310_v54, %v306_v42  ;;  %v314_v54 = vld [vmem:[#allocation4 + $0x240] sm:$0xff] }
 0x191   :  { %v318_v42 = vld [vmem:[#allocation4 + $0x260] sm:$0xff] }
 0x192   :  { %6410 = vmatpush1.bf16.msra.mxu0 %v9573_v55  ;;  %6474 = vmatpush1.bf16.msra.mxu1 %v9575_v41  ;;  %v9589_v55 = vpack.c.bf16 %v304_v2, %v300_v53  ;;  %v307_v41 = vld [vmem:[#allocation4 + $0x208] sm:$0xff]  ;;  %12172 = vst [vmem:[#allocation112_spill] sm:$0xff] %v9597_v44 }
 0x193   :  { %6412 = vmatprep.subr.bf16.mxu0 %v9581_v61  ;;  %6476 = vmatprep.subr.bf16.mxu1 %v9583_v9  ;;  %v9593_v8 = vpack.c.bf16 %v311_v10, %v307_v41  ;;  %v9595_v61 = vpack.c.bf16 %v313_v62, %v309_v1  ;;  %v312_v9 = vld [vmem:[#allocation4 + $0x230] sm:$0xff]  ;;  %v315_v53 = vld [vmem:[#allocation4 + $0x248] sm:$0xff]  ;;  %v317_v10 = vld [vmem:[#allocation4 + $0x258] sm:$0xff] }
 0x194   :  { %12169 = vst [vmem:[#allocation109_spill] sm:$0xff] %v9589_v55  ;;  %v9600_v2 = vpack.c.bf16 %v312_v9, %v308_v60  ;;  %v319_v41 = vld [vmem:[#allocation4 + $0x268] sm:$0xff]  ;;  %v321_v1 = vld [vmem:[#allocation4 + $0x278] sm:$0xff]  ;;  %v316_v9 = vld [vmem:[#allocation4 + $0x250] sm:$0xff] }
 0x195   :  { %12170 = vst [vmem:[#allocation110_spill] sm:$0xff] %v9593_v8  ;;  %12171 = vst [vmem:[#allocation111_spill] sm:$0xff] %v9595_v61  ;;  %v9607_v62 = vpack.c.bf16 %v321_v1, %v317_v10  ;;  %v320_v60 = vld [vmem:[#allocation4 + $0x270] sm:$0xff]  ;;  %v329_v10 = vld [vmem:[#allocation4 + $0x2b8] sm:$0xff] }
 0x196   :  { %6414 = vmatpush1.bf16.msra.mxu0 %v9586_v45  ;;  %6478 = vmatpush1.bf16.msra.mxu1 %v9589_v55  ;;  %12173 = vst [vmem:[#allocation113_spill] sm:$0xff] %v9600_v2  ;;  %v9605_v55 = vpack.c.bf16 %v319_v41, %v315_v53  ;;  %v9609_v45 = vpack.c.bf16 %v318_v42, %v314_v54  ;;  %v327_v53 = vld [vmem:[#allocation4 + $0x2a8] sm:$0xff]  ;;  %v325_v41 = vld [vmem:[#allocation4 + $0x298] sm:$0xff]  ;;  %v322_v1 = vld [vmem:[#allocation4 + $0x280] sm:$0xff] }
 0x197   :  { %6416 = vmatprep.subr.bf16.mxu0 %v9593_v8  ;;  %6480 = vmatprep.subr.bf16.mxu1 %v9595_v61  ;;  %12175 = vst [vmem:[#allocation115_spill] sm:$0xff] %v9607_v62  ;;  %v9612_v61 = vpack.c.bf16 %v320_v60, %v316_v9  ;;  %v326_v54 = vld [vmem:[#allocation4 + $0x2a0] sm:$0xff]  ;;  %v9619_v42 = vpack.c.bf16 %v329_v10, %v325_v41  ;;  %v324_v9 = vld [vmem:[#allocation4 + $0x290] sm:$0xff]  ;;  %v337_v41 = vld [vmem:[#allocation4 + $0x2f8] sm:$0xff] }
 0x198   :  { %12174 = vst [vmem:[#allocation114_spill] sm:$0xff] %v9605_v55  ;;  %12176 = vst [vmem:[#allocation116_spill] sm:$0xff] %v9609_v45  ;;  %v9621_v8 = vpack.c.bf16 %v326_v54, %v322_v1  ;;  %v328_v60 = vld [vmem:[#allocation4 + $0x2b0] sm:$0xff]  ;;  %v330_v10 = vld [vmem:[#allocation4 + $0x2c0] sm:$0xff] }
 0x199   :  { %12177 = vst [vmem:[#allocation117_spill] sm:$0xff] %v9612_v61  ;;  %12179 = vst [vmem:[#allocation119_spill] sm:$0xff] %v9619_v42  ;;  %v334_v1 = vld [vmem:[#allocation4 + $0x2e0] sm:$0xff] }
 0x19a   :  { %6418 = vmatpush1.bf16.msra.mxu0 %v9597_v44  ;;  %6482 = vmatpush1.bf16.msra.mxu1 %v9600_v2  ;;  %v323_v2 = vld [vmem:[#allocation4 + $0x288] sm:$0xff]  ;;  %12180 = vst [vmem:[#allocation120_spill] sm:$0xff] %v9621_v8 }
 0x19b   :  { %6420 = vmatprep.subr.bf16.mxu0 %v9605_v55  ;;  %6484 = vmatprep.subr.bf16.mxu1 %v9607_v62  ;;  %v9617_v44 = vpack.c.bf16 %v327_v53, %v323_v2  ;;  %v9624_v62 = vpack.c.bf16 %v328_v60, %v324_v9  ;;  %v335_v2 = vld [vmem:[#allocation4 + $0x2e8] sm:$0xff]  ;;  %v333_v53 = vld [vmem:[#allocation4 + $0x2d8] sm:$0xff]  ;;  %v9633_v55 = vpack.c.bf16 %v334_v1, %v330_v10  ;;  %v332_v9 = vld [vmem:[#allocation4 + $0x2d0] sm:$0xff] }
 0x19c   :  { %v9631_v54 = vpack.c.bf16 %v337_v41, %v333_v53  ;;  %v336_v60 = vld [vmem:[#allocation4 + $0x2f0] sm:$0xff]  ;;  %v345_v53 = vld [vmem:[#allocation4 + $0x338] sm:$0xff]  ;;  %v338_v41 = vld [vmem:[#allocation4 + $0x300] sm:$0xff] }
 0x19d   :  { %12178 = vst [vmem:[#allocation118_spill] sm:$0xff] %v9617_v44  ;;  %12181 = vst [vmem:[#allocation121_spill] sm:$0xff] %v9624_v62  ;;  %v342_v10 = vld [vmem:[#allocation4 + $0x320] sm:$0xff] }
 0x19e   :  { %6422 = vmatpush1.bf16.msra.mxu0 %v9609_v45  ;;  %6486 = vmatpush1.bf16.msra.mxu1 %v9612_v61  ;;  %v331_v61 = vld [vmem:[#allocation4 + $0x2c8] sm:$0xff]  ;;  %12183 = vst [vmem:[#allocation123_spill] sm:$0xff] %v9631_v54  ;;  %12184 = vst [vmem:[#allocation124_spill] sm:$0xff] %v9633_v55 }
 0x19f   :  { %6424 = vmatprep.subr.bf16.mxu0 %v9617_v44  ;;  %6488 = vmatprep.subr.bf16.mxu1 %v9619_v42  ;;  %v9629_v45 = vpack.c.bf16 %v335_v2, %v331_v61  ;;  %v9636_v42 = vpack.c.bf16 %v336_v60, %v332_v9  ;;  %v343_v61 = vld [vmem:[#allocation4 + $0x328] sm:$0xff]  ;;  %v341_v2 = vld [vmem:[#allocation4 + $0x318] sm:$0xff]  ;;  %v9645_v44 = vpack.c.bf16 %v342_v10, %v338_v41  ;;  %v340_v9 = vld [vmem:[#allocation4 + $0x310] sm:$0xff] }
 0x1a0   :  { %v9643_v1 = vpack.c.bf16 %v345_v53, %v341_v2  ;;  %v344_v60 = vld [vmem:[#allocation4 + $0x330] sm:$0xff]  ;;  %v353_v2 = vld [vmem:[#allocation4 + $0x378] sm:$0xff]  ;;  %v346_v53 = vld [vmem:[#allocation4 + $0x340] sm:$0xff] }
 0x1a1   :  { %12182 = vst [vmem:[#allocation122_spill] sm:$0xff] %v9629_v45  ;;  %12185 = vst [vmem:[#allocation125_spill] sm:$0xff] %v9636_v42  ;;  %v350_v41 = vld [vmem:[#allocation4 + $0x360] sm:$0xff] }
 0x1a2   :  { %6426 = vmatpush1.bf16.msra.mxu0 %v9621_v8  ;;  %6490 = vmatpush1.bf16.msra.mxu1 %v9624_v62  ;;  %v339_v62 = vld [vmem:[#allocation4 + $0x308] sm:$0xff]  ;;  %12187 = vst [vmem:[#allocation127_spill] sm:$0xff] %v9643_v1  ;;  %12188 = vst [vmem:[#allocation128_spill] sm:$0xff] %v9645_v44 }
 0x1a3   :  { %6428 = vmatprep.subr.bf16.mxu0 %v9629_v45  ;;  %6492 = vmatprep.subr.bf16.mxu1 %v9631_v54  ;;  %v9641_v8 = vpack.c.bf16 %v343_v61, %v339_v62  ;;  %v9648_v54 = vpack.c.bf16 %v344_v60, %v340_v9  ;;  %v351_v62 = vld [vmem:[#allocation4 + $0x368] sm:$0xff]  ;;  %v349_v61 = vld [vmem:[#allocation4 + $0x358] sm:$0xff]  ;;  %v9657_v45 = vpack.c.bf16 %v350_v41, %v346_v53  ;;  %v348_v9 = vld [vmem:[#allocation4 + $0x350] sm:$0xff] }
 0x1a4   :  { %v9655_v10 = vpack.c.bf16 %v353_v2, %v349_v61  ;;  %v352_v60 = vld [vmem:[#allocation4 + $0x370] sm:$0xff]  ;;  %v361_v61 = vld [vmem:[#allocation4 + $0x3b8] sm:$0xff]  ;;  %v354_v2 = vld [vmem:[#allocation4 + $0x380] sm:$0xff] }
 0x1a5   :  { %12186 = vst [vmem:[#allocation126_spill] sm:$0xff] %v9641_v8  ;;  %12189 = vst [vmem:[#allocation129_spill] sm:$0xff] %v9648_v54  ;;  %v358_v53 = vld [vmem:[#allocation4 + $0x3a0] sm:$0xff] }
 0x1a6   :  { %6430 = vmatpush1.bf16.msra.mxu0 %v9633_v55  ;;  %6494 = vmatpush1.bf16.msra.mxu1 %v9636_v42  ;;  %v347_v42 = vld [vmem:[#allocation4 + $0x348] sm:$0xff]  ;;  %12191 = vst [vmem:[#allocation131_spill] sm:$0xff] %v9655_v10  ;;  %12192 = vst [vmem:[#allocation132_spill] sm:$0xff] %v9657_v45 }
 0x1a7   :  { %6432 = vmatprep.subr.bf16.mxu0 %v9641_v8  ;;  %6496 = vmatprep.subr.bf16.mxu1 %v9643_v1  ;;  %v9653_v55 = vpack.c.bf16 %v351_v62, %v347_v42  ;;  %v9660_v1 = vpack.c.bf16 %v352_v60, %v348_v9  ;;  %v359_v42 = vld [vmem:[#allocation4 + $0x3a8] sm:$0xff]  ;;  %v357_v62 = vld [vmem:[#allocation4 + $0x398] sm:$0xff]  ;;  %v9669_v8 = vpack.c.bf16 %v358_v53, %v354_v2  ;;  %v356_v9 = vld [vmem:[#allocation4 + $0x390] sm:$0xff] }
 0x1a8   :  { %v9667_v41 = vpack.c.bf16 %v361_v61, %v357_v62  ;;  %v360_v60 = vld [vmem:[#allocation4 + $0x3b0] sm:$0xff]  ;;  %v369_v62 = vld [vmem:[#allocation4 + $0x3f8] sm:$0xff]  ;;  %v362_v61 = vld [vmem:[#allocation4 + $0x3c0] sm:$0xff] }
 0x1a9   :  { %12190 = vst [vmem:[#allocation130_spill] sm:$0xff] %v9653_v55  ;;  %12193 = vst [vmem:[#allocation133_spill] sm:$0xff] %v9660_v1  ;;  %v366_v2 = vld [vmem:[#allocation4 + $0x3e0] sm:$0xff] }
 0x1aa   :  { %6434 = vmatpush1.bf16.msra.mxu0 %v9645_v44  ;;  %6498 = vmatpush1.bf16.msra.mxu1 %v9648_v54  ;;  %v355_v54 = vld [vmem:[#allocation4 + $0x388] sm:$0xff]  ;;  %12195 = vst [vmem:[#allocation135_spill] sm:$0xff] %v9667_v41  ;;  %12196 = vst [vmem:[#allocation136_spill] sm:$0xff] %v9669_v8 }
 0x1ab   :  { %6436 = vmatprep.subr.bf16.mxu0 %v9653_v55  ;;  %6500 = vmatprep.subr.bf16.mxu1 %v9655_v10  ;;  %v9665_v44 = vpack.c.bf16 %v359_v42, %v355_v54  ;;  %v9672_v10 = vpack.c.bf16 %v360_v60, %v356_v9  ;;  %v367_v54 = vld [vmem:[#allocation4 + $0x3e8] sm:$0xff]  ;;  %v365_v42 = vld [vmem:[#allocation4 + $0x3d8] sm:$0xff]  ;;  %v9681_v55 = vpack.c.bf16 %v366_v2, %v362_v61  ;;  %v364_v9 = vld [vmem:[#allocation4 + $0x3d0] sm:$0xff] }
 0x1ac   :  { %v9679_v53 = vpack.c.bf16 %v369_v62, %v365_v42  ;;  %v368_v60 = vld [vmem:[#allocation4 + $0x3f0] sm:$0xff]  ;;  %v598_v42 = vld [vmem:[%s11676_s2] sm:$0xf] }
 0x1ad   :  { %12194 = vst [vmem:[#allocation134_spill] sm:$0xff] %v9665_v44  ;;  %12197 = vst [vmem:[#allocation137_spill] sm:$0xff] %v9672_v10 }
 0x1ae   :  { %6438 = vmatpush1.bf16.msra.mxu0 %v9657_v45  ;;  %6502 = vmatpush1.bf16.msra.mxu1 %v9660_v1  ;;  %v363_v1 = vld [vmem:[#allocation4 + $0x3c8] sm:$0xff]  ;;  %12199 = vst [vmem:[#allocation139_spill] sm:$0xff] %v9679_v53  ;;  %12200 = vst [vmem:[#allocation140_spill] sm:$0xff] %v9681_v55 }
 0x1af   :  { %6440 = vmatprep.subr.bf16.mxu0 %v9665_v44  ;;  %6504 = vmatprep.subr.bf16.mxu1 %v9667_v41  ;;  %v9677_v45 = vpack.c.bf16 %v367_v54, %v363_v1  ;;  %v9684_v41 = vpack.c.bf16 %v368_v60, %v364_v9  ;;  %v12202_v1 = vlaneseq }
 0x1b1   :  { %12198 = vst [vmem:[#allocation138_spill] sm:$0xff] %v9677_v45  ;;  %12201 = vst [vmem:[#allocation141_spill] sm:$0xff] %v9684_v41  ;;  %v601_v54 = vshrl.u32 %v12202_v1, 7 }
 0x1b2   :  { %6442 = vmatpush1.bf16.msra.mxu0 %v9669_v8  ;;  %6506 = vmatpush1.bf16.msra.mxu1 %v9672_v10 }
 0x1b3   :  { %6444 = vmatprep.subr.bf16.mxu0 %v9677_v45  ;;  %6508 = vmatprep.subr.bf16.mxu1 %v9679_v53  ;;  %v9690_v10 = vsub.s32 0, %v601_v54  ;;  %v9695_v62 = vsub.s32 1, %v601_v54  ;;  %v9697_v61 = vsub.s32 2, %v601_v54  ;;  %v9711_v58 = vsub.s32 3, %v601_v54 }
 0x1b5   :  { %v9700_v2 = vrot.slane %v598_v42, %v9690_v10  ;;  %v9703_v9 = vrot.slane %v598_v42, %v9695_v62  ;;  %v9706_v60 = vrot.slane %v598_v42, %v9697_v61  ;;  %v9714_v12 = vrot.slane %v598_v42, %v9711_v58 }
 0x1b6   :  { %6446 = vmatpush1.bf16.msra.mxu0 %v9681_v55  ;;  %6510 = vmatpush1.bf16.msra.mxu1 %v9684_v41 }
 0x1b7   :  { %12203 = vst [vmem:[#allocation142_spill] sm:$0xff] %v9700_v2  ;;  %12204 = vst [vmem:[#allocation143_spill] sm:$0xff] %v9703_v9 }
 0x1b8   :  { %12205 = vst [vmem:[#allocation144_spill] sm:$0xff] %v9706_v60  ;;  %12206 = vst [vmem:[#allocation145_spill] sm:$0xff] %v9714_v12 }
 0x24c   :  { %v815_v1 = vpop.f32.mrb[0].mxu0  ;;  %v886_v41 = vpop.f32.mrb[0].mxu1 }
 0x24d   :  { %v816_v55 = vadd.f32 %v815_v1, %v9700_v2  ;;  %v817_v53 = vpop.f32.mrb[1].mxu0  ;;  %v888_v45 = vpop.f32.mrb[1].mxu1  ;;  %v887_v44 = vadd.f32 %v886_v41, %v9706_v60 }
 0x24e   :  { %v818_v8 = vadd.f32 %v817_v53, %v9703_v9  ;;  %v889_v46 = vadd.f32 %v888_v45, %v9714_v12  ;;  %v373_v45 = vld [vmem:[%s11679_s5 + $0x18] sm:$0xff] }
 0x24f   :  { %8570 = vtanh.f32 %v816_v55 }
 0x250   :  { %8572 = vtanh.f32 %v818_v8 }
 0x251   :  { %8574 = vtanh.f32 %v887_v44 }
 0x252   :  { %8576 = vtanh.f32 %v889_v46  ;;  %v372_v46 = vld [vmem:[%s11679_s5 + $0x10] sm:$0xff] }
 0x259   :  { %v8571_v37 = vpop.eup %8570 }
 0x25a   :  { %v895_v17 = vadd.f32 1.0, %v8571_v37  ;;  %v8573_v28 = vpop.eup %8572  ;;  %v11786_v37 = vmov 0.0|0.0  }
 0x25b   :  { %v897_v2 = vadd.f32 1.0, %v8573_v28  ;;  %v8575_v59 = vpop.eup %8574  ;;  %v371_v28 = vld [vmem:[%s11679_s5 + $0x8] sm:$0xff]  ;;  %6511 = vmatprep.subr.bf16.mxu0 %v11786_v37 }
 0x25c   :  { %v896_v1 = vmul.f32 0.5, %v895_v17  ;;  %v8577_v8 = vpop.eup %8576 }
 0x25d   :  { %v898_v53 = vmul.f32 0.5, %v897_v2  ;;  %v899_v44 = vadd.f32 1.0, %v8577_v8  ;;  %v9742_v2 = vpack.c.bf16 %v373_v45, %v372_v46  ;;  %v377_v8 = vld [vmem:[%s11679_s5 + $0x38] sm:$0xff] }
 0x25e   :  { %v902_v55 = vmul.f32 %v8575_v59, %v896_v1  ;;  %v370_v59 = vld [vmem:[%s11679_s5] sm:$0xff]  ;;  %v375_v1 = vld [vmem:[%s11679_s5 + $0x28] sm:$0xff]  ;;  %v381_v46 = vld [vmem:[%s11679_s5 + $0x58] sm:$0xff] }
 0x25f   :  { %v901_v9 = vmul.f32 0.0, %v898_v53  ;;  %v900_v54 = vmul.f32 0.5, %v899_v44  ;;  %v9731_v17 = vpack.c.bf16 %v371_v28, %v370_v59  ;;  %12210 = vst [vmem:[#allocation149_spill] sm:$0xff] %v9742_v2  ;;  %v380_v28 = vld [vmem:[%s11679_s5 + $0x50] sm:$0xff] }
 0x260   :  { %v9782_v45 = vpack.c.bf16 %v381_v46, %v380_v28  ;;  %v620_v28 = vld [vmem:[%s11678_s4] sm:$0xf] }
 0x261   :  { %v9717_v41 = vadd.f32 %v902_v55, %v901_v9   ;;  %12209 = vst [vmem:[#allocation148_spill] sm:$0xff] %v9731_v17  ;;  %v374_v9 = vld [vmem:[%s11679_s5 + $0x20] sm:$0xff]  ;;  %v376_v55 = vld [vmem:[%s11679_s5 + $0x30] sm:$0xff]  ;;  %v9811_v46 = vrot.slane %v620_v28, %v9690_v10 }
 0x262   :  { %v9752_v53 = vpack.c.bf16 %v375_v1, %v374_v9  ;;  %v9762_v44 = vpack.c.bf16 %v377_v8, %v376_v55  ;;  %12214 = vst [vmem:[#allocation153_spill] sm:$0xff] %v9782_v45  ;;  %v382_v9 = vld [vmem:[%s11679_s5 + $0x60] sm:$0xff]  ;;  %v383_v1 = vld [vmem:[%s11679_s5 + $0x68] sm:$0xff]  ;;  %v384_v8 = vld [vmem:[%s11679_s5 + $0x70] sm:$0xff] }
 0x263   :  { %12207 = vst [vmem:[#allocation146_spill] sm:$0xff] %v9717_v41  ;;  %8578 = vtanh.f32 %v9717_v41  ;;  %v9792_v55 = vpack.c.bf16 %v383_v1, %v382_v9  ;;  %12217 = vst [vmem:[#allocation156_spill] sm:$0xff] %v9811_v46  ;;  %v9814_v9 = vrot.slane %v620_v28, %v9695_v62  ;;  %v9817_v1 = vrot.slane %v620_v28, %v9697_v61 }
 0x264   :  { %12211 = vst [vmem:[#allocation150_spill] sm:$0xff] %v9752_v53  ;;  %12212 = vst [vmem:[#allocation151_spill] sm:$0xff] %v9762_v44 }
 0x265   :  { %12215 = vst [vmem:[#allocation154_spill] sm:$0xff] %v9792_v55  ;;  %12218 = vst [vmem:[#allocation157_spill] sm:$0xff] %v9814_v9 }
 0x266   :  { %12219 = vst [vmem:[#allocation158_spill] sm:$0xff] %v9817_v1 }
 0x26d   :  { %v8579_v42 = vpop.eup %8578 }
 0x26e   :  { %v9720_v60 = vmul.f32 %v8579_v42, %v900_v54   ;;  %v378_v54 = vld [vmem:[%s11679_s5 + $0x40] sm:$0xff]  ;;  %v379_v42 = vld [vmem:[%s11679_s5 + $0x48] sm:$0xff] }
 0x26f   :  { %v9772_v59 = vpack.c.bf16 %v379_v42, %v378_v54  ;;  %v385_v54 = vld [vmem:[%s11679_s5 + $0x78] sm:$0xff] }
 0x270   :  { %12208 = vst [vmem:[#allocation147_spill] sm:$0xff] %v9720_v60  ;;  %971 = vmatmul.mubr.f32.vlgmr.msra.gmra.mrb[2].mxu0 %v9720_v60  ;;  %1042 = vmatmul.mubr.f32.vlgmr.msra.gmra.mrb[2].mxu1 %v9720_v60  ;;  %v9802_v42 = vpack.c.bf16 %v385_v54, %v384_v8 }
 0x271   :  { %1233 = vmatprep.mubr.f32.mxu1 %v12147_v18  ;;  %6513 = vmatpush3.bf16.msra.mxu0 %v9731_v17  ;;  %12213 = vst [vmem:[#allocation152_spill] sm:$0xff] %v9772_v59 }
 0x272   :  { %6514 = vmatprep.subr.bf16.mxu0 %v11786_v37  ;;  %12216 = vst [vmem:[#allocation155_spill] sm:$0xff] %v9802_v42  ;;  %6123 = vmatprep.mubr.msk.f32.mxu0 %vm9087_vm6, %v12147_v18 }
 0x275   :  { %6516 = vmatpush3.bf16.msra.mxu0 %v9742_v2 }
 0x276   :  { %6517 = vmatprep.subr.bf16.mxu0 %v11786_v37 }
 0x279   :  { %6519 = vmatpush3.bf16.msra.mxu0 %v9752_v53 }
 0x27a   :  { %6520 = vmatprep.subr.bf16.mxu0 %v11786_v37 }
 0x27d   :  { %6522 = vmatpush3.bf16.msra.mxu0 %v9762_v44  ;;  %v9823_v44 = vrot.slane %v620_v28, %v9711_v58 }
 0x27e   :  { %6523 = vmatprep.subr.bf16.mxu0 %v11786_v37 }
 0x27f   :  { %12220 = vst [vmem:[#allocation159_spill] sm:$0xff] %v9823_v44 }
 0x281   :  { %6525 = vmatpush3.bf16.msra.mxu0 %v9772_v59 }
 0x282   :  { %6526 = vmatprep.subr.bf16.mxu0 %v11786_v37 }
 0x285   :  { %6528 = vmatpush3.bf16.msra.mxu0 %v9782_v45 }
 0x286   :  { %6529 = vmatprep.subr.bf16.mxu0 %v11786_v37 }
 0x289   :  { %6531 = vmatpush3.bf16.msra.mxu0 %v9792_v55 }
 0x28a   :  { %6532 = vmatprep.subr.bf16.mxu0 %v11786_v37 }
 0x28d   :  { %6534 = vmatpush3.bf16.msra.mxu0 %v9802_v42 }
 0x343   :  { %v972_v8 = vpop.f32.mrb[2].mxu0  ;;  %v1043_v54 = vpop.f32.mrb[2].mxu1 }
 0x344   :  { %v973_v37 = vadd.f32 %v972_v8, %v9811_v46  ;;  %v974_v42 = vpop.f32.mrb[3].mxu0  ;;  %v1045_v55 = vpop.f32.mrb[3].mxu1  ;;  %v1044_v59 = vadd.f32 %v1043_v54, %v9817_v1 }
 0x345   :  { %v975_v45 = vadd.f32 %v974_v42, %v9814_v9  ;;  %v1046_v53 = vadd.f32 %v1045_v55, %v9823_v44 }
 0x346   :  { %8580 = vtanh.f32 %v973_v37 }
 0x347   :  { %8582 = vtanh.f32 %v975_v45 }
 0x348   :  { %8584 = vtanh.f32 %v1044_v59 }
 0x349   :  { %8586 = vtanh.f32 %v1046_v53 }
 0x350   :  { %v8581_v2 = vpop.eup %8580 }
 0x351   :  { %v1052_v17 = vadd.f32 1.0, %v8581_v2  ;;  %v8583_v12 = vpop.eup %8582 }
 0x352   :  { %v1054_v26 = vadd.f32 1.0, %v8583_v12  ;;  %v8585_v8 = vpop.eup %8584 }
 0x353   :  { %v1053_v27 = vmul.f32 0.5, %v1052_v17  ;;  %v8587_v59 = vpop.eup %8586 }
 0x354   :  { %v1055_v46 = vmul.f32 0.5, %v1054_v26  ;;  %v1056_v45 = vadd.f32 1.0, %v8587_v59  ;;  %v9836_v26 = vld [vmem:[%s11680_s6 + $0x8] sm:$0x7f] }
 0x355   :  { %v1059_v24 = vmul.f32 %v8585_v8, %v1053_v27  ;;  %12223 = vst [vmem:[#allocation162_spill] sm:$0xff] %v9836_v26  ;;  %5981 = vmatprep.subr.msk.mxu1 %vm1156_vm7, %v9836_v26 }
 0x356   :  { %v1058_v42 = vmul.f32 0.0, %v1055_v46  ;;  %v1057_v28 = vmul.f32 0.5, %v1056_v45 }
 0x358   :  { %v9826_v37 = vadd.f32 %v1059_v24, %v1058_v42   ;;  %v9841_v24 = vld [vmem:[%s11680_s6] sm:$0x7f] }
 0x359   :  { %12224 = vst [vmem:[#allocation163_spill] sm:$0xff] %v9841_v24  ;;  %5982 = vmatpush1.msk.msra.mxu1 %vm1156_vm7, %v9841_v24  ;;  %v435_v24 = vld [vmem:[#allocation6 + $0x168] sm:$0xff] }
 0x35a   :  { %12221 = vst [vmem:[#allocation160_spill] sm:$0xff] %v9826_v37  ;;  %8588 = vtanh.f32 %v9826_v37 }
 0x364   :  { %v8589_v54 = vpop.eup %8588 }
 0x365   :  { %v9829_v1 = vmul.f32 %v8589_v54, %v1057_v28  }
 0x367   :  { %12222 = vst [vmem:[#allocation161_spill] sm:$0xff] %v9829_v1  ;;  %6124 = vmatmul.mubr.f32.vlgmr.msra.gmra.mrb[4].mxu0 %v9829_v1 }
 0x368   :  { %2228 = vmatprep.mubr.f32.mxu0 %v12147_v18 }
 0x43a   :  { %v1129_v27 = vpop.f32.mrb[4].mxu0 }
 0x43b   :  { %8590 = vtanh.f32 %v1129_v27  ;;  %v6125_v12 = vpop.f32.mrb[5].mxu0  ;;  %v9853_v27 = vld [vmem:[%s11680_s6 + $0x18] sm:$0x7f] }
 0x43c   :  { %12225 = vst [vmem:[#allocation164_spill] sm:$0xff] %v9853_v27  ;;  %5988 = vmatprep.subr.msk.mxu1 %vm1156_vm7, %v9853_v27  ;;  %v395_v12 = vld [vmem:[#allocation6 + $0x28] sm:$0xff] }
 0x445   :  { %v8591_v17 = vpop.eup %8590 }
 0x446   :  { %v1134_v2 = vadd.f32 1.0, %v8591_v17 }
 0x448   :  { %v1135_v53 = vmul.f32 0.5, %v1134_v2 }
 0x44a   :  { %v1137_v55 = vsub.f32 1.0, %v1135_v53  ;;  %v1136_v46 = vmul.f32 %v1135_v53, %v9472_v35  ;;  %v391_v35 = vld [vmem:[#allocation6 + $0x8] sm:$0xff]  ;;  %v394_v53 = vld [vmem:[#allocation6 + $0x20] sm:$0xff] }
 0x44c   :  { %v1138_v8 = vmul.f32 %v1137_v55, %v9494_v36  ;;  %v399_v55 = vld [vmem:[#allocation6 + $0x48] sm:$0xff] }
 0x44e   :  { %v1139_v42 = vadd.f32 %v1138_v8, %v1136_v46  ;;  %v403_v46 = vld [vmem:[#allocation6 + $0x68] sm:$0xff] }
 0x450   :  { %v1140_v59 = vadd.f32 %v1139_v42, %v9461_v19  ;;  %v9897_v42 = vpack.c.bf16 %v403_v46, %v399_v55  ;;  %v419_v55 = vld [vmem:[#allocation6 + $0xe8] sm:$0xff] }
 0x452   :  { %v1141_v45 = vadd.f32 3.1415927, %v1140_v59  ;;  %12229 = vst [vmem:[#allocation168_spill] sm:$0xff] %v9897_v42 }
 0x454   :  { %v1142_v28 = vmul.f32 0.15915494, %v1141_v45  ;;  %v402_v45 = vld [vmem:[#allocation6 + $0x60] sm:$0xff] }
 0x456   :  { %v1143_v54 = vfloor.f32 %v1142_v28  ;;  %v407_v28 = vld [vmem:[#allocation6 + $0x88] sm:$0xff] }
 0x458   :  { %v1144_v44 = vmul.f32 6.2831855, %v1143_v54  ;;  %v411_v54 = vld [vmem:[#allocation6 + $0xa8] sm:$0xff] }
 0x45a   :  { %v1145_v9 = vsub.f32 %v1140_v59, %v1144_v44  ;;  %v9873_v44 = vld [vmem:[%s11680_s6 + $0x10] sm:$0x7f] }
 0x45b   :  { %12226 = vst [vmem:[#allocation165_spill] sm:$0xff] %v9873_v44 }
 0x45c   :  { %1148 = vperm.xlu1 %8569, %v1145_v9   ;;  %v9875_v9 = vpack.c.bf16 %v395_v12, %v391_v35  ;;  %v9906_v12 = vpack.c.bf16 %v411_v54, %v407_v28  ;;  %v418_v28 = vld [vmem:[#allocation6 + $0xe0] sm:$0xff]  ;;  %v423_v54 = vld [vmem:[#allocation6 + $0x108] sm:$0xff] }
 0x45e   :  { %12227 = vst [vmem:[#allocation166_spill] sm:$0xff] %v9875_v9  ;;  %12231 = vst [vmem:[#allocation170_spill] sm:$0xff] %v9906_v12 }
 0x4db   :  { %v1149_v36 = vpop.permute.xlu1 %1148 }
 0x4dc   :  { %v9859_v17 = vsel %vm688_vm0, %v1149_v36, %v1140_v59   ;;  %v398_v59 = vld [vmem:[#allocation6 + $0x40] sm:$0xff] }
 0x4dd   :  { %v9863_v2 = vsub.f32 %v9859_v17, %v9461_v19   ;;  %3296 = vst.msk [vmem:[%s11688_s14] sm:$0xff] %vm743_vm3, %v9859_v17  ;;  %v390_v19 = vld [vmem:[#allocation6] sm:$0xff]  ;;  %v9903_v35 = vpack.c.bf16 %v402_v45, %v398_v59 }
 0x4de   :  { %v9895_v8 = vpack.c.bf16 %v394_v53, %v390_v19  ;;  %v406_v36 = vld [vmem:[#allocation6 + $0x80] sm:$0xff]  ;;  %v415_v53 = vld [vmem:[#allocation6 + $0xc8] sm:$0xff] }
 0x4df   :  { %5983 = vmatmul.mubr.msk.f32.vlgmr.msra.gmra.mrb[4].mxu1 %vm743_vm3, %v9863_v2  ;;  %12230 = vst [vmem:[#allocation169_spill] sm:$0xff] %v9903_v35  ;;  %v410_v19 = vld [vmem:[#allocation6 + $0xa0] sm:$0xff]  ;;  %v9915_v59 = vpack.c.bf16 %v419_v55, %v415_v53  ;;  %v431_v55 = vld [vmem:[#allocation6 + $0x148] sm:$0xff] }
 0x4e0   :  { %5989 = vmatpush1.msk.msra.mxu1 %vm1156_vm7, %v9873_v44  ;;  %1239 = vmatprep.mubr.f32.mxu1 %v12147_v18  ;;  %12228 = vst [vmem:[#allocation167_spill] sm:$0xff] %v9895_v8  ;;  %v9912_v46 = vpack.c.bf16 %v410_v19, %v406_v36  ;;  %v414_v45 = vld [vmem:[#allocation6 + $0xc0] sm:$0xff]  ;;  %v427_v44 = vld [vmem:[#allocation6 + $0x128] sm:$0xff] }
 0x4e1   :  { %6536 = vmatprep.subr.bf16.mxu1 %v9875_v9  ;;  %12233 = vst [vmem:[#allocation172_spill] sm:$0xff] %v9915_v59  ;;  %v9921_v27 = vpack.c.bf16 %v418_v28, %v414_v45  ;;  %v9924_v36 = vpack.c.bf16 %v427_v44, %v423_v54  ;;  %v422_v19 = vld [vmem:[#allocation6 + $0x100] sm:$0xff]  ;;  %v9933_v45 = vpack.c.bf16 %v435_v24, %v431_v55  ;;  %v439_v54 = vld [vmem:[#allocation6 + $0x188] sm:$0xff] }
 0x4e2   :  { %12232 = vst [vmem:[#allocation171_spill] sm:$0xff] %v9912_v46  ;;  %v426_v53 = vld [vmem:[#allocation6 + $0x120] sm:$0xff]  ;;  %v447_v55 = vld [vmem:[#allocation6 + $0x1c8] sm:$0xff] }
 0x4e3   :  { %5984 = vmatmul.mubr.msk.f32.gmra.mrb[6].mxu1 %vm743_vm3, %v9863_v2  ;;  %12234 = vst [vmem:[#allocation173_spill] sm:$0xff] %v9921_v27  ;;  %12235 = vst [vmem:[#allocation174_spill] sm:$0xff] %v9924_v36  ;;  %v9930_v26 = vpack.c.bf16 %v426_v53, %v422_v19  ;;  %v430_v28 = vld [vmem:[#allocation6 + $0x140] sm:$0xff]  ;;  %v9942_v19 = vpack.c.bf16 %v443_v11, %v439_v54  ;;  %v9948_v57 = vpack.c.bf16 %v451_v5, %v447_v55 }
 0x4e4   :  { %1245 = vmatprep.mubr.f32.mxu1 %v12147_v18  ;;  %12237 = vst [vmem:[#allocation176_spill] sm:$0xff] %v9933_v45  ;;  %v434_v44 = vld [vmem:[#allocation6 + $0x160] sm:$0xff]  ;;  %v9954_v54 = vpack.c.bf16 %v397_v49, %v393_v50  ;;  %v9957_v5 = vpack.c.bf16 %v396_v40, %v392_v48  ;;  %v9964_v49 = vpack.c.bf16 %v404_v32, %v400_v33  ;;  %v408_v48 = vld [vmem:[#allocation6 + $0x90] sm:$0xff] }
 0x4e5   :  { %12236 = vst [vmem:[#allocation175_spill] sm:$0xff] %v9930_v26  ;;  %v9938_v6 = vpack.c.bf16 %v434_v44, %v430_v28  ;;  %12239 = vst [vmem:[#allocation178_spill] sm:$0xff] %v9942_v19  ;;  %v438_v53 = vld [vmem:[#allocation6 + $0x180] sm:$0xff]  ;;  %v412_v50 = vld [vmem:[#allocation6 + $0xb0] sm:$0xff] }
 0x4e6   :  { %v442_v24 = vld [vmem:[#allocation6 + $0x1a0] sm:$0xff]  ;;  %12241 = vst [vmem:[#allocation180_spill] sm:$0xff] %v9948_v57  ;;  %12243 = vst [vmem:[#allocation182_spill] sm:$0xff] %v9954_v54  ;;  %v9971_v31 = vpack.c.bf16 %v412_v50, %v408_v48  ;;  %v416_v32 = vld [vmem:[#allocation6 + $0xd0] sm:$0xff] }
 0x4e7   :  { %5985 = vmatmul.mubr.msk.f32.gmra.mrb[8].mxu1 %vm743_vm3, %v9863_v2  ;;  %12238 = vst [vmem:[#allocation177_spill] sm:$0xff] %v9938_v6  ;;  %v9945_v4 = vpack.c.bf16 %v442_v24, %v438_v53  ;;  %v446_v28 = vld [vmem:[#allocation6 + $0x1c0] sm:$0xff]  ;;  %v401_v53 = vld [vmem:[#allocation6 + $0x58] sm:$0xff]  ;;  %12244 = vst [vmem:[#allocation183_spill] sm:$0xff] %v9957_v5 }
 0x4e8   :  { %1251 = vmatprep.mubr.f32.mxu1 %v12147_v18  ;;  %v450_v44 = vld [vmem:[#allocation6 + $0x1e0] sm:$0xff]  ;;  %v405_v24 = vld [vmem:[#allocation6 + $0x78] sm:$0xff]  ;;  %12246 = vst [vmem:[#allocation185_spill] sm:$0xff] %v9964_v49  ;;  %12248 = vst [vmem:[#allocation187_spill] sm:$0xff] %v9971_v31 }
 0x4e9   :  { %12240 = vst [vmem:[#allocation179_spill] sm:$0xff] %v9945_v4  ;;  %v9951_v11 = vpack.c.bf16 %v450_v44, %v446_v28  ;;  %v9960_v55 = vpack.c.bf16 %v405_v24, %v401_v53  ;;  %v409_v28 = vld [vmem:[#allocation6 + $0x98] sm:$0xff]  ;;  %v420_v33 = vld [vmem:[#allocation6 + $0xf0] sm:$0xff] }
 0x4ea   :  { %v413_v44 = vld [vmem:[#allocation6 + $0xb8] sm:$0xff] }
 0x4eb   :  { %5986 = vmatmul.mubr.msk.f32.gmra.mrb[10].mxu1 %vm743_vm3, %v9863_v2  ;;  %12242 = vst [vmem:[#allocation181_spill] sm:$0xff] %v9951_v11  ;;  %12245 = vst [vmem:[#allocation184_spill] sm:$0xff] %v9960_v55  ;;  %v9968_v40 = vpack.c.bf16 %v413_v44, %v409_v28  ;;  %v417_v53 = vld [vmem:[#allocation6 + $0xd8] sm:$0xff]  ;;  %v9977_v28 = vpack.c.bf16 %v420_v33, %v416_v32  ;;  %v9980_v44 = vpack.c.bf16 %v429_v14, %v425_v15 }
 0x4ec   :  { %1257 = vmatprep.mubr.f32.mxu1 %v12147_v18  ;;  %v421_v24 = vld [vmem:[#allocation6 + $0xf8] sm:$0xff]  ;;  %v9989_v14 = vpack.c.bf16 %v436_v0, %v432_v3  ;;  %v10001_v0 = vpack.c.bf16 %v452_v51, %v448_v52  ;;  %v455_v51 = vld [vmem:[#allocation7 + $0x8] sm:$0xff]  ;;  %v458_v3 = vld [vmem:[#allocation7 + $0x20] sm:$0xff] }
 0x4ed   :  { %12247 = vst [vmem:[#allocation186_spill] sm:$0xff] %v9968_v40  ;;  %v9974_v22 = vpack.c.bf16 %v421_v24, %v417_v53  ;;  %12250 = vst [vmem:[#allocation189_spill] sm:$0xff] %v9977_v28  ;;  %v433_v48 = vld [vmem:[#allocation6 + $0x158] sm:$0xff]  ;;  %v9983_v53 = vpack.c.bf16 %v428_v7, %v424_v13  ;;  %v459_v52 = vld [vmem:[#allocation7 + $0x28] sm:$0xff] }
 0x4ee   :  { %12251 = vst [vmem:[#allocation190_spill] sm:$0xff] %v9980_v44  ;;  %v437_v50 = vld [vmem:[#allocation6 + $0x178] sm:$0xff]  ;;  %12254 = vst [vmem:[#allocation193_spill] sm:$0xff] %v9989_v14 }
 0x4ef   :  { %5987 = vmatmul.mubr.msk.f32.gmra.mrb[12].mxu1 %vm743_vm3, %v9863_v2  ;;  %12249 = vst [vmem:[#allocation188_spill] sm:$0xff] %v9974_v22  ;;  %12252 = vst [vmem:[#allocation191_spill] sm:$0xff] %v9983_v53  ;;  %v9986_v24 = vpack.c.bf16 %v437_v50, %v433_v48  ;;  %v441_v32 = vld [vmem:[#allocation6 + $0x198] sm:$0xff]  ;;  %v9995_v48 = vpack.c.bf16 %v444_v56, %v440_v63  ;;  %v10024_v56 = vpack.c.bf16 %v459_v52, %v455_v51  ;;  %v454_v63 = vld [vmem:[#allocation7] sm:$0xff] }
 0x4f0   :  { %1328 = vmatprep.mubr.f32.mxu1 %v12147_v18  ;;  %v445_v33 = vld [vmem:[#allocation6 + $0x1b8] sm:$0xff]  ;;  %12258 = vst [vmem:[#allocation197_spill] sm:$0xff] %v10001_v0  ;;  %v471_v51 = vld [vmem:[#allocation7 + $0x88] sm:$0xff] }
 0x4f1   :  { %12253 = vst [vmem:[#allocation192_spill] sm:$0xff] %v9986_v24  ;;  %v9992_v15 = vpack.c.bf16 %v445_v33, %v441_v32  ;;  %v449_v7 = vld [vmem:[#allocation6 + $0x1d8] sm:$0xff]  ;;  %12256 = vst [vmem:[#allocation195_spill] sm:$0xff] %v9995_v48  ;;  %6856 = vmatprep.subr.bf16.mxu0 %v10024_v56  ;;  %v10027_v32 = vpack.c.bf16 %v458_v3, %v454_v63  ;;  %v463_v33 = vld [vmem:[#allocation7 + $0x48] sm:$0xff] }
 0x4f2   :  { %v453_v13 = vld [vmem:[#allocation6 + $0x1f8] sm:$0xff]  ;;  %12259 = vst [vmem:[#allocation198_spill] sm:$0xff] %v10024_v56  ;;  %v475_v52 = vld [vmem:[#allocation7 + $0xa8] sm:$0xff]  ;;  %v470_v63 = vld [vmem:[#allocation7 + $0x80] sm:$0xff] }
 0x4f3   :  { %5990 = vmatmul.mubr.msk.f32.vlgmr.msra.gmra.mrb[14].mxu1 %vm743_vm3, %v9863_v2  ;;  %12255 = vst [vmem:[#allocation194_spill] sm:$0xff] %v9992_v15  ;;  %v9998_v50 = vpack.c.bf16 %v453_v13, %v449_v7  ;;  %12260 = vst [vmem:[#allocation199_spill] sm:$0xff] %v10027_v32  ;;  %6858 = vmatpush1.bf16.msra.mxu0 %v10027_v32  ;;  %v467_v7 = vld [vmem:[#allocation7 + $0x68] sm:$0xff]  ;;  %v10036_v56 = vpack.c.bf16 %v475_v52, %v471_v51  ;;  %v474_v3 = vld [vmem:[#allocation7 + $0xa0] sm:$0xff] }
 0x4f4   :  { %6538 = vmatpush1.bf16.msra.mxu1 %v9895_v8  ;;  %1334 = vmatprep.mubr.f32.mxu1 %v12147_v18  ;;  %v10030_v13 = vpack.c.bf16 %v467_v7, %v463_v33  ;;  %v10038_v38 = vpack.c.bf16 %v474_v3, %v470_v63  ;;  %v479_v33 = vld [vmem:[#allocation7 + $0xc8] sm:$0xff]  ;;  %v486_v3 = vld [vmem:[#allocation7 + $0x100] sm:$0xff] }
 0x4f5   :  { %6540 = vmatprep.subr.bf16.mxu1 %v9897_v42  ;;  %12257 = vst [vmem:[#allocation196_spill] sm:$0xff] %v9998_v50  ;;  %12263 = vst [vmem:[#allocation202_spill] sm:$0xff] %v10036_v56  ;;  %v483_v7 = vld [vmem:[#allocation7 + $0xe8] sm:$0xff] }
 0x4f6   :  { %12261 = vst [vmem:[#allocation200_spill] sm:$0xff] %v10030_v13  ;;  %6860 = vmatprep.subr.bf16.mxu0 %v10030_v13  ;;  %12264 = vst [vmem:[#allocation203_spill] sm:$0xff] %v10038_v38  ;;  %v10042_v43 = vpack.c.bf16 %v483_v7, %v479_v33  ;;  %v482_v13 = vld [vmem:[#allocation7 + $0xe0] sm:$0xff]  ;;  %v487_v51 = vld [vmem:[#allocation7 + $0x108] sm:$0xff] }
 0x4f7   :  { %5991 = vmatmul.mubr.msk.f32.gmra.mrb[16].mxu1 %vm743_vm3, %v9863_v2  ;;  %6862 = vmatpush1.bf16.msra.mxu0 %v10032_v39  ;;  %v10044_v32 = vpack.c.bf16 %v482_v13, %v478_v47  ;;  %v491_v52 = vld [vmem:[#allocation7 + $0x128] sm:$0xff]  ;;  %v494_v47 = vld [vmem:[#allocation7 + $0x140] sm:$0xff] }
 0x4f8   :  { %6542 = vmatpush1.bf16.msra.mxu1 %v9903_v35  ;;  %1340 = vmatprep.mubr.f32.mxu1 %v12147_v18  ;;  %12265 = vst [vmem:[#allocation204_spill] sm:$0xff] %v10042_v43  ;;  %v10048_v63 = vpack.c.bf16 %v491_v52, %v487_v51  ;;  %v495_v33 = vld [vmem:[#allocation7 + $0x148] sm:$0xff] }
 0x4f9   :  { %6544 = vmatprep.subr.bf16.mxu1 %v9906_v12  ;;  %6864 = vmatprep.subr.bf16.mxu0 %v10036_v56  ;;  %12266 = vst [vmem:[#allocation205_spill] sm:$0xff] %v10044_v32  ;;  %v490_v56 = vld [vmem:[#allocation7 + $0x120] sm:$0xff]  ;;  %v499_v7 = vld [vmem:[#allocation7 + $0x168] sm:$0xff] }
 0x4fa   :  { %12267 = vst [vmem:[#allocation206_spill] sm:$0xff] %v10048_v63  ;;  %v10050_v39 = vpack.c.bf16 %v490_v56, %v486_v3  ;;  %v10054_v13 = vpack.c.bf16 %v499_v7, %v495_v33  ;;  %v503_v51 = vld [vmem:[#allocation7 + $0x188] sm:$0xff]  ;;  %v502_v3 = vld [vmem:[#allocation7 + $0x180] sm:$0xff] }
 0x4fb   :  { %5992 = vmatmul.mubr.msk.f32.gmra.mrb[18].mxu1 %vm743_vm3, %v9863_v2  ;;  %6866 = vmatpush1.bf16.msra.mxu0 %v10038_v38  ;;  %v507_v52 = vld [vmem:[#allocation7 + $0x1a8] sm:$0xff] }
 0x4fc   :  { %6546 = vmatpush1.bf16.msra.mxu1 %v9912_v46  ;;  %1346 = vmatprep.mubr.f32.mxu1 %v12147_v18  ;;  %12268 = vst [vmem:[#allocation207_spill] sm:$0xff] %v10050_v39  ;;  %12269 = vst [vmem:[#allocation208_spill] sm:$0xff] %v10054_v13  ;;  %v10060_v56 = vpack.c.bf16 %v507_v52, %v503_v51  ;;  %v511_v33 = vld [vmem:[#allocation7 + $0x1c8] sm:$0xff] }
 0x4fd   :  { %6548 = vmatprep.subr.bf16.mxu1 %v9915_v59  ;;  %6868 = vmatprep.subr.bf16.mxu0 %v10042_v43  ;;  %v498_v43 = vld [vmem:[#allocation7 + $0x160] sm:$0xff]  ;;  %v515_v7 = vld [vmem:[#allocation7 + $0x1e8] sm:$0xff] }
 0x4fe   :  { %v10056_v38 = vpack.c.bf16 %v498_v43, %v494_v47  ;;  %12271 = vst [vmem:[#allocation210_spill] sm:$0xff] %v10060_v56  ;;  %v10066_v43 = vpack.c.bf16 %v515_v7, %v511_v33  ;;  %v510_v47 = vld [vmem:[#allocation7 + $0x1c0] sm:$0xff] }
 0x4ff   :  { %5993 = vmatmul.mubr.msk.f32.gmra.mrb[20].mxu1 %vm743_vm3, %v9863_v2  ;;  %6870 = vmatpush1.bf16.msra.mxu0 %v10044_v32 }
 0x500   :  { %6550 = vmatpush1.bf16.msra.mxu1 %v9921_v27  ;;  %1352 = vmatprep.mubr.f32.mxu1 %v12147_v18  ;;  %12270 = vst [vmem:[#allocation209_spill] sm:$0xff] %v10056_v38  ;;  %12273 = vst [vmem:[#allocation212_spill] sm:$0xff] %v10066_v43 }
 0x501   :  { %6552 = vmatprep.subr.bf16.mxu1 %v9924_v36  ;;  %6872 = vmatprep.subr.bf16.mxu0 %v10048_v63  ;;  %v506_v63 = vld [vmem:[#allocation7 + $0x1a0] sm:$0xff] }
 0x502   :  { %v10062_v32 = vpack.c.bf16 %v506_v63, %v502_v3  ;;  %v642_v63 = vld [vmem:[%s11681_s7] sm:$0xf] }
 0x503   :  { %5994 = vmatmul.mubr.msk.f32.gmra.mrb[22].mxu1 %vm743_vm3, %v9863_v2  ;;  %6874 = vmatpush1.bf16.msra.mxu0 %v10050_v39  ;;  %v10076_v3 = vrot.slane %v642_v63, %v9695_v62  ;;  %v10079_v33 = vrot.slane %v642_v63, %v9690_v10 }
 0x504   :  { %6554 = vmatpush1.bf16.msra.mxu1 %v9930_v26  ;;  %1423 = vmatprep.mubr.f32.mxu1 %v12147_v18  ;;  %12272 = vst [vmem:[#allocation211_spill] sm:$0xff] %v10062_v32 }
 0x505   :  { %6556 = vmatprep.subr.bf16.mxu1 %v9933_v45  ;;  %6876 = vmatprep.subr.bf16.mxu0 %v10054_v13  ;;  %v514_v13 = vld [vmem:[#allocation7 + $0x1e0] sm:$0xff]  ;;  %12275 = vst [vmem:[#allocation214_spill] sm:$0xff] %v10076_v3  ;;  %12276 = vst [vmem:[#allocation215_spill] sm:$0xff] %v10079_v33 }
 0x506   :  { %v10068_v39 = vpack.c.bf16 %v514_v13, %v510_v47  ;;  %v10084_v47 = vrot.slane %v642_v63, %v9697_v61 }
 0x507   :  { %6878 = vmatpush1.bf16.msra.mxu0 %v10056_v38 }
 0x508   :  { %6558 = vmatpush1.bf16.msra.mxu1 %v9938_v6  ;;  %6880 = vmatprep.subr.bf16.mxu0 %v10060_v56  ;;  %12274 = vst [vmem:[#allocation213_spill] sm:$0xff] %v10068_v39  ;;  %12277 = vst [vmem:[#allocation216_spill] sm:$0xff] %v10084_v47  ;;  %v10088_v56 = vrot.slane %v642_v63, %v9711_v58 }
 0x509   :  { %6560 = vmatprep.subr.bf16.mxu1 %v9942_v19 }
 0x50a   :  { %12278 = vst [vmem:[#allocation217_spill] sm:$0xff] %v10088_v56 }
 0x50b   :  { %6882 = vmatpush1.bf16.msra.mxu0 %v10062_v32 }
 0x50c   :  { %6562 = vmatpush1.bf16.msra.mxu1 %v9945_v4  ;;  %6884 = vmatprep.subr.bf16.mxu0 %v10066_v43 }
 0x50d   :  { %6564 = vmatprep.subr.bf16.mxu1 %v9948_v57 }
 0x50f   :  { %6886 = vmatpush1.bf16.msra.mxu0 %v10068_v39 }
 0x510   :  { %6566 = vmatpush1.bf16.msra.mxu1 %v9951_v11 }
 0x511   :  { %6568 = vmatprep.subr.bf16.mxu1 %v9954_v54 }
 0x513   :  { %1424 = vmatmul.mubr.f32.vlgmr.msra.gmra.mrb[4].mxu1 %v12147_v18 }
 0x514   :  { %6570 = vmatpush1.bf16.msra.mxu1 %v9957_v5  ;;  %1494 = vmatprep.mubr.f32.mxu1 %v12147_v18 }
 0x515   :  { %6572 = vmatprep.subr.bf16.mxu1 %v9960_v55 }
 0x518   :  { %6574 = vmatpush1.bf16.msra.mxu1 %v9964_v49 }
 0x519   :  { %6576 = vmatprep.subr.bf16.mxu1 %v9968_v40 }
 0x51c   :  { %6578 = vmatpush1.bf16.msra.mxu1 %v9971_v31 }
 0x51d   :  { %6580 = vmatprep.subr.bf16.mxu1 %v9974_v22 }
 0x520   :  { %6582 = vmatpush1.bf16.msra.mxu1 %v9977_v28 }
 0x521   :  { %6584 = vmatprep.subr.bf16.mxu1 %v9980_v44 }
 0x524   :  { %6586 = vmatpush1.bf16.msra.mxu1 %v9983_v53 }
 0x525   :  { %6588 = vmatprep.subr.bf16.mxu1 %v9986_v24 }
 0x528   :  { %6590 = vmatpush1.bf16.msra.mxu1 %v9989_v14 }
 0x529   :  { %6592 = vmatprep.subr.bf16.mxu1 %v9992_v15 }
 0x52c   :  { %6594 = vmatpush1.bf16.msra.mxu1 %v9995_v48 }
 0x52d   :  { %6596 = vmatprep.subr.bf16.mxu1 %v9998_v50 }
 0x530   :  { %6598 = vmatpush1.bf16.msra.mxu1 %v10001_v0 }
 0x531   :  { %6600 = vmatprep.subr.bf16.mxu1 %v9875_v9 }
 0x533   :  { %1495 = vmatmul.mubr.f32.vlgmr.msra.gmra.mrb[14].mxu1 %v12147_v18 }
 0x534   :  { %6602 = vmatpush1.bf16.msra.mxu1 %v9895_v8  ;;  %1584 = vmatprep.mubr.f32.mxu1 %v12147_v18 }
 0x535   :  { %6604 = vmatprep.subr.bf16.mxu1 %v9897_v42 }
 0x538   :  { %6606 = vmatpush1.bf16.msra.mxu1 %v9903_v35 }
 0x539   :  { %6608 = vmatprep.subr.bf16.mxu1 %v9906_v12 }
 0x53c   :  { %6610 = vmatpush1.bf16.msra.mxu1 %v9912_v46 }
 0x53d   :  { %6612 = vmatprep.subr.bf16.mxu1 %v9915_v59 }
 0x540   :  { %6614 = vmatpush1.bf16.msra.mxu1 %v9921_v27 }
 0x541   :  { %6616 = vmatprep.subr.bf16.mxu1 %v9924_v36 }
 0x544   :  { %6618 = vmatpush1.bf16.msra.mxu1 %v9930_v26 }
 0x545   :  { %6620 = vmatprep.subr.bf16.mxu1 %v9933_v45 }
 0x548   :  { %6622 = vmatpush1.bf16.msra.mxu1 %v9938_v6 }
 0x549   :  { %6624 = vmatprep.subr.bf16.mxu1 %v9942_v19 }
 0x54c   :  { %6626 = vmatpush1.bf16.msra.mxu1 %v9945_v4 }
 0x54d   :  { %6628 = vmatprep.subr.bf16.mxu1 %v9948_v57 }
 0x550   :  { %6630 = vmatpush1.bf16.msra.mxu1 %v9951_v11 }
 0x551   :  { %6632 = vmatprep.subr.bf16.mxu1 %v9954_v54 }
 0x5e6   :  { %v1425_v51 = vpop.f32.mrb[4].mxu1 }
 0x5e7   :  { %v1427_v52 = vpop.f32.mrb[5].mxu1  ;;  %v8271_v13 = vadd.f32 %v1425_v51, %v10079_v33 }
 0x5e8   :  { %v8272_v7 = vadd.f32 %v1427_v52, %v10076_v3 }
 0x5ea   :  { %8592 = vtanh.f32 %v8272_v7 }
 0x5eb   :  { %8594 = vtanh.f32 %v8271_v13 }
 0x5f4   :  { %v8593_v38 = vpop.eup %8592 }
 0x5f5   :  { %v8595_v34 = vpop.eup %8594  ;;  %v1511_v30 = vadd.f32 1.0, %v8593_v38 }
 0x5f6   :  { %v1509_v29 = vadd.f32 1.0, %v8595_v34 }
 0x5f7   :  { %v1512_v51 = vmul.f32 0.5, %v1511_v30 }
 0x5f8   :  { %v1510_v7 = vmul.f32 0.5, %v1509_v29 }
 0x5f9   :  { %v1515_v25 = vmul.f32 0.0, %v1512_v51 }
 0x606   :  { %v1496_v39 = vpop.f32.mrb[14].mxu1 }
 0x607   :  { %v8281_v43 = vadd.f32 %v1496_v39, %v10084_v47  ;;  %v1498_v32 = vpop.f32.mrb[15].mxu1 }
 0x608   :  { %v8282_v52 = vadd.f32 %v1498_v32, %v10088_v56 }
 0x609   :  { %8596 = vtanh.f32 %v8281_v43 }
 0x60a   :  { %8598 = vtanh.f32 %v8282_v52 }
 0x613   :  { %v8597_v13 = vpop.eup %8596 }
 0x614   :  { %v1516_v21 = vmul.f32 %v8597_v13, %v1510_v7  ;;  %v8599_v39 = vpop.eup %8598 }
 0x615   :  { %v1513_v63 = vadd.f32 1.0, %v8599_v39 }
 0x616   :  { %v10091_v20 = vadd.f32 %v1516_v21, %v1515_v25 }
 0x617   :  { %v1514_v16 = vmul.f32 0.5, %v1513_v63 }
 0x618   :  { %8600 = vtanh.f32 %v10091_v20 }
 0x622   :  { %v8601_v60 = vpop.eup %8600 }
 0x623   :  { %v10094_v43 = vmul.f32 %v8601_v60, %v1514_v16 }
 0x625   :  { %1585 = vmatmul.mubr.f32.vlgmr.msra.gmra.mrb[6].mxu1 %v10094_v43  ;;  %2229 = vmatmul.mubr.f32.vlgmr.msra.gmra.mrb[6].mxu0 %v10094_v43 }
 0x626   :  { %6634 = vmatpush1.bf16.msra.mxu1 %v9957_v5  ;;  %1655 = vmatprep.mubr.f32.mxu1 %v12147_v18 }
 0x627   :  { %6636 = vmatprep.subr.bf16.mxu1 %v9960_v55  ;;  %2234 = vmatprep.mubr.f32.mxu0 %v12147_v18 }
 0x62a   :  { %6638 = vmatpush1.bf16.msra.mxu1 %v9964_v49 }
 0x62b   :  { %6640 = vmatprep.subr.bf16.mxu1 %v9968_v40 }
 0x62e   :  { %6642 = vmatpush1.bf16.msra.mxu1 %v9971_v31 }
 0x62f   :  { %6644 = vmatprep.subr.bf16.mxu1 %v9974_v22 }
 0x632   :  { %6646 = vmatpush1.bf16.msra.mxu1 %v9977_v28 }
 0x633   :  { %6648 = vmatprep.subr.bf16.mxu1 %v9980_v44 }
 0x636   :  { %6650 = vmatpush1.bf16.msra.mxu1 %v9983_v53 }
 0x637   :  { %6652 = vmatprep.subr.bf16.mxu1 %v9986_v24 }
 0x63a   :  { %6654 = vmatpush1.bf16.msra.mxu1 %v9989_v14 }
 0x63b   :  { %6656 = vmatprep.subr.bf16.mxu1 %v9992_v15 }
 0x63e   :  { %6658 = vmatpush1.bf16.msra.mxu1 %v9995_v48 }
 0x63f   :  { %6660 = vmatprep.subr.bf16.mxu1 %v9998_v50 }
 0x642   :  { %6662 = vmatpush1.bf16.msra.mxu1 %v10001_v0 }
 0x643   :  { %6664 = vmatprep.subr.bf16.mxu1 %v9875_v9 }
 0x645   :  { %1656 = vmatmul.mubr.f32.vlgmr.msra.gmra.mrb[16].mxu1 %v10094_v43 }
 0x646   :  { %6666 = vmatpush1.bf16.msra.mxu1 %v9895_v8  ;;  %1745 = vmatprep.mubr.f32.mxu1 %v12147_v18 }
 0x647   :  { %6668 = vmatprep.subr.bf16.mxu1 %v9897_v42 }
 0x64a   :  { %6670 = vmatpush1.bf16.msra.mxu1 %v9903_v35 }
 0x64b   :  { %6672 = vmatprep.subr.bf16.mxu1 %v9906_v12 }
 0x64e   :  { %6674 = vmatpush1.bf16.msra.mxu1 %v9912_v46 }
 0x64f   :  { %6676 = vmatprep.subr.bf16.mxu1 %v9915_v59 }
 0x652   :  { %6678 = vmatpush1.bf16.msra.mxu1 %v9921_v27 }
 0x653   :  { %6680 = vmatprep.subr.bf16.mxu1 %v9924_v36 }
 0x656   :  { %6682 = vmatpush1.bf16.msra.mxu1 %v9930_v26 }
 0x657   :  { %6684 = vmatprep.subr.bf16.mxu1 %v9933_v45 }
 0x65a   :  { %6686 = vmatpush1.bf16.msra.mxu1 %v9938_v6 }
 0x65b   :  { %6688 = vmatprep.subr.bf16.mxu1 %v9942_v19 }
 0x65e   :  { %6690 = vmatpush1.bf16.msra.mxu1 %v9945_v4 }
 0x65f   :  { %6692 = vmatprep.subr.bf16.mxu1 %v9948_v57 }
 0x662   :  { %6694 = vmatpush1.bf16.msra.mxu1 %v9951_v11 }
 0x663   :  { %6696 = vmatprep.subr.bf16.mxu1 %v9954_v54 }
 0x6f8   :  { %v1586_v16 = vpop.f32.mrb[6].mxu1 }
 0x6f9   :  { %v1588_v21 = vpop.f32.mrb[7].mxu1  ;;  %v8273_v29 = vadd.f32 %v1586_v16, %v10079_v33 }
 0x6fa   :  { %v8274_v25 = vadd.f32 %v1588_v21, %v10076_v3 }
 0x6fc   :  { %8602 = vtanh.f32 %v8274_v25 }
 0x6fd   :  { %8604 = vtanh.f32 %v8273_v29 }
 0x706   :  { %v8603_v60 = vpop.eup %8602 }
 0x707   :  { %v8605_v32 = vpop.eup %8604  ;;  %v1672_v52 = vadd.f32 1.0, %v8603_v60 }
 0x708   :  { %v1670_v7 = vadd.f32 1.0, %v8605_v32 }
 0x709   :  { %v1673_v13 = vmul.f32 0.5, %v1672_v52 }
 0x70a   :  { %v1671_v39 = vmul.f32 0.5, %v1670_v7 }
 0x70b   :  { %v1676_v21 = vmul.f32 %v1673_v13, %v10091_v20 }
 0x718   :  { %v1657_v30 = vpop.f32.mrb[16].mxu1 }
 0x719   :  { %v8283_v34 = vadd.f32 %v1657_v30, %v10084_v47  ;;  %v1659_v38 = vpop.f32.mrb[17].mxu1 }
 0x71a   :  { %v8284_v51 = vadd.f32 %v1659_v38, %v10088_v56 }
 0x71b   :  { %8606 = vtanh.f32 %v8283_v34 }
 0x71c   :  { %8608 = vtanh.f32 %v8284_v51 }
 0x725   :  { %v8607_v63 = vpop.eup %8606 }
 0x726   :  { %v1677_v16 = vmul.f32 %v8607_v63, %v1671_v39  ;;  %v8609_v29 = vpop.eup %8608 }
 0x727   :  { %v1674_v30 = vadd.f32 1.0, %v8609_v29 }
 0x728   :  { %v10139_v25 = vadd.f32 %v1677_v16, %v1676_v21 }
 0x729   :  { %v1675_v41 = vmul.f32 0.5, %v1674_v30 }
 0x72a   :  { %8610 = vtanh.f32 %v10139_v25 }
 0x734   :  { %v8611_v34 = vpop.eup %8610 }
 0x735   :  { %v10142_v1 = vmul.f32 %v8611_v34, %v1675_v41 }
 0x737   :  { %1746 = vmatmul.mubr.f32.vlgmr.msra.gmra.mrb[8].mxu1 %v10142_v1  ;;  %2235 = vmatmul.mubr.f32.gmra.mrb[8].mxu0 %v10142_v1 }
 0x738   :  { %6698 = vmatpush1.bf16.msra.mxu1 %v9957_v5  ;;  %1816 = vmatprep.mubr.f32.mxu1 %v12147_v18 }
 0x739   :  { %6700 = vmatprep.subr.bf16.mxu1 %v9960_v55  ;;  %2240 = vmatprep.mubr.f32.mxu0 %v12147_v18 }
 0x73c   :  { %6702 = vmatpush1.bf16.msra.mxu1 %v9964_v49 }
 0x73d   :  { %6704 = vmatprep.subr.bf16.mxu1 %v9968_v40 }
 0x740   :  { %6706 = vmatpush1.bf16.msra.mxu1 %v9971_v31 }
 0x741   :  { %6708 = vmatprep.subr.bf16.mxu1 %v9974_v22 }
 0x744   :  { %6710 = vmatpush1.bf16.msra.mxu1 %v9977_v28 }
 0x745   :  { %6712 = vmatprep.subr.bf16.mxu1 %v9980_v44 }
 0x748   :  { %6714 = vmatpush1.bf16.msra.mxu1 %v9983_v53 }
 0x749   :  { %6716 = vmatprep.subr.bf16.mxu1 %v9986_v24 }
 0x74c   :  { %6718 = vmatpush1.bf16.msra.mxu1 %v9989_v14 }
 0x74d   :  { %6720 = vmatprep.subr.bf16.mxu1 %v9992_v15 }
 0x750   :  { %6722 = vmatpush1.bf16.msra.mxu1 %v9995_v48 }
 0x751   :  { %6724 = vmatprep.subr.bf16.mxu1 %v9998_v50 }
 0x754   :  { %6726 = vmatpush1.bf16.msra.mxu1 %v10001_v0 }
 0x755   :  { %6728 = vmatprep.subr.bf16.mxu1 %v9875_v9 }
 0x757   :  { %1817 = vmatmul.mubr.f32.vlgmr.msra.gmra.mrb[18].mxu1 %v10142_v1 }
 0x758   :  { %6730 = vmatpush1.bf16.msra.mxu1 %v9895_v8  ;;  %1906 = vmatprep.mubr.f32.mxu1 %v12147_v18 }
 0x759   :  { %6732 = vmatprep.subr.bf16.mxu1 %v9897_v42 }
 0x75c   :  { %6734 = vmatpush1.bf16.msra.mxu1 %v9903_v35 }
 0x75d   :  { %6736 = vmatprep.subr.bf16.mxu1 %v9906_v12 }
 0x760   :  { %6738 = vmatpush1.bf16.msra.mxu1 %v9912_v46 }
 0x761   :  { %6740 = vmatprep.subr.bf16.mxu1 %v9915_v59 }
 0x764   :  { %6742 = vmatpush1.bf16.msra.mxu1 %v9921_v27 }
 0x765   :  { %6744 = vmatprep.subr.bf16.mxu1 %v9924_v36 }
 0x768   :  { %6746 = vmatpush1.bf16.msra.mxu1 %v9930_v26 }
 0x769   :  { %6748 = vmatprep.subr.bf16.mxu1 %v9933_v45 }
 0x76c   :  { %6750 = vmatpush1.bf16.msra.mxu1 %v9938_v6 }
 0x76d   :  { %6752 = vmatprep.subr.bf16.mxu1 %v9942_v19 }
 0x770   :  { %6754 = vmatpush1.bf16.msra.mxu1 %v9945_v4 }
 0x771   :  { %6756 = vmatprep.subr.bf16.mxu1 %v9948_v57 }
 0x774   :  { %6758 = vmatpush1.bf16.msra.mxu1 %v9951_v11 }
 0x775   :  { %6760 = vmatprep.subr.bf16.mxu1 %v9954_v54 }
 0x80a   :  { %v1747_v20 = vpop.f32.mrb[8].mxu1 }
 0x80b   :  { %v1749_v41 = vpop.f32.mrb[9].mxu1  ;;  %v8275_v60 = vadd.f32 %v1747_v20, %v10079_v33 }
 0x80c   :  { %v8276_v38 = vadd.f32 %v1749_v41, %v10076_v3 }
 0x80e   :  { %8612 = vtanh.f32 %v8276_v38 }
 0x80f   :  { %8614 = vtanh.f32 %v8275_v60 }
 0x818   :  { %v8613_v7 = vpop.eup %8612 }
 0x819   :  { %v8615_v13 = vpop.eup %8614  ;;  %v1833_v39 = vadd.f32 1.0, %v8613_v7 }
 0x81a   :  { %v1831_v21 = vadd.f32 1.0, %v8615_v13 }
 0x81b   :  { %v1834_v16 = vmul.f32 0.5, %v1833_v39 }
 0x81c   :  { %v1832_v29 = vmul.f32 0.5, %v1831_v21 }
 0x81d   :  { %v1837_v34 = vmul.f32 %v1834_v16, %v10139_v25 }
 0x82a   :  { %v1818_v32 = vpop.f32.mrb[18].mxu1 }
 0x82b   :  { %v8285_v52 = vadd.f32 %v1818_v32, %v10084_v47  ;;  %v1820_v51 = vpop.f32.mrb[19].mxu1 }
 0x82c   :  { %v8286_v63 = vadd.f32 %v1820_v51, %v10088_v56 }
 0x82d   :  { %8616 = vtanh.f32 %v8285_v52 }
 0x82e   :  { %8618 = vtanh.f32 %v8286_v63 }
 0x837   :  { %v8617_v30 = vpop.eup %8616 }
 0x838   :  { %v1838_v20 = vmul.f32 %v8617_v30, %v1832_v29  ;;  %v8619_v38 = vpop.eup %8618 }
 0x839   :  { %v1835_v60 = vadd.f32 1.0, %v8619_v38 }
 0x83a   :  { %v10187_v41 = vadd.f32 %v1838_v20, %v1837_v34 }
 0x83b   :  { %v1836_v32 = vmul.f32 0.5, %v1835_v60 }
 0x83c   :  { %8620 = vtanh.f32 %v10187_v41 }
 0x846   :  { %v8621_v52 = vpop.eup %8620 }
 0x847   :  { %v10190_v37 = vmul.f32 %v8621_v52, %v1836_v32 }
 0x849   :  { %1907 = vmatmul.mubr.f32.vlgmr.msra.gmra.mrb[10].mxu1 %v10190_v37  ;;  %2241 = vmatmul.mubr.f32.gmra.mrb[10].mxu0 %v10190_v37 }
 0x84a   :  { %6762 = vmatpush1.bf16.msra.mxu1 %v9957_v5  ;;  %1977 = vmatprep.mubr.f32.mxu1 %v12147_v18 }
 0x84b   :  { %6764 = vmatprep.subr.bf16.mxu1 %v9960_v55  ;;  %2246 = vmatprep.mubr.f32.mxu0 %v12147_v18 }
 0x84e   :  { %6766 = vmatpush1.bf16.msra.mxu1 %v9964_v49 }
 0x84f   :  { %6768 = vmatprep.subr.bf16.mxu1 %v9968_v40 }
 0x852   :  { %6770 = vmatpush1.bf16.msra.mxu1 %v9971_v31 }
 0x853   :  { %6772 = vmatprep.subr.bf16.mxu1 %v9974_v22 }
 0x856   :  { %6774 = vmatpush1.bf16.msra.mxu1 %v9977_v28 }
 0x857   :  { %6776 = vmatprep.subr.bf16.mxu1 %v9980_v44 }
 0x85a   :  { %6778 = vmatpush1.bf16.msra.mxu1 %v9983_v53 }
 0x85b   :  { %6780 = vmatprep.subr.bf16.mxu1 %v9986_v24 }
 0x85e   :  { %6782 = vmatpush1.bf16.msra.mxu1 %v9989_v14 }
 0x85f   :  { %6784 = vmatprep.subr.bf16.mxu1 %v9992_v15 }
 0x862   :  { %6786 = vmatpush1.bf16.msra.mxu1 %v9995_v48 }
 0x863   :  { %6788 = vmatprep.subr.bf16.mxu1 %v9998_v50 }
 0x866   :  { %6790 = vmatpush1.bf16.msra.mxu1 %v10001_v0 }
 0x867   :  { %6792 = vmatprep.subr.bf16.mxu1 %v9875_v9 }
 0x869   :  { %1978 = vmatmul.mubr.f32.vlgmr.msra.gmra.mrb[20].mxu1 %v10190_v37 }
 0x86a   :  { %6794 = vmatpush1.bf16.msra.mxu1 %v9895_v8  ;;  %2067 = vmatprep.mubr.f32.mxu1 %v12147_v18 }
 0x86b   :  { %6796 = vmatprep.subr.bf16.mxu1 %v9897_v42 }
 0x86e   :  { %6798 = vmatpush1.bf16.msra.mxu1 %v9903_v35 }
 0x86f   :  { %6800 = vmatprep.subr.bf16.mxu1 %v9906_v12 }
 0x872   :  { %6802 = vmatpush1.bf16.msra.mxu1 %v9912_v46 }
 0x873   :  { %6804 = vmatprep.subr.bf16.mxu1 %v9915_v59 }
 0x876   :  { %6806 = vmatpush1.bf16.msra.mxu1 %v9921_v27 }
 0x877   :  { %6808 = vmatprep.subr.bf16.mxu1 %v9924_v36 }
 0x87a   :  { %6810 = vmatpush1.bf16.msra.mxu1 %v9930_v26 }
 0x87b   :  { %6812 = vmatprep.subr.bf16.mxu1 %v9933_v45 }
 0x87e   :  { %6814 = vmatpush1.bf16.msra.mxu1 %v9938_v6  ;;  %v580_v6 = vld [vmem:[#allocation9 + $0x1f0] sm:$0xff] }
 0x87f   :  { %6816 = vmatprep.subr.bf16.mxu1 %v9942_v19  ;;  %v576_v19 = vld [vmem:[#allocation9 + $0x1d0] sm:$0xff] }
 0x882   :  { %6818 = vmatpush1.bf16.msra.mxu1 %v9945_v4  ;;  %v572_v4 = vld [vmem:[#allocation9 + $0x1b0] sm:$0xff] }
 0x883   :  { %6820 = vmatprep.subr.bf16.mxu1 %v9948_v57  ;;  %v568_v57 = vld [vmem:[#allocation9 + $0x190] sm:$0xff] }
 0x886   :  { %6822 = vmatpush1.bf16.msra.mxu1 %v9951_v11  ;;  %v564_v11 = vld [vmem:[#allocation9 + $0x170] sm:$0xff] }
 0x887   :  { %6824 = vmatprep.subr.bf16.mxu1 %v9954_v54 }
 0x91c   :  { %v1908_v25 = vpop.f32.mrb[10].mxu1 }
 0x91d   :  { %v1910_v51 = vpop.f32.mrb[11].mxu1  ;;  %v8277_v13 = vadd.f32 %v1908_v25, %v10079_v33 }
 0x91e   :  { %v8278_v7 = vadd.f32 %v1910_v51, %v10076_v3 }
 0x920   :  { %8622 = vtanh.f32 %v8278_v7 }
 0x921   :  { %8624 = vtanh.f32 %v8277_v13 }
 0x92a   :  { %v8623_v16 = vpop.eup %8622 }
 0x92b   :  { %v8625_v29 = vpop.eup %8624  ;;  %v1994_v30 = vadd.f32 1.0, %v8623_v16  ;;  %v461_v16 = vld [vmem:[#allocation7 + $0x38] sm:$0xff] }
 0x92c   :  { %v1992_v20 = vadd.f32 1.0, %v8625_v29 }
 0x92d   :  { %v1995_v38 = vmul.f32 0.5, %v1994_v30  ;;  %v456_v30 = vld [vmem:[#allocation7 + $0x10] sm:$0xff] }
 0x92e   :  { %v1993_v60 = vmul.f32 0.5, %v1992_v20 }
 0x92f   :  { %v1998_v52 = vmul.f32 %v1995_v38, %v10187_v41  ;;  %v12279_v41 = vmov 0.0|0.0   ;;  %v465_v38 = vld [vmem:[#allocation7 + $0x58] sm:$0xff] }
 0x93c   :  { %v1979_v39 = vpop.f32.mrb[20].mxu1 }
 0x93d   :  { %v8287_v63 = vadd.f32 %v1979_v39, %v10084_v47  ;;  %v1981_v21 = vpop.f32.mrb[21].mxu1 }
 0x93e   :  { %v8288_v34 = vadd.f32 %v1981_v21, %v10088_v56  ;;  %v457_v21 = vld [vmem:[#allocation7 + $0x18] sm:$0xff] }
 0x93f   :  { %8626 = vtanh.f32 %v8287_v63  ;;  %v10263_v29 = vpack.c.bf16 %v461_v16, %v457_v21  ;;  %v472_v21 = vld [vmem:[#allocation7 + $0x90] sm:$0xff] }
 0x940   :  { %8628 = vtanh.f32 %v8288_v34  ;;  %v460_v34 = vld [vmem:[#allocation7 + $0x30] sm:$0xff] }
 0x941   :  { %12280 = vst [vmem:[#allocation218_spill] sm:$0xff] %v10263_v29  ;;  %v10265_v20 = vpack.c.bf16 %v460_v34, %v456_v30  ;;  %6888 = vmatprep.subr.bf16.mxu0 %v10263_v29  ;;  %v476_v16 = vld [vmem:[#allocation7 + $0xb0] sm:$0xff]  ;;  %v481_v34 = vld [vmem:[#allocation7 + $0xd8] sm:$0xff] }
 0x942   :  { %v10277_v30 = vpack.c.bf16 %v476_v16, %v472_v21  ;;  %v488_v16 = vld [vmem:[#allocation7 + $0x110] sm:$0xff] }
 0x943   :  { %12281 = vst [vmem:[#allocation219_spill] sm:$0xff] %v10265_v20  ;;  %6890 = vmatpush1.bf16.msra.mxu0 %v10265_v20 }
 0x944   :  { %12285 = vst [vmem:[#allocation223_spill] sm:$0xff] %v10277_v30 }
 0x949   :  { %v8627_v32 = vpop.eup %8626 }
 0x94a   :  { %v1999_v25 = vmul.f32 %v8627_v32, %v1993_v60  ;;  %v8629_v7 = vpop.eup %8628  ;;  %v469_v60 = vld [vmem:[#allocation7 + $0x78] sm:$0xff] }
 0x94b   :  { %v1996_v13 = vadd.f32 1.0, %v8629_v7  ;;  %v10269_v32 = vpack.c.bf16 %v469_v60, %v465_v38  ;;  %v485_v38 = vld [vmem:[#allocation7 + $0xf8] sm:$0xff] }
 0x94c   :  { %v10235_v51 = vadd.f32 %v1999_v25, %v1998_v52  ;;  %v464_v52 = vld [vmem:[#allocation7 + $0x50] sm:$0xff]  ;;  %v10281_v60 = vpack.c.bf16 %v485_v38, %v481_v34  ;;  %v497_v34 = vld [vmem:[#allocation7 + $0x158] sm:$0xff] }
 0x94d   :  { %v1997_v39 = vmul.f32 0.5, %v1996_v13  ;;  %12282 = vst [vmem:[#allocation220_spill] sm:$0xff] %v10269_v32  ;;  %v468_v25 = vld [vmem:[#allocation7 + $0x70] sm:$0xff]  ;;  %6892 = vmatprep.subr.bf16.mxu0 %v10269_v32  ;;  %v473_v13 = vld [vmem:[#allocation7 + $0x98] sm:$0xff] }
 0x94e   :  { %8630 = vtanh.f32 %v10235_v51  ;;  %v10271_v7 = vpack.c.bf16 %v468_v25, %v464_v52  ;;  %12286 = vst [vmem:[#allocation224_spill] sm:$0xff] %v10281_v60  ;;  %v480_v52 = vld [vmem:[#allocation7 + $0xd0] sm:$0xff]  ;;  %v501_v38 = vld [vmem:[#allocation7 + $0x178] sm:$0xff] }
 0x94f   :  { %v484_v25 = vld [vmem:[#allocation7 + $0xf0] sm:$0xff] }
 0x950   :  { %12283 = vst [vmem:[#allocation221_spill] sm:$0xff] %v10271_v7  ;;  %6894 = vmatpush1.bf16.msra.mxu0 %v10271_v7  ;;  %v10283_v32 = vpack.c.bf16 %v484_v25, %v480_v52  ;;  %v10293_v52 = vpack.c.bf16 %v501_v38, %v497_v34  ;;  %v500_v25 = vld [vmem:[#allocation7 + $0x170] sm:$0xff]  ;;  %v519_v38 = vld [vmem:[#allocation9 + $0x8] sm:$0xff] }
 0x952   :  { %12287 = vst [vmem:[#allocation225_spill] sm:$0xff] %v10283_v32  ;;  %12290 = vst [vmem:[#allocation228_spill] sm:$0xff] %v10293_v52 }
 0x958   :  { %v8631_v63 = vpop.eup %8630 }
 0x959   :  { %v10238_v54 = vmul.f32 %v8631_v63, %v1997_v39  ;;  %v477_v39 = vld [vmem:[#allocation7 + $0xb8] sm:$0xff] }
 0x95a   :  { %v10275_v63 = vpack.c.bf16 %v477_v39, %v473_v13  ;;  %v489_v13 = vld [vmem:[#allocation7 + $0x118] sm:$0xff] }
 0x95b   :  { %2068 = vmatmul.mubr.f32.vlgmr.msra.gmra.mrb[12].mxu1 %v10238_v54  ;;  %2247 = vmatmul.mubr.f32.gmra.mrb[12].mxu0 %v10238_v54  ;;  %v493_v39 = vld [vmem:[#allocation7 + $0x138] sm:$0xff] }
 0x95c   :  { %6826 = vmatpush1.bf16.msra.mxu1 %v9957_v5  ;;  %2138 = vmatprep.mubr.f32.mxu1 %v12147_v18  ;;  %12284 = vst [vmem:[#allocation222_spill] sm:$0xff] %v10275_v63  ;;  %v10287_v21 = vpack.c.bf16 %v493_v39, %v489_v13  ;;  %v504_v39 = vld [vmem:[#allocation7 + $0x190] sm:$0xff] }
 0x95d   :  { %6828 = vmatprep.subr.bf16.mxu1 %v9960_v55  ;;  %2252 = vmatprep.mubr.f32.mxu0 %v12147_v18  ;;  %v556_v55 = vld [vmem:[#allocation9 + $0x130] sm:$0xff] }
 0x95e   :  { %6896 = vmatprep.subr.bf16.mxu0 %v10275_v63  ;;  %12288 = vst [vmem:[#allocation226_spill] sm:$0xff] %v10287_v21  ;;  %v492_v63 = vld [vmem:[#allocation7 + $0x130] sm:$0xff] }
 0x95f   :  { %6898 = vmatpush1.bf16.msra.mxu0 %v10277_v30  ;;  %v10289_v7 = vpack.c.bf16 %v492_v63, %v488_v16  ;;  %v496_v30 = vld [vmem:[#allocation7 + $0x150] sm:$0xff]  ;;  %v513_v63 = vld [vmem:[#allocation7 + $0x1d8] sm:$0xff] }
 0x960   :  { %6830 = vmatpush1.bf16.msra.mxu1 %v9964_v49  ;;  %6900 = vmatprep.subr.bf16.mxu0 %v10281_v60  ;;  %v505_v60 = vld [vmem:[#allocation7 + $0x198] sm:$0xff]  ;;  %v10295_v20 = vpack.c.bf16 %v500_v25, %v496_v30  ;;  %v516_v30 = vld [vmem:[#allocation7 + $0x1f0] sm:$0xff]  ;;  %v523_v25 = vld [vmem:[#allocation9 + $0x28] sm:$0xff] }
 0x961   :  { %6832 = vmatprep.subr.bf16.mxu1 %v9968_v40  ;;  %12289 = vst [vmem:[#allocation227_spill] sm:$0xff] %v10289_v7  ;;  %v517_v16 = vld [vmem:[#allocation7 + $0x1f8] sm:$0xff]  ;;  %v552_v49 = vld [vmem:[#allocation9 + $0x110] sm:$0xff] }
 0x962   :  { %12291 = vst [vmem:[#allocation229_spill] sm:$0xff] %v10295_v20  ;;  %v10304_v34 = vpack.c.bf16 %v517_v16, %v513_v63  ;;  %v557_v40 = vld [vmem:[#allocation9 + $0x138] sm:$0xff]  ;;  %v560_v5 = vld [vmem:[#allocation9 + $0x150] sm:$0xff] }
 0x963   :  { %6902 = vmatpush1.bf16.msra.mxu0 %v10283_v32  ;;  %v509_v32 = vld [vmem:[#allocation7 + $0x1b8] sm:$0xff] }
 0x964   :  { %6834 = vmatpush1.bf16.msra.mxu1 %v9971_v31  ;;  %6904 = vmatprep.subr.bf16.mxu0 %v10287_v21  ;;  %v10297_v13 = vpack.c.bf16 %v509_v32, %v505_v60  ;;  %12294 = vst [vmem:[#allocation232_spill] sm:$0xff] %v10304_v34  ;;  %v512_v32 = vld [vmem:[#allocation7 + $0x1d0] sm:$0xff]  ;;  %v553_v31 = vld [vmem:[#allocation9 + $0x118] sm:$0xff] }
 0x965   :  { %6836 = vmatprep.subr.bf16.mxu1 %v9974_v22  ;;  %v10308_v60 = vpack.c.bf16 %v516_v30, %v512_v32 }
 0x966   :  { %12292 = vst [vmem:[#allocation230_spill] sm:$0xff] %v10297_v13 }
 0x967   :  { %6906 = vmatpush1.bf16.msra.mxu0 %v10289_v7  ;;  %12295 = vst [vmem:[#allocation233_spill] sm:$0xff] %v10308_v60 }
 0x968   :  { %6838 = vmatpush1.bf16.msra.mxu1 %v9977_v28  ;;  %6908 = vmatprep.subr.bf16.mxu0 %v10293_v52  ;;  %v10311_v52 = vpack.c.bf16 %v523_v25, %v519_v38 }
 0x969   :  { %6840 = vmatprep.subr.bf16.mxu1 %v9980_v44  ;;  %v532_v44 = vld [vmem:[#allocation9 + $0x70] sm:$0xff] }
 0x96a   :  { %12296 = vst [vmem:[#allocation234_spill] sm:$0xff] %v10311_v52 }
 0x96b   :  { %6910 = vmatpush1.bf16.msra.mxu0 %v10295_v20 }
 0x96c   :  { %6842 = vmatpush1.bf16.msra.mxu1 %v9983_v53  ;;  %6912 = vmatprep.subr.bf16.mxu0 %v10297_v13  ;;  %v528_v53 = vld [vmem:[#allocation9 + $0x50] sm:$0xff] }
 0x96d   :  { %6844 = vmatprep.subr.bf16.mxu1 %v9986_v24  ;;  %v524_v24 = vld [vmem:[#allocation9 + $0x30] sm:$0xff] }
 0x970   :  { %6846 = vmatpush1.bf16.msra.mxu1 %v9989_v14  ;;  %v520_v14 = vld [vmem:[#allocation9 + $0x10] sm:$0xff] }
 0x971   :  { %6848 = vmatprep.subr.bf16.mxu1 %v9992_v15  ;;  %v525_v15 = vld [vmem:[#allocation9 + $0x38] sm:$0xff] }
 0x974   :  { %6850 = vmatpush1.bf16.msra.mxu1 %v9995_v48  ;;  %v521_v48 = vld [vmem:[#allocation9 + $0x18] sm:$0xff] }
 0x975   :  { %6852 = vmatprep.subr.bf16.mxu1 %v9998_v50 }
 0x978   :  { %6854 = vmatpush1.bf16.msra.mxu1 %v10001_v0  ;;  %v508_v0 = vld [vmem:[#allocation7 + $0x1b0] sm:$0xff] }
 0x979   :  { %7239 = vmatprep.subr.bf16.mxu1 %v12279_v41  ;;  %v10301_v21 = vpack.c.bf16 %v508_v0, %v504_v39 }
 0x97b   :  { %2139 = vmatmul.mubr.f32.vlgmr.msra.gmra.mrb[22].mxu1 %v10238_v54  ;;  %12293 = vst [vmem:[#allocation231_spill] sm:$0xff] %v10301_v21  ;;  %6914 = vmatpush1.bf16.msra.mxu0 %v10301_v21 }
 0x97c   :  { %6158 = vmatprep.mubr.msk.f32.mxu1 %vm9087_vm6, %v12147_v18  ;;  %6916 = vmatprep.subr.bf16.mxu0 %v10304_v34 }
 0x97f   :  { %6918 = vmatpush1.bf16.msra.mxu0 %v10308_v60 }
 0x980   :  { %6920 = vmatprep.subr.bf16.mxu0 %v10311_v52 }
 0xa2e   :  { %v2069_v0 = vpop.f32.mrb[12].mxu1 }
 0xa2f   :  { %v2071_v39 = vpop.f32.mrb[13].mxu1  ;;  %v8279_v16 = vadd.f32 %v2069_v0, %v10079_v33 }
 0xa30   :  { %v8280_v63 = vadd.f32 %v2071_v39, %v10076_v3 }
 0xa32   :  { %8632 = vtanh.f32 %v8280_v63 }
 0xa33   :  { %8634 = vtanh.f32 %v8279_v16 }
 0xa3c   :  { %v8633_v21 = vpop.eup %8632 }
 0xa3d   :  { %v8635_v60 = vpop.eup %8634  ;;  %v2155_v13 = vadd.f32 1.0, %v8633_v21  ;;  %v518_v21 = vld [vmem:[#allocation9] sm:$0xff] }
 0xa3e   :  { %v2153_v25 = vadd.f32 1.0, %v8635_v60  ;;  %v527_v60 = vld [vmem:[#allocation9 + $0x48] sm:$0xff] }
 0xa3f   :  { %v2156_v20 = vmul.f32 0.5, %v2155_v13  ;;  %v531_v13 = vld [vmem:[#allocation9 + $0x68] sm:$0xff] }
 0xa40   :  { %v2154_v7 = vmul.f32 0.5, %v2153_v25  ;;  %v539_v25 = vld [vmem:[#allocation9 + $0xa8] sm:$0xff] }
 0xa41   :  { %v2159_v39 = vmul.f32 %v2156_v20, %v10235_v51  ;;  %v526_v20 = vld [vmem:[#allocation9 + $0x40] sm:$0xff] }
 0xa4e   :  { %v2140_v34 = vpop.f32.mrb[22].mxu1 }
 0xa4f   :  { %v8289_v32 = vadd.f32 %v2140_v34, %v10084_v47  ;;  %v2142_v30 = vpop.f32.mrb[23].mxu1 }
 0xa50   :  { %v8290_v38 = vadd.f32 %v2142_v30, %v10088_v56  ;;  %v522_v30 = vld [vmem:[#allocation9 + $0x20] sm:$0xff] }
 0xa51   :  { %8636 = vtanh.f32 %v8289_v32  ;;  %v10326_v51 = vpack.c.bf16 %v522_v30, %v518_v21  ;;  %v542_v30 = vld [vmem:[#allocation9 + $0xc0] sm:$0xff] }
 0xa52   :  { %8638 = vtanh.f32 %v8290_v38  ;;  %v535_v38 = vld [vmem:[#allocation9 + $0x88] sm:$0xff] }
 0xa5b   :  { %v8637_v50 = vpop.eup %8636 }
 0xa5c   :  { %v2160_v0 = vmul.f32 %v8637_v50, %v2154_v7  ;;  %v8639_v34 = vpop.eup %8638  ;;  %v10328_v50 = vpack.c.bf16 %v531_v13, %v527_v60  ;;  %v530_v7 = vld [vmem:[#allocation9 + $0x60] sm:$0xff]  ;;  %v551_v13 = vld [vmem:[#allocation9 + $0x108] sm:$0xff] }
 0xa5d   :  { %v2157_v16 = vadd.f32 1.0, %v8639_v34  ;;  %v538_v34 = vld [vmem:[#allocation9 + $0xa0] sm:$0xff] }
 0xa5e   :  { %v10319_v63 = vadd.f32 %v2160_v0, %v2159_v39   ;;  %v10336_v39 = vpack.c.bf16 %v539_v25, %v535_v38  ;;  %v534_v0 = vld [vmem:[#allocation9 + $0x80] sm:$0xff] }
 0xa5f   :  { %v2158_v47 = vmul.f32 0.5, %v2157_v16  ;;  %v543_v16 = vld [vmem:[#allocation9 + $0xc8] sm:$0xff]  ;;  %v546_v60 = vld [vmem:[#allocation9 + $0xe0] sm:$0xff] }
 0xa60   :  { %8640 = vtanh.f32 %v10319_v63  ;;  %v550_v38 = vld [vmem:[#allocation9 + $0x100] sm:$0xff] }
 0xa61   :  { %v554_v25 = vld [vmem:[#allocation9 + $0x120] sm:$0xff] }
 0xa6a   :  { %v8641_v32 = vpop.eup %8640 }
 0xa6b   :  { %v10322_v33 = vmul.f32 %v8641_v32, %v2158_v47   ;;  %v10333_v47 = vpack.c.bf16 %v530_v7, %v526_v20  ;;  %v547_v32 = vld [vmem:[#allocation9 + $0xe8] sm:$0xff] }
 0xa6c   :  { %v10344_v21 = vpack.c.bf16 %v547_v32, %v543_v16  ;;  %v555_v20 = vld [vmem:[#allocation9 + $0x128] sm:$0xff]  ;;  %v558_v32 = vld [vmem:[#allocation9 + $0x140] sm:$0xff] }
 0xa6d   :  { %2253 = vmatmul.mubr.f32.gmra.mrb[14].mxu0 %v10322_v33  ;;  %v10352_v7 = vpack.c.bf16 %v555_v20, %v551_v13  ;;  %v571_v13 = vld [vmem:[#allocation9 + $0x1a8] sm:$0xff] }
 0xa6e   :  { %2323 = vmatprep.mubr.f32.mxu0 %v12147_v18 }
 0xa6f   :  { %12298 = vst [vmem:[#allocation236_spill] sm:$0xff] %v10352_v7 }
 0xa71   :  { %2324 = vmatmul.mubr.f32.vlgmr.msra.gmra.mrb[16].mxu0 %v10094_v43  ;;  %v10341_v43 = vpack.c.bf16 %v538_v34, %v534_v0  ;;  %v559_v0 = vld [vmem:[#allocation9 + $0x148] sm:$0xff] }
 0xa72   :  { %6922 = vmatpush1.bf16.msra.mxu0 %v10326_v51  ;;  %2329 = vmatprep.mubr.f32.mxu0 %v12147_v18  ;;  %v563_v34 = vld [vmem:[#allocation9 + $0x168] sm:$0xff] }
 0xa73   :  { %6924 = vmatprep.subr.bf16.mxu0 %v10328_v50  ;;  %v10360_v16 = vpack.c.bf16 %v563_v34, %v559_v0  ;;  %v575_v0 = vld [vmem:[#allocation9 + $0x1c8] sm:$0xff] }
 0xa74   :  { %v579_v34 = vld [vmem:[#allocation9 + $0x1e8] sm:$0xff] }
 0xa75   :  { %2330 = vmatmul.mubr.f32.gmra.mrb[18].mxu0 %v10142_v1  ;;  %v10349_v1 = vpack.c.bf16 %v546_v60, %v542_v30  ;;  %12300 = vst [vmem:[#allocation238_spill] sm:$0xff] %v10360_v16  ;;  %v562_v30 = vld [vmem:[#allocation9 + $0x160] sm:$0xff]  ;;  %v567_v60 = vld [vmem:[#allocation9 + $0x188] sm:$0xff]  ;;  %v10374_v3 = vpack.c.bf16 %v579_v34, %v575_v0  ;;  %v10383_v0 = vpack.c.bf16 %v524_v24, %v520_v14  ;;  %v536_v14 = vld [vmem:[#allocation9 + $0x90] sm:$0xff] }
 0xa76   :  { %6926 = vmatpush1.bf16.msra.mxu0 %v10333_v47  ;;  %2335 = vmatprep.mubr.f32.mxu0 %v12147_v18  ;;  %v10364_v20 = vpack.c.bf16 %v562_v30, %v558_v32  ;;  %v574_v32 = vld [vmem:[#allocation9 + $0x1c0] sm:$0xff] }
 0xa77   :  { %6928 = vmatprep.subr.bf16.mxu0 %v10336_v39  ;;  %12297 = vst [vmem:[#allocation235_spill] sm:$0xff] %v10349_v1  ;;  %12304 = vst [vmem:[#allocation242_spill] sm:$0xff] %v10374_v3  ;;  %v578_v30 = vld [vmem:[#allocation9 + $0x1e0] sm:$0xff] }
 0xa78   :  { %12301 = vst [vmem:[#allocation239_spill] sm:$0xff] %v10364_v20  ;;  %12307 = vst [vmem:[#allocation245_spill] sm:$0xff] %v10383_v0 }
 0xa79   :  { %2336 = vmatmul.mubr.f32.gmra.mrb[20].mxu0 %v10190_v37  ;;  %v10357_v37 = vpack.c.bf16 %v554_v25, %v550_v38  ;;  %v566_v38 = vld [vmem:[#allocation9 + $0x180] sm:$0xff] }
 0xa7a   :  { %6930 = vmatpush1.bf16.msra.mxu0 %v10341_v43  ;;  %2341 = vmatprep.mubr.f32.mxu0 %v12147_v18  ;;  %v570_v25 = vld [vmem:[#allocation9 + $0x1a0] sm:$0xff] }
 0xa7b   :  { %6932 = vmatprep.subr.bf16.mxu0 %v10344_v21  ;;  %12299 = vst [vmem:[#allocation237_spill] sm:$0xff] %v10357_v37  ;;  %v10371_v56 = vpack.c.bf16 %v570_v25, %v566_v38  ;;  %v529_v38 = vld [vmem:[#allocation9 + $0x58] sm:$0xff] }
 0xa7c   :  { %v533_v25 = vld [vmem:[#allocation9 + $0x78] sm:$0xff] }
 0xa7d   :  { %2342 = vmatmul.mubr.f32.gmra.mrb[22].mxu0 %v10238_v54  ;;  %v10368_v54 = vpack.c.bf16 %v571_v13, %v567_v60  ;;  %12303 = vst [vmem:[#allocation241_spill] sm:$0xff] %v10371_v56  ;;  %v10377_v60 = vpack.c.bf16 %v578_v30, %v574_v32  ;;  %v10380_v13 = vpack.c.bf16 %v525_v15, %v521_v48  ;;  %v537_v32 = vld [vmem:[#allocation9 + $0x98] sm:$0xff]  ;;  %v540_v48 = vld [vmem:[#allocation9 + $0xb0] sm:$0xff] }
 0xa7e   :  { %6934 = vmatpush1.bf16.msra.mxu0 %v10349_v1  ;;  %2347 = vmatprep.mubr.f32.mxu0 %v12147_v18  ;;  %v10386_v34 = vpack.c.bf16 %v533_v25, %v529_v38  ;;  %v541_v30 = vld [vmem:[#allocation9 + $0xb8] sm:$0xff]  ;;  %v10390_v15 = vpack.c.bf16 %v532_v44, %v528_v53  ;;  %v10397_v28 = vpack.c.bf16 %v540_v48, %v536_v14  ;;  %v544_v44 = vld [vmem:[#allocation9 + $0xd0] sm:$0xff] }
 0xa7f   :  { %6936 = vmatprep.subr.bf16.mxu0 %v10352_v7  ;;  %12302 = vst [vmem:[#allocation240_spill] sm:$0xff] %v10368_v54  ;;  %12305 = vst [vmem:[#allocation243_spill] sm:$0xff] %v10377_v60  ;;  %v10394_v24 = vpack.c.bf16 %v541_v30, %v537_v32  ;;  %v545_v38 = vld [vmem:[#allocation9 + $0xd8] sm:$0xff]  ;;  %v548_v53 = vld [vmem:[#allocation9 + $0xf0] sm:$0xff]  ;;  %v10406_v30 = vpack.c.bf16 %v557_v40, %v553_v31  ;;  %v10415_v31 = vpack.c.bf16 %v564_v11, %v560_v5 }
 0xa80   :  { %12306 = vst [vmem:[#allocation244_spill] sm:$0xff] %v10380_v13  ;;  %12308 = vst [vmem:[#allocation246_spill] sm:$0xff] %v10386_v34  ;;  %v549_v25 = vld [vmem:[#allocation9 + $0xf8] sm:$0xff]  ;;  %v10403_v32 = vpack.c.bf16 %v548_v53, %v544_v44  ;;  %v10427_v11 = vpack.c.bf16 %v580_v6, %v576_v19  ;;  %v584_v19 = vld [vmem:[%s11686_s12 + $0x10] sm:$0xff] }
 0xa81   :  { %2348 = vmatmul.mubr.f32.gmra.mrb[24].mxu0 %v10322_v33  ;;  %12309 = vst [vmem:[#allocation247_spill] sm:$0xff] %v10390_v15  ;;  %12310 = vst [vmem:[#allocation248_spill] sm:$0xff] %v10394_v24  ;;  %v10400_v22 = vpack.c.bf16 %v549_v25, %v545_v38  ;;  %v561_v14 = vld [vmem:[#allocation9 + $0x158] sm:$0xff]  ;;  %v10409_v38 = vpack.c.bf16 %v556_v55, %v552_v49 }
 0xa82   :  { %6938 = vmatpush1.bf16.msra.mxu0 %v10357_v37  ;;  %2418 = vmatprep.mubr.f32.mxu0 %v12147_v18  ;;  %12311 = vst [vmem:[#allocation249_spill] sm:$0xff] %v10397_v28  ;;  %12313 = vst [vmem:[#allocation251_spill] sm:$0xff] %v10403_v32  ;;  %v565_v48 = vld [vmem:[#allocation9 + $0x178] sm:$0xff] }
 0xa83   :  { %6940 = vmatprep.subr.bf16.mxu0 %v10360_v16  ;;  %12312 = vst [vmem:[#allocation250_spill] sm:$0xff] %v10400_v22  ;;  %12314 = vst [vmem:[#allocation252_spill] sm:$0xff] %v10406_v30  ;;  %v10412_v25 = vpack.c.bf16 %v565_v48, %v561_v14  ;;  %v569_v44 = vld [vmem:[#allocation9 + $0x198] sm:$0xff]  ;;  %v10421_v14 = vpack.c.bf16 %v572_v4, %v568_v57  ;;  %v582_v57 = vld [vmem:[%s11686_s12] sm:$0xff] }
 0xa84   :  { %12315 = vst [vmem:[#allocation253_spill] sm:$0xff] %v10409_v38  ;;  %v573_v53 = vld [vmem:[#allocation9 + $0x1b8] sm:$0xff]  ;;  %12317 = vst [vmem:[#allocation255_spill] sm:$0xff] %v10415_v31  ;;  %v583_v4 = vld [vmem:[%s11686_s12 + $0x8] sm:$0xff] }
 0xa85   :  { %12316 = vst [vmem:[#allocation254_spill] sm:$0xff] %v10412_v25  ;;  %v10418_v40 = vpack.c.bf16 %v573_v53, %v569_v44  ;;  %v577_v55 = vld [vmem:[#allocation9 + $0x1d8] sm:$0xff]  ;;  %12319 = vst [vmem:[#allocation257_spill] sm:$0xff] %v10421_v14  ;;  %v10456_v6 = vpack.c.bf16 %v583_v4, %v582_v57  ;;  %v586_v53 = vld [vmem:[%s11686_s12 + $0x20] sm:$0xff] }
 0xa86   :  { %6942 = vmatpush1.bf16.msra.mxu0 %v10364_v20  ;;  %v581_v49 = vld [vmem:[#allocation9 + $0x1f8] sm:$0xff]  ;;  %12321 = vst [vmem:[#allocation259_spill] sm:$0xff] %v10427_v11  ;;  %v588_v57 = vld [vmem:[%s11686_s12 + $0x30] sm:$0xff] }
 0xa87   :  { %6944 = vmatprep.subr.bf16.mxu0 %v10368_v54  ;;  %12318 = vst [vmem:[#allocation256_spill] sm:$0xff] %v10418_v40  ;;  %v10424_v48 = vpack.c.bf16 %v581_v49, %v577_v55  ;;  %12322 = vst [vmem:[#allocation260_spill] sm:$0xff] %v10456_v6  ;;  %7241 = vmatpush3.bf16.msra.mxu1 %v10456_v6  ;;  %v585_v5 = vld [vmem:[%s11686_s12 + $0x18] sm:$0xff]  ;;  %v587_v55 = vld [vmem:[%s11686_s12 + $0x28] sm:$0xff] }
 0xa88   :  { %7242 = vmatprep.subr.bf16.mxu1 %v12279_v41  ;;  %v10466_v44 = vpack.c.bf16 %v585_v5, %v584_v19  ;;  %v10476_v49 = vpack.c.bf16 %v587_v55, %v586_v53  ;;  %v589_v4 = vld [vmem:[%s11686_s12 + $0x38] sm:$0xff]  ;;  %v590_v5 = vld [vmem:[%s11686_s12 + $0x40] sm:$0xff]  ;;  %v591_v53 = vld [vmem:[%s11686_s12 + $0x48] sm:$0xff] }
 0xa89   :  { %12320 = vst [vmem:[#allocation258_spill] sm:$0xff] %v10424_v48  ;;  %v10486_v19 = vpack.c.bf16 %v589_v4, %v588_v57  ;;  %v10496_v55 = vpack.c.bf16 %v591_v53, %v590_v5  ;;  %v592_v57 = vld [vmem:[%s11686_s12 + $0x50] sm:$0xff]  ;;  %v593_v4 = vld [vmem:[%s11686_s12 + $0x58] sm:$0xff]  ;;  %v594_v5 = vld [vmem:[%s11686_s12 + $0x60] sm:$0xff] }
 0xa8a   :  { %6946 = vmatpush1.bf16.msra.mxu0 %v10371_v56  ;;  %12323 = vst [vmem:[#allocation261_spill] sm:$0xff] %v10466_v44  ;;  %12324 = vst [vmem:[#allocation262_spill] sm:$0xff] %v10476_v49  ;;  %v595_v53 = vld [vmem:[%s11686_s12 + $0x68] sm:$0xff] }
 0xa8b   :  { %6948 = vmatprep.subr.bf16.mxu0 %v10374_v3  ;;  %7244 = vmatpush3.bf16.msra.mxu1 %v10466_v44  ;;  %12325 = vst [vmem:[#allocation263_spill] sm:$0xff] %v10486_v19  ;;  %12326 = vst [vmem:[#allocation264_spill] sm:$0xff] %v10496_v55 }
 0xa8c   :  { %7245 = vmatprep.subr.bf16.mxu1 %v12279_v41 }
 0xa8e   :  { %6950 = vmatpush1.bf16.msra.mxu0 %v10377_v60 }
 0xa8f   :  { %6952 = vmatprep.subr.bf16.mxu0 %v10380_v13  ;;  %7247 = vmatpush3.bf16.msra.mxu1 %v10476_v49 }
 0xa90   :  { %7248 = vmatprep.subr.bf16.mxu1 %v12279_v41 }
 0xa91   :  { %2419 = vmatmul.mubr.f32.vlgmr.msra.gmra.mrb[6].mxu0 %v12147_v18 }
 0xa92   :  { %6954 = vmatpush1.bf16.msra.mxu0 %v10383_v0  ;;  %2489 = vmatprep.mubr.f32.mxu0 %v12147_v18 }
 0xa93   :  { %6956 = vmatprep.subr.bf16.mxu0 %v10386_v34  ;;  %7250 = vmatpush3.bf16.msra.mxu1 %v10486_v19  ;;  %v10506_v19 = vpack.c.bf16 %v593_v4, %v592_v57  ;;  %v596_v57 = vld [vmem:[%s11686_s12 + $0x70] sm:$0xff]  ;;  %v597_v4 = vld [vmem:[%s11686_s12 + $0x78] sm:$0xff] }
 0xa94   :  { %7251 = vmatprep.subr.bf16.mxu1 %v12279_v41 }
 0xa95   :  { %12327 = vst [vmem:[#allocation265_spill] sm:$0xff] %v10506_v19 }
 0xa96   :  { %6958 = vmatpush1.bf16.msra.mxu0 %v10390_v15 }
 0xa97   :  { %6960 = vmatprep.subr.bf16.mxu0 %v10394_v24  ;;  %7253 = vmatpush3.bf16.msra.mxu1 %v10496_v55  ;;  %v10516_v55 = vpack.c.bf16 %v595_v53, %v594_v5  ;;  %v664_v5 = vld [vmem:[%s11685_s11] sm:$0xf] }
 0xa98   :  { %7254 = vmatprep.subr.bf16.mxu1 %v12279_v41  ;;  %v10536_v53 = vrot.slane %v664_v5, %v9690_v10  ;;  %v10545_v26 = vrot.slane %v664_v5, %v9711_v58 }
 0xa99   :  { %12328 = vst [vmem:[#allocation266_spill] sm:$0xff] %v10516_v55 }
 0xa9a   :  { %6962 = vmatpush1.bf16.msra.mxu0 %v10397_v28  ;;  %12331 = vst [vmem:[#allocation269_spill] sm:$0xff] %v10536_v53  ;;  %12333 = vst [vmem:[#allocation271_spill] sm:$0xff] %v10545_v26 }
 0xa9b   :  { %6964 = vmatprep.subr.bf16.mxu0 %v10400_v22  ;;  %7256 = vmatpush3.bf16.msra.mxu1 %v10506_v19  ;;  %v10526_v19 = vpack.c.bf16 %v597_v4, %v596_v57  ;;  %v10541_v57 = vrot.slane %v664_v5, %v9697_v61 }
 0xa9c   :  { %7257 = vmatprep.subr.bf16.mxu1 %v12279_v41 }
 0xa9d   :  { %12329 = vst [vmem:[#allocation267_spill] sm:$0xff] %v10526_v19  ;;  %12332 = vst [vmem:[#allocation270_spill] sm:$0xff] %v10541_v57 }
 0xa9e   :  { %6966 = vmatpush1.bf16.msra.mxu0 %v10403_v32 }
 0xa9f   :  { %6968 = vmatprep.subr.bf16.mxu0 %v10406_v30  ;;  %7259 = vmatpush3.bf16.msra.mxu1 %v10516_v55 }
 0xaa0   :  { %7260 = vmatprep.subr.bf16.mxu1 %v12279_v41  ;;  %v10533_v41 = vrot.slane %v664_v5, %v9695_v62 }
 0xaa2   :  { %6970 = vmatpush1.bf16.msra.mxu0 %v10409_v38  ;;  %12330 = vst [vmem:[#allocation268_spill] sm:$0xff] %v10533_v41 }
 0xaa3   :  { %6972 = vmatprep.subr.bf16.mxu0 %v10412_v25  ;;  %7262 = vmatpush3.bf16.msra.mxu1 %v10526_v19 }
 0xaa6   :  { %6974 = vmatpush1.bf16.msra.mxu0 %v10415_v31 }
 0xaa7   :  { %6976 = vmatprep.subr.bf16.mxu0 %v10418_v40 }
 0xaaa   :  { %6978 = vmatpush1.bf16.msra.mxu0 %v10421_v14 }
 0xaab   :  { %6980 = vmatprep.subr.bf16.mxu0 %v10424_v48 }
 0xaae   :  { %6982 = vmatpush1.bf16.msra.mxu0 %v10427_v11 }
 0xaaf   :  { %6984 = vmatprep.subr.bf16.mxu0 %v10311_v52 }
 0xab1   :  { %2490 = vmatmul.mubr.f32.vlgmr.msra.gmra.mrb[16].mxu0 %v12147_v18 }
 0xab2   :  { %6986 = vmatpush1.bf16.msra.mxu0 %v10326_v51  ;;  %2579 = vmatprep.mubr.f32.mxu0 %v12147_v18 }
 0xab3   :  { %6988 = vmatprep.subr.bf16.mxu0 %v10328_v50 }
 0xab6   :  { %6990 = vmatpush1.bf16.msra.mxu0 %v10333_v47 }
 0xab7   :  { %6992 = vmatprep.subr.bf16.mxu0 %v10336_v39 }
 0xaba   :  { %6994 = vmatpush1.bf16.msra.mxu0 %v10341_v43 }
 0xabb   :  { %6996 = vmatprep.subr.bf16.mxu0 %v10344_v21 }
 0xabe   :  { %6998 = vmatpush1.bf16.msra.mxu0 %v10349_v1 }
 0xabf   :  { %7000 = vmatprep.subr.bf16.mxu0 %v10352_v7 }
 0xac2   :  { %7002 = vmatpush1.bf16.msra.mxu0 %v10357_v37 }
 0xac3   :  { %7004 = vmatprep.subr.bf16.mxu0 %v10360_v16 }
 0xac6   :  { %7006 = vmatpush1.bf16.msra.mxu0 %v10364_v20 }
 0xac7   :  { %7008 = vmatprep.subr.bf16.mxu0 %v10368_v54 }
 0xaca   :  { %7010 = vmatpush1.bf16.msra.mxu0 %v10371_v56 }
 0xacb   :  { %7012 = vmatprep.subr.bf16.mxu0 %v10374_v3 }
 0xace   :  { %7014 = vmatpush1.bf16.msra.mxu0 %v10377_v60 }
 0xacf   :  { %7016 = vmatprep.subr.bf16.mxu0 %v10380_v13 }
 0xb64   :  { %v2420_v49 = vpop.f32.mrb[6].mxu0 }
 0xb65   :  { %v2422_v44 = vpop.f32.mrb[7].mxu0  ;;  %v8291_v6 = vadd.f32 %v2420_v49, %v10536_v53 }
 0xb66   :  { %v8292_v55 = vadd.f32 %v2422_v44, %v10533_v41 }
 0xb68   :  { %8642 = vtanh.f32 %v8292_v55 }
 0xb69   :  { %8644 = vtanh.f32 %v8291_v6 }
 0xb72   :  { %v8643_v62 = vpop.eup %8642 }
 0xb73   :  { %v8645_v10 = vpop.eup %8644  ;;  %v2506_v36 = vadd.f32 1.0, %v8643_v62 }
 0xb74   :  { %v2504_v27 = vadd.f32 1.0, %v8645_v10 }
 0xb75   :  { %v2507_v49 = vmul.f32 0.5, %v2506_v36 }
 0xb76   :  { %v2505_v6 = vmul.f32 0.5, %v2504_v27 }
 0xb77   :  { %v2510_v61 = vmul.f32 0.0, %v2507_v49 }
 0xb84   :  { %v2491_v4 = vpop.f32.mrb[16].mxu0 }
 0xb85   :  { %v8301_v19 = vadd.f32 %v2491_v4, %v10541_v57  ;;  %v2493_v45 = vpop.f32.mrb[17].mxu0 }
 0xb86   :  { %v8302_v44 = vadd.f32 %v2493_v45, %v10545_v26 }
 0xb87   :  { %8646 = vtanh.f32 %v8301_v19 }
 0xb88   :  { %8648 = vtanh.f32 %v8302_v44 }
 0xb91   :  { %v8647_v55 = vpop.eup %8646 }
 0xb92   :  { %v2511_v59 = vmul.f32 %v8647_v55, %v2505_v6  ;;  %v8649_v4 = vpop.eup %8648 }
 0xb93   :  { %v2508_v58 = vadd.f32 1.0, %v8649_v4 }
 0xb94   :  { %v10548_v46 = vadd.f32 %v2511_v59, %v2510_v61 }
 0xb95   :  { %v2509_v5 = vmul.f32 0.5, %v2508_v58 }
 0xb96   :  { %8650 = vtanh.f32 %v10548_v46 }
 0xba0   :  { %v8651_v12 = vpop.eup %8650 }
 0xba1   :  { %v2514_v19 = vmul.f32 %v8651_v12, %v2509_v5 }
 0xba3   :  { %2580 = vmatmul.mubr.f32.vlgmr.msra.gmra.mrb[8].mxu0 %v2514_v19  ;;  %6159 = vmatmul.mubr.f32.vlgmr.msra.gmra.mrb[24].mxu1 %v2514_v19 }
 0xba4   :  { %7018 = vmatpush1.bf16.msra.mxu0 %v10383_v0  ;;  %2650 = vmatprep.mubr.f32.mxu0 %v12147_v18 }
 0xba5   :  { %7020 = vmatprep.subr.bf16.mxu0 %v10386_v34  ;;  %6161 = vmatprep.mubr.msk.f32.mxu1 %vm9087_vm6, %v12147_v18 }
 0xba8   :  { %7022 = vmatpush1.bf16.msra.mxu0 %v10390_v15 }
 0xba9   :  { %7024 = vmatprep.subr.bf16.mxu0 %v10394_v24 }
 0xbac   :  { %7026 = vmatpush1.bf16.msra.mxu0 %v10397_v28 }
 0xbad   :  { %7028 = vmatprep.subr.bf16.mxu0 %v10400_v22 }
 0xbb0   :  { %7030 = vmatpush1.bf16.msra.mxu0 %v10403_v32 }
 0xbb1   :  { %7032 = vmatprep.subr.bf16.mxu0 %v10406_v30 }
 0xbb4   :  { %7034 = vmatpush1.bf16.msra.mxu0 %v10409_v38 }
 0xbb5   :  { %7036 = vmatprep.subr.bf16.mxu0 %v10412_v25 }
 0xbb8   :  { %7038 = vmatpush1.bf16.msra.mxu0 %v10415_v31 }
 0xbb9   :  { %7040 = vmatprep.subr.bf16.mxu0 %v10418_v40 }
 0xbbc   :  { %7042 = vmatpush1.bf16.msra.mxu0 %v10421_v14 }
 0xbbd   :  { %7044 = vmatprep.subr.bf16.mxu0 %v10424_v48 }
 0xbc0   :  { %7046 = vmatpush1.bf16.msra.mxu0 %v10427_v11 }
 0xbc1   :  { %7048 = vmatprep.subr.bf16.mxu0 %v10311_v52 }
 0xbc3   :  { %2651 = vmatmul.mubr.f32.vlgmr.msra.gmra.mrb[18].mxu0 %v2514_v19 }
 0xbc4   :  { %7050 = vmatpush1.bf16.msra.mxu0 %v10326_v51  ;;  %2740 = vmatprep.mubr.f32.mxu0 %v12147_v18 }
 0xbc5   :  { %7052 = vmatprep.subr.bf16.mxu0 %v10328_v50 }
 0xbc8   :  { %7054 = vmatpush1.bf16.msra.mxu0 %v10333_v47 }
 0xbc9   :  { %7056 = vmatprep.subr.bf16.mxu0 %v10336_v39 }
 0xbcc   :  { %7058 = vmatpush1.bf16.msra.mxu0 %v10341_v43 }
 0xbcd   :  { %7060 = vmatprep.subr.bf16.mxu0 %v10344_v21 }
 0xbd0   :  { %7062 = vmatpush1.bf16.msra.mxu0 %v10349_v1 }
 0xbd1   :  { %7064 = vmatprep.subr.bf16.mxu0 %v10352_v7 }
 0xbd4   :  { %7066 = vmatpush1.bf16.msra.mxu0 %v10357_v37 }
 0xbd5   :  { %7068 = vmatprep.subr.bf16.mxu0 %v10360_v16 }
 0xbd8   :  { %7070 = vmatpush1.bf16.msra.mxu0 %v10364_v20 }
 0xbd9   :  { %7072 = vmatprep.subr.bf16.mxu0 %v10368_v54 }
 0xbdc   :  { %7074 = vmatpush1.bf16.msra.mxu0 %v10371_v56 }
 0xbdd   :  { %7076 = vmatprep.subr.bf16.mxu0 %v10374_v3 }
 0xbe0   :  { %7078 = vmatpush1.bf16.msra.mxu0 %v10377_v60 }
 0xbe1   :  { %7080 = vmatprep.subr.bf16.mxu0 %v10380_v13 }
 0xc76   :  { %v2581_v27 = vpop.f32.mrb[8].mxu0  ;;  %v10587_v12 = vpop.f32.mrb[24].mxu1 }
 0xc77   :  { %v2583_v59 = vpop.f32.mrb[9].mxu0  ;;  %v6160_v36 = vpop.f32.mrb[25].mxu1  ;;  %v8293_v62 = vadd.f32 %v2581_v27, %v10536_v53 }
 0xc78   :  { %v8294_v45 = vadd.f32 %v2583_v59, %v10533_v41 }
 0xc7a   :  { %8652 = vtanh.f32 %v8294_v45 }
 0xc7b   :  { %8654 = vtanh.f32 %v8293_v62 }
 0xc84   :  { %v8653_v6 = vpop.eup %8652 }
 0xc85   :  { %v8655_v55 = vpop.eup %8654  ;;  %v2667_v61 = vadd.f32 1.0, %v8653_v6 }
 0xc86   :  { %v2665_v58 = vadd.f32 1.0, %v8655_v55 }
 0xc87   :  { %v2668_v5 = vmul.f32 0.5, %v2667_v61 }
 0xc88   :  { %v2666_v19 = vmul.f32 0.5, %v2665_v58 }
 0xc89   :  { %v2671_v59 = vmul.f32 %v2668_v5, %v10548_v46 }
 0xc96   :  { %v2652_v10 = vpop.f32.mrb[18].mxu0 }
 0xc97   :  { %v8303_v44 = vadd.f32 %v2652_v10, %v10541_v57  ;;  %v2654_v49 = vpop.f32.mrb[19].mxu0 }
 0xc98   :  { %v8304_v4 = vadd.f32 %v2654_v49, %v10545_v26 }
 0xc99   :  { %8656 = vtanh.f32 %v8303_v44 }
 0xc9a   :  { %8658 = vtanh.f32 %v8304_v4 }
 0xca3   :  { %v8657_v36 = vpop.eup %8656 }
 0xca4   :  { %v2672_v27 = vmul.f32 %v8657_v36, %v2666_v19  ;;  %v8659_v62 = vpop.eup %8658 }
 0xca5   :  { %v2669_v10 = vadd.f32 1.0, %v8659_v62 }
 0xca6   :  { %v10594_v45 = vadd.f32 %v2672_v27, %v2671_v59 }
 0xca7   :  { %v2670_v35 = vmul.f32 0.5, %v2669_v10 }
 0xca8   :  { %8660 = vtanh.f32 %v10594_v45 }
 0xcb2   :  { %v8661_v44 = vpop.eup %8660 }
 0xcb3   :  { %v2675_v42 = vmul.f32 %v8661_v44, %v2670_v35 }
 0xcb5   :  { %2741 = vmatmul.mubr.f32.vlgmr.msra.gmra.mrb[10].mxu0 %v2675_v42  ;;  %6162 = vmatmul.mubr.f32.gmra.mrb[26].mxu1 %v2675_v42 }
 0xcb6   :  { %7082 = vmatpush1.bf16.msra.mxu0 %v10383_v0  ;;  %2811 = vmatprep.mubr.f32.mxu0 %v12147_v18 }
 0xcb7   :  { %7084 = vmatprep.subr.bf16.mxu0 %v10386_v34  ;;  %6164 = vmatprep.mubr.msk.f32.mxu1 %vm9087_vm6, %v12147_v18 }
 0xcba   :  { %7086 = vmatpush1.bf16.msra.mxu0 %v10390_v15 }
 0xcbb   :  { %7088 = vmatprep.subr.bf16.mxu0 %v10394_v24 }
 0xcbe   :  { %7090 = vmatpush1.bf16.msra.mxu0 %v10397_v28 }
 0xcbf   :  { %7092 = vmatprep.subr.bf16.mxu0 %v10400_v22 }
 0xcc2   :  { %7094 = vmatpush1.bf16.msra.mxu0 %v10403_v32 }
 0xcc3   :  { %7096 = vmatprep.subr.bf16.mxu0 %v10406_v30 }
 0xcc6   :  { %7098 = vmatpush1.bf16.msra.mxu0 %v10409_v38 }
 0xcc7   :  { %7100 = vmatprep.subr.bf16.mxu0 %v10412_v25 }
 0xcca   :  { %7102 = vmatpush1.bf16.msra.mxu0 %v10415_v31 }
 0xccb   :  { %7104 = vmatprep.subr.bf16.mxu0 %v10418_v40 }
 0xcce   :  { %7106 = vmatpush1.bf16.msra.mxu0 %v10421_v14 }
 0xccf   :  { %7108 = vmatprep.subr.bf16.mxu0 %v10424_v48 }
 0xcd2   :  { %7110 = vmatpush1.bf16.msra.mxu0 %v10427_v11 }
 0xcd3   :  { %7112 = vmatprep.subr.bf16.mxu0 %v10311_v52 }
 0xcd5   :  { %2812 = vmatmul.mubr.f32.vlgmr.msra.gmra.mrb[20].mxu0 %v2675_v42 }
 0xcd6   :  { %7114 = vmatpush1.bf16.msra.mxu0 %v10326_v51  ;;  %2901 = vmatprep.mubr.f32.mxu0 %v12147_v18 }
 0xcd7   :  { %7116 = vmatprep.subr.bf16.mxu0 %v10328_v50 }
 0xcda   :  { %7118 = vmatpush1.bf16.msra.mxu0 %v10333_v47 }
 0xcdb   :  { %7120 = vmatprep.subr.bf16.mxu0 %v10336_v39 }
 0xcde   :  { %7122 = vmatpush1.bf16.msra.mxu0 %v10341_v43 }
 0xcdf   :  { %7124 = vmatprep.subr.bf16.mxu0 %v10344_v21 }
 0xce2   :  { %7126 = vmatpush1.bf16.msra.mxu0 %v10349_v1 }
 0xce3   :  { %7128 = vmatprep.subr.bf16.mxu0 %v10352_v7 }
 0xce6   :  { %7130 = vmatpush1.bf16.msra.mxu0 %v10357_v37 }
 0xce7   :  { %7132 = vmatprep.subr.bf16.mxu0 %v10360_v16 }
 0xcea   :  { %7134 = vmatpush1.bf16.msra.mxu0 %v10364_v20 }
 0xceb   :  { %7136 = vmatprep.subr.bf16.mxu0 %v10368_v54 }
 0xcee   :  { %7138 = vmatpush1.bf16.msra.mxu0 %v10371_v56 }
 0xcef   :  { %7140 = vmatprep.subr.bf16.mxu0 %v10374_v3 }
 0xcf2   :  { %7142 = vmatpush1.bf16.msra.mxu0 %v10377_v60 }
 0xcf3   :  { %7144 = vmatprep.subr.bf16.mxu0 %v10380_v13 }
 0xd88   :  { %v2742_v42 = vpop.f32.mrb[10].mxu0  ;;  %v10633_v35 = vpop.f32.mrb[26].mxu1 }
 0xd89   :  { %v2744_v49 = vpop.f32.mrb[11].mxu0  ;;  %v6163_v6 = vpop.f32.mrb[27].mxu1  ;;  %v8295_v61 = vadd.f32 %v2742_v42, %v10536_v53 }
 0xd8a   :  { %v8296_v55 = vadd.f32 %v2744_v49, %v10533_v41 }
 0xd8c   :  { %8662 = vtanh.f32 %v8296_v55 }
 0xd8d   :  { %8664 = vtanh.f32 %v8295_v61 }
 0xd96   :  { %v8663_v19 = vpop.eup %8662 }
 0xd97   :  { %v8665_v36 = vpop.eup %8664  ;;  %v2828_v59 = vadd.f32 1.0, %v8663_v19 }
 0xd98   :  { %v2826_v62 = vadd.f32 1.0, %v8665_v36 }
 0xd99   :  { %v2829_v10 = vmul.f32 0.5, %v2828_v59 }
 0xd9a   :  { %v2827_v44 = vmul.f32 0.5, %v2826_v62 }
 0xd9b   :  { %v2832_v49 = vmul.f32 %v2829_v10, %v10594_v45 }
 0xda8   :  { %v2813_v4 = vpop.f32.mrb[20].mxu0 }
 0xda9   :  { %v8305_v58 = vadd.f32 %v2813_v4, %v10541_v57  ;;  %v2815_v5 = vpop.f32.mrb[21].mxu0 }
 0xdaa   :  { %v8306_v27 = vadd.f32 %v2815_v5, %v10545_v26 }
 0xdab   :  { %8666 = vtanh.f32 %v8305_v58 }
 0xdac   :  { %8668 = vtanh.f32 %v8306_v27 }
 0xdb5   :  { %v8667_v6 = vpop.eup %8666 }
 0xdb6   :  { %v2833_v42 = vmul.f32 %v8667_v6, %v2827_v44  ;;  %v8669_v61 = vpop.eup %8668 }
 0xdb7   :  { %v2830_v4 = vadd.f32 1.0, %v8669_v61 }
 0xdb8   :  { %v10642_v55 = vadd.f32 %v2833_v42, %v2832_v49 }
 0xdb9   :  { %v2831_v46 = vmul.f32 0.5, %v2830_v4 }
 0xdba   :  { %8670 = vtanh.f32 %v10642_v55 }
 0xdc4   :  { %v8671_v58 = vpop.eup %8670 }
 0xdc5   :  { %v2836_v8 = vmul.f32 %v8671_v58, %v2831_v46  ;;  %v12334_v46 = vmax.f32 %v10587_v12, %v10633_v35 }
 0xdc7   :  { %2902 = vmatmul.mubr.f32.vlgmr.msra.gmra.mrb[12].mxu0 %v2836_v8  ;;  %6165 = vmatmul.mubr.f32.gmra.mrb[28].mxu1 %v2836_v8 }
 0xdc8   :  { %7146 = vmatpush1.bf16.msra.mxu0 %v10383_v0  ;;  %2972 = vmatprep.mubr.f32.mxu0 %v12147_v18 }
 0xdc9   :  { %7148 = vmatprep.subr.bf16.mxu0 %v10386_v34  ;;  %6167 = vmatprep.mubr.msk.f32.mxu1 %vm9087_vm6, %v12147_v18 }
 0xdcc   :  { %7150 = vmatpush1.bf16.msra.mxu0 %v10390_v15 }
 0xdcd   :  { %7152 = vmatprep.subr.bf16.mxu0 %v10394_v24 }
 0xdd0   :  { %7154 = vmatpush1.bf16.msra.mxu0 %v10397_v28 }
 0xdd1   :  { %7156 = vmatprep.subr.bf16.mxu0 %v10400_v22 }
 0xdd4   :  { %7158 = vmatpush1.bf16.msra.mxu0 %v10403_v32 }
 0xdd5   :  { %7160 = vmatprep.subr.bf16.mxu0 %v10406_v30 }
 0xdd8   :  { %7162 = vmatpush1.bf16.msra.mxu0 %v10409_v38 }
 0xdd9   :  { %7164 = vmatprep.subr.bf16.mxu0 %v10412_v25 }
 0xddc   :  { %7166 = vmatpush1.bf16.msra.mxu0 %v10415_v31 }
 0xddd   :  { %7168 = vmatprep.subr.bf16.mxu0 %v10418_v40 }
 0xde0   :  { %7170 = vmatpush1.bf16.msra.mxu0 %v10421_v14 }
 0xde1   :  { %7172 = vmatprep.subr.bf16.mxu0 %v10424_v48 }
 0xde4   :  { %7174 = vmatpush1.bf16.msra.mxu0 %v10427_v11 }
 0xde5   :  { %7176 = vmatprep.subr.bf16.mxu0 %v10311_v52 }
 0xde7   :  { %2973 = vmatmul.mubr.f32.vlgmr.msra.gmra.mrb[22].mxu0 %v2836_v8 }
 0xde8   :  { %7178 = vmatpush1.bf16.msra.mxu0 %v10326_v51  ;;  %3062 = vmatprep.mubr.f32.mxu0 %v12147_v18 }
 0xde9   :  { %7180 = vmatprep.subr.bf16.mxu0 %v10328_v50 }
 0xdec   :  { %7182 = vmatpush1.bf16.msra.mxu0 %v10333_v47 }
 0xded   :  { %7184 = vmatprep.subr.bf16.mxu0 %v10336_v39 }
 0xdf0   :  { %7186 = vmatpush1.bf16.msra.mxu0 %v10341_v43 }
 0xdf1   :  { %7188 = vmatprep.subr.bf16.mxu0 %v10344_v21 }
 0xdf4   :  { %7190 = vmatpush1.bf16.msra.mxu0 %v10349_v1 }
 0xdf5   :  { %7192 = vmatprep.subr.bf16.mxu0 %v10352_v7 }
 0xdf8   :  { %7194 = vmatpush1.bf16.msra.mxu0 %v10357_v37 }
 0xdf9   :  { %7196 = vmatprep.subr.bf16.mxu0 %v10360_v16 }
 0xdfc   :  { %7198 = vmatpush1.bf16.msra.mxu0 %v10364_v20 }
 0xdfd   :  { %7200 = vmatprep.subr.bf16.mxu0 %v10368_v54 }
 0xe00   :  { %7202 = vmatpush1.bf16.msra.mxu0 %v10371_v56 }
 0xe01   :  { %7204 = vmatprep.subr.bf16.mxu0 %v10374_v3 }
 0xe04   :  { %7206 = vmatpush1.bf16.msra.mxu0 %v10377_v60 }
 0xe05   :  { %7208 = vmatprep.subr.bf16.mxu0 %v10380_v13 }
 0xe9a   :  { %v2903_v8 = vpop.f32.mrb[12].mxu0  ;;  %v10681_v45 = vpop.f32.mrb[28].mxu1 }
 0xe9b   :  { %v10687_v5 = vmax.f32 %v12334_v46, %v10681_v45  ;;  %v2905_v19 = vpop.f32.mrb[13].mxu0  ;;  %v6166_v36 = vpop.f32.mrb[29].mxu1  ;;  %v8297_v27 = vadd.f32 %v2903_v8, %v10536_v53 }
 0xe9c   :  { %v8298_v59 = vadd.f32 %v2905_v19, %v10533_v41 }
 0xe9e   :  { %8672 = vtanh.f32 %v8298_v59 }
 0xe9f   :  { %8674 = vtanh.f32 %v8297_v27 }
 0xea8   :  { %v8673_v6 = vpop.eup %8672 }
 0xea9   :  { %v8675_v49 = vpop.eup %8674  ;;  %v2989_v42 = vadd.f32 1.0, %v8673_v6 }
 0xeaa   :  { %v2987_v4 = vadd.f32 1.0, %v8675_v49 }
 0xeab   :  { %v2990_v58 = vmul.f32 0.5, %v2989_v42 }
 0xeac   :  { %v2988_v46 = vmul.f32 0.5, %v2987_v4 }
 0xead   :  { %v2993_v19 = vmul.f32 %v2990_v58, %v10642_v55 }
 0xeba   :  { %v2974_v62 = vpop.f32.mrb[22].mxu0 }
 0xebb   :  { %v8307_v10 = vadd.f32 %v2974_v62, %v10541_v57  ;;  %v2976_v44 = vpop.f32.mrb[23].mxu0 }
 0xebc   :  { %v8308_v61 = vadd.f32 %v2976_v44, %v10545_v26 }
 0xebd   :  { %8676 = vtanh.f32 %v8307_v10 }
 0xebe   :  { %8678 = vtanh.f32 %v8308_v61 }
 0xec7   :  { %v8677_v36 = vpop.eup %8676 }
 0xec8   :  { %v2994_v8 = vmul.f32 %v8677_v36, %v2988_v46  ;;  %v8679_v27 = vpop.eup %8678 }
 0xec9   :  { %v2991_v13 = vadd.f32 1.0, %v8679_v27 }
 0xeca   :  { %v2995_v59 = vadd.f32 %v2994_v8, %v2993_v19 }
 0xecb   :  { %v2992_v62 = vmul.f32 0.5, %v2991_v13 }
 0xecc   :  { %8680 = vtanh.f32 %v2995_v59 }
 0xed6   :  { %v8681_v60 = vpop.eup %8680 }
 0xed7   :  { %v2997_v3 = vmul.f32 %v8681_v60, %v2992_v62 }
 0xed9   :  { %3063 = vmatmul.mubr.f32.vlgmr.msra.gmra.mrb[14].mxu0 %v2997_v3  ;;  %6168 = vmatmul.mubr.f32.gmra.mrb[30].mxu1 %v2997_v3 }
 0xeda   :  { %7210 = vmatpush1.bf16.msra.mxu0 %v10383_v0  ;;  %3133 = vmatprep.mubr.f32.mxu0 %v12147_v18 }
 0xedb   :  { %7212 = vmatprep.subr.bf16.mxu0 %v10386_v34  ;;  %6170 = vmatprep.mubr.msk.f32.mxu1 %vm9087_vm6, %v12147_v18 }
 0xede   :  { %7214 = vmatpush1.bf16.msra.mxu0 %v10390_v15 }
 0xedf   :  { %7216 = vmatprep.subr.bf16.mxu0 %v10394_v24 }
 0xee2   :  { %7218 = vmatpush1.bf16.msra.mxu0 %v10397_v28 }
 0xee3   :  { %7220 = vmatprep.subr.bf16.mxu0 %v10400_v22 }
 0xee6   :  { %7222 = vmatpush1.bf16.msra.mxu0 %v10403_v32 }
 0xee7   :  { %7224 = vmatprep.subr.bf16.mxu0 %v10406_v30 }
 0xeea   :  { %7226 = vmatpush1.bf16.msra.mxu0 %v10409_v38 }
 0xeeb   :  { %7228 = vmatprep.subr.bf16.mxu0 %v10412_v25 }
 0xeee   :  { %7230 = vmatpush1.bf16.msra.mxu0 %v10415_v31 }
 0xeef   :  { %7232 = vmatprep.subr.bf16.mxu0 %v10418_v40 }
 0xef2   :  { %7234 = vmatpush1.bf16.msra.mxu0 %v10421_v14 }
 0xef3   :  { %7236 = vmatprep.subr.bf16.mxu0 %v10424_v48 }
 0xef6   :  { %7238 = vmatpush1.bf16.msra.mxu0 %v10427_v11 }
 0xef9   :  { %3134 = vmatmul.mubr.f32.vlgmr.msra.gmra.mrb[24].mxu0 %v2997_v3 }
 0xfac   :  { %v3064_v18 = vpop.f32.mrb[14].mxu0  ;;  %v3240_v60 = vpop.f32.mrb[30].mxu1 }
 0xfad   :  { %v3251_v13 = vmax.f32 %v10687_v5, %v3240_v60  ;;  %v3066_v55 = vpop.f32.mrb[15].mxu0  ;;  %v6169_v10 = vpop.f32.mrb[31].mxu1  ;;  %v8299_v6 = vadd.f32 %v3064_v18, %v10536_v53 }
 0xfae   :  { %v8300_v44 = vadd.f32 %v3066_v55, %v10533_v41 }
 0xfb0   :  { %8682 = vtanh.f32 %v8300_v44 }
 0xfb1   :  { %8684 = vtanh.f32 %v8299_v6 }
 0xfba   :  { %v8683_v4 = vpop.eup %8682 }
 0xfbb   :  { %v8685_v58 = vpop.eup %8684  ;;  %v3150_v3 = vadd.f32 1.0, %v8683_v4 }
 0xfbc   :  { %v3148_v36 = vadd.f32 1.0, %v8685_v58 }
 0xfbd   :  { %v3151_v5 = vmul.f32 0.5, %v3150_v3 }
 0xfbe   :  { %v3149_v19 = vmul.f32 0.5, %v3148_v36 }
 0xfbf   :  { %v3154_v27 = vmul.f32 %v3151_v5, %v2995_v59 }
 0xfcc   :  { %v3135_v49 = vpop.f32.mrb[24].mxu0 }
 0xfcd   :  { %v8309_v42 = vadd.f32 %v3135_v49, %v10541_v57  ;;  %v3137_v61 = vpop.f32.mrb[25].mxu0 }
 0xfce   :  { %v8310_v46 = vadd.f32 %v3137_v61, %v10545_v26 }
 0xfcf   :  { %8686 = vtanh.f32 %v8309_v42 }
 0xfd0   :  { %8688 = vtanh.f32 %v8310_v46 }
 0xfd9   :  { %v8687_v8 = vpop.eup %8686 }
 0xfda   :  { %v3155_v62 = vmul.f32 %v8687_v8, %v3149_v19  ;;  %v8689_v55 = vpop.eup %8688 }
 0xfdb   :  { %v3152_v10 = vadd.f32 1.0, %v8689_v55 }
 0xfdc   :  { %v3156_v18 = vadd.f32 %v3155_v62, %v3154_v27  }
 0xfdd   :  { %v3153_v44 = vmul.f32 0.5, %v3152_v10 }
 0xfde   :  { %8690 = vtanh.f32 %v3156_v18 }
 0xfe8   :  { %v8691_v6 = vpop.eup %8690 }
 0xfe9   :  { %v3158_v49 = vmul.f32 %v8691_v6, %v3153_v44  }
 0xfeb   :  { %6171 = vmatmul.mubr.f32.gmra.mrb[32].mxu1 %v3158_v49 }
0x10be   :  { %v3245_v42 = vpop.f32.mrb[32].mxu1 }
0x10bf   :  { %v3252_v57 = vmax.f32 %v3251_v13, %v3245_v42  ;;  %v6172_v4 = vpop.f32.mrb[33].mxu1 }
0x10c1   :  { %v3253_v61 = vsub.f32 %v10587_v12, %v3252_v57  ;;  %v3256_v58 = vsub.f32 %v10633_v35, %v3252_v57  ;;  %v3259_v3 = vsub.f32 %v10681_v45, %v3252_v57  ;;  %v3262_v46 = vsub.f32 %v3240_v60, %v3252_v57 }
0x10c2   :  { %v3265_v59 = vsub.f32 %v3245_v42, %v3252_v57 }
0x10c3   :  { %v3254_v36 = vmul.f32 1.442695, %v3253_v61  ;;  %v3257_v5 = vmul.f32 1.442695, %v3256_v58  ;;  %v3260_v19 = vmul.f32 1.442695, %v3259_v3 }
0x10c4   :  { %v3263_v8 = vmul.f32 1.442695, %v3262_v46  ;;  %v3266_v27 = vmul.f32 1.442695, %v3265_v59 }
0x10c5   :  { %8692 = vpow2.f32 %v3254_v36 }
0x10c6   :  { %8694 = vpow2.f32 %v3257_v5 }
0x10c7   :  { %8696 = vpow2.f32 %v3260_v19 }
0x10c8   :  { %8698 = vpow2.f32 %v3263_v8 }
0x10c9   :  { %8700 = vpow2.f32 %v3266_v27 }
0x10cf   :  { %v8693_v13 = vpop.eup %8692 }
0x10d0   :  { %v8695_v62 = vpop.eup %8694  ;;  %v3268_v12 = vmul.f32 %v8693_v13, %v9863_v2 }
0x10d1   :  { %v8697_v55 = vpop.eup %8696  ;;  %v3269_v35 = vadd.f32 %v8695_v62, %v8693_v13  ;;  %v3270_v45 = vmul.f32 %v8695_v62, %v9863_v2 }
0x10d2   :  { %v8699_v60 = vpop.eup %8698  ;;  %v3273_v44 = vmul.f32 %v8697_v55, %v9863_v2 }
0x10d3   :  { %v3272_v57 = vadd.f32 %v8697_v55, %v3269_v35  ;;  %v3271_v10 = vadd.f32 %v3270_v45, %v3268_v12  ;;  %v8701_v6 = vpop.eup %8700  ;;  %v3276_v61 = vmul.f32 %v8699_v60, %v9863_v2  ;;  %v12335_v45 = vmov %v9863_v2 }
0x10d4   :  { %v3279_v3 = vmul.f32 %v8701_v6, %v9863_v2 }
0x10d5   :  { %v3275_v42 = vadd.f32 %v8699_v60, %v3272_v57  ;;  %v3274_v4 = vadd.f32 %v3273_v44, %v3271_v10  ;;  %v12336_v60 = vmov %v9863_v2  ;;  %v12337_v57 = vmov %v9863_v2  ;;  %v12338_v10 = vld [vmem:[#allocation160_spill] sm:$0xff]  ;;  %v12339_v44 = vld [vmem:[#allocation161_spill] sm:$0xff] }
0x10d7   :  { %v3278_v58 = vadd.f32 %v8701_v6, %v3275_v42  ;;  %v3277_v46 = vadd.f32 %v3276_v61, %v3274_v4  ;;  %v12340_v6 = vld [vmem:[#allocation146_spill] sm:$0xff]  ;;  %v12341_v42 = vld [vmem:[#allocation147_spill] sm:$0xff] }
0x10d9   :  { %8702 = vrcp.f32 %v3278_v58  ;;  %v3280_v59 = vadd.f32 %v3279_v3, %v3277_v46 }
0x10e3   :  { %v8703_v36 = vpop.eup %8702 }
0x10e4   :  { %v3282_v5 = vmul.f32 %v8703_v36, %v3280_v59 }
0x10e6   :  { %v3283_v19 = vadd.f32 %v3282_v5, %v9859_v17 }
0x10e8   :  { %v3284_v8 = vadd.f32 3.1415927, %v3283_v19 }
0x10ea   :  { %v3285_v27 = vmul.f32 0.15915494, %v3284_v8 }
0x10ec   :  { %v3286_v13 = vfloor.f32 %v3285_v27 }
0x10ee   :  { %v3287_v62 = vmul.f32 6.2831855, %v3286_v13 }
0x10f0   :  { %v3288_v12 = vsub.f32 %v3283_v19, %v3287_v62 }
0x10f2   :  { %3291 = vperm.xlu0 %8568, %v3288_v12  }
0x1171   :  { %v3292_v55 = vpop.permute.xlu0 %3291 }
0x1172   :  { %v3294_v35 = vsel %vm688_vm0, %v3292_v55, %v3283_v19  }
0x1173   :  { %3295 = vst.msk [vmem:[%s11687_s13] sm:$0xff] %vm743_vm3, %v3294_v35 }
0x1174 LB: > { %v12342_v1 = vld [vmem:[#allocation235_spill] sm:$0xff]  ;;  %v12343_v9 = vld [vmem:[#allocation166_spill] sm:$0xff]  ;;  %12345 = vst [vmem:[#allocation272_spill] sm:$0xff] %v9018_v45  ;;  %v12346_v4 = vmov %v9018_v45  ;;  %12347 = vst [vmem:[#allocation273_spill] sm:$0xff] %v9022_v60  ;;  %v12348_v61 = vmov %v9022_v60  ;;  %v12350_v58 = vmov %v9026_v57  ;;  %v9088_v59 = vmov 6   ;;  %s5995_s16 = sshll.u32 %s9074_s9, 3  ;;  %3426 = vmatprep.mubr.f32.mxu0 %v9070_v42  ;;  %3497 = vmatprep.mubr.f32.mxu1 %v9070_v42  ;;  %v9026_v57 = vphi %v12337_v57, %v12669_v57   ;;  %v9022_v60 = vphi %v12336_v60, %v12670_v60   ;;  %v9018_v45 = vphi %v12335_v45, %v12675_v45   ;;  %s9074_s9 = sphi %s10771_s9, %s3302_s9   ;;  %v9070_v42 = vphi %v12341_v42, %v12680_v42   ;;  %v9066_v6 = vphi %v12340_v6, %v12679_v6   ;;  %v9062_v44 = vphi %v12339_v44, %v12678_v44   ;;  %v9058_v10 = vphi %v12338_v10, %v12677_v10   ;;  %v9054_v33 = vphi %v10322_v33, %v11366_v33   ;;  %v9050_v63 = vphi %v10319_v63, %v11363_v63   ;;  %v9046_v49 = vphi %v3158_v49, %v12676_v49   ;;  %v9042_v18 = vphi %v3156_v18, %v11606_v18   ;;  %v9038_v17 = vphi %v9859_v17, %v12672_v17   ;;  %v9034_v35 = vphi %v3294_v35, %v5906_v35   ;;  %v9030_v2 = vphi %v9863_v2, %v12668_v2  }
0x1175   : > { %12349 = vst [vmem:[#allocation274_spill] sm:$0xff] %v9026_v57  ;;  %12351 = vst [vmem:[#allocation275_spill] sm:$0xff] %v9030_v2  ;;  %v12354_v3 = vld [vmem:[#allocation13_spill] sm:$0xff]  ;;  %v12355_v46 = vld [vmem:[#allocation14_spill] sm:$0xff]  ;;  %8704 = vset.pattern.permute.xlu0 %v9088_v59  ;;  %s3318_s30 = scalar_lea.vmem %s11674_s0, %s5995_s16  ;;  %8705 = vset.pattern.permute.xlu1 %v9088_v59  ;;  %s9089_s23 = smov 7   ;;  %vm9091_vm10 = vmmov 0  }
0x1176   : > { %12352 = vst [vmem:[#allocation276_spill] sm:$0xff] %v9042_v18  ;;  %12353 = vst [vmem:[#allocation277_spill] sm:$0xff] %v9046_v49  ;;  %7264 = vmatprep.subr.bf16.mxu0 %v12354_v3  ;;  %7328 = vmatprep.subr.bf16.mxu1 %v12355_v46  ;;  %v12356_v36 = vld [vmem:[#allocation15_spill] sm:$0xff]  ;;  %v12357_v5 = vld [vmem:[#allocation16_spill] sm:$0xff]  ;;  %s6013_s4 = sadd.s32 4294967295, %s9074_s9  ;;  %s3302_s9 = sadd.s32 1, %s9074_s9  }
0x1177   : > { %7266 = vmatpush1.bf16.msra.mxu0 %v12356_v36  ;;  %7330 = vmatpush1.bf16.msra.mxu1 %v12357_v5  ;;  %v12358_v19 = vld [vmem:[#allocation17_spill] sm:$0xff]  ;;  %v12359_v8 = vld [vmem:[#allocation18_spill] sm:$0xff]  ;;  %v12360_v62 = vld [vmem:[#allocation19_spill] sm:$0xff]  ;;  %s11064_s5 = sshll.u32 %s6013_s4, 3  ;;  %p11626_p12 = scmp.ge.s32.totalorder %s3302_s9, 8  }
0x1178   : > { %7268 = vmatprep.subr.bf16.mxu0 %v12358_v19  ;;  %7332 = vmatprep.subr.bf16.mxu1 %v12359_v8  ;;  %v10828_v27 = vld [vmem:[%s3318_s30] sm:$0xff]  ;;  %v12361_v12 = vld [vmem:[#allocation20_spill] sm:$0xff]  ;;  %v12363_v60 = vld [vmem:[#allocation22_spill] sm:$0xff]  ;;  %s5911_s28 = scalar_lea.vmem %s11688_s14, %s11064_s5  ;;  %s5909_s17 = scalar_lea.vmem %s11687_s13, %s11064_s5 }
0x1179   : > { %v3320_v13 = vadd.f32 3.1415927, %v10828_v27  ;;  %v12362_v55 = vld [vmem:[#allocation21_spill] sm:$0xff]  ;;  %v12364_v3 = vld [vmem:[#allocation23_spill] sm:$0xff]  ;;  %v12365_v46 = vld [vmem:[#allocation24_spill] sm:$0xff] }
0x117a   : > { %v12366_v36 = vld [vmem:[#allocation25_spill] sm:$0xff]  ;;  %v12367_v5 = vld [vmem:[#allocation26_spill] sm:$0xff]  ;;  %v12368_v8 = vld [vmem:[#allocation27_spill] sm:$0xff] }
0x117b   : > { %7270 = vmatpush1.bf16.msra.mxu0 %v12360_v62  ;;  %7334 = vmatpush1.bf16.msra.mxu1 %v12361_v12  ;;  %v3321_v45 = vmul.f32 0.15915494, %v3320_v13  ;;  %v12369_v62 = vld [vmem:[#allocation28_spill] sm:$0xff]  ;;  %v12370_v12 = vld [vmem:[#allocation29_spill] sm:$0xff]  ;;  %v12371_v13 = vld [vmem:[#allocation30_spill] sm:$0xff] }
0x117c   : > { %7272 = vmatprep.subr.bf16.mxu0 %v12362_v55  ;;  %7336 = vmatprep.subr.bf16.mxu1 %v12363_v60  ;;  %v12372_v55 = vld [vmem:[#allocation31_spill] sm:$0xff]  ;;  %v12374_v60 = vld [vmem:[#allocation33_spill] sm:$0xff]  ;;  %v12420_v42 = vld [vmem:[#allocation80_spill] sm:$0xff] }
0x117d   : > { %v3322_v57 = vfloor.f32 %v3321_v45  ;;  %v12373_v45 = vld [vmem:[#allocation32_spill] sm:$0xff]  ;;  %v12522_v29 = vld [vmem:[#allocation218_spill] sm:$0xff]  ;;  %v12585_v56 = vld [vmem:[#allocation217_spill] sm:$0xff] }
0x117e   : > { %v12572_v30 = vld [vmem:[#allocation194_spill] sm:$0xff] }
0x117f   : > { %7274 = vmatpush1.bf16.msra.mxu0 %v12364_v3  ;;  %7338 = vmatpush1.bf16.msra.mxu1 %v12365_v46  ;;  %v3323_v59 = vmul.f32 6.2831855, %v3322_v57  ;;  %v12375_v57 = vld [vmem:[#allocation34_spill] sm:$0xff]  ;;  %v12376_v3 = vld [vmem:[#allocation35_spill] sm:$0xff]  ;;  %v12377_v46 = vld [vmem:[#allocation36_spill] sm:$0xff] }
0x1180   : > { %7276 = vmatprep.subr.bf16.mxu0 %v12366_v36  ;;  %7340 = vmatprep.subr.bf16.mxu1 %v12367_v5  ;;  %v12378_v36 = vld [vmem:[#allocation37_spill] sm:$0xff]  ;;  %v12380_v5 = vld [vmem:[#allocation39_spill] sm:$0xff]  ;;  %v12601_v52 = vld [vmem:[#allocation234_spill] sm:$0xff] }
0x1181   : > { %v3324_v19 = vsub.f32 %v10828_v27, %v3323_v59  ;;  %v12379_v59 = vld [vmem:[#allocation38_spill] sm:$0xff] }
0x1183   : > { %7278 = vmatpush1.bf16.msra.mxu0 %v12368_v8  ;;  %7342 = vmatpush1.bf16.msra.mxu1 %v12369_v62  ;;  %v12382_v8 = vld [vmem:[#allocation41_spill] sm:$0xff]  ;;  %v12383_v62 = vld [vmem:[#allocation42_spill] sm:$0xff] }
0x1184   : > { %7280 = vmatprep.subr.bf16.mxu0 %v12370_v12  ;;  %3327 = vperm.xlu0 %8704, %v3324_v19   ;;  %v12381_v19 = vld [vmem:[#allocation40_spill] sm:$0xff]  ;;  %v12384_v12 = vld [vmem:[#allocation43_spill] sm:$0xff] }
0x1185   : > { %7344 = vmatprep.subr.bf16.mxu1 %v12371_v13  ;;  %v12385_v13 = vld [vmem:[#allocation44_spill] sm:$0xff] }
0x1187   : > { %7282 = vmatpush1.bf16.msra.mxu0 %v12372_v55  ;;  %7346 = vmatpush1.bf16.msra.mxu1 %v12373_v45  ;;  %v12386_v55 = vld [vmem:[#allocation45_spill] sm:$0xff]  ;;  %v12387_v45 = vld [vmem:[#allocation46_spill] sm:$0xff] }
0x1188   : > { %7284 = vmatprep.subr.bf16.mxu0 %v12374_v60  ;;  %7348 = vmatprep.subr.bf16.mxu1 %v12375_v57  ;;  %v12388_v60 = vld [vmem:[#allocation47_spill] sm:$0xff]  ;;  %v12389_v57 = vld [vmem:[#allocation48_spill] sm:$0xff] }
0x118b   : > { %7286 = vmatpush1.bf16.msra.mxu0 %v12376_v3  ;;  %7350 = vmatpush1.bf16.msra.mxu1 %v12377_v46  ;;  %v12390_v3 = vld [vmem:[#allocation49_spill] sm:$0xff]  ;;  %v12391_v46 = vld [vmem:[#allocation50_spill] sm:$0xff] }
0x118c   : > { %7288 = vmatprep.subr.bf16.mxu0 %v12378_v36  ;;  %7352 = vmatprep.subr.bf16.mxu1 %v12379_v59  ;;  %v12392_v36 = vld [vmem:[#allocation51_spill] sm:$0xff]  ;;  %v12393_v59 = vld [vmem:[#allocation52_spill] sm:$0xff] }
0x118f   : > { %7290 = vmatpush1.bf16.msra.mxu0 %v12380_v5  ;;  %7354 = vmatpush1.bf16.msra.mxu1 %v12381_v19  ;;  %v12394_v5 = vld [vmem:[#allocation53_spill] sm:$0xff]  ;;  %v12395_v19 = vld [vmem:[#allocation54_spill] sm:$0xff] }
0x1190   : > { %7292 = vmatprep.subr.bf16.mxu0 %v12382_v8  ;;  %7356 = vmatprep.subr.bf16.mxu1 %v12383_v62  ;;  %v12396_v8 = vld [vmem:[#allocation55_spill] sm:$0xff]  ;;  %v12397_v62 = vld [vmem:[#allocation56_spill] sm:$0xff] }
0x1193   : > { %7294 = vmatpush1.bf16.msra.mxu0 %v12384_v12  ;;  %7358 = vmatpush1.bf16.msra.mxu1 %v12385_v13  ;;  %v12398_v12 = vld [vmem:[#allocation57_spill] sm:$0xff]  ;;  %v12399_v13 = vld [vmem:[#allocation58_spill] sm:$0xff] }
0x1194   : > { %7296 = vmatprep.subr.bf16.mxu0 %v12386_v55  ;;  %7360 = vmatprep.subr.bf16.mxu1 %v12387_v45  ;;  %v12400_v55 = vld [vmem:[#allocation59_spill] sm:$0xff]  ;;  %v12401_v45 = vld [vmem:[#allocation60_spill] sm:$0xff] }
0x1197   : > { %7298 = vmatpush1.bf16.msra.mxu0 %v12388_v60  ;;  %7362 = vmatpush1.bf16.msra.mxu1 %v12389_v57  ;;  %v12402_v60 = vld [vmem:[#allocation61_spill] sm:$0xff]  ;;  %v12403_v57 = vld [vmem:[#allocation62_spill] sm:$0xff] }
0x1198   : > { %7300 = vmatprep.subr.bf16.mxu0 %v12390_v3  ;;  %7364 = vmatprep.subr.bf16.mxu1 %v12391_v46  ;;  %v12404_v3 = vld [vmem:[#allocation63_spill] sm:$0xff]  ;;  %v12405_v46 = vld [vmem:[#allocation64_spill] sm:$0xff] }
0x119b   : > { %7302 = vmatpush1.bf16.msra.mxu0 %v12392_v36  ;;  %7366 = vmatpush1.bf16.msra.mxu1 %v12393_v59  ;;  %v12406_v36 = vld [vmem:[#allocation65_spill] sm:$0xff]  ;;  %v12407_v59 = vld [vmem:[#allocation66_spill] sm:$0xff] }
0x119c   : > { %7304 = vmatprep.subr.bf16.mxu0 %v12394_v5  ;;  %7368 = vmatprep.subr.bf16.mxu1 %v12395_v19  ;;  %v12408_v5 = vld [vmem:[#allocation67_spill] sm:$0xff]  ;;  %v12409_v19 = vld [vmem:[#allocation68_spill] sm:$0xff] }
0x119f   : > { %7306 = vmatpush1.bf16.msra.mxu0 %v12396_v8  ;;  %7370 = vmatpush1.bf16.msra.mxu1 %v12397_v62  ;;  %v12410_v8 = vld [vmem:[#allocation69_spill] sm:$0xff]  ;;  %v12411_v62 = vld [vmem:[#allocation70_spill] sm:$0xff] }
0x11a0   : > { %7308 = vmatprep.subr.bf16.mxu0 %v12398_v12  ;;  %7372 = vmatprep.subr.bf16.mxu1 %v12399_v13  ;;  %v12412_v12 = vld [vmem:[#allocation72_spill] sm:$0xff]  ;;  %v12413_v13 = vld [vmem:[#allocation73_spill] sm:$0xff] }
0x11a3   : > { %7310 = vmatpush1.bf16.msra.mxu0 %v12400_v55  ;;  %7374 = vmatpush1.bf16.msra.mxu1 %v12401_v45  ;;  %v12414_v55 = vld [vmem:[#allocation74_spill] sm:$0xff]  ;;  %v12415_v45 = vld [vmem:[#allocation75_spill] sm:$0xff] }
0x11a4   : > { %7312 = vmatprep.subr.bf16.mxu0 %v12402_v60  ;;  %7376 = vmatprep.subr.bf16.mxu1 %v12403_v57  ;;  %v12416_v60 = vld [vmem:[#allocation76_spill] sm:$0xff]  ;;  %v12417_v57 = vld [vmem:[#allocation77_spill] sm:$0xff] }
0x11a7   : > { %7314 = vmatpush1.bf16.msra.mxu0 %v12404_v3  ;;  %7378 = vmatpush1.bf16.msra.mxu1 %v12405_v46  ;;  %v12418_v3 = vld [vmem:[#allocation78_spill] sm:$0xff]  ;;  %v12419_v46 = vld [vmem:[#allocation79_spill] sm:$0xff] }
0x11a8   : > { %7316 = vmatprep.subr.bf16.mxu0 %v12406_v36  ;;  %7380 = vmatprep.subr.bf16.mxu1 %v12407_v59  ;;  %v3331_v36 = vadd.f32 3.1415927, %v9034_v35 }
0x11aa   : > { %v3332_v59 = vmul.f32 0.15915494, %v3331_v36 }
0x11ab   : > { %7318 = vmatpush1.bf16.msra.mxu0 %v12408_v5  ;;  %7382 = vmatpush1.bf16.msra.mxu1 %v12409_v19 }
0x11ac   : > { %7320 = vmatprep.subr.bf16.mxu0 %v12410_v8  ;;  %7384 = vmatprep.subr.bf16.mxu1 %v12411_v62  ;;  %v3333_v5 = vfloor.f32 %v3332_v59 }
0x11ae   : > { %v3334_v19 = vmul.f32 6.2831855, %v3333_v5 }
0x11af   : > { %7322 = vmatpush1.bf16.msra.mxu0 %v12412_v12  ;;  %7386 = vmatpush1.bf16.msra.mxu1 %v12413_v13 }
0x11b0   : > { %7324 = vmatprep.subr.bf16.mxu0 %v12414_v55  ;;  %7388 = vmatprep.subr.bf16.mxu1 %v12415_v45  ;;  %v3335_v8 = vsub.f32 %v9034_v35, %v3334_v19 }
0x11b2   : > { %v3340_v13 = vadd.f32 3.1415927, %v3335_v8 }
0x11b3   : > { %7326 = vmatpush1.bf16.msra.mxu0 %v12416_v60  ;;  %7390 = vmatpush1.bf16.msra.mxu1 %v12417_v57  ;;  %v5996_v60 = vadd.f32 -3.1415927, %v3335_v8 }
0x11b4   : > { %7392 = vmatprep.subr.bf16.mxu0 %v12418_v3  ;;  %7456 = vmatprep.subr.bf16.mxu1 %v12419_v46 }
0x1203   : > { %v3328_v62 = vpop.permute.xlu0 %3327 }
0x1204   : > { %v3330_v12 = vsel %vm688_vm0, %v3328_v62, %v10828_v27 }
0x1205   : > { %v3336_v55 = vsub.f32 %v3335_v8, %v3330_v12  ;;  %v10898_v45 = vsub.f32 %v3330_v12, %v9038_v17  ;;  %v12422_v12 = vld [vmem:[#allocation82_spill] sm:$0xff] }
0x1207   : > { %vm3337_vm8 = vcmp.gt.f32.partialorder %v3336_v55, 1.5707964  ;;  %vm3339_vm9 = vcmp.lt.f32.partialorder %v3336_v55, -1.5707964  ;;  %3352 = vrot.lane.b32.xlu1 %v10898_v45, %s9089_s23  ;;  %v12425_v55 = vld [vmem:[#allocation85_spill] sm:$0xff] }
0x1208   : > { %v3341_v57 = vsel %vm3339_vm9, %v3340_v13, %v3335_v8  ;;  %v12424_v13 = vld [vmem:[#allocation84_spill] sm:$0xff] }
0x1209   : > { %v3342_v3 = vsel %vm3337_vm8, %v5996_v60, %v3341_v57  ;;  %v12426_v60 = vld [vmem:[#allocation86_spill] sm:$0xff]  ;;  %v12427_v57 = vld [vmem:[#allocation87_spill] sm:$0xff] }
0x120a   : > { %3345 = vperm.xlu0 %8704, %v3342_v3   ;;  %v12428_v3 = vld [vmem:[#allocation88_spill] sm:$0xff] }
0x120b   : > { %3356 = vrot.lane.b32.xlu1 %v10828_v27, %s9089_s23  ;;  %v12421_v27 = vld [vmem:[#allocation81_spill] sm:$0xff] }
0x1279   : > { %v3353_v46 = vpop.permute.xlu1 %3352 }
0x127d   : > { %v3357_v19 = vpop.permute.xlu1 %3356 }
0x1289   : > { %v3346_v36 = vpop.permute.xlu0 %3345 }
0x128a   : > { %v3348_v59 = vsel %vm688_vm0, %v3346_v36, %v9034_v35  ;;  %v12423_v35 = vld [vmem:[#allocation83_spill] sm:$0xff]  ;;  %v12430_v36 = vld [vmem:[#allocation90_spill] sm:$0xff] }
0x128b   : > { %v10908_v5 = vsub.f32 %v3348_v59, %v9038_v17  ;;  %v12431_v59 = vld [vmem:[#allocation91_spill] sm:$0xff] }
0x128d   : > { %v3359_v8 = vsel %vm743_vm3, %v10908_v5, %v3353_v46  ;;  %v12429_v46 = vld [vmem:[#allocation89_spill] sm:$0xff] }
0x128e   : > { %v3360_v62 = vsel %vm745_vm4, %v3359_v8, %v3357_v19  ;;  %v12432_v19 = vld [vmem:[#allocation92_spill] sm:$0xff]  ;;  %v12433_v8 = vld [vmem:[#allocation93_spill] sm:$0xff] }
0x128f   : > { %5997 = vmatmul.mubr.msk.f32.vlgmr.msra.gmra.mrb[0].mxu0 %vm747_vm5, %v3360_v62  ;;  %5998 = vmatmul.mubr.msk.f32.vlgmr.msra.gmra.mrb[0].mxu1 %vm747_vm5, %v3360_v62  ;;  %v12434_v62 = vld [vmem:[#allocation94_spill] sm:$0xff] }
0x1290   : > { %7394 = vmatpush1.bf16.msra.mxu0 %v12420_v42  ;;  %7458 = vmatpush1.bf16.msra.mxu1 %v12421_v27  ;;  %v12435_v42 = vld [vmem:[#allocation95_spill] sm:$0xff]  ;;  %v12436_v27 = vld [vmem:[#allocation96_spill] sm:$0xff] }
0x1291   : > { %7396 = vmatprep.subr.bf16.mxu0 %v12422_v12  ;;  %7460 = vmatprep.subr.bf16.mxu1 %v12423_v35  ;;  %v12437_v12 = vld [vmem:[#allocation97_spill] sm:$0xff]  ;;  %v12438_v35 = vld [vmem:[#allocation98_spill] sm:$0xff] }
0x1292   : > { %3583 = vmatprep.mubr.f32.mxu0 %v9062_v44  ;;  %3654 = vmatprep.mubr.f32.mxu1 %v9062_v44 }
0x1294   : > { %7398 = vmatpush1.bf16.msra.mxu0 %v12424_v13  ;;  %7462 = vmatpush1.bf16.msra.mxu1 %v12425_v55  ;;  %v12439_v13 = vld [vmem:[#allocation99_spill] sm:$0xff]  ;;  %v12440_v55 = vld [vmem:[#allocation100_spill] sm:$0xff] }
0x1295   : > { %7400 = vmatprep.subr.bf16.mxu0 %v12426_v60  ;;  %7464 = vmatprep.subr.bf16.mxu1 %v12427_v57  ;;  %v12441_v60 = vld [vmem:[#allocation101_spill] sm:$0xff]  ;;  %v12442_v57 = vld [vmem:[#allocation102_spill] sm:$0xff] }
0x1298   : > { %7402 = vmatpush1.bf16.msra.mxu0 %v12428_v3  ;;  %7466 = vmatpush1.bf16.msra.mxu1 %v12429_v46  ;;  %v12443_v3 = vld [vmem:[#allocation103_spill] sm:$0xff]  ;;  %v12444_v46 = vld [vmem:[#allocation104_spill] sm:$0xff] }
0x1299   : > { %7404 = vmatprep.subr.bf16.mxu0 %v12430_v36  ;;  %7468 = vmatprep.subr.bf16.mxu1 %v12431_v59  ;;  %v12445_v36 = vld [vmem:[#allocation105_spill] sm:$0xff]  ;;  %v12446_v59 = vld [vmem:[#allocation106_spill] sm:$0xff] }
0x129c   : > { %7406 = vmatpush1.bf16.msra.mxu0 %v12432_v19  ;;  %7470 = vmatpush1.bf16.msra.mxu1 %v12433_v8  ;;  %v12447_v19 = vld [vmem:[#allocation107_spill] sm:$0xff]  ;;  %v12448_v8 = vld [vmem:[#allocation108_spill] sm:$0xff] }
0x129d   : > { %7408 = vmatprep.subr.bf16.mxu0 %v12434_v62  ;;  %7472 = vmatprep.subr.bf16.mxu1 %v12435_v42  ;;  %v12449_v62 = vld [vmem:[#allocation109_spill] sm:$0xff]  ;;  %v12450_v42 = vld [vmem:[#allocation110_spill] sm:$0xff] }
0x12a0   : > { %7410 = vmatpush1.bf16.msra.mxu0 %v12436_v27  ;;  %7474 = vmatpush1.bf16.msra.mxu1 %v12437_v12  ;;  %v12451_v27 = vld [vmem:[#allocation111_spill] sm:$0xff]  ;;  %v12452_v12 = vld [vmem:[#allocation112_spill] sm:$0xff] }
0x12a1   : > { %7412 = vmatprep.subr.bf16.mxu0 %v12438_v35  ;;  %7476 = vmatprep.subr.bf16.mxu1 %v12439_v13  ;;  %v12453_v35 = vld [vmem:[#allocation113_spill] sm:$0xff]  ;;  %v12454_v13 = vld [vmem:[#allocation114_spill] sm:$0xff] }
0x12a4   : > { %7414 = vmatpush1.bf16.msra.mxu0 %v12440_v55  ;;  %7478 = vmatpush1.bf16.msra.mxu1 %v12441_v60  ;;  %v12455_v55 = vld [vmem:[#allocation115_spill] sm:$0xff]  ;;  %v12456_v60 = vld [vmem:[#allocation116_spill] sm:$0xff] }
0x12a5   : > { %7416 = vmatprep.subr.bf16.mxu0 %v12442_v57  ;;  %7480 = vmatprep.subr.bf16.mxu1 %v12443_v3  ;;  %v12457_v57 = vld [vmem:[#allocation117_spill] sm:$0xff]  ;;  %v12458_v3 = vld [vmem:[#allocation118_spill] sm:$0xff] }
0x12a8   : > { %7418 = vmatpush1.bf16.msra.mxu0 %v12444_v46  ;;  %7482 = vmatpush1.bf16.msra.mxu1 %v12445_v36  ;;  %v12459_v46 = vld [vmem:[#allocation119_spill] sm:$0xff]  ;;  %v12460_v36 = vld [vmem:[#allocation120_spill] sm:$0xff] }
0x12a9   : > { %7420 = vmatprep.subr.bf16.mxu0 %v12446_v59  ;;  %7484 = vmatprep.subr.bf16.mxu1 %v12447_v19  ;;  %v12461_v59 = vld [vmem:[#allocation121_spill] sm:$0xff]  ;;  %v12462_v19 = vld [vmem:[#allocation122_spill] sm:$0xff] }
0x12ac   : > { %7422 = vmatpush1.bf16.msra.mxu0 %v12448_v8  ;;  %7486 = vmatpush1.bf16.msra.mxu1 %v12449_v62  ;;  %v12463_v8 = vld [vmem:[#allocation123_spill] sm:$0xff]  ;;  %v12464_v62 = vld [vmem:[#allocation124_spill] sm:$0xff] }
0x12ad   : > { %7424 = vmatprep.subr.bf16.mxu0 %v12450_v42  ;;  %7488 = vmatprep.subr.bf16.mxu1 %v12451_v27  ;;  %v12465_v42 = vld [vmem:[#allocation125_spill] sm:$0xff]  ;;  %v12466_v27 = vld [vmem:[#allocation126_spill] sm:$0xff] }
0x12b0   : > { %7426 = vmatpush1.bf16.msra.mxu0 %v12452_v12  ;;  %7490 = vmatpush1.bf16.msra.mxu1 %v12453_v35  ;;  %v12467_v12 = vld [vmem:[#allocation127_spill] sm:$0xff]  ;;  %v12468_v35 = vld [vmem:[#allocation128_spill] sm:$0xff] }
0x12b1   : > { %7428 = vmatprep.subr.bf16.mxu0 %v12454_v13  ;;  %7492 = vmatprep.subr.bf16.mxu1 %v12455_v55  ;;  %v12469_v13 = vld [vmem:[#allocation129_spill] sm:$0xff]  ;;  %v12470_v55 = vld [vmem:[#allocation130_spill] sm:$0xff] }
0x12b4   : > { %7430 = vmatpush1.bf16.msra.mxu0 %v12456_v60  ;;  %7494 = vmatpush1.bf16.msra.mxu1 %v12457_v57  ;;  %v12471_v60 = vld [vmem:[#allocation131_spill] sm:$0xff]  ;;  %v12472_v57 = vld [vmem:[#allocation132_spill] sm:$0xff] }
0x12b5   : > { %7432 = vmatprep.subr.bf16.mxu0 %v12458_v3  ;;  %7496 = vmatprep.subr.bf16.mxu1 %v12459_v46  ;;  %v12473_v3 = vld [vmem:[#allocation133_spill] sm:$0xff]  ;;  %v12474_v46 = vld [vmem:[#allocation134_spill] sm:$0xff] }
0x12b8   : > { %7434 = vmatpush1.bf16.msra.mxu0 %v12460_v36  ;;  %7498 = vmatpush1.bf16.msra.mxu1 %v12461_v59  ;;  %v12475_v36 = vld [vmem:[#allocation135_spill] sm:$0xff]  ;;  %v12476_v59 = vld [vmem:[#allocation136_spill] sm:$0xff] }
0x12b9   : > { %7436 = vmatprep.subr.bf16.mxu0 %v12462_v19  ;;  %7500 = vmatprep.subr.bf16.mxu1 %v12463_v8  ;;  %v12477_v19 = vld [vmem:[#allocation137_spill] sm:$0xff]  ;;  %v12478_v8 = vld [vmem:[#allocation138_spill] sm:$0xff] }
0x12bc   : > { %7438 = vmatpush1.bf16.msra.mxu0 %v12464_v62  ;;  %7502 = vmatpush1.bf16.msra.mxu1 %v12465_v42  ;;  %v12479_v62 = vld [vmem:[#allocation139_spill] sm:$0xff]  ;;  %v12480_v42 = vld [vmem:[#allocation140_spill] sm:$0xff] }
0x12bd   : > { %7440 = vmatprep.subr.bf16.mxu0 %v12466_v27  ;;  %7504 = vmatprep.subr.bf16.mxu1 %v12467_v12  ;;  %v12481_v27 = vld [vmem:[#allocation141_spill] sm:$0xff]  ;;  %v12482_v12 = vld [vmem:[#allocation162_spill] sm:$0xff] }
0x12c0   : > { %7442 = vmatpush1.bf16.msra.mxu0 %v12468_v35  ;;  %7506 = vmatpush1.bf16.msra.mxu1 %v12469_v13 }
0x12c1   : > { %7444 = vmatprep.subr.bf16.mxu0 %v12470_v55  ;;  %7508 = vmatprep.subr.bf16.mxu1 %v12471_v60  ;;  %v12483_v55 = vld [vmem:[#allocation142_spill] sm:$0xff] }
0x12c4   : > { %7446 = vmatpush1.bf16.msra.mxu0 %v12472_v57  ;;  %7510 = vmatpush1.bf16.msra.mxu1 %v12473_v3 }
0x12c5   : > { %7448 = vmatprep.subr.bf16.mxu0 %v12474_v46  ;;  %7512 = vmatprep.subr.bf16.mxu1 %v12475_v36  ;;  %v12484_v46 = vld [vmem:[#allocation143_spill] sm:$0xff] }
0x12c8   : > { %7450 = vmatpush1.bf16.msra.mxu0 %v12476_v59  ;;  %7514 = vmatpush1.bf16.msra.mxu1 %v12477_v19  ;;  %v12485_v59 = vld [vmem:[#allocation144_spill] sm:$0xff] }
0x12c9   : > { %7452 = vmatprep.subr.bf16.mxu0 %v12478_v8  ;;  %7516 = vmatprep.subr.bf16.mxu1 %v12479_v62  ;;  %v12486_v8 = vld [vmem:[#allocation145_spill] sm:$0xff] }
0x12cc   : > { %7454 = vmatpush1.bf16.msra.mxu0 %v12480_v42  ;;  %7518 = vmatpush1.bf16.msra.mxu1 %v12481_v27 }
0x12cd   : > { %5999 = vmatprep.subr.msk.mxu1 %vm1156_vm7, %v12482_v12 }
0x1362   : > { %v3428_v35 = vpop.f32.mrb[0].mxu0  ;;  %v3499_v13 = vpop.f32.mrb[0].mxu1 }
0x1363   : > { %v3429_v60 = vadd.f32 %v3428_v35, %v12483_v55  ;;  %v3430_v57 = vpop.f32.mrb[1].mxu0  ;;  %v3501_v3 = vpop.f32.mrb[1].mxu1  ;;  %v3500_v19 = vadd.f32 %v3499_v13, %v12485_v59  ;;  %v12493_v59 = vld [vmem:[#allocation150_spill] sm:$0xff] }
0x1364   : > { %v3431_v36 = vadd.f32 %v3430_v57, %v12484_v46  ;;  %v3502_v62 = vadd.f32 %v3501_v3, %v12486_v8  ;;  %v12489_v3 = vld [vmem:[#allocation163_spill] sm:$0xff]  ;;  %v12495_v8 = vld [vmem:[#allocation152_spill] sm:$0xff] }
0x1365   : > { %8706 = vtanh.f32 %v3429_v60 }
0x1366   : > { %8708 = vtanh.f32 %v3431_v36  ;;  %v12492_v36 = vld [vmem:[#allocation149_spill] sm:$0xff] }
0x1367   : > { %8710 = vtanh.f32 %v3500_v19  ;;  %v12494_v19 = vld [vmem:[#allocation151_spill] sm:$0xff] }
0x1368   : > { %8712 = vtanh.f32 %v3502_v62  ;;  %v12496_v62 = vld [vmem:[#allocation153_spill] sm:$0xff] }
0x136f   : > { %v8707_v42 = vpop.eup %8706 }
0x1370   : > { %v3508_v27 = vadd.f32 1.0, %v8707_v42  ;;  %v8709_v12 = vpop.eup %8708 }
0x1371   : > { %v3510_v44 = vadd.f32 1.0, %v8709_v12  ;;  %v8711_v26 = vpop.eup %8710  ;;  %v12498_v12 = vld [vmem:[#allocation155_spill] sm:$0xff] }
0x1372   : > { %v3509_v18 = vmul.f32 0.5, %v3508_v27  ;;  %v8713_v13 = vpop.eup %8712  ;;  %v12497_v27 = vld [vmem:[#allocation154_spill] sm:$0xff] }
0x1373   : > { %v3511_v53 = vmul.f32 0.5, %v3510_v44  ;;  %v3512_v60 = vadd.f32 1.0, %v8713_v13  ;;  %v11969_v44 = vmov 0.0  }
0x1374   : > { %v3515_v35 = vmul.f32 %v8711_v26, %v3509_v18  ;;  %v12490_v26 = vld [vmem:[#allocation164_spill] sm:$0xff] }
0x1375   : > { %v3514_v55 = vmul.f32 %v9066_v6, %v3511_v53  ;;  %v3513_v57 = vmul.f32 0.5, %v3512_v60  ;;  %v11967_v53 = vmov 0.0|0.0   ;;  %v12491_v18 = vld [vmem:[#allocation148_spill] sm:$0xff] }
0x1376   : > { %7519 = vmatprep.subr.bf16.mxu0 %v11967_v53  ;;  %v12500_v60 = vld [vmem:[#allocation156_spill] sm:$0xff] }
0x1377   : > { %v10986_v6 = vadd.f32 %v3515_v35, %v3514_v55   ;;  %v12499_v35 = vld [vmem:[#allocation198_spill] sm:$0xff] }
0x1379   : > { %12487 = vst [vmem:[#allocation160_spill] sm:$0xff] %v10986_v6  ;;  %8714 = vtanh.f32 %v10986_v6  ;;  %v12550_v6 = vld [vmem:[#allocation183_spill] sm:$0xff] }
0x1383   : > { %v8715_v46 = vpop.eup %8714 }
0x1384   : > { %v10989_v42 = vmul.f32 %v8715_v46, %v3513_v57  }
0x1386   : > { %12488 = vst [vmem:[#allocation161_spill] sm:$0xff] %v10989_v42  ;;  %3584 = vmatmul.mubr.f32.vlgmr.msra.gmra.mrb[2].mxu0 %v10989_v42  ;;  %3655 = vmatmul.mubr.f32.vlgmr.msra.gmra.mrb[2].mxu1 %v10989_v42 }
0x1387   : > { %6000 = vmatpush1.msk.msra.mxu1 %vm1156_vm7, %v12489_v3  ;;  %7521 = vmatpush3.bf16.msra.mxu0 %v12491_v18 }
0x1388   : > { %6006 = vmatprep.subr.msk.mxu1 %vm1156_vm7, %v12490_v26  ;;  %7522 = vmatprep.subr.bf16.mxu0 %v11967_v53  ;;  %v12501_v26 = vld [vmem:[#allocation157_spill] sm:$0xff] }
0x1389   : > { %6205 = vmatprep.mubr.msk.f32.mxu0 %vm9091_vm10, %v11969_v44  ;;  %3845 = vmatprep.mubr.f32.mxu1 %v11969_v44 }
0x138a   : > { %6001 = vmatmul.mubr.msk.f32.vlgmr.msra.gmra.mrb[4].mxu1 %vm743_vm3, %v9030_v2 }
0x138b   : > { %7524 = vmatpush3.bf16.msra.mxu0 %v12492_v36  ;;  %v12502_v36 = vld [vmem:[#allocation158_spill] sm:$0xff] }
0x138c   : > { %7525 = vmatprep.subr.bf16.mxu0 %v11967_v53 }
0x138f   : > { %7527 = vmatpush3.bf16.msra.mxu0 %v12493_v59 }
0x1390   : > { %7528 = vmatprep.subr.bf16.mxu0 %v11967_v53 }
0x1393   : > { %7530 = vmatpush3.bf16.msra.mxu0 %v12494_v19  ;;  %v12503_v19 = vld [vmem:[#allocation159_spill] sm:$0xff] }
0x1394   : > { %7531 = vmatprep.subr.bf16.mxu0 %v11967_v53 }
0x1397   : > { %7533 = vmatpush3.bf16.msra.mxu0 %v12495_v8 }
0x1398   : > { %7534 = vmatprep.subr.bf16.mxu0 %v11967_v53 }
0x139b   : > { %7536 = vmatpush3.bf16.msra.mxu0 %v12496_v62 }
0x139c   : > { %7537 = vmatprep.subr.bf16.mxu0 %v11967_v53 }
0x139f   : > { %7539 = vmatpush3.bf16.msra.mxu0 %v12497_v27 }
0x13a0   : > { %7540 = vmatprep.subr.bf16.mxu0 %v11967_v53 }
0x13a3   : > { %7542 = vmatpush3.bf16.msra.mxu0 %v12498_v12 }
0x13a4   : > { %7864 = vmatprep.subr.bf16.mxu0 %v12499_v35 }
0x1459   : > { %v3585_v55 = vpop.f32.mrb[2].mxu0  ;;  %v3656_v13 = vpop.f32.mrb[2].mxu1 }
0x145a   : > { %v3586_v57 = vadd.f32 %v3585_v55, %v12500_v60  ;;  %v3587_v46 = vpop.f32.mrb[3].mxu0  ;;  %v3658_v3 = vpop.f32.mrb[3].mxu1  ;;  %v3657_v59 = vadd.f32 %v3656_v13, %v12502_v36  ;;  %v12508_v36 = vld [vmem:[#allocation200_spill] sm:$0xff] }
0x145b   : > { %v3588_v18 = vadd.f32 %v3587_v46, %v12501_v26  ;;  %v3659_v8 = vadd.f32 %v3658_v3, %v12503_v19  ;;  %v12506_v3 = vld [vmem:[#allocation199_spill] sm:$0xff]  ;;  %v12512_v19 = vld [vmem:[#allocation204_spill] sm:$0xff] }
0x145c   : > { %8716 = vtanh.f32 %v3586_v57 }
0x145d   : > { %8718 = vtanh.f32 %v3588_v18  ;;  %v12507_v18 = vmov 0.0  }
0x145e   : > { %8720 = vtanh.f32 %v3657_v59  ;;  %v12511_v59 = vld [vmem:[#allocation203_spill] sm:$0xff]  ;;  %3851 = vmatprep.mubr.f32.mxu1 %v12507_v18 }
0x145f   : > { %8722 = vtanh.f32 %v3659_v8  ;;  %v12513_v8 = vld [vmem:[#allocation205_spill] sm:$0xff]  ;;  %6002 = vmatmul.mubr.msk.f32.gmra.mrb[6].mxu1 %vm743_vm3, %v12350_v58 }
0x1460   : > { %3857 = vmatprep.mubr.f32.mxu1 %v12507_v18 }
0x1463   : > { %6003 = vmatmul.mubr.msk.f32.gmra.mrb[8].mxu1 %vm743_vm3, %v12348_v61 }
0x1464   : > { %3863 = vmatprep.mubr.f32.mxu1 %v12507_v18 }
0x1466   : > { %v8717_v62 = vpop.eup %8716 }
0x1467   : > { %v3665_v27 = vadd.f32 1.0, %v8717_v62  ;;  %v8719_v12 = vpop.eup %8718  ;;  %v12514_v62 = vld [vmem:[#allocation206_spill] sm:$0xff]  ;;  %6004 = vmatmul.mubr.msk.f32.gmra.mrb[10].mxu1 %vm743_vm3, %v12346_v4 }
0x1468   : > { %v3667_v35 = vadd.f32 1.0, %v8719_v12  ;;  %v8721_v44 = vpop.eup %8720  ;;  %v12516_v12 = vld [vmem:[#allocation208_spill] sm:$0xff]  ;;  %3869 = vmatprep.mubr.f32.mxu1 %v12507_v18 }
0x1469   : > { %v3666_v53 = vmul.f32 0.5, %v3665_v27  ;;  %v8723_v13 = vpop.eup %8722  ;;  %v12515_v27 = vld [vmem:[#allocation207_spill] sm:$0xff] }
0x146a   : > { %v3668_v42 = vmul.f32 0.5, %v3667_v35  ;;  %v3669_v57 = vadd.f32 1.0, %v8723_v13  ;;  %v12517_v35 = vld [vmem:[#allocation209_spill] sm:$0xff]  ;;  %v12520_v13 = vld [vmem:[#allocation212_spill] sm:$0xff] }
0x146b   : > { %v3672_v55 = vmul.f32 %v8721_v44, %v3666_v53  ;;  %v12509_v53 = vld [vmem:[#allocation201_spill] sm:$0xff] }
0x146c   : > { %v3671_v60 = vmul.f32 %v9058_v10, %v3668_v42  ;;  %v3670_v46 = vmul.f32 0.5, %v3669_v57  ;;  %v12510_v42 = vld [vmem:[#allocation202_spill] sm:$0xff]  ;;  %v12521_v57 = vld [vmem:[#allocation213_spill] sm:$0xff] }
0x146e   : > { %v11022_v10 = vadd.f32 %v3672_v55, %v3671_v60   ;;  %v12518_v55 = vld [vmem:[#allocation210_spill] sm:$0xff]  ;;  %v12519_v60 = vld [vmem:[#allocation211_spill] sm:$0xff] }
0x1470   : > { %12504 = vst [vmem:[#allocation146_spill] sm:$0xff] %v11022_v10  ;;  %8724 = vtanh.f32 %v11022_v10  ;;  %v12554_v10 = vld [vmem:[#allocation185_spill] sm:$0xff] }
0x147a   : > { %v8725_v26 = vpop.eup %8724 }
0x147b   : > { %v11025_v44 = vmul.f32 %v8725_v26, %v3670_v46   ;;  %v12523_v46 = vld [vmem:[#allocation165_spill] sm:$0xff] }
0x147c   : > { %6007 = vmatpush1.msk.msra.mxu1 %vm1156_vm7, %v12523_v46 }
0x147d   : > { %12505 = vst [vmem:[#allocation147_spill] sm:$0xff] %v11025_v44  ;;  %6206 = vmatmul.mubr.f32.vlgmr.msra.gmra.mrb[4].mxu0 %v11025_v44  ;;  %7544 = vmatprep.subr.bf16.mxu1 %v12343_v9  ;;  %v12552_v44 = vld [vmem:[#allocation184_spill] sm:$0xff] }
0x147e   : > { %7866 = vmatpush1.bf16.msra.mxu0 %v12506_v3  ;;  %4840 = vmatprep.mubr.f32.mxu0 %v12507_v18 }
0x147f   : > { %7868 = vmatprep.subr.bf16.mxu0 %v12508_v36 }
0x1482   : > { %7870 = vmatpush1.bf16.msra.mxu0 %v12509_v53 }
0x1483   : > { %7872 = vmatprep.subr.bf16.mxu0 %v12510_v42 }
0x1486   : > { %7874 = vmatpush1.bf16.msra.mxu0 %v12511_v59 }
0x1487   : > { %7876 = vmatprep.subr.bf16.mxu0 %v12512_v19 }
0x148a   : > { %7878 = vmatpush1.bf16.msra.mxu0 %v12513_v8 }
0x148b   : > { %7880 = vmatprep.subr.bf16.mxu0 %v12514_v62 }
0x148e   : > { %7882 = vmatpush1.bf16.msra.mxu0 %v12515_v27 }
0x148f   : > { %7884 = vmatprep.subr.bf16.mxu0 %v12516_v12 }
0x1492   : > { %7886 = vmatpush1.bf16.msra.mxu0 %v12517_v35 }
0x1493   : > { %7888 = vmatprep.subr.bf16.mxu0 %v12518_v55 }
0x1496   : > { %7890 = vmatpush1.bf16.msra.mxu0 %v12519_v60 }
0x1497   : > { %7892 = vmatprep.subr.bf16.mxu0 %v12520_v13 }
0x149a   : > { %7894 = vmatpush1.bf16.msra.mxu0 %v12521_v57  ;;  %v12526_v57 = vld [vmem:[#allocation167_spill] sm:$0xff] }
0x149b   : > { %7896 = vmatprep.subr.bf16.mxu0 %v12522_v29  ;;  %v12527_v46 = vmov %v12526_v57 }
0x1550   : > { %v3742_v26 = vpop.f32.mrb[4].mxu0 }
0x1551   : > { %8726 = vtanh.f32 %v3742_v26  ;;  %v6207_v3 = vpop.f32.mrb[5].mxu0  ;;  %v12528_v26 = vld [vmem:[#allocation168_spill] sm:$0xff] }
0x155b   : > { %v8727_v36 = vpop.eup %8726 }
0x155c   : > { %v3747_v53 = vadd.f32 1.0, %v8727_v36  ;;  %v12531_v36 = vld [vmem:[#allocation170_spill] sm:$0xff] }
0x155e   : > { %v3748_v42 = vmul.f32 0.5, %v3747_v53  ;;  %v12532_v53 = vld [vmem:[#allocation171_spill] sm:$0xff] }
0x1560   : > { %v3750_v59 = vsub.f32 1.0, %v3748_v42  ;;  %v3749_v19 = vmul.f32 %v3748_v42, %v10898_v45  ;;  %v12533_v42 = vld [vmem:[#allocation172_spill] sm:$0xff] }
0x1562   : > { %v3751_v8 = vmul.f32 %v3750_v59, %v10908_v5  ;;  %v12534_v59 = vmov %v12533_v42 }
0x1564   : > { %v3752_v62 = vadd.f32 %v3751_v8, %v3749_v19  ;;  %v12535_v19 = vld [vmem:[#allocation173_spill] sm:$0xff]  ;;  %v12536_v8 = vld [vmem:[#allocation174_spill] sm:$0xff] }
0x1566   : > { %v3753_v27 = vadd.f32 %v9038_v17, %v3752_v62  ;;  %v12537_v62 = vld [vmem:[#allocation175_spill] sm:$0xff] }
0x1568   : > { %v3754_v12 = vadd.f32 3.1415927, %v3753_v27 }
0x156a   : > { %v3755_v35 = vmul.f32 0.15915494, %v3754_v12  ;;  %v12539_v12 = vld [vmem:[#allocation177_spill] sm:$0xff] }
0x156c   : > { %v3756_v55 = vfloor.f32 %v3755_v35  ;;  %v12540_v35 = vld [vmem:[#allocation178_spill] sm:$0xff] }
0x156e   : > { %v3757_v60 = vmul.f32 6.2831855, %v3756_v55  ;;  %v12541_v55 = vmov %v12540_v35 }
0x1570   : > { %v3758_v13 = vsub.f32 %v3753_v27, %v3757_v60  ;;  %v12542_v60 = vld [vmem:[#allocation179_spill] sm:$0xff] }
0x1572   : > { %3761 = vperm.xlu0 %8704, %v3758_v13   ;;  %v12543_v13 = vmov %v12542_v60 }
0x15f1   : > { %v3762_v45 = vpop.permute.xlu0 %3761 }
0x15f2   : > { %v11072_v5 = vsel %vm688_vm0, %v3762_v45, %v3753_v27   ;;  %v12538_v27 = vld [vmem:[#allocation176_spill] sm:$0xff] }
0x15f3   : > { %12524 = vst [vmem:[#allocation278_spill] sm:$0xff] %v11072_v5  ;;  %v11076_v45 = vsub.f32 %v11072_v5, %v9038_v17   ;;  %5912 = vst.msk [vmem:[%s5911_s28] sm:$0xff] %vm743_vm3, %v11072_v5  ;;  %v12529_v17 = vld [vmem:[#allocation169_spill] sm:$0xff] }
0x15f4   : > { %v12530_v3 = vmov %v12529_v17 }
0x15f5   : > { %12525 = vst [vmem:[#allocation279_spill] sm:$0xff] %v11076_v45  ;;  %6005 = vmatmul.mubr.msk.f32.gmra.mrb[12].mxu1 %vm743_vm3, %v11076_v45 }
0x15f6   : > { %3940 = vmatprep.mubr.f32.mxu1 %v12507_v18 }
0x15f9   : > { %6008 = vmatmul.mubr.msk.f32.vlgmr.msra.gmra.mrb[14].mxu1 %vm743_vm3, %v9030_v2  ;;  %v12568_v2 = vld [vmem:[#allocation192_spill] sm:$0xff] }
0x15fa   : > { %7546 = vmatpush1.bf16.msra.mxu1 %v12526_v57  ;;  %3946 = vmatprep.mubr.f32.mxu1 %v12507_v18  ;;  %v12544_v57 = vld [vmem:[#allocation180_spill] sm:$0xff]  ;;  %v12569_v25 = vmov %v12568_v2 }
0x15fb   : > { %7548 = vmatprep.subr.bf16.mxu1 %v12528_v26  ;;  %v12545_v29 = vmov %v12544_v57 }
0x15fd   : > { %6009 = vmatmul.mubr.msk.f32.gmra.mrb[16].mxu1 %vm743_vm3, %v12350_v58  ;;  %v12555_v58 = vmov %v12554_v10 }
0x15fe   : > { %7550 = vmatpush1.bf16.msra.mxu1 %v12529_v17  ;;  %3952 = vmatprep.mubr.f32.mxu1 %v12507_v18  ;;  %v12546_v17 = vld [vmem:[#allocation181_spill] sm:$0xff] }
0x15ff   : > { %7552 = vmatprep.subr.bf16.mxu1 %v12531_v36  ;;  %v12547_v23 = vmov %v12546_v17 }
0x1601   : > { %6010 = vmatmul.mubr.msk.f32.gmra.mrb[18].mxu1 %vm743_vm3, %v12348_v61  ;;  %v12553_v61 = vmov %v12552_v44 }
0x1602   : > { %7554 = vmatpush1.bf16.msra.mxu1 %v12532_v53  ;;  %3958 = vmatprep.mubr.f32.mxu1 %v12507_v18 }
0x1603   : > { %7556 = vmatprep.subr.bf16.mxu1 %v12533_v42  ;;  %v12548_v42 = vld [vmem:[#allocation182_spill] sm:$0xff] }
0x1604   : > { %v12549_v5 = vmov %v12548_v42 }
0x1605   : > { %6011 = vmatmul.mubr.msk.f32.gmra.mrb[20].mxu1 %vm743_vm3, %v12346_v4  ;;  %v12551_v4 = vmov %v12550_v6 }
0x1606   : > { %7558 = vmatpush1.bf16.msra.mxu1 %v12535_v19  ;;  %3964 = vmatprep.mubr.f32.mxu1 %v12507_v18 }
0x1607   : > { %7560 = vmatprep.subr.bf16.mxu1 %v12536_v8 }
0x1609   : > { %6012 = vmatmul.mubr.msk.f32.gmra.mrb[22].mxu1 %vm743_vm3, %v11076_v45  ;;  %v12556_v45 = vld [vmem:[#allocation186_spill] sm:$0xff] }
0x160a   : > { %7562 = vmatpush1.bf16.msra.mxu1 %v12537_v62  ;;  %4035 = vmatprep.mubr.f32.mxu1 %v12507_v18  ;;  %v12557_v41 = vmov %v12556_v45 }
0x160b   : > { %7564 = vmatprep.subr.bf16.mxu1 %v12538_v27 }
0x160e   : > { %7566 = vmatpush1.bf16.msra.mxu1 %v12539_v12 }
0x160f   : > { %7568 = vmatprep.subr.bf16.mxu1 %v12540_v35  ;;  %v12558_v35 = vld [vmem:[#allocation187_spill] sm:$0xff] }
0x1610   : > { %v12559_v11 = vmov %v12558_v35 }
0x1612   : > { %7570 = vmatpush1.bf16.msra.mxu1 %v12542_v60  ;;  %v12560_v60 = vld [vmem:[#allocation188_spill] sm:$0xff] }
0x1613   : > { %7572 = vmatprep.subr.bf16.mxu1 %v12544_v57  ;;  %v12561_v48 = vmov %v12560_v60  ;;  %v12562_v57 = vld [vmem:[#allocation189_spill] sm:$0xff] }
0x1614   : > { %v12563_v14 = vmov %v12562_v57 }
0x1616   : > { %7574 = vmatpush1.bf16.msra.mxu1 %v12546_v17  ;;  %v12564_v17 = vld [vmem:[#allocation190_spill] sm:$0xff] }
0x1617   : > { %7576 = vmatprep.subr.bf16.mxu1 %v12548_v42  ;;  %v12565_v40 = vmov %v12564_v17  ;;  %v12566_v42 = vld [vmem:[#allocation191_spill] sm:$0xff] }
0x1618   : > { %v12567_v31 = vmov %v12566_v42 }
0x1619   : > { %4036 = vmatmul.mubr.f32.vlgmr.msra.gmra.mrb[4].mxu1 %v9054_v33 }
0x161a   : > { %7578 = vmatpush1.bf16.msra.mxu1 %v12550_v6  ;;  %4106 = vmatprep.mubr.f32.mxu1 %v12507_v18  ;;  %v12570_v6 = vld [vmem:[#allocation193_spill] sm:$0xff] }
0x161b   : > { %7580 = vmatprep.subr.bf16.mxu1 %v12552_v44  ;;  %v12571_v38 = vmov %v12570_v6  ;;  %v12573_v44 = vld [vmem:[#allocation195_spill] sm:$0xff] }
0x161c   : > { %v12574_v32 = vmov %v12573_v44 }
0x161e   : > { %7582 = vmatpush1.bf16.msra.mxu1 %v12554_v10  ;;  %v12575_v10 = vld [vmem:[#allocation196_spill] sm:$0xff] }
0x161f   : > { %7584 = vmatprep.subr.bf16.mxu1 %v12556_v45  ;;  %v12576_v22 = vmov %v12575_v10  ;;  %v12577_v45 = vld [vmem:[#allocation197_spill] sm:$0xff] }
0x1620   : > { %v12578_v28 = vmov %v12577_v45 }
0x1622   : > { %7586 = vmatpush1.bf16.msra.mxu1 %v12558_v35  ;;  %v12579_v35 = vld [vmem:[#allocation214_spill] sm:$0xff] }
0x1623   : > { %7588 = vmatprep.subr.bf16.mxu1 %v12560_v60  ;;  %v12580_v24 = vmov %v12579_v35 }
0x1626   : > { %7590 = vmatpush1.bf16.msra.mxu1 %v12562_v57  ;;  %v12581_v57 = vld [vmem:[#allocation215_spill] sm:$0xff] }
0x1627   : > { %7592 = vmatprep.subr.bf16.mxu1 %v12564_v17  ;;  %v12582_v15 = vmov %v12581_v57 }
0x162a   : > { %7594 = vmatpush1.bf16.msra.mxu1 %v12566_v42 }
0x162b   : > { %7596 = vmatprep.subr.bf16.mxu1 %v12568_v2 }
0x162e   : > { %7598 = vmatpush1.bf16.msra.mxu1 %v12570_v6  ;;  %v12583_v6 = vld [vmem:[#allocation216_spill] sm:$0xff] }
0x162f   : > { %7600 = vmatprep.subr.bf16.mxu1 %v12572_v30  ;;  %v12584_v34 = vmov %v12583_v6 }
0x1632   : > { %7602 = vmatpush1.bf16.msra.mxu1 %v12573_v44 }
0x1633   : > { %7604 = vmatprep.subr.bf16.mxu1 %v12575_v10 }
0x1636   : > { %7606 = vmatpush1.bf16.msra.mxu1 %v12577_v45 }
0x1637   : > { %7608 = vmatprep.subr.bf16.mxu1 %v12343_v9 }
0x1639   : > { %4107 = vmatmul.mubr.f32.vlgmr.msra.gmra.mrb[14].mxu1 %v9054_v33 }
0x163a   : > { %7610 = vmatpush1.bf16.msra.mxu1 %v12527_v46  ;;  %4196 = vmatprep.mubr.f32.mxu1 %v12507_v18 }
0x163b   : > { %7612 = vmatprep.subr.bf16.mxu1 %v12528_v26 }
0x163e   : > { %7614 = vmatpush1.bf16.msra.mxu1 %v12530_v3 }
0x163f   : > { %7616 = vmatprep.subr.bf16.mxu1 %v12531_v36 }
0x1642   : > { %7618 = vmatpush1.bf16.msra.mxu1 %v12532_v53 }
0x1643   : > { %7620 = vmatprep.subr.bf16.mxu1 %v12534_v59 }
0x1646   : > { %7622 = vmatpush1.bf16.msra.mxu1 %v12535_v19 }
0x1647   : > { %7624 = vmatprep.subr.bf16.mxu1 %v12536_v8 }
0x164a   : > { %7626 = vmatpush1.bf16.msra.mxu1 %v12537_v62 }
0x164b   : > { %7628 = vmatprep.subr.bf16.mxu1 %v12538_v27 }
0x164e   : > { %7630 = vmatpush1.bf16.msra.mxu1 %v12539_v12 }
0x164f   : > { %7632 = vmatprep.subr.bf16.mxu1 %v12541_v55 }
0x1652   : > { %7634 = vmatpush1.bf16.msra.mxu1 %v12543_v13 }
0x1653   : > { %7636 = vmatprep.subr.bf16.mxu1 %v12545_v29 }
0x1656   : > { %7638 = vmatpush1.bf16.msra.mxu1 %v12547_v23 }
0x1657   : > { %7640 = vmatprep.subr.bf16.mxu1 %v12549_v5 }
0x16ec   : > { %v4037_v2 = vpop.f32.mrb[4].mxu1 }
0x16ed   : > { %v4039_v33 = vpop.f32.mrb[5].mxu1  ;;  %v8351_v17 = vadd.f32 %v4037_v2, %v12581_v57 }
0x16ee   : > { %v8352_v60 = vadd.f32 %v4039_v33, %v12579_v35 }
0x16f0   : > { %8728 = vtanh.f32 %v8352_v60 }
0x16f1   : > { %8730 = vtanh.f32 %v8351_v17 }
0x16fa   : > { %v8729_v45 = vpop.eup %8728 }
0x16fb   : > { %v8731_v0 = vpop.eup %8730  ;;  %v4123_v49 = vadd.f32 1.0, %v8729_v45  ;;  %v12596_v45 = vld [vmem:[#allocation229_spill] sm:$0xff] }
0x16fc   : > { %v4121_v20 = vadd.f32 1.0, %v8731_v0  ;;  %v12592_v0 = vld [vmem:[#allocation225_spill] sm:$0xff] }
0x16fd   : > { %v4124_v16 = vmul.f32 0.5, %v4123_v49  ;;  %v12593_v49 = vld [vmem:[#allocation226_spill] sm:$0xff] }
0x16fe   : > { %v4122_v37 = vmul.f32 0.5, %v4121_v20  ;;  %v12590_v20 = vld [vmem:[#allocation223_spill] sm:$0xff] }
0x16ff   : > { %v4127_v33 = vmul.f32 %v9050_v63, %v4124_v16  ;;  %v12586_v63 = vld [vmem:[#allocation219_spill] sm:$0xff]  ;;  %v12589_v16 = vld [vmem:[#allocation222_spill] sm:$0xff] }
0x170c   : > { %v4108_v42 = vpop.f32.mrb[14].mxu1 }
0x170d   : > { %v8361_v44 = vadd.f32 %v4108_v42, %v12583_v6  ;;  %v4110_v10 = vpop.f32.mrb[15].mxu1 }
0x170e   : > { %v8362_v54 = vadd.f32 %v4110_v10, %v12585_v56  ;;  %v12595_v10 = vld [vmem:[#allocation228_spill] sm:$0xff] }
0x170f   : > { %8732 = vtanh.f32 %v8361_v44  ;;  %v12594_v44 = vld [vmem:[#allocation227_spill] sm:$0xff] }
0x1710   : > { %8734 = vtanh.f32 %v8362_v54  ;;  %v12591_v54 = vld [vmem:[#allocation224_spill] sm:$0xff] }
0x1719   : > { %v8733_v7 = vpop.eup %8732 }
0x171a   : > { %v4128_v2 = vmul.f32 %v8733_v7, %v4122_v37  ;;  %v8735_v60 = vpop.eup %8734  ;;  %v12587_v7 = vld [vmem:[#allocation220_spill] sm:$0xff]  ;;  %v12588_v37 = vld [vmem:[#allocation221_spill] sm:$0xff] }
0x171b   : > { %v4125_v57 = vadd.f32 1.0, %v8735_v60  ;;  %v12599_v60 = vld [vmem:[#allocation232_spill] sm:$0xff] }
0x171c   : > { %v11155_v35 = vadd.f32 %v4128_v2, %v4127_v33  ;;  %v12597_v33 = vld [vmem:[#allocation230_spill] sm:$0xff]  ;;  %v12598_v2 = vld [vmem:[#allocation231_spill] sm:$0xff] }
0x171d   : > { %v4126_v17 = vmul.f32 0.5, %v4125_v57  ;;  %v12600_v57 = vld [vmem:[#allocation233_spill] sm:$0xff] }
0x171e   : > { %8736 = vtanh.f32 %v11155_v35 }
0x1728   : > { %v8737_v42 = vpop.eup %8736 }
0x1729   : > { %v11158_v6 = vmul.f32 %v8737_v42, %v4126_v17 }
0x172b   : > { %4197 = vmatmul.mubr.f32.vlgmr.msra.gmra.mrb[6].mxu1 %v11158_v6  ;;  %4841 = vmatmul.mubr.f32.vlgmr.msra.gmra.mrb[6].mxu0 %v11158_v6 }
0x172c   : > { %7642 = vmatpush1.bf16.msra.mxu1 %v12551_v4  ;;  %4267 = vmatprep.mubr.f32.mxu1 %v12507_v18 }
0x172d   : > { %7644 = vmatprep.subr.bf16.mxu1 %v12553_v61  ;;  %4846 = vmatprep.mubr.f32.mxu0 %v12507_v18 }
0x172e   : > { %7898 = vmatpush1.bf16.msra.mxu0 %v12586_v63 }
0x172f   : > { %7900 = vmatprep.subr.bf16.mxu0 %v12587_v7 }
0x1730   : > { %7646 = vmatpush1.bf16.msra.mxu1 %v12555_v58 }
0x1731   : > { %7648 = vmatprep.subr.bf16.mxu1 %v12557_v41 }
0x1732   : > { %7902 = vmatpush1.bf16.msra.mxu0 %v12588_v37 }
0x1733   : > { %7904 = vmatprep.subr.bf16.mxu0 %v12589_v16 }
0x1734   : > { %7650 = vmatpush1.bf16.msra.mxu1 %v12559_v11 }
0x1735   : > { %7652 = vmatprep.subr.bf16.mxu1 %v12561_v48 }
0x1736   : > { %7906 = vmatpush1.bf16.msra.mxu0 %v12590_v20 }
0x1737   : > { %7908 = vmatprep.subr.bf16.mxu0 %v12591_v54 }
0x1738   : > { %7654 = vmatpush1.bf16.msra.mxu1 %v12563_v14 }
0x1739   : > { %7656 = vmatprep.subr.bf16.mxu1 %v12565_v40 }
0x173a   : > { %7910 = vmatpush1.bf16.msra.mxu0 %v12592_v0 }
0x173b   : > { %7912 = vmatprep.subr.bf16.mxu0 %v12593_v49 }
0x173c   : > { %7658 = vmatpush1.bf16.msra.mxu1 %v12567_v31 }
0x173d   : > { %7660 = vmatprep.subr.bf16.mxu1 %v12569_v25 }
0x173e   : > { %7914 = vmatpush1.bf16.msra.mxu0 %v12594_v44 }
0x173f   : > { %7916 = vmatprep.subr.bf16.mxu0 %v12595_v10 }
0x1740   : > { %7662 = vmatpush1.bf16.msra.mxu1 %v12571_v38 }
0x1741   : > { %7664 = vmatprep.subr.bf16.mxu1 %v12572_v30 }
0x1742   : > { %7918 = vmatpush1.bf16.msra.mxu0 %v12596_v45 }
0x1743   : > { %7920 = vmatprep.subr.bf16.mxu0 %v12597_v33 }
0x1744   : > { %7666 = vmatpush1.bf16.msra.mxu1 %v12574_v32 }
0x1745   : > { %7668 = vmatprep.subr.bf16.mxu1 %v12576_v22 }
0x1746   : > { %7922 = vmatpush1.bf16.msra.mxu0 %v12598_v2 }
0x1747   : > { %7924 = vmatprep.subr.bf16.mxu0 %v12599_v60 }
0x1748   : > { %7670 = vmatpush1.bf16.msra.mxu1 %v12578_v28 }
0x1749   : > { %7672 = vmatprep.subr.bf16.mxu1 %v12343_v9 }
0x174a   : > { %7926 = vmatpush1.bf16.msra.mxu0 %v12600_v57 }
0x174b   : > { %4268 = vmatmul.mubr.f32.vlgmr.msra.gmra.mrb[16].mxu1 %v11158_v6  ;;  %7928 = vmatprep.subr.bf16.mxu0 %v12601_v52 }
0x174c   : > { %7674 = vmatpush1.bf16.msra.mxu1 %v12527_v46  ;;  %4357 = vmatprep.mubr.f32.mxu1 %v12507_v18 }
0x174d   : > { %7676 = vmatprep.subr.bf16.mxu1 %v12528_v26 }
0x1750   : > { %7678 = vmatpush1.bf16.msra.mxu1 %v12530_v3 }
0x1751   : > { %7680 = vmatprep.subr.bf16.mxu1 %v12531_v36 }
0x1754   : > { %7682 = vmatpush1.bf16.msra.mxu1 %v12532_v53 }
0x1755   : > { %7684 = vmatprep.subr.bf16.mxu1 %v12534_v59 }
0x1758   : > { %7686 = vmatpush1.bf16.msra.mxu1 %v12535_v19 }
0x1759   : > { %7688 = vmatprep.subr.bf16.mxu1 %v12536_v8 }
0x175c   : > { %7690 = vmatpush1.bf16.msra.mxu1 %v12537_v62 }
0x175d   : > { %7692 = vmatprep.subr.bf16.mxu1 %v12538_v27 }
0x1760   : > { %7694 = vmatpush1.bf16.msra.mxu1 %v12539_v12 }
0x1761   : > { %7696 = vmatprep.subr.bf16.mxu1 %v12541_v55 }
0x1764   : > { %7698 = vmatpush1.bf16.msra.mxu1 %v12543_v13 }
0x1765   : > { %7700 = vmatprep.subr.bf16.mxu1 %v12545_v29 }
0x1768   : > { %7702 = vmatpush1.bf16.msra.mxu1 %v12547_v23 }
0x1769   : > { %7704 = vmatprep.subr.bf16.mxu1 %v12549_v5 }
0x17fe   : > { %v4198_v17 = vpop.f32.mrb[6].mxu1 }
0x17ff   : > { %v4200_v42 = vpop.f32.mrb[7].mxu1  ;;  %v8353_v7 = vadd.f32 %v4198_v17, %v12582_v15 }
0x1800   : > { %v8354_v63 = vadd.f32 %v4200_v42, %v12580_v24 }
0x1802   : > { %8738 = vtanh.f32 %v8354_v63 }
0x1803   : > { %8740 = vtanh.f32 %v8353_v7 }
0x180c   : > { %v8739_v54 = vpop.eup %8738 }
0x180d   : > { %v8741_v0 = vpop.eup %8740  ;;  %v4284_v49 = vadd.f32 1.0, %v8739_v54 }
0x180e   : > { %v4282_v10 = vadd.f32 1.0, %v8741_v0 }
0x180f   : > { %v4285_v45 = vmul.f32 0.5, %v4284_v49 }
0x1810   : > { %v4283_v33 = vmul.f32 0.5, %v4282_v10 }
0x1811   : > { %v4288_v60 = vmul.f32 %v4285_v45, %v11155_v35 }
0x181e   : > { %v4269_v37 = vpop.f32.mrb[16].mxu1 }
0x181f   : > { %v8363_v16 = vadd.f32 %v4269_v37, %v12584_v34  ;;  %v4271_v20 = vpop.f32.mrb[17].mxu1 }
0x1820   : > { %v8364_v44 = vadd.f32 %v4271_v20, %v12585_v56 }
0x1821   : > { %8742 = vtanh.f32 %v8363_v16 }
0x1822   : > { %8744 = vtanh.f32 %v8364_v44 }
0x182b   : > { %v8743_v2 = vpop.eup %8742 }
0x182c   : > { %v4289_v57 = vmul.f32 %v8743_v2, %v4283_v33  ;;  %v8745_v42 = vpop.eup %8744 }
0x182d   : > { %v4286_v63 = vadd.f32 1.0, %v8745_v42 }
0x182e   : > { %v11219_v17 = vadd.f32 %v4289_v57, %v4288_v60 }
0x182f   : > { %v4287_v7 = vmul.f32 0.5, %v4286_v63 }
0x1830   : > { %8746 = vtanh.f32 %v11219_v17 }
0x183a   : > { %v8747_v37 = vpop.eup %8746 }
0x183b   : > { %v11222_v16 = vmul.f32 %v8747_v37, %v4287_v7 }
0x183d   : > { %4358 = vmatmul.mubr.f32.vlgmr.msra.gmra.mrb[8].mxu1 %v11222_v16  ;;  %4847 = vmatmul.mubr.f32.gmra.mrb[8].mxu0 %v11222_v16 }
0x183e   : > { %7706 = vmatpush1.bf16.msra.mxu1 %v12551_v4  ;;  %4428 = vmatprep.mubr.f32.mxu1 %v12507_v18 }
0x183f   : > { %7708 = vmatprep.subr.bf16.mxu1 %v12553_v61  ;;  %4852 = vmatprep.mubr.f32.mxu0 %v12507_v18 }
0x1842   : > { %7710 = vmatpush1.bf16.msra.mxu1 %v12555_v58 }
0x1843   : > { %7712 = vmatprep.subr.bf16.mxu1 %v12557_v41 }
0x1846   : > { %7714 = vmatpush1.bf16.msra.mxu1 %v12559_v11 }
0x1847   : > { %7716 = vmatprep.subr.bf16.mxu1 %v12561_v48 }
0x184a   : > { %7718 = vmatpush1.bf16.msra.mxu1 %v12563_v14 }
0x184b   : > { %7720 = vmatprep.subr.bf16.mxu1 %v12565_v40 }
0x184e   : > { %7722 = vmatpush1.bf16.msra.mxu1 %v12567_v31 }
0x184f   : > { %7724 = vmatprep.subr.bf16.mxu1 %v12569_v25 }
0x1852   : > { %7726 = vmatpush1.bf16.msra.mxu1 %v12571_v38 }
0x1853   : > { %7728 = vmatprep.subr.bf16.mxu1 %v12572_v30 }
0x1856   : > { %7730 = vmatpush1.bf16.msra.mxu1 %v12574_v32 }
0x1857   : > { %7732 = vmatprep.subr.bf16.mxu1 %v12576_v22 }
0x185a   : > { %7734 = vmatpush1.bf16.msra.mxu1 %v12578_v28 }
0x185b   : > { %7736 = vmatprep.subr.bf16.mxu1 %v12343_v9 }
0x185d   : > { %4429 = vmatmul.mubr.f32.vlgmr.msra.gmra.mrb[18].mxu1 %v11222_v16 }
0x185e   : > { %7738 = vmatpush1.bf16.msra.mxu1 %v12527_v46  ;;  %4518 = vmatprep.mubr.f32.mxu1 %v12507_v18 }
0x185f   : > { %7740 = vmatprep.subr.bf16.mxu1 %v12528_v26 }
0x1862   : > { %7742 = vmatpush1.bf16.msra.mxu1 %v12530_v3 }
0x1863   : > { %7744 = vmatprep.subr.bf16.mxu1 %v12531_v36 }
0x1866   : > { %7746 = vmatpush1.bf16.msra.mxu1 %v12532_v53 }
0x1867   : > { %7748 = vmatprep.subr.bf16.mxu1 %v12534_v59 }
0x186a   : > { %7750 = vmatpush1.bf16.msra.mxu1 %v12535_v19 }
0x186b   : > { %7752 = vmatprep.subr.bf16.mxu1 %v12536_v8 }
0x186e   : > { %7754 = vmatpush1.bf16.msra.mxu1 %v12537_v62 }
0x186f   : > { %7756 = vmatprep.subr.bf16.mxu1 %v12538_v27 }
0x1872   : > { %7758 = vmatpush1.bf16.msra.mxu1 %v12539_v12 }
0x1873   : > { %7760 = vmatprep.subr.bf16.mxu1 %v12541_v55 }
0x1876   : > { %7762 = vmatpush1.bf16.msra.mxu1 %v12543_v13 }
0x1877   : > { %7764 = vmatprep.subr.bf16.mxu1 %v12545_v29 }
0x187a   : > { %7766 = vmatpush1.bf16.msra.mxu1 %v12547_v23 }
0x187b   : > { %7768 = vmatprep.subr.bf16.mxu1 %v12549_v5 }
0x1910   : > { %v4359_v35 = vpop.f32.mrb[8].mxu1 }
0x1911   : > { %v4361_v20 = vpop.f32.mrb[9].mxu1  ;;  %v8355_v0 = vadd.f32 %v4359_v35, %v12582_v15 }
0x1912   : > { %v8356_v54 = vadd.f32 %v4361_v20, %v12580_v24 }
0x1914   : > { %8748 = vtanh.f32 %v8356_v54 }
0x1915   : > { %8750 = vtanh.f32 %v8355_v0 }
0x191e   : > { %v8749_v45 = vpop.eup %8748 }
0x191f   : > { %v8751_v33 = vpop.eup %8750  ;;  %v4445_v2 = vadd.f32 1.0, %v8749_v45 }
0x1920   : > { %v4443_v57 = vadd.f32 1.0, %v8751_v33 }
0x1921   : > { %v4446_v42 = vmul.f32 0.5, %v4445_v2 }
0x1922   : > { %v4444_v63 = vmul.f32 0.5, %v4443_v57 }
0x1923   : > { %v4449_v37 = vmul.f32 %v4446_v42, %v11219_v17 }
0x1930   : > { %v4430_v49 = vpop.f32.mrb[18].mxu1 }
0x1931   : > { %v8365_v44 = vadd.f32 %v4430_v49, %v12584_v34  ;;  %v4432_v10 = vpop.f32.mrb[19].mxu1 }
0x1932   : > { %v8366_v60 = vadd.f32 %v4432_v10, %v12585_v56 }
0x1933   : > { %8752 = vtanh.f32 %v8365_v44 }
0x1934   : > { %8754 = vtanh.f32 %v8366_v60 }
0x193d   : > { %v8753_v7 = vpop.eup %8752 }
0x193e   : > { %v4450_v35 = vmul.f32 %v8753_v7, %v4444_v63  ;;  %v8755_v54 = vpop.eup %8754 }
0x193f   : > { %v4447_v0 = vadd.f32 1.0, %v8755_v54 }
0x1940   : > { %v11267_v20 = vadd.f32 %v4450_v35, %v4449_v37 }
0x1941   : > { %v4448_v49 = vmul.f32 0.5, %v4447_v0 }
0x1942   : > { %8756 = vtanh.f32 %v11267_v20 }
0x194c   : > { %v8757_v44 = vpop.eup %8756 }
0x194d   : > { %v11270_v52 = vmul.f32 %v8757_v44, %v4448_v49 }
0x194f   : > { %4519 = vmatmul.mubr.f32.vlgmr.msra.gmra.mrb[10].mxu1 %v11270_v52  ;;  %4853 = vmatmul.mubr.f32.gmra.mrb[10].mxu0 %v11270_v52 }
0x1950   : > { %7770 = vmatpush1.bf16.msra.mxu1 %v12551_v4  ;;  %4589 = vmatprep.mubr.f32.mxu1 %v12507_v18 }
0x1951   : > { %7772 = vmatprep.subr.bf16.mxu1 %v12553_v61  ;;  %4858 = vmatprep.mubr.f32.mxu0 %v12507_v18 }
0x1954   : > { %7774 = vmatpush1.bf16.msra.mxu1 %v12555_v58 }
0x1955   : > { %7776 = vmatprep.subr.bf16.mxu1 %v12557_v41 }
0x1958   : > { %7778 = vmatpush1.bf16.msra.mxu1 %v12559_v11 }
0x1959   : > { %7780 = vmatprep.subr.bf16.mxu1 %v12561_v48 }
0x195c   : > { %7782 = vmatpush1.bf16.msra.mxu1 %v12563_v14 }
0x195d   : > { %7784 = vmatprep.subr.bf16.mxu1 %v12565_v40 }
0x1960   : > { %7786 = vmatpush1.bf16.msra.mxu1 %v12567_v31 }
0x1961   : > { %7788 = vmatprep.subr.bf16.mxu1 %v12569_v25 }
0x1964   : > { %7790 = vmatpush1.bf16.msra.mxu1 %v12571_v38 }
0x1965   : > { %7792 = vmatprep.subr.bf16.mxu1 %v12572_v30 }
0x1968   : > { %7794 = vmatpush1.bf16.msra.mxu1 %v12574_v32 }
0x1969   : > { %7796 = vmatprep.subr.bf16.mxu1 %v12576_v22 }
0x196c   : > { %7798 = vmatpush1.bf16.msra.mxu1 %v12578_v28 }
0x196d   : > { %7800 = vmatprep.subr.bf16.mxu1 %v12343_v9 }
0x196f   : > { %4590 = vmatmul.mubr.f32.vlgmr.msra.gmra.mrb[20].mxu1 %v11270_v52 }
0x1970   : > { %7802 = vmatpush1.bf16.msra.mxu1 %v12527_v46  ;;  %4679 = vmatprep.mubr.f32.mxu1 %v12507_v18 }
0x1971   : > { %7804 = vmatprep.subr.bf16.mxu1 %v12528_v26 }
0x1974   : > { %7806 = vmatpush1.bf16.msra.mxu1 %v12530_v3 }
0x1975   : > { %7808 = vmatprep.subr.bf16.mxu1 %v12531_v36  ;;  %v12664_v36 = vld [vmem:[#allocation271_spill] sm:$0xff] }
0x1978   : > { %7810 = vmatpush1.bf16.msra.mxu1 %v12532_v53 }
0x1979   : > { %7812 = vmatprep.subr.bf16.mxu1 %v12534_v59 }
0x197c   : > { %7814 = vmatpush1.bf16.msra.mxu1 %v12535_v19 }
0x197d   : > { %7816 = vmatprep.subr.bf16.mxu1 %v12536_v8 }
0x1980   : > { %7818 = vmatpush1.bf16.msra.mxu1 %v12537_v62 }
0x1981   : > { %7820 = vmatprep.subr.bf16.mxu1 %v12538_v27 }
0x1984   : > { %7822 = vmatpush1.bf16.msra.mxu1 %v12539_v12 }
0x1985   : > { %7824 = vmatprep.subr.bf16.mxu1 %v12541_v55 }
0x1988   : > { %7826 = vmatpush1.bf16.msra.mxu1 %v12543_v13 }
0x1989   : > { %7828 = vmatprep.subr.bf16.mxu1 %v12545_v29 }
0x198c   : > { %7830 = vmatpush1.bf16.msra.mxu1 %v12547_v23 }
0x198d   : > { %7832 = vmatprep.subr.bf16.mxu1 %v12549_v5 }
0x1a22   : > { %v4520_v17 = vpop.f32.mrb[10].mxu1 }
0x1a23   : > { %v4522_v10 = vpop.f32.mrb[11].mxu1  ;;  %v8357_v33 = vadd.f32 %v4520_v17, %v12582_v15 }
0x1a24   : > { %v8358_v45 = vadd.f32 %v4522_v10, %v12580_v24 }
0x1a26   : > { %8758 = vtanh.f32 %v8358_v45 }
0x1a27   : > { %8760 = vtanh.f32 %v8357_v33 }
0x1a30   : > { %v8759_v42 = vpop.eup %8758 }
0x1a31   : > { %v8761_v63 = vpop.eup %8760  ;;  %v4606_v7 = vadd.f32 1.0, %v8759_v42  ;;  %v12604_v42 = vld [vmem:[#allocation261_spill] sm:$0xff] }
0x1a32   : > { %v4604_v35 = vadd.f32 1.0, %v8761_v63  ;;  %v12605_v63 = vld [vmem:[#allocation262_spill] sm:$0xff] }
0x1a33   : > { %v4607_v54 = vmul.f32 0.5, %v4606_v7  ;;  %v12606_v7 = vld [vmem:[#allocation263_spill] sm:$0xff] }
0x1a34   : > { %v4605_v0 = vmul.f32 0.5, %v4604_v35  ;;  %v12608_v35 = vld [vmem:[#allocation265_spill] sm:$0xff] }
0x1a35   : > { %v4610_v44 = vmul.f32 %v4607_v54, %v11267_v20  ;;  %v12602_v20 = vmov 0.0|0.0   ;;  %v12609_v54 = vld [vmem:[#allocation266_spill] sm:$0xff] }
0x1a42   : > { %v4591_v2 = vpop.f32.mrb[20].mxu1 }
0x1a43   : > { %v8367_v60 = vadd.f32 %v4591_v2, %v12584_v34  ;;  %v4593_v57 = vpop.f32.mrb[21].mxu1 }
0x1a44   : > { %v8368_v37 = vadd.f32 %v4593_v57, %v12585_v56  ;;  %v12603_v57 = vld [vmem:[#allocation260_spill] sm:$0xff] }
0x1a45   : > { %8762 = vtanh.f32 %v8367_v60 }
0x1a46   : > { %8764 = vtanh.f32 %v8368_v37  ;;  %v12607_v37 = vld [vmem:[#allocation264_spill] sm:$0xff] }
0x1a4f   : > { %v8763_v49 = vpop.eup %8762 }
0x1a50   : > { %v4611_v17 = vmul.f32 %v8763_v49, %v4605_v0  ;;  %v8765_v45 = vpop.eup %8764  ;;  %v12610_v0 = vld [vmem:[#allocation267_spill] sm:$0xff] }
0x1a51   : > { %v4608_v33 = vadd.f32 1.0, %v8765_v45 }
0x1a52   : > { %v11315_v10 = vadd.f32 %v4611_v17, %v4610_v44 }
0x1a53   : > { %v4609_v2 = vmul.f32 0.5, %v4608_v33 }
0x1a54   : > { %8766 = vtanh.f32 %v11315_v10 }
0x1a5e   : > { %v8767_v60 = vpop.eup %8766 }
0x1a5f   : > { %v11318_v3 = vmul.f32 %v8767_v60, %v4609_v2 }
0x1a61   : > { %4680 = vmatmul.mubr.f32.vlgmr.msra.gmra.mrb[12].mxu1 %v11318_v3  ;;  %4859 = vmatmul.mubr.f32.gmra.mrb[12].mxu0 %v11318_v3 }
0x1a62   : > { %7834 = vmatpush1.bf16.msra.mxu1 %v12551_v4  ;;  %4750 = vmatprep.mubr.f32.mxu1 %v12507_v18 }
0x1a63   : > { %7836 = vmatprep.subr.bf16.mxu1 %v12553_v61  ;;  %4864 = vmatprep.mubr.f32.mxu0 %v12507_v18 }
0x1a66   : > { %7838 = vmatpush1.bf16.msra.mxu1 %v12555_v58 }
0x1a67   : > { %7840 = vmatprep.subr.bf16.mxu1 %v12557_v41 }
0x1a6a   : > { %7842 = vmatpush1.bf16.msra.mxu1 %v12559_v11 }
0x1a6b   : > { %7844 = vmatprep.subr.bf16.mxu1 %v12561_v48 }
0x1a6e   : > { %7846 = vmatpush1.bf16.msra.mxu1 %v12563_v14 }
0x1a6f   : > { %7848 = vmatprep.subr.bf16.mxu1 %v12565_v40 }
0x1a72   : > { %7850 = vmatpush1.bf16.msra.mxu1 %v12567_v31 }
0x1a73   : > { %7852 = vmatprep.subr.bf16.mxu1 %v12569_v25 }
0x1a76   : > { %7854 = vmatpush1.bf16.msra.mxu1 %v12571_v38 }
0x1a77   : > { %7856 = vmatprep.subr.bf16.mxu1 %v12572_v30 }
0x1a7a   : > { %7858 = vmatpush1.bf16.msra.mxu1 %v12574_v32 }
0x1a7b   : > { %7860 = vmatprep.subr.bf16.mxu1 %v12576_v22 }
0x1a7e   : > { %7862 = vmatpush1.bf16.msra.mxu1 %v12578_v28 }
0x1a7f   : > { %8247 = vmatprep.subr.bf16.mxu1 %v12602_v20 }
0x1a81   : > { %4751 = vmatmul.mubr.f32.vlgmr.msra.gmra.mrb[22].mxu1 %v11318_v3 }
0x1a82   : > { %8249 = vmatpush3.bf16.msra.mxu1 %v12603_v57  ;;  %6240 = vmatprep.mubr.msk.f32.mxu1 %vm9091_vm10, %v12507_v18 }
0x1a83   : > { %8250 = vmatprep.subr.bf16.mxu1 %v12602_v20 }
0x1a86   : > { %8252 = vmatpush3.bf16.msra.mxu1 %v12604_v42 }
0x1a87   : > { %8253 = vmatprep.subr.bf16.mxu1 %v12602_v20 }
0x1a8a   : > { %8255 = vmatpush3.bf16.msra.mxu1 %v12605_v63 }
0x1a8b   : > { %8256 = vmatprep.subr.bf16.mxu1 %v12602_v20 }
0x1a8e   : > { %8258 = vmatpush3.bf16.msra.mxu1 %v12606_v7 }
0x1a8f   : > { %8259 = vmatprep.subr.bf16.mxu1 %v12602_v20 }
0x1a92   : > { %8261 = vmatpush3.bf16.msra.mxu1 %v12607_v37 }
0x1a93   : > { %8262 = vmatprep.subr.bf16.mxu1 %v12602_v20 }
0x1a96   : > { %8264 = vmatpush3.bf16.msra.mxu1 %v12608_v35 }
0x1a97   : > { %8265 = vmatprep.subr.bf16.mxu1 %v12602_v20 }
0x1a9a   : > { %8267 = vmatpush3.bf16.msra.mxu1 %v12609_v54 }
0x1a9b   : > { %8268 = vmatprep.subr.bf16.mxu1 %v12602_v20 }
0x1a9e   : > { %8270 = vmatpush3.bf16.msra.mxu1 %v12610_v0 }
0x1b34   : > { %v4681_v49 = vpop.f32.mrb[12].mxu1 }
0x1b35   : > { %v4683_v44 = vpop.f32.mrb[13].mxu1  ;;  %v8359_v45 = vadd.f32 %v4681_v49, %v12582_v15 }
0x1b36   : > { %v8360_v17 = vadd.f32 %v4683_v44, %v12580_v24  ;;  %v12650_v24 = vld [vmem:[#allocation256_spill] sm:$0xff] }
0x1b38   : > { %8768 = vtanh.f32 %v8360_v17 }
0x1b39   : > { %8770 = vtanh.f32 %v8359_v45 }
0x1b42   : > { %v8769_v57 = vpop.eup %8768 }
0x1b43   : > { %v8771_v42 = vpop.eup %8770  ;;  %v4767_v63 = vadd.f32 1.0, %v8769_v57  ;;  %v12620_v57 = vld [vmem:[#allocation241_spill] sm:$0xff] }
0x1b44   : > { %v4765_v7 = vadd.f32 1.0, %v8771_v42  ;;  %v12623_v42 = vld [vmem:[#allocation243_spill] sm:$0xff] }
0x1b45   : > { %v4768_v37 = vmul.f32 0.5, %v4767_v63 }
0x1b46   : > { %v4766_v35 = vmul.f32 0.5, %v4765_v7 }
0x1b47   : > { %v4771_v0 = vmul.f32 %v4768_v37, %v11315_v10  ;;  %v12613_v10 = vld [vmem:[#allocation237_spill] sm:$0xff] }
0x1b54   : > { %v4752_v33 = vpop.f32.mrb[22].mxu1 }
0x1b55   : > { %v8369_v2 = vadd.f32 %v4752_v33, %v12584_v34  ;;  %v4754_v60 = vpop.f32.mrb[23].mxu1 }
0x1b56   : > { %v8370_v20 = vadd.f32 %v4754_v60, %v12585_v56  ;;  %v12618_v60 = vld [vmem:[#allocation240_spill] sm:$0xff] }
0x1b57   : > { %8772 = vtanh.f32 %v8369_v2  ;;  %v12616_v2 = vld [vmem:[#allocation239_spill] sm:$0xff]  ;;  %v12619_v37 = vmov %v12618_v60 }
0x1b58   : > { %8774 = vtanh.f32 %v8370_v20  ;;  %v12614_v20 = vmov %v12613_v10  ;;  %v12617_v7 = vmov %v12616_v2 }
0x1b61   : > { %v8773_v54 = vpop.eup %8772 }
0x1b62   : > { %v4772_v49 = vmul.f32 %v8773_v54, %v4766_v35  ;;  %v8775_v44 = vpop.eup %8774  ;;  %v12621_v54 = vmov %v12620_v57  ;;  %v12625_v35 = vld [vmem:[#allocation244_spill] sm:$0xff] }
0x1b63   : > { %v4769_v17 = vadd.f32 1.0, %v8775_v44  ;;  %v12626_v4 = vmov %v12625_v35  ;;  %v12628_v44 = vld [vmem:[#allocation245_spill] sm:$0xff] }
0x1b64   : > { %v11363_v63 = vadd.f32 %v4772_v49, %v4771_v0   ;;  %v12624_v0 = vmov %v12623_v42  ;;  %v12627_v49 = vld [vmem:[#allocation277_spill] sm:$0xff]  ;;  %v12629_v5 = vmov %v12628_v44 }
0x1b65   : > { %v4770_v45 = vmul.f32 0.5, %v4769_v17  ;;  %v12630_v17 = vld [vmem:[#allocation246_spill] sm:$0xff] }
0x1b66   : > { %8776 = vtanh.f32 %v11363_v63  ;;  %v12631_v8 = vmov %v12630_v17 }
0x1b70   : > { %v8777_v33 = vpop.eup %8776 }
0x1b71   : > { %v11366_v33 = vmul.f32 %v8777_v33, %v4770_v45   ;;  %v12632_v45 = vld [vmem:[#allocation247_spill] sm:$0xff] }
0x1b72   : > { %v12633_v9 = vmov %v12632_v45 }
0x1b73   : > { %4865 = vmatmul.mubr.f32.gmra.mrb[14].mxu0 %v11366_v33 }
0x1b74   : > { %4935 = vmatprep.mubr.f32.mxu0 %v12507_v18 }
0x1b77   : > { %4936 = vmatmul.mubr.f32.vlgmr.msra.gmra.mrb[16].mxu0 %v11158_v6  ;;  %v12611_v6 = vld [vmem:[#allocation236_spill] sm:$0xff] }
0x1b78   : > { %7930 = vmatpush1.bf16.msra.mxu0 %v10326_v51  ;;  %4941 = vmatprep.mubr.f32.mxu0 %v12507_v18 }
0x1b79   : > { %7932 = vmatprep.subr.bf16.mxu0 %v10328_v50 }
0x1b7b   : > { %4942 = vmatmul.mubr.f32.gmra.mrb[18].mxu0 %v11222_v16  ;;  %v12612_v16 = vmov %v12611_v6 }
0x1b7c   : > { %7934 = vmatpush1.bf16.msra.mxu0 %v10333_v47  ;;  %4947 = vmatprep.mubr.f32.mxu0 %v12507_v18 }
0x1b7d   : > { %7936 = vmatprep.subr.bf16.mxu0 %v10336_v39 }
0x1b7f   : > { %4948 = vmatmul.mubr.f32.gmra.mrb[20].mxu0 %v11270_v52  ;;  %v12615_v52 = vld [vmem:[#allocation238_spill] sm:$0xff] }
0x1b80   : > { %7938 = vmatpush1.bf16.msra.mxu0 %v10341_v43  ;;  %4953 = vmatprep.mubr.f32.mxu0 %v12507_v18 }
0x1b81   : > { %7940 = vmatprep.subr.bf16.mxu0 %v10344_v21 }
0x1b83   : > { %4954 = vmatmul.mubr.f32.gmra.mrb[22].mxu0 %v11318_v3  ;;  %v12622_v3 = vld [vmem:[#allocation242_spill] sm:$0xff] }
0x1b84   : > { %7942 = vmatpush1.bf16.msra.mxu0 %v12342_v1  ;;  %4959 = vmatprep.mubr.f32.mxu0 %v12507_v18 }
0x1b85   : > { %7944 = vmatprep.subr.bf16.mxu0 %v12611_v6  ;;  %v12634_v6 = vld [vmem:[#allocation248_spill] sm:$0xff] }
0x1b86   : > { %v12635_v11 = vmov %v12634_v6 }
0x1b87   : > { %4960 = vmatmul.mubr.f32.gmra.mrb[24].mxu0 %v11366_v33 }
0x1b88   : > { %7946 = vmatpush1.bf16.msra.mxu0 %v12613_v10  ;;  %5030 = vmatprep.mubr.f32.mxu0 %v12507_v18  ;;  %v12636_v10 = vld [vmem:[#allocation249_spill] sm:$0xff] }
0x1b89   : > { %7948 = vmatprep.subr.bf16.mxu0 %v12615_v52  ;;  %v12637_v12 = vmov %v12636_v10 }
0x1b8c   : > { %7950 = vmatpush1.bf16.msra.mxu0 %v12616_v2  ;;  %v12638_v2 = vld [vmem:[#allocation250_spill] sm:$0xff] }
0x1b8d   : > { %7952 = vmatprep.subr.bf16.mxu0 %v12618_v60  ;;  %v12639_v13 = vmov %v12638_v2  ;;  %v12640_v60 = vld [vmem:[#allocation251_spill] sm:$0xff] }
0x1b8e   : > { %v12641_v14 = vmov %v12640_v60 }
0x1b90   : > { %7954 = vmatpush1.bf16.msra.mxu0 %v12620_v57  ;;  %v12642_v57 = vld [vmem:[#allocation252_spill] sm:$0xff] }
0x1b91   : > { %7956 = vmatprep.subr.bf16.mxu0 %v12622_v3  ;;  %v12643_v15 = vmov %v12642_v57 }
0x1b94   : > { %7958 = vmatpush1.bf16.msra.mxu0 %v12623_v42  ;;  %v12644_v42 = vld [vmem:[#allocation253_spill] sm:$0xff] }
0x1b95   : > { %7960 = vmatprep.subr.bf16.mxu0 %v12625_v35  ;;  %v12645_v19 = vmov %v12644_v42  ;;  %v12646_v35 = vld [vmem:[#allocation254_spill] sm:$0xff] }
0x1b96   : > { %v12647_v22 = vmov %v12646_v35 }
0x1b97   : > { %5031 = vmatmul.mubr.f32.vlgmr.msra.gmra.mrb[6].mxu0 %v12627_v49 }
0x1b98   : > { %7962 = vmatpush1.bf16.msra.mxu0 %v12628_v44  ;;  %5101 = vmatprep.mubr.f32.mxu0 %v12507_v18  ;;  %v12648_v44 = vld [vmem:[#allocation255_spill] sm:$0xff] }
0x1b99   : > { %7964 = vmatprep.subr.bf16.mxu0 %v12630_v17  ;;  %v12649_v23 = vmov %v12648_v44  ;;  %v12651_v17 = vld [vmem:[#allocation257_spill] sm:$0xff] }
0x1b9a   : > { %v12652_v25 = vmov %v12651_v17 }
0x1b9c   : > { %7966 = vmatpush1.bf16.msra.mxu0 %v12632_v45  ;;  %v12653_v45 = vld [vmem:[#allocation258_spill] sm:$0xff] }
0x1b9d   : > { %7968 = vmatprep.subr.bf16.mxu0 %v12634_v6  ;;  %v12654_v26 = vmov %v12653_v45  ;;  %v12655_v6 = vld [vmem:[#allocation259_spill] sm:$0xff] }
0x1b9e   : > { %v12656_v27 = vmov %v12655_v6 }
0x1ba0   : > { %7970 = vmatpush1.bf16.msra.mxu0 %v12636_v10  ;;  %v12657_v10 = vld [vmem:[#allocation234_spill] sm:$0xff] }
0x1ba1   : > { %7972 = vmatprep.subr.bf16.mxu0 %v12638_v2 }
0x1ba4   : > { %7974 = vmatpush1.bf16.msra.mxu0 %v12640_v60  ;;  %v12658_v60 = vld [vmem:[#allocation268_spill] sm:$0xff] }
0x1ba5   : > { %7976 = vmatprep.subr.bf16.mxu0 %v12642_v57  ;;  %v12659_v28 = vmov %v12658_v60 }
0x1ba8   : > { %7978 = vmatpush1.bf16.msra.mxu0 %v12644_v42  ;;  %v12660_v42 = vld [vmem:[#allocation269_spill] sm:$0xff] }
0x1ba9   : > { %7980 = vmatprep.subr.bf16.mxu0 %v12646_v35  ;;  %v12661_v29 = vmov %v12660_v42 }
0x1bac   : > { %7982 = vmatpush1.bf16.msra.mxu0 %v12648_v44 }
0x1bad   : > { %7984 = vmatprep.subr.bf16.mxu0 %v12650_v24 }
0x1bb0   : > { %7986 = vmatpush1.bf16.msra.mxu0 %v12651_v17  ;;  %v12662_v17 = vld [vmem:[#allocation270_spill] sm:$0xff] }
0x1bb1   : > { %7988 = vmatprep.subr.bf16.mxu0 %v12653_v45  ;;  %v12663_v30 = vmov %v12662_v17 }
0x1bb4   : > { %7990 = vmatpush1.bf16.msra.mxu0 %v12655_v6 }
0x1bb5   : > { %7992 = vmatprep.subr.bf16.mxu0 %v12657_v10 }
0x1bb7   : > { %5102 = vmatmul.mubr.f32.vlgmr.msra.gmra.mrb[16].mxu0 %v12627_v49 }
0x1bb8   : > { %7994 = vmatpush1.bf16.msra.mxu0 %v10326_v51  ;;  %5191 = vmatprep.mubr.f32.mxu0 %v12507_v18 }
0x1bb9   : > { %7996 = vmatprep.subr.bf16.mxu0 %v10328_v50 }
0x1bbc   : > { %7998 = vmatpush1.bf16.msra.mxu0 %v10333_v47 }
0x1bbd   : > { %8000 = vmatprep.subr.bf16.mxu0 %v10336_v39 }
0x1bc0   : > { %8002 = vmatpush1.bf16.msra.mxu0 %v10341_v43 }
0x1bc1   : > { %8004 = vmatprep.subr.bf16.mxu0 %v10344_v21 }
0x1bc4   : > { %8006 = vmatpush1.bf16.msra.mxu0 %v12342_v1 }
0x1bc5   : > { %8008 = vmatprep.subr.bf16.mxu0 %v12612_v16 }
0x1bc8   : > { %8010 = vmatpush1.bf16.msra.mxu0 %v12614_v20 }
0x1bc9   : > { %8012 = vmatprep.subr.bf16.mxu0 %v12615_v52 }
0x1bcc   : > { %8014 = vmatpush1.bf16.msra.mxu0 %v12617_v7 }
0x1bcd   : > { %8016 = vmatprep.subr.bf16.mxu0 %v12619_v37 }
0x1bd0   : > { %8018 = vmatpush1.bf16.msra.mxu0 %v12621_v54 }
0x1bd1   : > { %8020 = vmatprep.subr.bf16.mxu0 %v12622_v3 }
0x1bd4   : > { %8022 = vmatpush1.bf16.msra.mxu0 %v12624_v0 }
0x1bd5   : > { %8024 = vmatprep.subr.bf16.mxu0 %v12626_v4 }
0x1c6a   : > { %v5032_v49 = vpop.f32.mrb[6].mxu0 }
0x1c6b   : > { %v5034_v2 = vpop.f32.mrb[7].mxu0  ;;  %v8371_v35 = vadd.f32 %v5032_v49, %v12660_v42 }
0x1c6c   : > { %v8372_v57 = vadd.f32 %v5034_v2, %v12658_v60  ;;  %v12665_v2 = vld [vmem:[#allocation276_spill] sm:$0xff] }
0x1c6e   : > { %8778 = vtanh.f32 %v8372_v57 }
0x1c6f   : > { %8780 = vtanh.f32 %v8371_v35 }
0x1c78   : > { %v8779_v31 = vpop.eup %8778 }
0x1c79   : > { %v8781_v32 = vpop.eup %8780  ;;  %v5118_v34 = vadd.f32 1.0, %v8779_v31 }
0x1c7a   : > { %v5116_v40 = vadd.f32 1.0, %v8781_v32 }
0x1c7b   : > { %v5119_v41 = vmul.f32 0.5, %v5118_v34 }
0x1c7c   : > { %v5117_v46 = vmul.f32 0.5, %v5116_v40 }
0x1c7d   : > { %v5122_v60 = vmul.f32 %v12665_v2, %v5119_v41 }
0x1c8a   : > { %v5103_v44 = vpop.f32.mrb[16].mxu0 }
0x1c8b   : > { %v8381_v45 = vadd.f32 %v5103_v44, %v12662_v17  ;;  %v5105_v6 = vpop.f32.mrb[17].mxu0 }
0x1c8c   : > { %v8382_v38 = vadd.f32 %v5105_v6, %v12664_v36 }
0x1c8d   : > { %8782 = vtanh.f32 %v8381_v45 }
0x1c8e   : > { %8784 = vtanh.f32 %v8382_v38 }
0x1c97   : > { %v8783_v48 = vpop.eup %8782 }
0x1c98   : > { %v5123_v49 = vmul.f32 %v8783_v48, %v5117_v46  ;;  %v8785_v42 = vpop.eup %8784 }
0x1c99   : > { %v5120_v35 = vadd.f32 1.0, %v8785_v42 }
0x1c9a   : > { %v11437_v57 = vadd.f32 %v5123_v49, %v5122_v60 }
0x1c9b   : > { %v5121_v44 = vmul.f32 0.5, %v5120_v35 }
0x1c9c   : > { %8786 = vtanh.f32 %v11437_v57 }
0x1ca6   : > { %v8787_v17 = vpop.eup %8786 }
0x1ca7   : > { %v5126_v45 = vmul.f32 %v8787_v17, %v5121_v44 }
0x1ca9   : > { %5192 = vmatmul.mubr.f32.vlgmr.msra.gmra.mrb[8].mxu0 %v5126_v45  ;;  %6241 = vmatmul.mubr.f32.vlgmr.msra.gmra.mrb[24].mxu1 %v5126_v45 }
0x1caa   : > { %8026 = vmatpush1.bf16.msra.mxu0 %v12629_v5  ;;  %5262 = vmatprep.mubr.f32.mxu0 %v12507_v18 }
0x1cab   : > { %8028 = vmatprep.subr.bf16.mxu0 %v12631_v8  ;;  %6243 = vmatprep.mubr.msk.f32.mxu1 %vm9091_vm10, %v12507_v18 }
0x1cae   : > { %8030 = vmatpush1.bf16.msra.mxu0 %v12633_v9 }
0x1caf   : > { %8032 = vmatprep.subr.bf16.mxu0 %v12635_v11 }
0x1cb2   : > { %8034 = vmatpush1.bf16.msra.mxu0 %v12637_v12 }
0x1cb3   : > { %8036 = vmatprep.subr.bf16.mxu0 %v12639_v13 }
0x1cb6   : > { %8038 = vmatpush1.bf16.msra.mxu0 %v12641_v14 }
0x1cb7   : > { %8040 = vmatprep.subr.bf16.mxu0 %v12643_v15 }
0x1cba   : > { %8042 = vmatpush1.bf16.msra.mxu0 %v12645_v19 }
0x1cbb   : > { %8044 = vmatprep.subr.bf16.mxu0 %v12647_v22 }
0x1cbe   : > { %8046 = vmatpush1.bf16.msra.mxu0 %v12649_v23 }
0x1cbf   : > { %8048 = vmatprep.subr.bf16.mxu0 %v12650_v24 }
0x1cc2   : > { %8050 = vmatpush1.bf16.msra.mxu0 %v12652_v25 }
0x1cc3   : > { %8052 = vmatprep.subr.bf16.mxu0 %v12654_v26 }
0x1cc6   : > { %8054 = vmatpush1.bf16.msra.mxu0 %v12656_v27 }
0x1cc7   : > { %8056 = vmatprep.subr.bf16.mxu0 %v12657_v10 }
0x1cc9   : > { %5263 = vmatmul.mubr.f32.vlgmr.msra.gmra.mrb[18].mxu0 %v5126_v45 }
0x1cca   : > { %8058 = vmatpush1.bf16.msra.mxu0 %v10326_v51  ;;  %5352 = vmatprep.mubr.f32.mxu0 %v12507_v18 }
0x1ccb   : > { %8060 = vmatprep.subr.bf16.mxu0 %v10328_v50 }
0x1cce   : > { %8062 = vmatpush1.bf16.msra.mxu0 %v10333_v47 }
0x1ccf   : > { %8064 = vmatprep.subr.bf16.mxu0 %v10336_v39 }
0x1cd2   : > { %8066 = vmatpush1.bf16.msra.mxu0 %v10341_v43 }
0x1cd3   : > { %8068 = vmatprep.subr.bf16.mxu0 %v10344_v21 }
0x1cd6   : > { %8070 = vmatpush1.bf16.msra.mxu0 %v12342_v1 }
0x1cd7   : > { %8072 = vmatprep.subr.bf16.mxu0 %v12612_v16 }
0x1cda   : > { %8074 = vmatpush1.bf16.msra.mxu0 %v12614_v20 }
0x1cdb   : > { %8076 = vmatprep.subr.bf16.mxu0 %v12615_v52 }
0x1cde   : > { %8078 = vmatpush1.bf16.msra.mxu0 %v12617_v7 }
0x1cdf   : > { %8080 = vmatprep.subr.bf16.mxu0 %v12619_v37 }
0x1ce2   : > { %8082 = vmatpush1.bf16.msra.mxu0 %v12621_v54 }
0x1ce3   : > { %8084 = vmatprep.subr.bf16.mxu0 %v12622_v3 }
0x1ce6   : > { %8086 = vmatpush1.bf16.msra.mxu0 %v12624_v0 }
0x1ce7   : > { %8088 = vmatprep.subr.bf16.mxu0 %v12626_v4 }
0x1d7c   : > { %v5193_v34 = vpop.f32.mrb[8].mxu0  ;;  %v11476_v32 = vpop.f32.mrb[24].mxu1 }
0x1d7d   : > { %v5195_v38 = vpop.f32.mrb[9].mxu0  ;;  %v6242_v31 = vpop.f32.mrb[25].mxu1  ;;  %v8373_v48 = vadd.f32 %v5193_v34, %v12661_v29 }
0x1d7e   : > { %v8374_v40 = vadd.f32 %v5195_v38, %v12659_v28 }
0x1d80   : > { %8788 = vtanh.f32 %v8374_v40 }
0x1d81   : > { %8790 = vtanh.f32 %v8373_v48 }
0x1d8a   : > { %v8789_v2 = vpop.eup %8788 }
0x1d8b   : > { %v8791_v60 = vpop.eup %8790  ;;  %v5279_v49 = vadd.f32 1.0, %v8789_v2 }
0x1d8c   : > { %v5277_v35 = vadd.f32 1.0, %v8791_v60 }
0x1d8d   : > { %v5280_v44 = vmul.f32 0.5, %v5279_v49 }
0x1d8e   : > { %v5278_v17 = vmul.f32 0.5, %v5277_v35 }
0x1d8f   : > { %v5283_v38 = vmul.f32 %v5280_v44, %v11437_v57 }
0x1d9c   : > { %v5264_v41 = vpop.f32.mrb[18].mxu0 }
0x1d9d   : > { %v8383_v46 = vadd.f32 %v5264_v41, %v12663_v30  ;;  %v5266_v6 = vpop.f32.mrb[19].mxu0 }
0x1d9e   : > { %v8384_v42 = vadd.f32 %v5266_v6, %v12664_v36 }
0x1d9f   : > { %8792 = vtanh.f32 %v8383_v46 }
0x1da0   : > { %8794 = vtanh.f32 %v8384_v42 }
0x1da9   : > { %v8793_v45 = vpop.eup %8792 }
0x1daa   : > { %v5284_v34 = vmul.f32 %v8793_v45, %v5278_v17  ;;  %v8795_v40 = vpop.eup %8794 }
0x1dab   : > { %v5281_v48 = vadd.f32 1.0, %v8795_v40 }
0x1dac   : > { %v11483_v31 = vadd.f32 %v5284_v34, %v5283_v38 }
0x1dad   : > { %v5282_v41 = vmul.f32 0.5, %v5281_v48 }
0x1dae   : > { %8796 = vtanh.f32 %v11483_v31 }
0x1db8   : > { %v8797_v46 = vpop.eup %8796 }
0x1db9   : > { %v5287_v53 = vmul.f32 %v8797_v46, %v5282_v41 }
0x1dbb   : > { %5353 = vmatmul.mubr.f32.vlgmr.msra.gmra.mrb[10].mxu0 %v5287_v53  ;;  %6244 = vmatmul.mubr.f32.gmra.mrb[26].mxu1 %v5287_v53 }
0x1dbc   : > { %8090 = vmatpush1.bf16.msra.mxu0 %v12629_v5  ;;  %5423 = vmatprep.mubr.f32.mxu0 %v12507_v18 }
0x1dbd   : > { %8092 = vmatprep.subr.bf16.mxu0 %v12631_v8  ;;  %6246 = vmatprep.mubr.msk.f32.mxu1 %vm9091_vm10, %v12507_v18 }
0x1dc0   : > { %8094 = vmatpush1.bf16.msra.mxu0 %v12633_v9 }
0x1dc1   : > { %8096 = vmatprep.subr.bf16.mxu0 %v12635_v11 }
0x1dc4   : > { %8098 = vmatpush1.bf16.msra.mxu0 %v12637_v12 }
0x1dc5   : > { %8100 = vmatprep.subr.bf16.mxu0 %v12639_v13 }
0x1dc8   : > { %8102 = vmatpush1.bf16.msra.mxu0 %v12641_v14 }
0x1dc9   : > { %8104 = vmatprep.subr.bf16.mxu0 %v12643_v15 }
0x1dcc   : > { %8106 = vmatpush1.bf16.msra.mxu0 %v12645_v19 }
0x1dcd   : > { %8108 = vmatprep.subr.bf16.mxu0 %v12647_v22 }
0x1dd0   : > { %8110 = vmatpush1.bf16.msra.mxu0 %v12649_v23 }
0x1dd1   : > { %8112 = vmatprep.subr.bf16.mxu0 %v12650_v24 }
0x1dd4   : > { %8114 = vmatpush1.bf16.msra.mxu0 %v12652_v25 }
0x1dd5   : > { %8116 = vmatprep.subr.bf16.mxu0 %v12654_v26 }
0x1dd8   : > { %8118 = vmatpush1.bf16.msra.mxu0 %v12656_v27 }
0x1dd9   : > { %8120 = vmatprep.subr.bf16.mxu0 %v12657_v10 }
0x1ddb   : > { %5424 = vmatmul.mubr.f32.vlgmr.msra.gmra.mrb[20].mxu0 %v5287_v53 }
0x1ddc   : > { %8122 = vmatpush1.bf16.msra.mxu0 %v10326_v51  ;;  %5513 = vmatprep.mubr.f32.mxu0 %v12507_v18 }
0x1ddd   : > { %8124 = vmatprep.subr.bf16.mxu0 %v10328_v50 }
0x1de0   : > { %8126 = vmatpush1.bf16.msra.mxu0 %v10333_v47 }
0x1de1   : > { %8128 = vmatprep.subr.bf16.mxu0 %v10336_v39 }
0x1de4   : > { %8130 = vmatpush1.bf16.msra.mxu0 %v10341_v43 }
0x1de5   : > { %8132 = vmatprep.subr.bf16.mxu0 %v10344_v21 }
0x1de8   : > { %8134 = vmatpush1.bf16.msra.mxu0 %v12342_v1 }
0x1de9   : > { %8136 = vmatprep.subr.bf16.mxu0 %v12612_v16 }
0x1dec   : > { %8138 = vmatpush1.bf16.msra.mxu0 %v12614_v20 }
0x1ded   : > { %8140 = vmatprep.subr.bf16.mxu0 %v12615_v52 }
0x1df0   : > { %8142 = vmatpush1.bf16.msra.mxu0 %v12617_v7 }
0x1df1   : > { %8144 = vmatprep.subr.bf16.mxu0 %v12619_v37 }
0x1df4   : > { %8146 = vmatpush1.bf16.msra.mxu0 %v12621_v54 }
0x1df5   : > { %8148 = vmatprep.subr.bf16.mxu0 %v12622_v3 }
0x1df8   : > { %8150 = vmatpush1.bf16.msra.mxu0 %v12624_v0 }
0x1df9   : > { %8152 = vmatprep.subr.bf16.mxu0 %v12626_v4 }
0x1e8e   : > { %v5354_v53 = vpop.f32.mrb[10].mxu0  ;;  %v11522_v57 = vpop.f32.mrb[26].mxu1 }
0x1e8f   : > { %v5356_v2 = vpop.f32.mrb[11].mxu0  ;;  %v6245_v60 = vpop.f32.mrb[27].mxu1  ;;  %v8375_v42 = vadd.f32 %v5354_v53, %v12661_v29 }
0x1e90   : > { %v8376_v49 = vadd.f32 %v5356_v2, %v12659_v28 }
0x1e92   : > { %8798 = vtanh.f32 %v8376_v49 }
0x1e93   : > { %8800 = vtanh.f32 %v8375_v42 }
0x1e9c   : > { %v8799_v45 = vpop.eup %8798 }
0x1e9d   : > { %v8801_v38 = vpop.eup %8800  ;;  %v5440_v34 = vadd.f32 1.0, %v8799_v45 }
0x1e9e   : > { %v5438_v48 = vadd.f32 1.0, %v8801_v38 }
0x1e9f   : > { %v5441_v41 = vmul.f32 0.5, %v5440_v34 }
0x1ea0   : > { %v5439_v46 = vmul.f32 0.5, %v5438_v48 }
0x1ea1   : > { %v5444_v2 = vmul.f32 %v5441_v41, %v11483_v31  ;;  %v12666_v31 = vmax.f32 %v11476_v32, %v11522_v57 }
0x1eae   : > { %v5425_v35 = vpop.f32.mrb[20].mxu0 }
0x1eaf   : > { %v8385_v44 = vadd.f32 %v5425_v35, %v12663_v30  ;;  %v5427_v17 = vpop.f32.mrb[21].mxu0 }
0x1eb0   : > { %v8386_v40 = vadd.f32 %v5427_v17, %v12664_v36 }
0x1eb1   : > { %8802 = vtanh.f32 %v8385_v44 }
0x1eb2   : > { %8804 = vtanh.f32 %v8386_v40 }
0x1ebb   : > { %v8803_v60 = vpop.eup %8802 }
0x1ebc   : > { %v5445_v53 = vmul.f32 %v8803_v60, %v5439_v46  ;;  %v8805_v42 = vpop.eup %8804 }
0x1ebd   : > { %v5442_v35 = vadd.f32 1.0, %v8805_v42 }
0x1ebe   : > { %v11531_v49 = vadd.f32 %v5445_v53, %v5444_v2 }
0x1ebf   : > { %v5443_v6 = vmul.f32 0.5, %v5442_v35 }
0x1ec0   : > { %8806 = vtanh.f32 %v11531_v49 }
0x1eca   : > { %v8807_v44 = vpop.eup %8806 }
0x1ecb   : > { %v5448_v55 = vmul.f32 %v8807_v44, %v5443_v6 }
0x1ecd   : > { %5514 = vmatmul.mubr.f32.vlgmr.msra.gmra.mrb[12].mxu0 %v5448_v55  ;;  %6247 = vmatmul.mubr.f32.gmra.mrb[28].mxu1 %v5448_v55 }
0x1ece   : > { %8154 = vmatpush1.bf16.msra.mxu0 %v12629_v5  ;;  %5584 = vmatprep.mubr.f32.mxu0 %v12507_v18 }
0x1ecf   : > { %8156 = vmatprep.subr.bf16.mxu0 %v12631_v8  ;;  %6249 = vmatprep.mubr.msk.f32.mxu1 %vm9091_vm10, %v12507_v18 }
0x1ed2   : > { %8158 = vmatpush1.bf16.msra.mxu0 %v12633_v9 }
0x1ed3   : > { %8160 = vmatprep.subr.bf16.mxu0 %v12635_v11 }
0x1ed6   : > { %8162 = vmatpush1.bf16.msra.mxu0 %v12637_v12 }
0x1ed7   : > { %8164 = vmatprep.subr.bf16.mxu0 %v12639_v13 }
0x1eda   : > { %8166 = vmatpush1.bf16.msra.mxu0 %v12641_v14 }
0x1edb   : > { %8168 = vmatprep.subr.bf16.mxu0 %v12643_v15 }
0x1ede   : > { %8170 = vmatpush1.bf16.msra.mxu0 %v12645_v19 }
0x1edf   : > { %8172 = vmatprep.subr.bf16.mxu0 %v12647_v22 }
0x1ee2   : > { %8174 = vmatpush1.bf16.msra.mxu0 %v12649_v23 }
0x1ee3   : > { %8176 = vmatprep.subr.bf16.mxu0 %v12650_v24 }
0x1ee6   : > { %8178 = vmatpush1.bf16.msra.mxu0 %v12652_v25 }
0x1ee7   : > { %8180 = vmatprep.subr.bf16.mxu0 %v12654_v26 }
0x1eea   : > { %8182 = vmatpush1.bf16.msra.mxu0 %v12656_v27 }
0x1eeb   : > { %8184 = vmatprep.subr.bf16.mxu0 %v12657_v10 }
0x1eed   : > { %5585 = vmatmul.mubr.f32.vlgmr.msra.gmra.mrb[22].mxu0 %v5448_v55 }
0x1eee   : > { %8186 = vmatpush1.bf16.msra.mxu0 %v10326_v51  ;;  %5674 = vmatprep.mubr.f32.mxu0 %v12507_v18 }
0x1eef   : > { %8188 = vmatprep.subr.bf16.mxu0 %v10328_v50 }
0x1ef2   : > { %8190 = vmatpush1.bf16.msra.mxu0 %v10333_v47 }
0x1ef3   : > { %8192 = vmatprep.subr.bf16.mxu0 %v10336_v39 }
0x1ef6   : > { %8194 = vmatpush1.bf16.msra.mxu0 %v10341_v43 }
0x1ef7   : > { %8196 = vmatprep.subr.bf16.mxu0 %v10344_v21 }
0x1efa   : > { %8198 = vmatpush1.bf16.msra.mxu0 %v12342_v1 }
0x1efb   : > { %8200 = vmatprep.subr.bf16.mxu0 %v12612_v16 }
0x1efe   : > { %8202 = vmatpush1.bf16.msra.mxu0 %v12614_v20 }
0x1eff   : > { %8204 = vmatprep.subr.bf16.mxu0 %v12615_v52 }
0x1f02   : > { %8206 = vmatpush1.bf16.msra.mxu0 %v12617_v7 }
0x1f03   : > { %8208 = vmatprep.subr.bf16.mxu0 %v12619_v37 }
0x1f06   : > { %8210 = vmatpush1.bf16.msra.mxu0 %v12621_v54 }
0x1f07   : > { %8212 = vmatprep.subr.bf16.mxu0 %v12622_v3 }
0x1f0a   : > { %8214 = vmatpush1.bf16.msra.mxu0 %v12624_v0 }
0x1f0b   : > { %8216 = vmatprep.subr.bf16.mxu0 %v12626_v4 }
0x1fa0   : > { %v5515_v55 = vpop.f32.mrb[12].mxu0  ;;  %v11570_v10 = vpop.f32.mrb[28].mxu1 }
0x1fa1   : > { %v11576_v6 = vmax.f32 %v12666_v31, %v11570_v10  ;;  %v5517_v17 = vpop.f32.mrb[13].mxu0  ;;  %v6248_v45 = vpop.f32.mrb[29].mxu1  ;;  %v8377_v34 = vadd.f32 %v5515_v55, %v12661_v29 }
0x1fa2   : > { %v8378_v38 = vadd.f32 %v5517_v17, %v12659_v28 }
0x1fa4   : > { %8808 = vtanh.f32 %v8378_v38 }
0x1fa5   : > { %8810 = vtanh.f32 %v8377_v34 }
0x1fae   : > { %v8809_v46 = vpop.eup %8808 }
0x1faf   : > { %v8811_v60 = vpop.eup %8810  ;;  %v5601_v2 = vadd.f32 1.0, %v8809_v46 }
0x1fb0   : > { %v5599_v42 = vadd.f32 1.0, %v8811_v60 }
0x1fb1   : > { %v5602_v35 = vmul.f32 0.5, %v5601_v2 }
0x1fb2   : > { %v5600_v44 = vmul.f32 0.5, %v5599_v42 }
0x1fb3   : > { %v5605_v17 = vmul.f32 %v5602_v35, %v11531_v49 }
0x1fc0   : > { %v5586_v40 = vpop.f32.mrb[22].mxu0 }
0x1fc1   : > { %v8387_v48 = vadd.f32 %v5586_v40, %v12663_v30  ;;  %v5588_v41 = vpop.f32.mrb[23].mxu0 }
0x1fc2   : > { %v8388_v53 = vadd.f32 %v5588_v41, %v12664_v36 }
0x1fc3   : > { %8812 = vtanh.f32 %v8387_v48 }
0x1fc4   : > { %8814 = vtanh.f32 %v8388_v53 }
0x1fcd   : > { %v8813_v31 = vpop.eup %8812 }
0x1fce   : > { %v5606_v55 = vmul.f32 %v8813_v31, %v5600_v44  ;;  %v8815_v38 = vpop.eup %8814 }
0x1fcf   : > { %v5603_v34 = vadd.f32 1.0, %v8815_v38 }
0x1fd0   : > { %v5607_v45 = vadd.f32 %v5606_v55, %v5605_v17 }
0x1fd1   : > { %v5604_v40 = vmul.f32 0.5, %v5603_v34 }
0x1fd2   : > { %8816 = vtanh.f32 %v5607_v45 }
0x1fdc   : > { %v8817_v0 = vpop.eup %8816 }
0x1fdd   : > { %v5609_v1 = vmul.f32 %v8817_v0, %v5604_v40 }
0x1fdf   : > { %5675 = vmatmul.mubr.f32.vlgmr.msra.gmra.mrb[14].mxu0 %v5609_v1  ;;  %6250 = vmatmul.mubr.f32.gmra.mrb[30].mxu1 %v5609_v1 }
0x1fe0   : > { %8218 = vmatpush1.bf16.msra.mxu0 %v12629_v5  ;;  %5745 = vmatprep.mubr.f32.mxu0 %v12507_v18 }
0x1fe1   : > { %8220 = vmatprep.subr.bf16.mxu0 %v12631_v8  ;;  %6252 = vmatprep.mubr.msk.f32.mxu1 %vm9091_vm10, %v12507_v18 }
0x1fe4   : > { %8222 = vmatpush1.bf16.msra.mxu0 %v12633_v9 }
0x1fe5   : > { %8224 = vmatprep.subr.bf16.mxu0 %v12635_v11 }
0x1fe8   : > { %8226 = vmatpush1.bf16.msra.mxu0 %v12637_v12 }
0x1fe9   : > { %8228 = vmatprep.subr.bf16.mxu0 %v12639_v13 }
0x1fec   : > { %8230 = vmatpush1.bf16.msra.mxu0 %v12641_v14 }
0x1fed   : > { %8232 = vmatprep.subr.bf16.mxu0 %v12643_v15 }
0x1ff0   : > { %8234 = vmatpush1.bf16.msra.mxu0 %v12645_v19 }
0x1ff1   : > { %8236 = vmatprep.subr.bf16.mxu0 %v12647_v22 }
0x1ff4   : > { %8238 = vmatpush1.bf16.msra.mxu0 %v12649_v23 }
0x1ff5   : > { %8240 = vmatprep.subr.bf16.mxu0 %v12650_v24 }
0x1ff8   : > { %8242 = vmatpush1.bf16.msra.mxu0 %v12652_v25 }
0x1ff9   : > { %8244 = vmatprep.subr.bf16.mxu0 %v12654_v26 }
0x1ffc   : > { %8246 = vmatpush1.bf16.msra.mxu0 %v12656_v27 }
0x1fff   : > { %5746 = vmatmul.mubr.f32.vlgmr.msra.gmra.mrb[24].mxu0 %v5609_v1 }
0x20b2   : > { %v5676_v18 = vpop.f32.mrb[14].mxu0  ;;  %v5852_v0 = vpop.f32.mrb[30].mxu1 }
0x20b3   : > { %v5863_v49 = vmax.f32 %v11576_v6, %v5852_v0  ;;  %v5678_v48 = vpop.f32.mrb[15].mxu0  ;;  %v6251_v41 = vpop.f32.mrb[31].mxu1  ;;  %v8379_v60 = vadd.f32 %v5676_v18, %v12661_v29 }
0x20b4   : > { %v8380_v46 = vadd.f32 %v5678_v48, %v12659_v28 }
0x20b6   : > { %8818 = vtanh.f32 %v8380_v46 }
0x20b7   : > { %8820 = vtanh.f32 %v8379_v60 }
0x20c0   : > { %v8819_v35 = vpop.eup %8818 }
0x20c1   : > { %v8821_v44 = vpop.eup %8820  ;;  %v5762_v1 = vadd.f32 1.0, %v8819_v35 }
0x20c2   : > { %v5760_v17 = vadd.f32 1.0, %v8821_v44 }
0x20c3   : > { %v5763_v6 = vmul.f32 0.5, %v5762_v1 }
0x20c4   : > { %v5761_v55 = vmul.f32 0.5, %v5760_v17 }
0x20c5   : > { %v5766_v34 = vmul.f32 %v5763_v6, %v5607_v45 }
0x20d2   : > { %v5747_v2 = vpop.f32.mrb[24].mxu0 }
0x20d3   : > { %v8389_v53 = vadd.f32 %v5747_v2, %v12663_v30  ;;  %v5749_v42 = vpop.f32.mrb[25].mxu0 }
0x20d4   : > { %v8390_v31 = vadd.f32 %v5749_v42, %v12664_v36 }
0x20d5   : > { %8822 = vtanh.f32 %v8389_v53 }
0x20d6   : > { %8824 = vtanh.f32 %v8390_v31 }
0x20df   : > { %v8823_v38 = vpop.eup %8822 }
0x20e0   : > { %v5767_v40 = vmul.f32 %v8823_v38, %v5761_v55  ;;  %v8825_v48 = vpop.eup %8824 }
0x20e1   : > { %v5764_v41 = vadd.f32 1.0, %v8825_v48 }
0x20e2   : > { %v11606_v18 = vadd.f32 %v5767_v40, %v5766_v34  }
0x20e3   : > { %v5765_v46 = vmul.f32 0.5, %v5764_v41  ;;  %v12667_v41 = vld [vmem:[#allocation275_spill] sm:$0xff] }
0x20e4   : > { %8826 = vtanh.f32 %v11606_v18 }
0x20ee   : > { %v8827_v60 = vpop.eup %8826 }
0x20ef   : > { %v5770_v53 = vmul.f32 %v8827_v60, %v5765_v46  }
0x20f1   : > { %6253 = vmatmul.mubr.f32.gmra.mrb[32].mxu1 %v5770_v53 }
0x21c4   : > { %v5857_v2 = vpop.f32.mrb[32].mxu1 }
0x21c5   : > { %v5864_v35 = vmax.f32 %v5863_v49, %v5857_v2  ;;  %v6254_v42 = vpop.f32.mrb[33].mxu1 }
0x21c7   : > { %v5865_v44 = vsub.f32 %v11476_v32, %v5864_v35  ;;  %v5868_v1 = vsub.f32 %v11522_v57, %v5864_v35  ;;  %v5871_v45 = vsub.f32 %v11570_v10, %v5864_v35  ;;  %v5874_v31 = vsub.f32 %v5852_v0, %v5864_v35 }
0x21c8   : > { %v5877_v17 = vsub.f32 %v5857_v2, %v5864_v35  ;;  %v12668_v2 = vld [vmem:[#allocation274_spill] sm:$0xff] }
0x21c9   : > { %v5866_v6 = vmul.f32 1.442695, %v5865_v44  ;;  %v5869_v55 = vmul.f32 1.442695, %v5868_v1  ;;  %v5872_v38 = vmul.f32 1.442695, %v5871_v45 }
0x21ca   : > { %v5875_v34 = vmul.f32 1.442695, %v5874_v31  ;;  %v5878_v40 = vmul.f32 1.442695, %v5877_v17 }
0x21cb   : > { %8828 = vpow2.f32 %v5866_v6  ;;  %v12671_v6 = vld [vmem:[#allocation279_spill] sm:$0xff] }
0x21cc   : > { %8830 = vpow2.f32 %v5869_v55 }
0x21cd   : > { %8832 = vpow2.f32 %v5872_v38 }
0x21ce   : > { %8834 = vpow2.f32 %v5875_v34 }
0x21cf   : > { %8836 = vpow2.f32 %v5878_v40 }
0x21d5   : > { %v8829_v49 = vpop.eup %8828 }
0x21d6   : > { %v8831_v48 = vpop.eup %8830  ;;  %v5880_v32 = vmul.f32 %v12667_v41, %v8829_v49 }
0x21d7   : > { %v8833_v46 = vpop.eup %8832  ;;  %v5881_v57 = vadd.f32 %v8831_v48, %v8829_v49  ;;  %v5882_v10 = vmul.f32 %v12668_v2, %v8831_v48 }
0x21d8   : > { %v8835_v0 = vpop.eup %8834 }
0x21d9   : > { %v5884_v60 = vadd.f32 %v8833_v46, %v5881_v57  ;;  %v5883_v35 = vadd.f32 %v5882_v10, %v5880_v32  ;;  %v12669_v57 = vld [vmem:[#allocation273_spill] sm:$0xff]  ;;  %v8837_v44 = vpop.eup %8836 }
0x21da   : > { %v5885_v42 = vmul.f32 %v12669_v57, %v8833_v46  ;;  %v5891_v55 = vmul.f32 %v8837_v44, %v12671_v6 }
0x21db   : > { %v5887_v1 = vadd.f32 %v8835_v0, %v5884_v60  ;;  %v12670_v60 = vld [vmem:[#allocation272_spill] sm:$0xff] }
0x21dc   : > { %v5886_v45 = vadd.f32 %v5885_v42, %v5883_v35  ;;  %v5888_v31 = vmul.f32 %v12670_v60, %v8835_v0  ;;  %v12680_v42 = vld [vmem:[#allocation161_spill] sm:$0xff] }
0x21dd   : > { %v5890_v17 = vadd.f32 %v8837_v44, %v5887_v1  ;;  %v12678_v44 = vld [vmem:[#allocation147_spill] sm:$0xff] }
0x21de   : > { %v5889_v38 = vadd.f32 %v5888_v31, %v5886_v45  ;;  %v12675_v45 = vmov %v12671_v6  ;;  %v12679_v6 = vld [vmem:[#allocation160_spill] sm:$0xff] }
0x21df   : > { %8838 = vrcp.f32 %v5890_v17  ;;  %v12672_v17 = vld [vmem:[#allocation278_spill] sm:$0xff] }
0x21e0   : > { %v5892_v34 = vadd.f32 %v5891_v55, %v5889_v38 }
0x21e9   : > { %v8839_v40 = vpop.eup %8838 }
0x21ea   : > { %v5894_v49 = vmul.f32 %v8839_v40, %v5892_v34 }
0x21ec   : > { %v5895_v48 = vadd.f32 %v5894_v49, %v12672_v17  ;;  %v12676_v49 = vmov %v5770_v53 }
0x21ee   : > { %v5896_v41 = vadd.f32 3.1415927, %v5895_v48 }
0x21f0   : > { %v5897_v32 = vmul.f32 0.15915494, %v5896_v41 }
0x21f2   : > { %v5898_v10 = vfloor.f32 %v5897_v32 }
0x21f4   : > { %v5899_v46 = vmul.f32 6.2831855, %v5898_v10  ;;  %v12677_v10 = vld [vmem:[#allocation146_spill] sm:$0xff] }
0x21f6   : > { %v5900_v3 = vsub.f32 %v5895_v48, %v5899_v46 }
0x21f8   : > { %5903 = vperm.xlu1 %8705, %v5900_v3  }
0x2273   :  { %3301 = sbr.rel (!%p11626_p12) target bundleno = 4468 (0x1174), region = 111 }
0x2277   : > { %v5904_v0 = vpop.permute.xlu1 %5903 }
0x2278   : > { %v5906_v35 = vsel %vm688_vm0, %v5904_v0, %v5895_v48  }
0x2279   : > { %5910 = vst.msk [vmem:[%s5909_s17] sm:$0xff] %vm743_vm3, %v5906_v35 }
0x227a   :  { %5921 = vsyncpa [#allocation3], 1 }
0x227b   :  { %5922 = vsyncpa [#allocation5], 1 }
0x227c   :  { %5923 = vsyncpa [#allocation8], 1 }

</bundles_post_ra>
